<compile_context>
chip_gen: v7x
topology: tpu7x:2x2x1
jax: 0.10.0
libtpu: 0.0.40
codegen_flags: <defaults>
</compile_context>

<pallas_src>
import functools

import jax
import jax.numpy as jnp
from jax.experimental import pallas as pl
from jax.experimental.pallas import tpu as pltpu


# ---------------------------------------------------------------------------
# Kernel 1: conv1 (3x3, pad 1) + ReLU + MaxPool 2x2/s2
# ---------------------------------------------------------------------------
def _conv1_pool_kernel(xp_ref, w_ref, s_ref, o_ref, *, H, W):
    """xp_ref: (H+2, W+2, Cin) f32 zero-padded image; w_ref: (9*Cin, Cout) bf16;
    s_ref: (1, Cout) f32; o_ref: (H//2, W//2, Cout) f32."""
    Cin = xp_ref.shape[-1]
    Cout = w_ref.shape[-1]
    # Tap-concatenated im2col in VMEM: one matmul with K = 9*Cin, single bf16 cast.
    taps = [xp_ref[dy:dy + H, dx:dx + W, :] for dy in range(3) for dx in range(3)]
    lhs = jnp.concatenate(taps, axis=-1).reshape(H * W, 9 * Cin).astype(jnp.bfloat16)
    y = jnp.dot(lhs, w_ref[...], preferred_element_type=jnp.float32) + s_ref[...]
    y = jnp.maximum(y, 0.0).reshape(H // 2, 2, W, Cout)
    # 2x2 / stride-2 max pool: rows first (leading-dim pairs), then columns.
    yh = jnp.maximum(y[:, 0], y[:, 1])                                 # (H//2, W, Cout)
    for j in range(W // 2):
        col = jnp.maximum(yh[:, 2 * j:2 * j + 1, :], yh[:, 2 * j + 1:2 * j + 2, :])
        o_ref[:, j:j + 1, :] = col.astype(o_ref.dtype)


def conv1_pool(x, folded):
    """x: (N, H, W, 3) f32 NHWC -> (N, H//2, W//2, 64) f32."""
    w, shift = folded
    N, H, W, Cin = x.shape
    # conv1 input is ~3 KiB; padding it once outside the kernel is negligible traffic.
    xp = jnp.pad(x.astype(jnp.float32), ((0, 0), (1, 1), (1, 1), (0, 0)))
    Ho, Wo = H // 2, W // 2
    Cout = w.shape[-1]
    return pl.pallas_call(
        functools.partial(_conv1_pool_kernel, H=H, W=W),
        out_shape=jax.ShapeDtypeStruct((N, Ho, Wo, Cout), jnp.float32),
        grid=(N,),
        in_specs=[
            pl.BlockSpec((None, H + 2, W + 2, Cin), lambda n: (n, 0, 0, 0)),
            pl.BlockSpec(w.shape, lambda n: (0, 0)),
            pl.BlockSpec(shift.shape, lambda n: (0, 0)),
        ],
        out_specs=pl.BlockSpec((None, Ho, Wo, Cout), lambda n: (n, 0, 0, 0)),
        compiler_params=pltpu.CompilerParams(dimension_semantics=("parallel",)),
    )(xp, w, shift)


# ---------------------------------------------------------------------------
# Kernels 2 & 3: fully fused inception block (optionally with avg-pool + FC head)
# ---------------------------------------------------------------------------
def _inception_kernel(*refs, H, W, o1, r3, r5, head):
    if head:
        (x_ref, mw_ref, ms_ref, w3_ref, s3_ref, w5_ref, s5_ref, w4_ref, s4_ref,
         wfc_ref, bfc_ref, o_ref, p3_ref, p5_ref, pp_ref) = refs
    else:
        (x_ref, mw_ref, ms_ref, w3_ref, s3_ref, w5_ref, s5_ref, w4_ref, s4_ref,
         o_ref, p3_ref, p5_ref, pp_ref) = refs

    HW = H * W
    Cin = x_ref.shape[-1]
    xb = x_ref[...]                                           # (H, W, Cin)

    # --- merged 1x1 convs that share the block input: branch1 | b2_reduce | b3_reduce ---
    xf = xb.reshape(HW, Cin).astype(jnp.bfloat16)
    merged = jnp.dot(xf, mw_ref[...], preferred_element_type=jnp.float32) + ms_ref[...]
    merged = jnp.maximum(merged, 0.0)                         # (HW, o1 + r3 + r5) f32

    b1 = merged[:, :o1]

    # --- branch2: 3x3 conv (stride 1, pad 1) as one tap-concatenated matmul ---
    p3_ref[...] = jnp.zeros(p3_ref.shape, p3_ref.dtype)
    p3_ref[1:H + 1, 1:W + 1, :] = merged[:, o1:o1 + r3].reshape(H, W, r3)
    lhs3 = jnp.concatenate(
        [p3_ref[dy:dy + H, dx:dx + W, :] for dy in range(3) for dx in range(3)], axis=-1)
    lhs3 = lhs3.reshape(HW, 9 * r3).astype(jnp.bfloat16)
    b2 = jnp.maximum(
        jnp.dot(lhs3, w3_ref[...], preferred_element_type=jnp.float32) + s3_ref[...], 0.0)

    # --- branch3: 5x5 conv (stride 1, pad 2) as one tap-concatenated matmul ---
    p5_ref[...] = jnp.zeros(p5_ref.shape, p5_ref.dtype)
    p5_ref[2:H + 2, 2:W + 2, :] = merged[:, o1 + r3:o1 + r3 + r5].reshape(H, W, r5)
    lhs5 = jnp.concatenate(
        [p5_ref[dy:dy + H, dx:dx + W, :] for dy in range(5) for dx in range(5)], axis=-1)
    lhs5 = lhs5.reshape(HW, 25 * r5).astype(jnp.bfloat16)
    b3 = jnp.maximum(
        jnp.dot(lhs5, w5_ref[...], preferred_element_type=jnp.float32) + s5_ref[...], 0.0)

    # --- branch4: 3x3/s1 max-pool (pad 1, -inf border like PyTorch) then 1x1 conv ---
    x32 = xb.astype(jnp.float32)
    pp_ref[...] = jnp.full(pp_ref.shape, -jnp.inf, pp_ref.dtype)
    pp_ref[1:H + 1, 1:W + 1, :] = x32
    pooled = x32                                              # center tap
    for dy in range(3):
        for dx in range(3):
            if dy == 1 and dx == 1:
                continue
            pooled = jnp.maximum(pooled, pp_ref[dy:dy + H, dx:dx + W, :])
    pooledf = pooled.reshape(HW, Cin).astype(jnp.bfloat16)
    b4 = jnp.maximum(
        jnp.dot(pooledf, w4_ref[...], preferred_element_type=jnp.float32) + s4_ref[...], 0.0)

    if head:
        # Global average pool before the FC (mean(x) @ W == mean(x @ W)), fully fused:
        # only the (1, num_classes) logits row leaves VMEM.
        feat = jnp.concatenate(
            [jnp.mean(b1, axis=0, keepdims=True),
             jnp.mean(b2, axis=0, keepdims=True),
             jnp.mean(b3, axis=0, keepdims=True),
             jnp.mean(b4, axis=0, keepdims=True)], axis=-1)   # (1, 480) f32
        logits = jnp.dot(feat, wfc_ref[...], preferred_element_type=jnp.float32) + bfc_ref[...]
        o_ref[...] = logits.astype(o_ref.dtype)
    else:
        out = jnp.concatenate([b1, b2, b3, b4], axis=-1)      # (HW, 256) f32, lane-dense
        o_ref[...] = out.reshape(H, W, -1).astype(o_ref.dtype)


def inception_block(x, blk, head=None):
    """x: (N, H, W, Cin).  Without head -> (N, H, W, Ctot) bf16; with head -> (N, nc) f32."""
    N, H, W, Cin = x.shape
    o1, r3, r5 = blk["splits"]
    o3, o5, opool = blk["w3"].shape[-1], blk["w5"].shape[-1], blk["w4"].shape[-1]
    c_out = o1 + o3 + o5 + opool

    weights = [blk["m_w"], blk["m_shift"], blk["w3"], blk["s3"],
               blk["w5"], blk["s5"], blk["w4"], blk["s4"]]
    if head is not None:
        weights += [head[0], head[1]]

    in_specs = [pl.BlockSpec((None, H, W, Cin), lambda n: (n, 0, 0, 0))]
    for _ in weights:                                         # all weights / shifts are 2-D
        in_specs.append(pl.BlockSpec(None, lambda n: (0, 0)))
    # Give the weight specs their concrete full shapes.
    in_specs = [in_specs[0]] + [pl.BlockSpec(w.shape, lambda n: (0, 0)) for w in weights]

    scratch = [
        pltpu.VMEM((H + 2, W + 2, r3), jnp.float32),          # zero-padded 3x3 reduce act
        pltpu.VMEM((H + 4, W + 4, r5), jnp.float32),          # zero-padded 5x5 reduce act
        pltpu.VMEM((H + 2, W + 2, Cin), jnp.float32),         # -inf padded pool input
    ]

    if head is None:
        out_shape = jax.ShapeDtypeStruct((N, H, W, c_out), jnp.bfloat16)
        out_spec = pl.BlockSpec((None, H, W, c_out), lambda n: (n, 0, 0, 0))
    else:
        nc = head[0].shape[-1]
        out_shape = jax.ShapeDtypeStruct((N, 1, nc), jnp.float32)
        out_spec = pl.BlockSpec((None, 1, nc), lambda n: (n, 0, 0))

    out = pl.pallas_call(
        functools.partial(_inception_kernel, H=H, W=W, o1=o1, r3=r3, r5=r5,
                          head=head is not None),
        out_shape=out_shape,
        grid=(N,),
        in_specs=in_specs,
        out_specs=out_spec,
        scratch_shapes=scratch,
        compiler_params=pltpu.CompilerParams(dimension_semantics=("parallel",)),
    )(x, *weights)

    if head is not None:
        out = out.reshape(N, head[0].shape[-1])
    return out


# ---------------------------------------------------------------------------
# Parameter folding (conv bias + eval-mode BatchNorm folded into bf16 weights)
# ---------------------------------------------------------------------------
def _fold_conv(p, k, bn=True, dtype=jnp.bfloat16):
    w = p["w"].astype(jnp.float32)                            # (Cout, Cin, k, k) PyTorch layout
    b = p["b"].astype(jnp.float32)
    Cout, Cin = w.shape[0], w.shape[1]
    if bn:
        scale = p["gamma"] / jnp.sqrt(p["var"] + 1e-5)
        shift = (b - p["mean"]) * scale + p["beta"]
    else:
        scale = jnp.ones((Cout,), jnp.float32)
        shift = b
    # Tap-major (dy, dx, cin) rows so it matches the in-kernel tap-concatenated LHS.
    wmat = jnp.transpose(w, (2, 3, 1, 0)).reshape(k * k * Cin, Cout) * scale[None, :]
    return wmat.astype(dtype), shift.reshape(1, Cout).astype(jnp.float32)


def _fold_inception(p):
    w1, s1 = _fold_conv(p["b1"], 1)
    w2r, s2r = _fold_conv(p["b2_red"], 1)
    w3r, s3r = _fold_conv(p["b3_red"], 1)
    w3, s3 = _fold_conv(p["b2"], 3)
    w5, s5 = _fold_conv(p["b3"], 5)
    w4, s4 = _fold_conv(p["b4"], 1)
    return {
        # The three 1x1 convs that share the block input fused into one matmul.
        "m_w": jnp.concatenate([w1, w2r, w3r], axis=-1),
        "m_shift": jnp.concatenate([s1, s2r, s3r], axis=-1),
        "splits": (int(w1.shape[-1]), int(w2r.shape[-1]), int(w3r.shape[-1])),
        "w3": w3, "s3": s3, "w5": w5, "s5": s5, "w4": w4, "s4": s4,
    }


def prepare_params(params):
    return {
        "conv1": _fold_conv(params["conv1"], 3, bn=False, dtype=jnp.bfloat16),
        "inc1": _fold_inception(params["inc1"]),
        "inc2": _fold_inception(params["inc2"]),
        "fc": (params["fc"]["w"].astype(jnp.float32),          # (480, num_classes), x @ W layout
               params["fc"]["b"].reshape(1, -1).astype(jnp.float32)),
    }


# ---------------------------------------------------------------------------
# Forward pass
# ---------------------------------------------------------------------------
def googlenet_forward(x_nchw, fp):
    x = jnp.transpose(x_nchw, (0, 2, 3, 1))                   # NCHW -> NHWC
    x = conv1_pool(x, fp["conv1"])                            # (N, 8, 8, 64)   kernel 1
    x = inception_block(x, fp["inc1"])                        # (N, 8, 8, 256)  kernel 2
    return inception_block(x, fp["inc2"], head=fp["fc"])      # (N, 10) f32     kernel 3


# ---------------------------------------------------------------------------
# Deterministic synthetic parameters (shapes match the PyTorch module __init__)
# ---------------------------------------------------------------------------
def _conv_params(key, cin, cout, k, bn=True):
    k1, k2, k3, k4, k5, k6 = jax.random.split(key, 6)
    p = {
        "w": jax.random.normal(k1, (cout, cin, k, k), jnp.float32) / (cin * k * k) ** 0.5,
        "b": 0.05 * jax.random.normal(k2, (cout,), jnp.float32),
    }
    if bn:  # BatchNorm in eval mode (running stats folded into the conv weights)
        p["gamma"] = 1.0 + 0.1 * jax.random.normal(k3, (cout,), jnp.float32)
        p["beta"] = 0.1 * jax.random.normal(k4, (cout,), jnp.float32)
        p["mean"] = 0.1 * jax.random.normal(k5, (cout,), jnp.float32)
        p["var"] = jax.random.uniform(k6, (cout,), jnp.float32, minval=0.5, maxval=1.5)
    return p


def _inception_params(key, cin, o1, r3, o3, r5, o5, opool):
    ks = jax.random.split(key, 6)
    return {
        "b1": _conv_params(ks[0], cin, o1, 1),
        "b2_red": _conv_params(ks[1], cin, r3, 1),
        "b2": _conv_params(ks[2], r3, o3, 3),
        "b3_red": _conv_params(ks[3], cin, r5, 1),
        "b3": _conv_params(ks[4], r5, o5, 5),
        "b4": _conv_params(ks[5], cin, opool, 1),
    }


if __name__ == "__main__":
    key = jax.random.PRNGKey(0)
    kx, kc1, ki1, ki2, kfc = jax.random.split(key, 5)
    params = {
        "conv1": _conv_params(kc1, 3, 64, 3, bn=False),
        "inc1": _inception_params(ki1, 64, 64, 96, 128, 16, 32, 32),
        "inc2": _inception_params(ki2, 256, 128, 128, 192, 32, 96, 64),
        "fc": {
            "w": jax.random.normal(kfc, (480, 10), jnp.float32) / 480 ** 0.5,
            "b": jnp.zeros((10,), jnp.float32),
        },
    }

    x = jax.random.normal(kx, (2, 3, 16, 16), jnp.float32)    # NCHW, PyTorch convention

    folded = prepare_params(params)                           # BN folding once, outside jit
    fwd = jax.jit(lambda inp: googlenet_forward(inp, folded))
    out = fwd(x)
    jax.block_until_ready(out)
    assert out.shape == (2, 10) and out.dtype == jnp.float32
    print("KERNEL_OK")
</pallas_src>

<mosaic_0001>
module attributes {stable_mosaic.version = 11 : i64} {
  func.func @_conv1_pool_kernel(%arg0: i32, %arg1: memref<1x18x18x3xf32, #tpu.memory_space<vmem>>, %arg2: memref<27x64xbf16, #tpu.memory_space<vmem>>, %arg3: memref<1x64xf32, #tpu.memory_space<vmem>>, %arg4: memref<1x8x8x64xf32, #tpu.memory_space<vmem>>) attributes {dimension_semantics = [#tpu.dimension_semantics<parallel>], iteration_bounds = array<i64: 2>, scalar_prefetch = 0 : i64, scratch_operands = 0 : i64, tpu.core_type = #tpu.core_type<tc>, window_params = [{transform_indices = @transform_0, window_bounds = array<i64: 1, 18, 18, 3>}, {pipeline_mode = #tpu.pipeline_mode<synchronous>, transform_indices = @transform_1, window_bounds = array<i64: 27, 64>}, {pipeline_mode = #tpu.pipeline_mode<synchronous>, transform_indices = @transform_2, window_bounds = array<i64: 1, 64>}, {transform_indices = @transform_3, window_bounds = array<i64: 1, 8, 8, 64>}]} {
    %c0 = arith.constant 0 : index
    %c0_0 = arith.constant 0 : index
    %c0_1 = arith.constant 0 : index
    %c0_2 = arith.constant 0 : index
    %0 = vector.load %arg1[%c0, %c0_0, %c0_1, %c0_2] : memref<1x18x18x3xf32, #tpu.memory_space<vmem>>, vector<1x16x16x3xf32>
    %1 = vector.shape_cast %0 : vector<1x16x16x3xf32> to vector<16x16x3xf32>
    %c0_3 = arith.constant 0 : index
    %c0_4 = arith.constant 0 : index
    %c1 = arith.constant 1 : index
    %c0_5 = arith.constant 0 : index
    %2 = vector.load %arg1[%c0_3, %c0_4, %c1, %c0_5] : memref<1x18x18x3xf32, #tpu.memory_space<vmem>>, vector<1x16x16x3xf32>
    %3 = vector.shape_cast %2 : vector<1x16x16x3xf32> to vector<16x16x3xf32>
    %c0_6 = arith.constant 0 : index
    %c0_7 = arith.constant 0 : index
    %c2 = arith.constant 2 : index
    %c0_8 = arith.constant 0 : index
    %4 = vector.load %arg1[%c0_6, %c0_7, %c2, %c0_8] : memref<1x18x18x3xf32, #tpu.memory_space<vmem>>, vector<1x16x16x3xf32>
    %5 = vector.shape_cast %4 : vector<1x16x16x3xf32> to vector<16x16x3xf32>
    %c0_9 = arith.constant 0 : index
    %c1_10 = arith.constant 1 : index
    %c0_11 = arith.constant 0 : index
    %c0_12 = arith.constant 0 : index
    %6 = vector.load %arg1[%c0_9, %c1_10, %c0_11, %c0_12] : memref<1x18x18x3xf32, #tpu.memory_space<vmem>>, vector<1x16x16x3xf32>
    %7 = vector.shape_cast %6 : vector<1x16x16x3xf32> to vector<16x16x3xf32>
    %c0_13 = arith.constant 0 : index
    %c1_14 = arith.constant 1 : index
    %c1_15 = arith.constant 1 : index
    %c0_16 = arith.constant 0 : index
    %8 = vector.load %arg1[%c0_13, %c1_14, %c1_15, %c0_16] : memref<1x18x18x3xf32, #tpu.memory_space<vmem>>, vector<1x16x16x3xf32>
    %9 = vector.shape_cast %8 : vector<1x16x16x3xf32> to vector<16x16x3xf32>
    %c0_17 = arith.constant 0 : index
    %c1_18 = arith.constant 1 : index
    %c2_19 = arith.constant 2 : index
    %c0_20 = arith.constant 0 : index
    %10 = vector.load %arg1[%c0_17, %c1_18, %c2_19, %c0_20] : memref<1x18x18x3xf32, #tpu.memory_space<vmem>>, vector<1x16x16x3xf32>
    %11 = vector.shape_cast %10 : vector<1x16x16x3xf32> to vector<16x16x3xf32>
    %c0_21 = arith.constant 0 : index
    %c2_22 = arith.constant 2 : index
    %c0_23 = arith.constant 0 : index
    %c0_24 = arith.constant 0 : index
    %12 = vector.load %arg1[%c0_21, %c2_22, %c0_23, %c0_24] : memref<1x18x18x3xf32, #tpu.memory_space<vmem>>, vector<1x16x16x3xf32>
    %13 = vector.shape_cast %12 : vector<1x16x16x3xf32> to vector<16x16x3xf32>
    %c0_25 = arith.constant 0 : index
    %c2_26 = arith.constant 2 : index
    %c1_27 = arith.constant 1 : index
    %c0_28 = arith.constant 0 : index
    %14 = vector.load %arg1[%c0_25, %c2_26, %c1_27, %c0_28] : memref<1x18x18x3xf32, #tpu.memory_space<vmem>>, vector<1x16x16x3xf32>
    %15 = vector.shape_cast %14 : vector<1x16x16x3xf32> to vector<16x16x3xf32>
    %c0_29 = arith.constant 0 : index
    %c2_30 = arith.constant 2 : index
    %c2_31 = arith.constant 2 : index
    %c0_32 = arith.constant 0 : index
    %16 = vector.load %arg1[%c0_29, %c2_30, %c2_31, %c0_32] : memref<1x18x18x3xf32, #tpu.memory_space<vmem>>, vector<1x16x16x3xf32>
    %17 = vector.shape_cast %16 : vector<1x16x16x3xf32> to vector<16x16x3xf32>
    %18 = tpu.concatenate %1, %3, %5, %7, %9, %11, %13, %15, %17 in 2 : vector<16x16x3xf32>, vector<16x16x3xf32>, vector<16x16x3xf32>, vector<16x16x3xf32>, vector<16x16x3xf32>, vector<16x16x3xf32>, vector<16x16x3xf32>, vector<16x16x3xf32>, vector<16x16x3xf32> -> vector<16x16x27xf32>
    %19 = vector.shape_cast %18 : vector<16x16x27xf32> to vector<256x27xf32>
    %20 = arith.truncf %19 : vector<256x27xf32> to vector<256x27xbf16>
    %c0_33 = arith.constant 0 : index
    %c0_34 = arith.constant 0 : index
    %21 = vector.load %arg2[%c0_33, %c0_34] : memref<27x64xbf16, #tpu.memory_space<vmem>>, vector<27x64xbf16>
    %cst = arith.constant dense<0.000000e+00> : vector<256x64xf32>
    %22 = tpu.matmul %20, %21, %cst {dimension_numbers = #tpu.dot_dimension_numbers<[1], [0], [0], [1], [0, 0, 1, 1], [], []>} : vector<256x27xbf16>, vector<27x64xbf16>, vector<256x64xf32> -> vector<256x64xf32>
    %c0_35 = arith.constant 0 : index
    %c0_36 = arith.constant 0 : index
    %23 = vector.load %arg3[%c0_35, %c0_36] : memref<1x64xf32, #tpu.memory_space<vmem>>, vector<1x64xf32>
    %24 = vector.broadcast %23 : vector<1x64xf32> to vector<256x64xf32>
    %25 = arith.addf %22, %24 : vector<256x64xf32>
    %cst_37 = arith.constant 0.000000e+00 : f32
    %26 = vector.broadcast %cst_37 : f32 to vector<256x64xf32>
    %27 = arith.maximumf %25, %26 : vector<256x64xf32>
    %28 = vector.shape_cast %27 : vector<256x64xf32> to vector<8x2x16x64xf32>
    %29 = vector.extract_strided_slice %28 {offsets = [0, 0, 0, 0], sizes = [8, 1, 16, 64], strides = [1, 1, 1, 1]} : vector<8x2x16x64xf32> to vector<8x1x16x64xf32>
    %30 = vector.shape_cast %29 : vector<8x1x16x64xf32> to vector<8x16x64xf32>
    %31 = vector.extract_strided_slice %28 {offsets = [0, 1, 0, 0], sizes = [8, 1, 16, 64], strides = [1, 1, 1, 1]} : vector<8x2x16x64xf32> to vector<8x1x16x64xf32>
    %32 = vector.shape_cast %31 : vector<8x1x16x64xf32> to vector<8x16x64xf32>
    %33 = arith.maximumf %30, %32 : vector<8x16x64xf32>
    %34 = vector.extract_strided_slice %33 {offsets = [0, 0, 0], sizes = [8, 1, 64], strides = [1, 1, 1]} : vector<8x16x64xf32> to vector<8x1x64xf32>
    %35 = vector.extract_strided_slice %33 {offsets = [0, 1, 0], sizes = [8, 1, 64], strides = [1, 1, 1]} : vector<8x16x64xf32> to vector<8x1x64xf32>
    %36 = arith.maximumf %34, %35 : vector<8x1x64xf32>
    %c0_38 = arith.constant 0 : index
    %c0_39 = arith.constant 0 : index
    %c0_40 = arith.constant 0 : index
    %c0_41 = arith.constant 0 : index
    %37 = vector.load %arg4[%c0_38, %c0_39, %c0_40, %c0_41] : memref<1x8x8x64xf32, #tpu.memory_space<vmem>>, vector<1x8x1x64xf32>
    %38 = vector.shape_cast %37 : vector<1x8x1x64xf32> to vector<8x1x64xf32>
    %39 = vector.shape_cast %36 : vector<8x1x64xf32> to vector<1x8x1x64xf32>
    tpu.vector_store %arg4[%c0_38, %c0_39, %c0_40, %c0_41], %39 {strides = array<i32>} : memref<1x8x8x64xf32, #tpu.memory_space<vmem>>, vector<1x8x1x64xf32>,
    %40 = vector.extract_strided_slice %33 {offsets = [0, 2, 0], sizes = [8, 1, 64], strides = [1, 1, 1]} : vector<8x16x64xf32> to vector<8x1x64xf32>
    %41 = vector.extract_strided_slice %33 {offsets = [0, 3, 0], sizes = [8, 1, 64], strides = [1, 1, 1]} : vector<8x16x64xf32> to vector<8x1x64xf32>
    %42 = arith.maximumf %40, %41 : vector<8x1x64xf32>
    %c0_42 = arith.constant 0 : index
    %c0_43 = arith.constant 0 : index
    %c1_44 = arith.constant 1 : index
    %c0_45 = arith.constant 0 : index
    %43 = vector.load %arg4[%c0_42, %c0_43, %c1_44, %c0_45] : memref<1x8x8x64xf32, #tpu.memory_space<vmem>>, vector<1x8x1x64xf32>
    %44 = vector.shape_cast %43 : vector<1x8x1x64xf32> to vector<8x1x64xf32>
    %45 = vector.shape_cast %42 : vector<8x1x64xf32> to vector<1x8x1x64xf32>
    tpu.vector_store %arg4[%c0_42, %c0_43, %c1_44, %c0_45], %45 {strides = array<i32>} : memref<1x8x8x64xf32, #tpu.memory_space<vmem>>, vector<1x8x1x64xf32>,
    %46 = vector.extract_strided_slice %33 {offsets = [0, 4, 0], sizes = [8, 1, 64], strides = [1, 1, 1]} : vector<8x16x64xf32> to vector<8x1x64xf32>
    %47 = vector.extract_strided_slice %33 {offsets = [0, 5, 0], sizes = [8, 1, 64], strides = [1, 1, 1]} : vector<8x16x64xf32> to vector<8x1x64xf32>
    %48 = arith.maximumf %46, %47 : vector<8x1x64xf32>
    %c0_46 = arith.constant 0 : index
    %c0_47 = arith.constant 0 : index
    %c2_48 = arith.constant 2 : index
    %c0_49 = arith.constant 0 : index
    %49 = vector.load %arg4[%c0_46, %c0_47, %c2_48, %c0_49] : memref<1x8x8x64xf32, #tpu.memory_space<vmem>>, vector<1x8x1x64xf32>
    %50 = vector.shape_cast %49 : vector<1x8x1x64xf32> to vector<8x1x64xf32>
    %51 = vector.shape_cast %48 : vector<8x1x64xf32> to vector<1x8x1x64xf32>
    tpu.vector_store %arg4[%c0_46, %c0_47, %c2_48, %c0_49], %51 {strides = array<i32>} : memref<1x8x8x64xf32, #tpu.memory_space<vmem>>, vector<1x8x1x64xf32>,
    %52 = vector.extract_strided_slice %33 {offsets = [0, 6, 0], sizes = [8, 1, 64], strides = [1, 1, 1]} : vector<8x16x64xf32> to vector<8x1x64xf32>
    %53 = vector.extract_strided_slice %33 {offsets = [0, 7, 0], sizes = [8, 1, 64], strides = [1, 1, 1]} : vector<8x16x64xf32> to vector<8x1x64xf32>
    %54 = arith.maximumf %52, %53 : vector<8x1x64xf32>
    %c0_50 = arith.constant 0 : index
    %c0_51 = arith.constant 0 : index
    %c3 = arith.constant 3 : index
    %c0_52 = arith.constant 0 : index
    %55 = vector.load %arg4[%c0_50, %c0_51, %c3, %c0_52] : memref<1x8x8x64xf32, #tpu.memory_space<vmem>>, vector<1x8x1x64xf32>
    %56 = vector.shape_cast %55 : vector<1x8x1x64xf32> to vector<8x1x64xf32>
    %57 = vector.shape_cast %54 : vector<8x1x64xf32> to vector<1x8x1x64xf32>
    tpu.vector_store %arg4[%c0_50, %c0_51, %c3, %c0_52], %57 {strides = array<i32>} : memref<1x8x8x64xf32, #tpu.memory_space<vmem>>, vector<1x8x1x64xf32>,
    %58 = vector.extract_strided_slice %33 {offsets = [0, 8, 0], sizes = [8, 1, 64], strides = [1, 1, 1]} : vector<8x16x64xf32> to vector<8x1x64xf32>
    %59 = vector.extract_strided_slice %33 {offsets = [0, 9, 0], sizes = [8, 1, 64], strides = [1, 1, 1]} : vector<8x16x64xf32> to vector<8x1x64xf32>
    %60 = arith.maximumf %58, %59 : vector<8x1x64xf32>
    %c0_53 = arith.constant 0 : index
    %c0_54 = arith.constant 0 : index
    %c4 = arith.constant 4 : index
    %c0_55 = arith.constant 0 : index
    %61 = vector.load %arg4[%c0_53, %c0_54, %c4, %c0_55] : memref<1x8x8x64xf32, #tpu.memory_space<vmem>>, vector<1x8x1x64xf32>
    %62 = vector.shape_cast %61 : vector<1x8x1x64xf32> to vector<8x1x64xf32>
    %63 = vector.shape_cast %60 : vector<8x1x64xf32> to vector<1x8x1x64xf32>
    tpu.vector_store %arg4[%c0_53, %c0_54, %c4, %c0_55], %63 {strides = array<i32>} : memref<1x8x8x64xf32, #tpu.memory_space<vmem>>, vector<1x8x1x64xf32>,
    %64 = vector.extract_strided_slice %33 {offsets = [0, 10, 0], sizes = [8, 1, 64], strides = [1, 1, 1]} : vector<8x16x64xf32> to vector<8x1x64xf32>
    %65 = vector.extract_strided_slice %33 {offsets = [0, 11, 0], sizes = [8, 1, 64], strides = [1, 1, 1]} : vector<8x16x64xf32> to vector<8x1x64xf32>
    %66 = arith.maximumf %64, %65 : vector<8x1x64xf32>
    %c0_56 = arith.constant 0 : index
    %c0_57 = arith.constant 0 : index
    %c5 = arith.constant 5 : index
    %c0_58 = arith.constant 0 : index
    %67 = vector.load %arg4[%c0_56, %c0_57, %c5, %c0_58] : memref<1x8x8x64xf32, #tpu.memory_space<vmem>>, vector<1x8x1x64xf32>
    %68 = vector.shape_cast %67 : vector<1x8x1x64xf32> to vector<8x1x64xf32>
    %69 = vector.shape_cast %66 : vector<8x1x64xf32> to vector<1x8x1x64xf32>
    tpu.vector_store %arg4[%c0_56, %c0_57, %c5, %c0_58], %69 {strides = array<i32>} : memref<1x8x8x64xf32, #tpu.memory_space<vmem>>, vector<1x8x1x64xf32>,
    %70 = vector.extract_strided_slice %33 {offsets = [0, 12, 0], sizes = [8, 1, 64], strides = [1, 1, 1]} : vector<8x16x64xf32> to vector<8x1x64xf32>
    %71 = vector.extract_strided_slice %33 {offsets = [0, 13, 0], sizes = [8, 1, 64], strides = [1, 1, 1]} : vector<8x16x64xf32> to vector<8x1x64xf32>
    %72 = arith.maximumf %70, %71 : vector<8x1x64xf32>
    %c0_59 = arith.constant 0 : index
    %c0_60 = arith.constant 0 : index
    %c6 = arith.constant 6 : index
    %c0_61 = arith.constant 0 : index
    %73 = vector.load %arg4[%c0_59, %c0_60, %c6, %c0_61] : memref<1x8x8x64xf32, #tpu.memory_space<vmem>>, vector<1x8x1x64xf32>
    %74 = vector.shape_cast %73 : vector<1x8x1x64xf32> to vector<8x1x64xf32>
    %75 = vector.shape_cast %72 : vector<8x1x64xf32> to vector<1x8x1x64xf32>
    tpu.vector_store %arg4[%c0_59, %c0_60, %c6, %c0_61], %75 {strides = array<i32>} : memref<1x8x8x64xf32, #tpu.memory_space<vmem>>, vector<1x8x1x64xf32>,
    %76 = vector.extract_strided_slice %33 {offsets = [0, 14, 0], sizes = [8, 1, 64], strides = [1, 1, 1]} : vector<8x16x64xf32> to vector<8x1x64xf32>
    %77 = vector.extract_strided_slice %33 {offsets = [0, 15, 0], sizes = [8, 1, 64], strides = [1, 1, 1]} : vector<8x16x64xf32> to vector<8x1x64xf32>
    %78 = arith.maximumf %76, %77 : vector<8x1x64xf32>
    %c0_62 = arith.constant 0 : index
    %c0_63 = arith.constant 0 : index
    %c7 = arith.constant 7 : index
    %c0_64 = arith.constant 0 : index
    %79 = vector.load %arg4[%c0_62, %c0_63, %c7, %c0_64] : memref<1x8x8x64xf32, #tpu.memory_space<vmem>>, vector<1x8x1x64xf32>
    %80 = vector.shape_cast %79 : vector<1x8x1x64xf32> to vector<8x1x64xf32>
    %81 = vector.shape_cast %78 : vector<8x1x64xf32> to vector<1x8x1x64xf32>
    tpu.vector_store %arg4[%c0_62, %c0_63, %c7, %c0_64], %81 {strides = array<i32>} : memref<1x8x8x64xf32, #tpu.memory_space<vmem>>, vector<1x8x1x64xf32>,
    return
  }
  func.func @transform_0(%arg0: i32) -> (i32, i32, i32, i32) {
    %c0_i32 = arith.constant 0 : i32
    %c0_i32_0 = arith.constant 0 : i32
    %c0_i32_1 = arith.constant 0 : i32
    %c0_i32_2 = arith.constant 0 : i32
    return %arg0, %c0_i32, %c0_i32_0, %c0_i32_1 : i32, i32, i32, i32
  }
  func.func @transform_1(%arg0: i32) -> (i32, i32) {
    %c0_i32 = arith.constant 0 : i32
    %c0_i32_0 = arith.constant 0 : i32
    %c0_i32_1 = arith.constant 0 : i32
    return %c0_i32, %c0_i32_0 : i32, i32
  }
  func.func @transform_2(%arg0: i32) -> (i32, i32) {
    %c0_i32 = arith.constant 0 : i32
    %c0_i32_0 = arith.constant 0 : i32
    %c0_i32_1 = arith.constant 0 : i32
    return %c0_i32, %c0_i32_0 : i32, i32
  }
  func.func @transform_3(%arg0: i32) -> (i32, i32, i32, i32) {
    %c0_i32 = arith.constant 0 : i32
    %c0_i32_0 = arith.constant 0 : i32
    %c0_i32_1 = arith.constant 0 : i32
    %c0_i32_2 = arith.constant 0 : i32
    return %arg0, %c0_i32, %c0_i32_0, %c0_i32_1 : i32, i32, i32, i32
  }
}

module attributes {stable_mosaic.version = 11 : i64} {
  func.func @_inception_kernel(%arg0: i32, %arg1: memref<1x8x8x64xf32, #tpu.memory_space<vmem>>, %arg2: memref<64x176xbf16, #tpu.memory_space<vmem>>, %arg3: memref<1x176xf32, #tpu.memory_space<vmem>>, %arg4: memref<864x128xbf16, #tpu.memory_space<vmem>>, %arg5: memref<1x128xf32, #tpu.memory_space<vmem>>, %arg6: memref<400x32xbf16, #tpu.memory_space<vmem>>, %arg7: memref<1x32xf32, #tpu.memory_space<vmem>>, %arg8: memref<64x32xbf16, #tpu.memory_space<vmem>>, %arg9: memref<1x32xf32, #tpu.memory_space<vmem>>, %arg10: memref<1x8x8x256xbf16, #tpu.memory_space<vmem>>, %arg11: memref<10x10x96xf32, #tpu.memory_space<vmem>>, %arg12: memref<12x12x16xf32, #tpu.memory_space<vmem>>, %arg13: memref<10x10x64xf32, #tpu.memory_space<vmem>>) attributes {dimension_semantics = [#tpu.dimension_semantics<parallel>], iteration_bounds = array<i64: 2>, scalar_prefetch = 0 : i64, scratch_operands = 3 : i64, tpu.core_type = #tpu.core_type<tc>, window_params = [{transform_indices = @transform_0, window_bounds = array<i64: 1, 8, 8, 64>}, {pipeline_mode = #tpu.pipeline_mode<synchronous>, transform_indices = @transform_1, window_bounds = array<i64: 64, 176>}, {pipeline_mode = #tpu.pipeline_mode<synchronous>, transform_indices = @transform_2, window_bounds = array<i64: 1, 176>}, {pipeline_mode = #tpu.pipeline_mode<synchronous>, transform_indices = @transform_3, window_bounds = array<i64: 864, 128>}, {pipeline_mode = #tpu.pipeline_mode<synchronous>, transform_indices = @transform_4, window_bounds = array<i64: 1, 128>}, {pipeline_mode = #tpu.pipeline_mode<synchronous>, transform_indices = @transform_5, window_bounds = array<i64: 400, 32>}, {pipeline_mode = #tpu.pipeline_mode<synchronous>, transform_indices = @transform_6, window_bounds = array<i64: 1, 32>}, {pipeline_mode = #tpu.pipeline_mode<synchronous>, transform_indices = @transform_7, window_bounds = array<i64: 64, 32>}, {pipeline_mode = #tpu.pipeline_mode<synchronous>, transform_indices = @transform_8, window_bounds = array<i64: 1, 32>}, {transform_indices = @transform_9, window_bounds = array<i64: 1, 8, 8, 256>}]} {
    %c0 = arith.constant 0 : index
    %c0_0 = arith.constant 0 : index
    %c0_1 = arith.constant 0 : index
    %c0_2 = arith.constant 0 : index
    %0 = vector.load %arg1[%c0, %c0_0, %c0_1, %c0_2] : memref<1x8x8x64xf32, #tpu.memory_space<vmem>>, vector<1x8x8x64xf32>
    %1 = vector.shape_cast %0 : vector<1x8x8x64xf32> to vector<8x8x64xf32>
    %2 = vector.shape_cast %1 : vector<8x8x64xf32> to vector<64x64xf32>
    %3 = arith.truncf %2 : vector<64x64xf32> to vector<64x64xbf16>
    %c0_3 = arith.constant 0 : index
    %c0_4 = arith.constant 0 : index
    %4 = vector.load %arg2[%c0_3, %c0_4] : memref<64x176xbf16, #tpu.memory_space<vmem>>, vector<64x176xbf16>
    %cst = arith.constant dense<0.000000e+00> : vector<64x176xf32>
    %5 = tpu.matmul %3, %4, %cst {dimension_numbers = #tpu.dot_dimension_numbers<[1], [0], [0], [1], [0, 0, 1, 1], [], []>} : vector<64x64xbf16>, vector<64x176xbf16>, vector<64x176xf32> -> vector<64x176xf32>
    %c0_5 = arith.constant 0 : index
    %c0_6 = arith.constant 0 : index
    %6 = vector.load %arg3[%c0_5, %c0_6] : memref<1x176xf32, #tpu.memory_space<vmem>>, vector<1x176xf32>
    %7 = vector.broadcast %6 : vector<1x176xf32> to vector<64x176xf32>
    %8 = arith.addf %5, %7 : vector<64x176xf32>
    %cst_7 = arith.constant 0.000000e+00 : f32
    %9 = vector.broadcast %cst_7 : f32 to vector<64x176xf32>
    %10 = arith.maximumf %8, %9 : vector<64x176xf32>
    %11 = vector.extract_strided_slice %10 {offsets = [0, 0], sizes = [64, 64], strides = [1, 1]} : vector<64x176xf32> to vector<64x64xf32>
    %cst_8 = arith.constant 0.000000e+00 : f32
    %12 = vector.broadcast %cst_8 : f32 to vector<10x10x96xf32>
    %c0_9 = arith.constant 0 : index
    %c0_10 = arith.constant 0 : index
    %c0_11 = arith.constant 0 : index
    %13 = vector.load %arg11[%c0_9, %c0_10, %c0_11] : memref<10x10x96xf32, #tpu.memory_space<vmem>>, vector<10x10x96xf32>
    tpu.vector_store %arg11[%c0_9, %c0_10, %c0_11], %12 {strides = array<i32>} : memref<10x10x96xf32, #tpu.memory_space<vmem>>, vector<10x10x96xf32>,
    %14 = vector.extract_strided_slice %10 {offsets = [0, 64], sizes = [64, 96], strides = [1, 1]} : vector<64x176xf32> to vector<64x96xf32>
    %15 = vector.shape_cast %14 : vector<64x96xf32> to vector<8x8x96xf32>
    %c1 = arith.constant 1 : index
    %c1_12 = arith.constant 1 : index
    %c0_13 = arith.constant 0 : index
    %16 = vector.load %arg11[%c1, %c1_12, %c0_13] : memref<10x10x96xf32, #tpu.memory_space<vmem>>, vector<8x8x96xf32>
    tpu.vector_store %arg11[%c1, %c1_12, %c0_13], %15 {strides = array<i32>} : memref<10x10x96xf32, #tpu.memory_space<vmem>>, vector<8x8x96xf32>,
    %c0_14 = arith.constant 0 : index
    %c0_15 = arith.constant 0 : index
    %c0_16 = arith.constant 0 : index
    %17 = vector.load %arg11[%c0_14, %c0_15, %c0_16] : memref<10x10x96xf32, #tpu.memory_space<vmem>>, vector<8x8x96xf32>
    %c0_17 = arith.constant 0 : index
    %c1_18 = arith.constant 1 : index
    %c0_19 = arith.constant 0 : index
    %18 = vector.load %arg11[%c0_17, %c1_18, %c0_19] : memref<10x10x96xf32, #tpu.memory_space<vmem>>, vector<8x8x96xf32>
    %c0_20 = arith.constant 0 : index
    %c2 = arith.constant 2 : index
    %c0_21 = arith.constant 0 : index
    %19 = vector.load %arg11[%c0_20, %c2, %c0_21] : memref<10x10x96xf32, #tpu.memory_space<vmem>>, vector<8x8x96xf32>
    %c1_22 = arith.constant 1 : index
    %c0_23 = arith.constant 0 : index
    %c0_24 = arith.constant 0 : index
    %20 = vector.load %arg11[%c1_22, %c0_23, %c0_24] : memref<10x10x96xf32, #tpu.memory_space<vmem>>, vector<8x8x96xf32>
    %c1_25 = arith.constant 1 : index
    %c1_26 = arith.constant 1 : index
    %c0_27 = arith.constant 0 : index
    %21 = vector.load %arg11[%c1_25, %c1_26, %c0_27] : memref<10x10x96xf32, #tpu.memory_space<vmem>>, vector<8x8x96xf32>
    %c1_28 = arith.constant 1 : index
    %c2_29 = arith.constant 2 : index
    %c0_30 = arith.constant 0 : index
    %22 = vector.load %arg11[%c1_28, %c2_29, %c0_30] : memref<10x10x96xf32, #tpu.memory_space<vmem>>, vector<8x8x96xf32>
    %c2_31 = arith.constant 2 : index
    %c0_32 = arith.constant 0 : index
    %c0_33 = arith.constant 0 : index
    %23 = vector.load %arg11[%c2_31, %c0_32, %c0_33] : memref<10x10x96xf32, #tpu.memory_space<vmem>>, vector<8x8x96xf32>
    %c2_34 = arith.constant 2 : index
    %c1_35 = arith.constant 1 : index
    %c0_36 = arith.constant 0 : index
    %24 = vector.load %arg11[%c2_34, %c1_35, %c0_36] : memref<10x10x96xf32, #tpu.memory_space<vmem>>, vector<8x8x96xf32>
    %c2_37 = arith.constant 2 : index
    %c2_38 = arith.constant 2 : index
    %c0_39 = arith.constant 0 : index
    %25 = vector.load %arg11[%c2_37, %c2_38, %c0_39] : memref<10x10x96xf32, #tpu.memory_space<vmem>>, vector<8x8x96xf32>
    %26 = tpu.concatenate %17, %18, %19, %20, %21, %22, %23, %24, %25 in 2 : vector<8x8x96xf32>, vector<8x8x96xf32>, vector<8x8x96xf32>, vector<8x8x96xf32>, vector<8x8x96xf32>, vector<8x8x96xf32>, vector<8x8x96xf32>, vector<8x8x96xf32>, vector<8x8x96xf32> -> vector<8x8x864xf32>
    %27 = vector.shape_cast %26 : vector<8x8x864xf32> to vector<64x864xf32>
    %28 = arith.truncf %27 : vector<64x864xf32> to vector<64x864xbf16>
    %c0_40 = arith.constant 0 : index
    %c0_41 = arith.constant 0 : index
    %29 = vector.load %arg4[%c0_40, %c0_41] : memref<864x128xbf16, #tpu.memory_space<vmem>>, vector<864x128xbf16>
    %cst_42 = arith.constant dense<0.000000e+00> : vector<64x128xf32>
    %30 = tpu.matmul %28, %29, %cst_42 {dimension_numbers = #tpu.dot_dimension_numbers<[1], [0], [0], [1], [0, 0, 1, 1], [], []>} : vector<64x864xbf16>, vector<864x128xbf16>, vector<64x128xf32> -> vector<64x128xf32>
    %c0_43 = arith.constant 0 : index
    %c0_44 = arith.constant 0 : index
    %31 = vector.load %arg5[%c0_43, %c0_44] : memref<1x128xf32, #tpu.memory_space<vmem>>, vector<1x128xf32>
    %32 = vector.broadcast %31 : vector<1x128xf32> to vector<64x128xf32>
    %33 = arith.addf %30, %32 : vector<64x128xf32>
    %cst_45 = arith.constant 0.000000e+00 : f32
    %34 = vector.broadcast %cst_45 : f32 to vector<64x128xf32>
    %35 = arith.maximumf %33, %34 : vector<64x128xf32>
    %cst_46 = arith.constant 0.000000e+00 : f32
    %36 = vector.broadcast %cst_46 : f32 to vector<12x12x16xf32>
    %c0_47 = arith.constant 0 : index
    %c0_48 = arith.constant 0 : index
    %c0_49 = arith.constant 0 : index
    %37 = vector.load %arg12[%c0_47, %c0_48, %c0_49] : memref<12x12x16xf32, #tpu.memory_space<vmem>>, vector<12x12x16xf32>
    tpu.vector_store %arg12[%c0_47, %c0_48, %c0_49], %36 {strides = array<i32>} : memref<12x12x16xf32, #tpu.memory_space<vmem>>, vector<12x12x16xf32>,
    %38 = vector.extract_strided_slice %10 {offsets = [0, 160], sizes = [64, 16], strides = [1, 1]} : vector<64x176xf32> to vector<64x16xf32>
    %39 = vector.shape_cast %38 : vector<64x16xf32> to vector<8x8x16xf32>
    %c2_50 = arith.constant 2 : index
    %c2_51 = arith.constant 2 : index
    %c0_52 = arith.constant 0 : index
    %40 = vector.load %arg12[%c2_50, %c2_51, %c0_52] : memref<12x12x16xf32, #tpu.memory_space<vmem>>, vector<8x8x16xf32>
    tpu.vector_store %arg12[%c2_50, %c2_51, %c0_52], %39 {strides = array<i32>} : memref<12x12x16xf32, #tpu.memory_space<vmem>>, vector<8x8x16xf32>,
    %c0_53 = arith.constant 0 : index
    %c0_54 = arith.constant 0 : index
    %c0_55 = arith.constant 0 : index
    %41 = vector.load %arg12[%c0_53, %c0_54, %c0_55] : memref<12x12x16xf32, #tpu.memory_space<vmem>>, vector<8x8x16xf32>
    %c0_56 = arith.constant 0 : index
    %c1_57 = arith.constant 1 : index
    %c0_58 = arith.constant 0 : index
    %42 = vector.load %arg12[%c0_56, %c1_57, %c0_58] : memref<12x12x16xf32, #tpu.memory_space<vmem>>, vector<8x8x16xf32>
    %c0_59 = arith.constant 0 : index
    %c2_60 = arith.constant 2 : index
    %c0_61 = arith.constant 0 : index
    %43 = vector.load %arg12[%c0_59, %c2_60, %c0_61] : memref<12x12x16xf32, #tpu.memory_space<vmem>>, vector<8x8x16xf32>
    %c0_62 = arith.constant 0 : index
    %c3 = arith.constant 3 : index
    %c0_63 = arith.constant 0 : index
    %44 = vector.load %arg12[%c0_62, %c3, %c0_63] : memref<12x12x16xf32, #tpu.memory_space<vmem>>, vector<8x8x16xf32>
    %c0_64 = arith.constant 0 : index
    %c4 = arith.constant 4 : index
    %c0_65 = arith.constant 0 : index
    %45 = vector.load %arg12[%c0_64, %c4, %c0_65] : memref<12x12x16xf32, #tpu.memory_space<vmem>>, vector<8x8x16xf32>
    %c1_66 = arith.constant 1 : index
    %c0_67 = arith.constant 0 : index
    %c0_68 = arith.constant 0 : index
    %46 = vector.load %arg12[%c1_66, %c0_67, %c0_68] : memref<12x12x16xf32, #tpu.memory_space<vmem>>, vector<8x8x16xf32>
    %c1_69 = arith.constant 1 : index
    %c1_70 = arith.constant 1 : index
    %c0_71 = arith.constant 0 : index
    %47 = vector.load %arg12[%c1_69, %c1_70, %c0_71] : memref<12x12x16xf32, #tpu.memory_space<vmem>>, vector<8x8x16xf32>
    %c1_72 = arith.constant 1 : index
    %c2_73 = arith.constant 2 : index
    %c0_74 = arith.constant 0 : index
    %48 = vector.load %arg12[%c1_72, %c2_73, %c0_74] : memref<12x12x16xf32, #tpu.memory_space<vmem>>, vector<8x8x16xf32>
    %c1_75 = arith.constant 1 : index
    %c3_76 = arith.constant 3 : index
    %c0_77 = arith.constant 0 : index
    %49 = vector.load %arg12[%c1_75, %c3_76, %c0_77] : memref<12x12x16xf32, #tpu.memory_space<vmem>>, vector<8x8x16xf32>
    %c1_78 = arith.constant 1 : index
    %c4_79 = arith.constant 4 : index
    %c0_80 = arith.constant 0 : index
    %50 = vector.load %arg12[%c1_78, %c4_79, %c0_80] : memref<12x12x16xf32, #tpu.memory_space<vmem>>, vector<8x8x16xf32>
    %c2_81 = arith.constant 2 : index
    %c0_82 = arith.constant 0 : index
    %c0_83 = arith.constant 0 : index
    %51 = vector.load %arg12[%c2_81, %c0_82, %c0_83] : memref<12x12x16xf32, #tpu.memory_space<vmem>>, vector<8x8x16xf32>
    %c2_84 = arith.constant 2 : index
    %c1_85 = arith.constant 1 : index
    %c0_86 = arith.constant 0 : index
    %52 = vector.load %arg12[%c2_84, %c1_85, %c0_86] : memref<12x12x16xf32, #tpu.memory_space<vmem>>, vector<8x8x16xf32>
    %c2_87 = arith.constant 2 : index
    %c2_88 = arith.constant 2 : index
    %c0_89 = arith.constant 0 : index
    %53 = vector.load %arg12[%c2_87, %c2_88, %c0_89] : memref<12x12x16xf32, #tpu.memory_space<vmem>>, vector<8x8x16xf32>
    %c2_90 = arith.constant 2 : index
    %c3_91 = arith.constant 3 : index
    %c0_92 = arith.constant 0 : index
    %54 = vector.load %arg12[%c2_90, %c3_91, %c0_92] : memref<12x12x16xf32, #tpu.memory_space<vmem>>, vector<8x8x16xf32>
    %c2_93 = arith.constant 2 : index
    %c4_94 = arith.constant 4 : index
    %c0_95 = arith.constant 0 : index
    %55 = vector.load %arg12[%c2_93, %c4_94, %c0_95] : memref<12x12x16xf32, #tpu.memory_space<vmem>>, vector<8x8x16xf32>
    %c3_96 = arith.constant 3 : index
    %c0_97 = arith.constant 0 : index
    %c0_98 = arith.constant 0 : index
    %56 = vector.load %arg12[%c3_96, %c0_97, %c0_98] : memref<12x12x16xf32, #tpu.memory_space<vmem>>, vector<8x8x16xf32>
    %c3_99 = arith.constant 3 : index
    %c1_100 = arith.constant 1 : index
    %c0_101 = arith.constant 0 : index
    %57 = vector.load %arg12[%c3_99, %c1_100, %c0_101] : memref<12x12x16xf32, #tpu.memory_space<vmem>>, vector<8x8x16xf32>
    %c3_102 = arith.constant 3 : index
    %c2_103 = arith.constant 2 : index
    %c0_104 = arith.constant 0 : index
    %58 = vector.load %arg12[%c3_102, %c2_103, %c0_104] : memref<12x12x16xf32, #tpu.memory_space<vmem>>, vector<8x8x16xf32>
    %c3_105 = arith.constant 3 : index
    %c3_106 = arith.constant 3 : index
    %c0_107 = arith.constant 0 : index
    %59 = vector.load %arg12[%c3_105, %c3_106, %c0_107] : memref<12x12x16xf32, #tpu.memory_space<vmem>>, vector<8x8x16xf32>
    %c3_108 = arith.constant 3 : index
    %c4_109 = arith.constant 4 : index
    %c0_110 = arith.constant 0 : index
    %60 = vector.load %arg12[%c3_108, %c4_109, %c0_110] : memref<12x12x16xf32, #tpu.memory_space<vmem>>, vector<8x8x16xf32>
    %c4_111 = arith.constant 4 : index
    %c0_112 = arith.constant 0 : index
    %c0_113 = arith.constant 0 : index
    %61 = vector.load %arg12[%c4_111, %c0_112, %c0_113] : memref<12x12x16xf32, #tpu.memory_space<vmem>>, vector<8x8x16xf32>
    %c4_114 = arith.constant 4 : index
    %c1_115 = arith.constant 1 : index
    %c0_116 = arith.constant 0 : index
    %62 = vector.load %arg12[%c4_114, %c1_115, %c0_116] : memref<12x12x16xf32, #tpu.memory_space<vmem>>, vector<8x8x16xf32>
    %c4_117 = arith.constant 4 : index
    %c2_118 = arith.constant 2 : index
    %c0_119 = arith.constant 0 : index
    %63 = vector.load %arg12[%c4_117, %c2_118, %c0_119] : memref<12x12x16xf32, #tpu.memory_space<vmem>>, vector<8x8x16xf32>
    %c4_120 = arith.constant 4 : index
    %c3_121 = arith.constant 3 : index
    %c0_122 = arith.constant 0 : index
    %64 = vector.load %arg12[%c4_120, %c3_121, %c0_122] : memref<12x12x16xf32, #tpu.memory_space<vmem>>, vector<8x8x16xf32>
    %c4_123 = arith.constant 4 : index
    %c4_124 = arith.constant 4 : index
    %c0_125 = arith.constant 0 : index
    %65 = vector.load %arg12[%c4_123, %c4_124, %c0_125] : memref<12x12x16xf32, #tpu.memory_space<vmem>>, vector<8x8x16xf32>
    %66 = tpu.concatenate %41, %42, %43, %44, %45, %46, %47, %48, %49, %50, %51, %52, %53, %54, %55, %56 in 2 : vector<8x8x16xf32>, vector<8x8x16xf32>, vector<8x8x16xf32>, vector<8x8x16xf32>, vector<8x8x16xf32>, vector<8x8x16xf32>, vector<8x8x16xf32>, vector<8x8x16xf32>, vector<8x8x16xf32>, vector<8x8x16xf32>, vector<8x8x16xf32>, vector<8x8x16xf32>, vector<8x8x16xf32>, vector<8x8x16xf32>, vector<8x8x16xf32>, vector<8x8x16xf32> -> vector<8x8x256xf32>
    %67 = tpu.concatenate %57, %58, %59, %60, %61, %62, %63, %64, %65 in 2 : vector<8x8x16xf32>, vector<8x8x16xf32>, vector<8x8x16xf32>, vector<8x8x16xf32>, vector<8x8x16xf32>, vector<8x8x16xf32>, vector<8x8x16xf32>, vector<8x8x16xf32>, vector<8x8x16xf32> -> vector<8x8x144xf32>
    %68 = tpu.concatenate %66, %67 in 2 : vector<8x8x256xf32>, vector<8x8x144xf32> -> vector<8x8x400xf32>
    %69 = vector.shape_cast %68 : vector<8x8x400xf32> to vector<64x400xf32>
    %70 = arith.truncf %69 : vector<64x400xf32> to vector<64x400xbf16>
    %c0_126 = arith.constant 0 : index
    %c0_127 = arith.constant 0 : index
    %71 = vector.load %arg6[%c0_126, %c0_127] : memref<400x32xbf16, #tpu.memory_space<vmem>>, vector<400x32xbf16>
    %cst_128 = arith.constant dense<0.000000e+00> : vector<64x32xf32>
    %72 = tpu.matmul %70, %71, %cst_128 {dimension_numbers = #tpu.dot_dimension_numbers<[1], [0], [0], [1], [0, 0, 1, 1], [], []>} : vector<64x400xbf16>, vector<400x32xbf16>, vector<64x32xf32> -> vector<64x32xf32>
    %c0_129 = arith.constant 0 : index
    %c0_130 = arith.constant 0 : index
    %73 = vector.load %arg7[%c0_129, %c0_130] : memref<1x32xf32, #tpu.memory_space<vmem>>, vector<1x32xf32>
    %74 = vector.broadcast %73 : vector<1x32xf32> to vector<64x32xf32>
    %75 = arith.addf %72, %74 : vector<64x32xf32>
    %cst_131 = arith.constant 0.000000e+00 : f32
    %76 = vector.broadcast %cst_131 : f32 to vector<64x32xf32>
    %77 = arith.maximumf %75, %76 : vector<64x32xf32>
    %cst_132 = arith.constant 0xFF800000 : f32
    %78 = vector.broadcast %cst_132 : f32 to vector<10x10x64xf32>
    %c0_133 = arith.constant 0 : index
    %c0_134 = arith.constant 0 : index
    %c0_135 = arith.constant 0 : index
    %79 = vector.load %arg13[%c0_133, %c0_134, %c0_135] : memref<10x10x64xf32, #tpu.memory_space<vmem>>, vector<10x10x64xf32>
    tpu.vector_store %arg13[%c0_133, %c0_134, %c0_135], %78 {strides = array<i32>} : memref<10x10x64xf32, #tpu.memory_space<vmem>>, vector<10x10x64xf32>,
    %c1_136 = arith.constant 1 : index
    %c1_137 = arith.constant 1 : index
    %c0_138 = arith.constant 0 : index
    %80 = vector.load %arg13[%c1_136, %c1_137, %c0_138] : memref<10x10x64xf32, #tpu.memory_space<vmem>>, vector<8x8x64xf32>
    tpu.vector_store %arg13[%c1_136, %c1_137, %c0_138], %1 {strides = array<i32>} : memref<10x10x64xf32, #tpu.memory_space<vmem>>, vector<8x8x64xf32>,
    %c0_139 = arith.constant 0 : index
    %c0_140 = arith.constant 0 : index
    %c0_141 = arith.constant 0 : index
    %81 = vector.load %arg13[%c0_139, %c0_140, %c0_141] : memref<10x10x64xf32, #tpu.memory_space<vmem>>, vector<8x8x64xf32>
    %82 = arith.maximumf %1, %81 : vector<8x8x64xf32>
    %c0_142 = arith.constant 0 : index
    %c1_143 = arith.constant 1 : index
    %c0_144 = arith.constant 0 : index
    %83 = vector.load %arg13[%c0_142, %c1_143, %c0_144] : memref<10x10x64xf32, #tpu.memory_space<vmem>>, vector<8x8x64xf32>
    %84 = arith.maximumf %82, %83 : vector<8x8x64xf32>
    %c0_145 = arith.constant 0 : index
    %c2_146 = arith.constant 2 : index
    %c0_147 = arith.constant 0 : index
    %85 = vector.load %arg13[%c0_145, %c2_146, %c0_147] : memref<10x10x64xf32, #tpu.memory_space<vmem>>, vector<8x8x64xf32>
    %86 = arith.maximumf %84, %85 : vector<8x8x64xf32>
    %c1_148 = arith.constant 1 : index
    %c0_149 = arith.constant 0 : index
    %c0_150 = arith.constant 0 : index
    %87 = vector.load %arg13[%c1_148, %c0_149, %c0_150] : memref<10x10x64xf32, #tpu.memory_space<vmem>>, vector<8x8x64xf32>
    %88 = arith.maximumf %86, %87 : vector<8x8x64xf32>
    %c1_151 = arith.constant 1 : index
    %c2_152 = arith.constant 2 : index
    %c0_153 = arith.constant 0 : index
    %89 = vector.load %arg13[%c1_151, %c2_152, %c0_153] : memref<10x10x64xf32, #tpu.memory_space<vmem>>, vector<8x8x64xf32>
    %90 = arith.maximumf %88, %89 : vector<8x8x64xf32>
    %c2_154 = arith.constant 2 : index
    %c0_155 = arith.constant 0 : index
    %c0_156 = arith.constant 0 : index
    %91 = vector.load %arg13[%c2_154, %c0_155, %c0_156] : memref<10x10x64xf32, #tpu.memory_space<vmem>>, vector<8x8x64xf32>
    %92 = arith.maximumf %90, %91 : vector<8x8x64xf32>
    %c2_157 = arith.constant 2 : index
    %c1_158 = arith.constant 1 : index
    %c0_159 = arith.constant 0 : index
    %93 = vector.load %arg13[%c2_157, %c1_158, %c0_159] : memref<10x10x64xf32, #tpu.memory_space<vmem>>, vector<8x8x64xf32>
    %94 = arith.maximumf %92, %93 : vector<8x8x64xf32>
    %c2_160 = arith.constant 2 : index
    %c2_161 = arith.constant 2 : index
    %c0_162 = arith.constant 0 : index
    %95 = vector.load %arg13[%c2_160, %c2_161, %c0_162] : memref<10x10x64xf32, #tpu.memory_space<vmem>>, vector<8x8x64xf32>
    %96 = arith.maximumf %94, %95 : vector<8x8x64xf32>
    %97 = vector.shape_cast %96 : vector<8x8x64xf32> to vector<64x64xf32>
    %98 = arith.truncf %97 : vector<64x64xf32> to vector<64x64xbf16>
    %c0_163 = arith.constant 0 : index
    %c0_164 = arith.constant 0 : index
    %99 = vector.load %arg8[%c0_163, %c0_164] : memref<64x32xbf16, #tpu.memory_space<vmem>>, vector<64x32xbf16>
    %cst_165 = arith.constant dense<0.000000e+00> : vector<64x32xf32>
    %100 = tpu.matmul %98, %99, %cst_165 {dimension_numbers = #tpu.dot_dimension_numbers<[1], [0], [0], [1], [0, 0, 1, 1], [], []>} : vector<64x64xbf16>, vector<64x32xbf16>, vector<64x32xf32> -> vector<64x32xf32>
    %c0_166 = arith.constant 0 : index
    %c0_167 = arith.constant 0 : index
    %101 = vector.load %arg9[%c0_166, %c0_167] : memref<1x32xf32, #tpu.memory_space<vmem>>, vector<1x32xf32>
    %102 = vector.broadcast %101 : vector<1x32xf32> to vector<64x32xf32>
    %103 = arith.addf %100, %102 : vector<64x32xf32>
    %cst_168 = arith.constant 0.000000e+00 : f32
    %104 = vector.broadcast %cst_168 : f32 to vector<64x32xf32>
    %105 = arith.maximumf %103, %104 : vector<64x32xf32>
    %106 = tpu.concatenate %11, %35, %77, %105 in 1 : vector<64x64xf32>, vector<64x128xf32>, vector<64x32xf32>, vector<64x32xf32> -> vector<64x256xf32>
    %107 = vector.shape_cast %106 : vector<64x256xf32> to vector<8x8x256xf32>
    %108 = arith.truncf %107 : vector<8x8x256xf32> to vector<8x8x256xbf16>
    %c0_169 = arith.constant 0 : index
    %c0_170 = arith.constant 0 : index
    %c0_171 = arith.constant 0 : index
    %c0_172 = arith.constant 0 : index
    %109 = vector.load %arg10[%c0_169, %c0_170, %c0_171, %c0_172] : memref<1x8x8x256xbf16, #tpu.memory_space<vmem>>, vector<1x8x8x256xbf16>
    %110 = vector.shape_cast %109 : vector<1x8x8x256xbf16> to vector<8x8x256xbf16>
    %111 = vector.shape_cast %108 : vector<8x8x256xbf16> to vector<1x8x8x256xbf16>
    tpu.vector_store %arg10[%c0_169, %c0_170, %c0_171, %c0_172], %111 {strides = array<i32>} : memref<1x8x8x256xbf16, #tpu.memory_space<vmem>>, vector<1x8x8x256xbf16>,
    return
  }
  func.func @transform_0(%arg0: i32) -> (i32, i32, i32, i32) {
    %c0_i32 = arith.constant 0 : i32
    %c0_i32_0 = arith.constant 0 : i32
    %c0_i32_1 = arith.constant 0 : i32
    %c0_i32_2 = arith.constant 0 : i32
    return %arg0, %c0_i32, %c0_i32_0, %c0_i32_1 : i32, i32, i32, i32
  }
  func.func @transform_1(%arg0: i32) -> (i32, i32) {
    %c0_i32 = arith.constant 0 : i32
    %c0_i32_0 = arith.constant 0 : i32
    %c0_i32_1 = arith.constant 0 : i32
    return %c0_i32, %c0_i32_0 : i32, i32
  }
  func.func @transform_2(%arg0: i32) -> (i32, i32) {
    %c0_i32 = arith.constant 0 : i32
    %c0_i32_0 = arith.constant 0 : i32
    %c0_i32_1 = arith.constant 0 : i32
    return %c0_i32, %c0_i32_0 : i32, i32
  }
  func.func @transform_3(%arg0: i32) -> (i32, i32) {
    %c0_i32 = arith.constant 0 : i32
    %c0_i32_0 = arith.constant 0 : i32
    %c0_i32_1 = arith.constant 0 : i32
    return %c0_i32, %c0_i32_0 : i32, i32
  }
  func.func @transform_4(%arg0: i32) -> (i32, i32) {
    %c0_i32 = arith.constant 0 : i32
    %c0_i32_0 = arith.constant 0 : i32
    %c0_i32_1 = arith.constant 0 : i32
    return %c0_i32, %c0_i32_0 : i32, i32
  }
  func.func @transform_5(%arg0: i32) -> (i32, i32) {
    %c0_i32 = arith.constant 0 : i32
    %c0_i32_0 = arith.constant 0 : i32
    %c0_i32_1 = arith.constant 0 : i32
    return %c0_i32, %c0_i32_0 : i32, i32
  }
  func.func @transform_6(%arg0: i32) -> (i32, i32) {
    %c0_i32 = arith.constant 0 : i32
    %c0_i32_0 = arith.constant 0 : i32
    %c0_i32_1 = arith.constant 0 : i32
    return %c0_i32, %c0_i32_0 : i32, i32
  }
  func.func @transform_7(%arg0: i32) -> (i32, i32) {
    %c0_i32 = arith.constant 0 : i32
    %c0_i32_0 = arith.constant 0 : i32
    %c0_i32_1 = arith.constant 0 : i32
    return %c0_i32, %c0_i32_0 : i32, i32
  }
  func.func @transform_8(%arg0: i32) -> (i32, i32) {
    %c0_i32 = arith.constant 0 : i32
    %c0_i32_0 = arith.constant 0 : i32
    %c0_i32_1 = arith.constant 0 : i32
    return %c0_i32, %c0_i32_0 : i32, i32
  }
  func.func @transform_9(%arg0: i32) -> (i32, i32, i32, i32) {
    %c0_i32 = arith.constant 0 : i32
    %c0_i32_0 = arith.constant 0 : i32
    %c0_i32_1 = arith.constant 0 : i32
    %c0_i32_2 = arith.constant 0 : i32
    return %arg0, %c0_i32, %c0_i32_0, %c0_i32_1 : i32, i32, i32, i32
  }
}

module attributes {stable_mosaic.version = 11 : i64} {
  func.func @_inception_kernel(%arg0: i32, %arg1: memref<1x8x8x256xbf16, #tpu.memory_space<vmem>>, %arg2: memref<256x288xbf16, #tpu.memory_space<vmem>>, %arg3: memref<1x288xf32, #tpu.memory_space<vmem>>, %arg4: memref<1152x192xbf16, #tpu.memory_space<vmem>>, %arg5: memref<1x192xf32, #tpu.memory_space<vmem>>, %arg6: memref<800x96xbf16, #tpu.memory_space<vmem>>, %arg7: memref<1x96xf32, #tpu.memory_space<vmem>>, %arg8: memref<256x64xbf16, #tpu.memory_space<vmem>>, %arg9: memref<1x64xf32, #tpu.memory_space<vmem>>, %arg10: memref<480x10xf32, #tpu.memory_space<vmem>>, %arg11: memref<1x10xf32, #tpu.memory_space<vmem>>, %arg12: memref<1x1x10xf32, #tpu.memory_space<vmem>>, %arg13: memref<10x10x128xf32, #tpu.memory_space<vmem>>, %arg14: memref<12x12x32xf32, #tpu.memory_space<vmem>>, %arg15: memref<10x10x256xf32, #tpu.memory_space<vmem>>) attributes {dimension_semantics = [#tpu.dimension_semantics<parallel>], iteration_bounds = array<i64: 2>, scalar_prefetch = 0 : i64, scratch_operands = 3 : i64, tpu.core_type = #tpu.core_type<tc>, window_params = [{transform_indices = @transform_0, window_bounds = array<i64: 1, 8, 8, 256>}, {pipeline_mode = #tpu.pipeline_mode<synchronous>, transform_indices = @transform_1, window_bounds = array<i64: 256, 288>}, {pipeline_mode = #tpu.pipeline_mode<synchronous>, transform_indices = @transform_2, window_bounds = array<i64: 1, 288>}, {pipeline_mode = #tpu.pipeline_mode<synchronous>, transform_indices = @transform_3, window_bounds = array<i64: 1152, 192>}, {pipeline_mode = #tpu.pipeline_mode<synchronous>, transform_indices = @transform_4, window_bounds = array<i64: 1, 192>}, {pipeline_mode = #tpu.pipeline_mode<synchronous>, transform_indices = @transform_5, window_bounds = array<i64: 800, 96>}, {pipeline_mode = #tpu.pipeline_mode<synchronous>, transform_indices = @transform_6, window_bounds = array<i64: 1, 96>}, {pipeline_mode = #tpu.pipeline_mode<synchronous>, transform_indices = @transform_7, window_bounds = array<i64: 256, 64>}, {pipeline_mode = #tpu.pipeline_mode<synchronous>, transform_indices = @transform_8, window_bounds = array<i64: 1, 64>}, {pipeline_mode = #tpu.pipeline_mode<synchronous>, transform_indices = @transform_9, window_bounds = array<i64: 480, 10>}, {pipeline_mode = #tpu.pipeline_mode<synchronous>, transform_indices = @transform_10, window_bounds = array<i64: 1, 10>}, {transform_indices = @transform_11, window_bounds = array<i64: 1, 1, 10>}]} {
    %c0 = arith.constant 0 : index
    %c0_0 = arith.constant 0 : index
    %c0_1 = arith.constant 0 : index
    %c0_2 = arith.constant 0 : index
    %0 = vector.load %arg1[%c0, %c0_0, %c0_1, %c0_2] : memref<1x8x8x256xbf16, #tpu.memory_space<vmem>>, vector<1x8x8x256xbf16>
    %1 = vector.shape_cast %0 : vector<1x8x8x256xbf16> to vector<8x8x256xbf16>
    %2 = vector.shape_cast %1 : vector<8x8x256xbf16> to vector<64x256xbf16>
    %c0_3 = arith.constant 0 : index
    %c0_4 = arith.constant 0 : index
    %3 = vector.load %arg2[%c0_3, %c0_4] : memref<256x288xbf16, #tpu.memory_space<vmem>>, vector<256x288xbf16>
    %cst = arith.constant dense<0.000000e+00> : vector<64x288xf32>
    %4 = tpu.matmul %2, %3, %cst {dimension_numbers = #tpu.dot_dimension_numbers<[1], [0], [0], [1], [0, 0, 1, 1], [], []>} : vector<64x256xbf16>, vector<256x288xbf16>, vector<64x288xf32> -> vector<64x288xf32>
    %c0_5 = arith.constant 0 : index
    %c0_6 = arith.constant 0 : index
    %5 = vector.load %arg3[%c0_5, %c0_6] : memref<1x288xf32, #tpu.memory_space<vmem>>, vector<1x288xf32>
    %6 = vector.broadcast %5 : vector<1x288xf32> to vector<64x288xf32>
    %7 = arith.addf %4, %6 : vector<64x288xf32>
    %cst_7 = arith.constant 0.000000e+00 : f32
    %8 = vector.broadcast %cst_7 : f32 to vector<64x288xf32>
    %9 = arith.maximumf %7, %8 : vector<64x288xf32>
    %10 = vector.extract_strided_slice %9 {offsets = [0, 0], sizes = [64, 128], strides = [1, 1]} : vector<64x288xf32> to vector<64x128xf32>
    %cst_8 = arith.constant 0.000000e+00 : f32
    %11 = vector.broadcast %cst_8 : f32 to vector<10x10x128xf32>
    %c0_9 = arith.constant 0 : index
    %c0_10 = arith.constant 0 : index
    %c0_11 = arith.constant 0 : index
    %12 = vector.load %arg13[%c0_9, %c0_10, %c0_11] : memref<10x10x128xf32, #tpu.memory_space<vmem>>, vector<10x10x128xf32>
    tpu.vector_store %arg13[%c0_9, %c0_10, %c0_11], %11 {strides = array<i32>} : memref<10x10x128xf32, #tpu.memory_space<vmem>>, vector<10x10x128xf32>,
    %13 = vector.extract_strided_slice %9 {offsets = [0, 128], sizes = [64, 128], strides = [1, 1]} : vector<64x288xf32> to vector<64x128xf32>
    %14 = vector.shape_cast %13 : vector<64x128xf32> to vector<8x8x128xf32>
    %c1 = arith.constant 1 : index
    %c1_12 = arith.constant 1 : index
    %c0_13 = arith.constant 0 : index
    %15 = vector.load %arg13[%c1, %c1_12, %c0_13] : memref<10x10x128xf32, #tpu.memory_space<vmem>>, vector<8x8x128xf32>
    tpu.vector_store %arg13[%c1, %c1_12, %c0_13], %14 {strides = array<i32>} : memref<10x10x128xf32, #tpu.memory_space<vmem>>, vector<8x8x128xf32>,
    %c0_14 = arith.constant 0 : index
    %c0_15 = arith.constant 0 : index
    %c0_16 = arith.constant 0 : index
    %16 = vector.load %arg13[%c0_14, %c0_15, %c0_16] : memref<10x10x128xf32, #tpu.memory_space<vmem>>, vector<8x8x128xf32>
    %c0_17 = arith.constant 0 : index
    %c1_18 = arith.constant 1 : index
    %c0_19 = arith.constant 0 : index
    %17 = vector.load %arg13[%c0_17, %c1_18, %c0_19] : memref<10x10x128xf32, #tpu.memory_space<vmem>>, vector<8x8x128xf32>
    %c0_20 = arith.constant 0 : index
    %c2 = arith.constant 2 : index
    %c0_21 = arith.constant 0 : index
    %18 = vector.load %arg13[%c0_20, %c2, %c0_21] : memref<10x10x128xf32, #tpu.memory_space<vmem>>, vector<8x8x128xf32>
    %c1_22 = arith.constant 1 : index
    %c0_23 = arith.constant 0 : index
    %c0_24 = arith.constant 0 : index
    %19 = vector.load %arg13[%c1_22, %c0_23, %c0_24] : memref<10x10x128xf32, #tpu.memory_space<vmem>>, vector<8x8x128xf32>
    %c1_25 = arith.constant 1 : index
    %c1_26 = arith.constant 1 : index
    %c0_27 = arith.constant 0 : index
    %20 = vector.load %arg13[%c1_25, %c1_26, %c0_27] : memref<10x10x128xf32, #tpu.memory_space<vmem>>, vector<8x8x128xf32>
    %c1_28 = arith.constant 1 : index
    %c2_29 = arith.constant 2 : index
    %c0_30 = arith.constant 0 : index
    %21 = vector.load %arg13[%c1_28, %c2_29, %c0_30] : memref<10x10x128xf32, #tpu.memory_space<vmem>>, vector<8x8x128xf32>
    %c2_31 = arith.constant 2 : index
    %c0_32 = arith.constant 0 : index
    %c0_33 = arith.constant 0 : index
    %22 = vector.load %arg13[%c2_31, %c0_32, %c0_33] : memref<10x10x128xf32, #tpu.memory_space<vmem>>, vector<8x8x128xf32>
    %c2_34 = arith.constant 2 : index
    %c1_35 = arith.constant 1 : index
    %c0_36 = arith.constant 0 : index
    %23 = vector.load %arg13[%c2_34, %c1_35, %c0_36] : memref<10x10x128xf32, #tpu.memory_space<vmem>>, vector<8x8x128xf32>
    %c2_37 = arith.constant 2 : index
    %c2_38 = arith.constant 2 : index
    %c0_39 = arith.constant 0 : index
    %24 = vector.load %arg13[%c2_37, %c2_38, %c0_39] : memref<10x10x128xf32, #tpu.memory_space<vmem>>, vector<8x8x128xf32>
    %25 = tpu.concatenate %16, %17, %18, %19, %20, %21, %22, %23, %24 in 2 : vector<8x8x128xf32>, vector<8x8x128xf32>, vector<8x8x128xf32>, vector<8x8x128xf32>, vector<8x8x128xf32>, vector<8x8x128xf32>, vector<8x8x128xf32>, vector<8x8x128xf32>, vector<8x8x128xf32> -> vector<8x8x1152xf32>
    %26 = vector.shape_cast %25 : vector<8x8x1152xf32> to vector<64x1152xf32>
    %27 = arith.truncf %26 : vector<64x1152xf32> to vector<64x1152xbf16>
    %c0_40 = arith.constant 0 : index
    %c0_41 = arith.constant 0 : index
    %28 = vector.load %arg4[%c0_40, %c0_41] : memref<1152x192xbf16, #tpu.memory_space<vmem>>, vector<1152x192xbf16>
    %cst_42 = arith.constant dense<0.000000e+00> : vector<64x192xf32>
    %29 = tpu.matmul %27, %28, %cst_42 {dimension_numbers = #tpu.dot_dimension_numbers<[1], [0], [0], [1], [0, 0, 1, 1], [], []>} : vector<64x1152xbf16>, vector<1152x192xbf16>, vector<64x192xf32> -> vector<64x192xf32>
    %c0_43 = arith.constant 0 : index
    %c0_44 = arith.constant 0 : index
    %30 = vector.load %arg5[%c0_43, %c0_44] : memref<1x192xf32, #tpu.memory_space<vmem>>, vector<1x192xf32>
    %31 = vector.broadcast %30 : vector<1x192xf32> to vector<64x192xf32>
    %32 = arith.addf %29, %31 : vector<64x192xf32>
    %cst_45 = arith.constant 0.000000e+00 : f32
    %33 = vector.broadcast %cst_45 : f32 to vector<64x192xf32>
    %34 = arith.maximumf %32, %33 : vector<64x192xf32>
    %cst_46 = arith.constant 0.000000e+00 : f32
    %35 = vector.broadcast %cst_46 : f32 to vector<12x12x32xf32>
    %c0_47 = arith.constant 0 : index
    %c0_48 = arith.constant 0 : index
    %c0_49 = arith.constant 0 : index
    %36 = vector.load %arg14[%c0_47, %c0_48, %c0_49] : memref<12x12x32xf32, #tpu.memory_space<vmem>>, vector<12x12x32xf32>
    tpu.vector_store %arg14[%c0_47, %c0_48, %c0_49], %35 {strides = array<i32>} : memref<12x12x32xf32, #tpu.memory_space<vmem>>, vector<12x12x32xf32>,
    %37 = vector.extract_strided_slice %9 {offsets = [0, 256], sizes = [64, 32], strides = [1, 1]} : vector<64x288xf32> to vector<64x32xf32>
    %38 = vector.shape_cast %37 : vector<64x32xf32> to vector<8x8x32xf32>
    %c2_50 = arith.constant 2 : index
    %c2_51 = arith.constant 2 : index
    %c0_52 = arith.constant 0 : index
    %39 = vector.load %arg14[%c2_50, %c2_51, %c0_52] : memref<12x12x32xf32, #tpu.memory_space<vmem>>, vector<8x8x32xf32>
    tpu.vector_store %arg14[%c2_50, %c2_51, %c0_52], %38 {strides = array<i32>} : memref<12x12x32xf32, #tpu.memory_space<vmem>>, vector<8x8x32xf32>,
    %c0_53 = arith.constant 0 : index
    %c0_54 = arith.constant 0 : index
    %c0_55 = arith.constant 0 : index
    %40 = vector.load %arg14[%c0_53, %c0_54, %c0_55] : memref<12x12x32xf32, #tpu.memory_space<vmem>>, vector<8x8x32xf32>
    %c0_56 = arith.constant 0 : index
    %c1_57 = arith.constant 1 : index
    %c0_58 = arith.constant 0 : index
    %41 = vector.load %arg14[%c0_56, %c1_57, %c0_58] : memref<12x12x32xf32, #tpu.memory_space<vmem>>, vector<8x8x32xf32>
    %c0_59 = arith.constant 0 : index
    %c2_60 = arith.constant 2 : index
    %c0_61 = arith.constant 0 : index
    %42 = vector.load %arg14[%c0_59, %c2_60, %c0_61] : memref<12x12x32xf32, #tpu.memory_space<vmem>>, vector<8x8x32xf32>
    %c0_62 = arith.constant 0 : index
    %c3 = arith.constant 3 : index
    %c0_63 = arith.constant 0 : index
    %43 = vector.load %arg14[%c0_62, %c3, %c0_63] : memref<12x12x32xf32, #tpu.memory_space<vmem>>, vector<8x8x32xf32>
    %c0_64 = arith.constant 0 : index
    %c4 = arith.constant 4 : index
    %c0_65 = arith.constant 0 : index
    %44 = vector.load %arg14[%c0_64, %c4, %c0_65] : memref<12x12x32xf32, #tpu.memory_space<vmem>>, vector<8x8x32xf32>
    %c1_66 = arith.constant 1 : index
    %c0_67 = arith.constant 0 : index
    %c0_68 = arith.constant 0 : index
    %45 = vector.load %arg14[%c1_66, %c0_67, %c0_68] : memref<12x12x32xf32, #tpu.memory_space<vmem>>, vector<8x8x32xf32>
    %c1_69 = arith.constant 1 : index
    %c1_70 = arith.constant 1 : index
    %c0_71 = arith.constant 0 : index
    %46 = vector.load %arg14[%c1_69, %c1_70, %c0_71] : memref<12x12x32xf32, #tpu.memory_space<vmem>>, vector<8x8x32xf32>
    %c1_72 = arith.constant 1 : index
    %c2_73 = arith.constant 2 : index
    %c0_74 = arith.constant 0 : index
    %47 = vector.load %arg14[%c1_72, %c2_73, %c0_74] : memref<12x12x32xf32, #tpu.memory_space<vmem>>, vector<8x8x32xf32>
    %c1_75 = arith.constant 1 : index
    %c3_76 = arith.constant 3 : index
    %c0_77 = arith.constant 0 : index
    %48 = vector.load %arg14[%c1_75, %c3_76, %c0_77] : memref<12x12x32xf32, #tpu.memory_space<vmem>>, vector<8x8x32xf32>
    %c1_78 = arith.constant 1 : index
    %c4_79 = arith.constant 4 : index
    %c0_80 = arith.constant 0 : index
    %49 = vector.load %arg14[%c1_78, %c4_79, %c0_80] : memref<12x12x32xf32, #tpu.memory_space<vmem>>, vector<8x8x32xf32>
    %c2_81 = arith.constant 2 : index
    %c0_82 = arith.constant 0 : index
    %c0_83 = arith.constant 0 : index
    %50 = vector.load %arg14[%c2_81, %c0_82, %c0_83] : memref<12x12x32xf32, #tpu.memory_space<vmem>>, vector<8x8x32xf32>
    %c2_84 = arith.constant 2 : index
    %c1_85 = arith.constant 1 : index
    %c0_86 = arith.constant 0 : index
    %51 = vector.load %arg14[%c2_84, %c1_85, %c0_86] : memref<12x12x32xf32, #tpu.memory_space<vmem>>, vector<8x8x32xf32>
    %c2_87 = arith.constant 2 : index
    %c2_88 = arith.constant 2 : index
    %c0_89 = arith.constant 0 : index
    %52 = vector.load %arg14[%c2_87, %c2_88, %c0_89] : memref<12x12x32xf32, #tpu.memory_space<vmem>>, vector<8x8x32xf32>
    %c2_90 = arith.constant 2 : index
    %c3_91 = arith.constant 3 : index
    %c0_92 = arith.constant 0 : index
    %53 = vector.load %arg14[%c2_90, %c3_91, %c0_92] : memref<12x12x32xf32, #tpu.memory_space<vmem>>, vector<8x8x32xf32>
    %c2_93 = arith.constant 2 : index
    %c4_94 = arith.constant 4 : index
    %c0_95 = arith.constant 0 : index
    %54 = vector.load %arg14[%c2_93, %c4_94, %c0_95] : memref<12x12x32xf32, #tpu.memory_space<vmem>>, vector<8x8x32xf32>
    %c3_96 = arith.constant 3 : index
    %c0_97 = arith.constant 0 : index
    %c0_98 = arith.constant 0 : index
    %55 = vector.load %arg14[%c3_96, %c0_97, %c0_98] : memref<12x12x32xf32, #tpu.memory_space<vmem>>, vector<8x8x32xf32>
    %c3_99 = arith.constant 3 : index
    %c1_100 = arith.constant 1 : index
    %c0_101 = arith.constant 0 : index
    %56 = vector.load %arg14[%c3_99, %c1_100, %c0_101] : memref<12x12x32xf32, #tpu.memory_space<vmem>>, vector<8x8x32xf32>
    %c3_102 = arith.constant 3 : index
    %c2_103 = arith.constant 2 : index
    %c0_104 = arith.constant 0 : index
    %57 = vector.load %arg14[%c3_102, %c2_103, %c0_104] : memref<12x12x32xf32, #tpu.memory_space<vmem>>, vector<8x8x32xf32>
    %c3_105 = arith.constant 3 : index
    %c3_106 = arith.constant 3 : index
    %c0_107 = arith.constant 0 : index
    %58 = vector.load %arg14[%c3_105, %c3_106, %c0_107] : memref<12x12x32xf32, #tpu.memory_space<vmem>>, vector<8x8x32xf32>
    %c3_108 = arith.constant 3 : index
    %c4_109 = arith.constant 4 : index
    %c0_110 = arith.constant 0 : index
    %59 = vector.load %arg14[%c3_108, %c4_109, %c0_110] : memref<12x12x32xf32, #tpu.memory_space<vmem>>, vector<8x8x32xf32>
    %c4_111 = arith.constant 4 : index
    %c0_112 = arith.constant 0 : index
    %c0_113 = arith.constant 0 : index
    %60 = vector.load %arg14[%c4_111, %c0_112, %c0_113] : memref<12x12x32xf32, #tpu.memory_space<vmem>>, vector<8x8x32xf32>
    %c4_114 = arith.constant 4 : index
    %c1_115 = arith.constant 1 : index
    %c0_116 = arith.constant 0 : index
    %61 = vector.load %arg14[%c4_114, %c1_115, %c0_116] : memref<12x12x32xf32, #tpu.memory_space<vmem>>, vector<8x8x32xf32>
    %c4_117 = arith.constant 4 : index
    %c2_118 = arith.constant 2 : index
    %c0_119 = arith.constant 0 : index
    %62 = vector.load %arg14[%c4_117, %c2_118, %c0_119] : memref<12x12x32xf32, #tpu.memory_space<vmem>>, vector<8x8x32xf32>
    %c4_120 = arith.constant 4 : index
    %c3_121 = arith.constant 3 : index
    %c0_122 = arith.constant 0 : index
    %63 = vector.load %arg14[%c4_120, %c3_121, %c0_122] : memref<12x12x32xf32, #tpu.memory_space<vmem>>, vector<8x8x32xf32>
    %c4_123 = arith.constant 4 : index
    %c4_124 = arith.constant 4 : index
    %c0_125 = arith.constant 0 : index
    %64 = vector.load %arg14[%c4_123, %c4_124, %c0_125] : memref<12x12x32xf32, #tpu.memory_space<vmem>>, vector<8x8x32xf32>
    %65 = tpu.concatenate %40, %41, %42, %43, %44, %45, %46, %47, %48, %49, %50, %51, %52, %53, %54, %55 in 2 : vector<8x8x32xf32>, vector<8x8x32xf32>, vector<8x8x32xf32>, vector<8x8x32xf32>, vector<8x8x32xf32>, vector<8x8x32xf32>, vector<8x8x32xf32>, vector<8x8x32xf32>, vector<8x8x32xf32>, vector<8x8x32xf32>, vector<8x8x32xf32>, vector<8x8x32xf32>, vector<8x8x32xf32>, vector<8x8x32xf32>, vector<8x8x32xf32>, vector<8x8x32xf32> -> vector<8x8x512xf32>
    %66 = tpu.concatenate %56, %57, %58, %59, %60, %61, %62, %63, %64 in 2 : vector<8x8x32xf32>, vector<8x8x32xf32>, vector<8x8x32xf32>, vector<8x8x32xf32>, vector<8x8x32xf32>, vector<8x8x32xf32>, vector<8x8x32xf32>, vector<8x8x32xf32>, vector<8x8x32xf32> -> vector<8x8x288xf32>
    %67 = tpu.concatenate %65, %66 in 2 : vector<8x8x512xf32>, vector<8x8x288xf32> -> vector<8x8x800xf32>
    %68 = vector.shape_cast %67 : vector<8x8x800xf32> to vector<64x800xf32>
    %69 = arith.truncf %68 : vector<64x800xf32> to vector<64x800xbf16>
    %c0_126 = arith.constant 0 : index
    %c0_127 = arith.constant 0 : index
    %70 = vector.load %arg6[%c0_126, %c0_127] : memref<800x96xbf16, #tpu.memory_space<vmem>>, vector<800x96xbf16>
    %cst_128 = arith.constant dense<0.000000e+00> : vector<64x96xf32>
    %71 = tpu.matmul %69, %70, %cst_128 {dimension_numbers = #tpu.dot_dimension_numbers<[1], [0], [0], [1], [0, 0, 1, 1], [], []>} : vector<64x800xbf16>, vector<800x96xbf16>, vector<64x96xf32> -> vector<64x96xf32>
    %c0_129 = arith.constant 0 : index
    %c0_130 = arith.constant 0 : index
    %72 = vector.load %arg7[%c0_129, %c0_130] : memref<1x96xf32, #tpu.memory_space<vmem>>, vector<1x96xf32>
    %73 = vector.broadcast %72 : vector<1x96xf32> to vector<64x96xf32>
    %74 = arith.addf %71, %73 : vector<64x96xf32>
    %cst_131 = arith.constant 0.000000e+00 : f32
    %75 = vector.broadcast %cst_131 : f32 to vector<64x96xf32>
    %76 = arith.maximumf %74, %75 : vector<64x96xf32>
    %77 = arith.extf %1 : vector<8x8x256xbf16> to vector<8x8x256xf32>
    %cst_132 = arith.constant 0xFF800000 : f32
    %78 = vector.broadcast %cst_132 : f32 to vector<10x10x256xf32>
    %c0_133 = arith.constant 0 : index
    %c0_134 = arith.constant 0 : index
    %c0_135 = arith.constant 0 : index
    %79 = vector.load %arg15[%c0_133, %c0_134, %c0_135] : memref<10x10x256xf32, #tpu.memory_space<vmem>>, vector<10x10x256xf32>
    tpu.vector_store %arg15[%c0_133, %c0_134, %c0_135], %78 {strides = array<i32>} : memref<10x10x256xf32, #tpu.memory_space<vmem>>, vector<10x10x256xf32>,
    %c1_136 = arith.constant 1 : index
    %c1_137 = arith.constant 1 : index
    %c0_138 = arith.constant 0 : index
    %80 = vector.load %arg15[%c1_136, %c1_137, %c0_138] : memref<10x10x256xf32, #tpu.memory_space<vmem>>, vector<8x8x256xf32>
    tpu.vector_store %arg15[%c1_136, %c1_137, %c0_138], %77 {strides = array<i32>} : memref<10x10x256xf32, #tpu.memory_space<vmem>>, vector<8x8x256xf32>,
    %c0_139 = arith.constant 0 : index
    %c0_140 = arith.constant 0 : index
    %c0_141 = arith.constant 0 : index
    %81 = vector.load %arg15[%c0_139, %c0_140, %c0_141] : memref<10x10x256xf32, #tpu.memory_space<vmem>>, vector<8x8x256xf32>
    %82 = arith.maximumf %77, %81 : vector<8x8x256xf32>
    %c0_142 = arith.constant 0 : index
    %c1_143 = arith.constant 1 : index
    %c0_144 = arith.constant 0 : index
    %83 = vector.load %arg15[%c0_142, %c1_143, %c0_144] : memref<10x10x256xf32, #tpu.memory_space<vmem>>, vector<8x8x256xf32>
    %84 = arith.maximumf %82, %83 : vector<8x8x256xf32>
    %c0_145 = arith.constant 0 : index
    %c2_146 = arith.constant 2 : index
    %c0_147 = arith.constant 0 : index
    %85 = vector.load %arg15[%c0_145, %c2_146, %c0_147] : memref<10x10x256xf32, #tpu.memory_space<vmem>>, vector<8x8x256xf32>
    %86 = arith.maximumf %84, %85 : vector<8x8x256xf32>
    %c1_148 = arith.constant 1 : index
    %c0_149 = arith.constant 0 : index
    %c0_150 = arith.constant 0 : index
    %87 = vector.load %arg15[%c1_148, %c0_149, %c0_150] : memref<10x10x256xf32, #tpu.memory_space<vmem>>, vector<8x8x256xf32>
    %88 = arith.maximumf %86, %87 : vector<8x8x256xf32>
    %c1_151 = arith.constant 1 : index
    %c2_152 = arith.constant 2 : index
    %c0_153 = arith.constant 0 : index
    %89 = vector.load %arg15[%c1_151, %c2_152, %c0_153] : memref<10x10x256xf32, #tpu.memory_space<vmem>>, vector<8x8x256xf32>
    %90 = arith.maximumf %88, %89 : vector<8x8x256xf32>
    %c2_154 = arith.constant 2 : index
    %c0_155 = arith.constant 0 : index
    %c0_156 = arith.constant 0 : index
    %91 = vector.load %arg15[%c2_154, %c0_155, %c0_156] : memref<10x10x256xf32, #tpu.memory_space<vmem>>, vector<8x8x256xf32>
    %92 = arith.maximumf %90, %91 : vector<8x8x256xf32>
    %c2_157 = arith.constant 2 : index
    %c1_158 = arith.constant 1 : index
    %c0_159 = arith.constant 0 : index
    %93 = vector.load %arg15[%c2_157, %c1_158, %c0_159] : memref<10x10x256xf32, #tpu.memory_space<vmem>>, vector<8x8x256xf32>
    %94 = arith.maximumf %92, %93 : vector<8x8x256xf32>
    %c2_160 = arith.constant 2 : index
    %c2_161 = arith.constant 2 : index
    %c0_162 = arith.constant 0 : index
    %95 = vector.load %arg15[%c2_160, %c2_161, %c0_162] : memref<10x10x256xf32, #tpu.memory_space<vmem>>, vector<8x8x256xf32>
    %96 = arith.maximumf %94, %95 : vector<8x8x256xf32>
    %97 = vector.shape_cast %96 : vector<8x8x256xf32> to vector<64x256xf32>
    %98 = arith.truncf %97 : vector<64x256xf32> to vector<64x256xbf16>
    %c0_163 = arith.constant 0 : index
    %c0_164 = arith.constant 0 : index
    %99 = vector.load %arg8[%c0_163, %c0_164] : memref<256x64xbf16, #tpu.memory_space<vmem>>, vector<256x64xbf16>
    %cst_165 = arith.constant dense<0.000000e+00> : vector<64x64xf32>
    %100 = tpu.matmul %98, %99, %cst_165 {dimension_numbers = #tpu.dot_dimension_numbers<[1], [0], [0], [1], [0, 0, 1, 1], [], []>} : vector<64x256xbf16>, vector<256x64xbf16>, vector<64x64xf32> -> vector<64x64xf32>
    %c0_166 = arith.constant 0 : index
    %c0_167 = arith.constant 0 : index
    %101 = vector.load %arg9[%c0_166, %c0_167] : memref<1x64xf32, #tpu.memory_space<vmem>>, vector<1x64xf32>
    %102 = vector.broadcast %101 : vector<1x64xf32> to vector<64x64xf32>
    %103 = arith.addf %100, %102 : vector<64x64xf32>
    %cst_168 = arith.constant 0.000000e+00 : f32
    %104 = vector.broadcast %cst_168 : f32 to vector<64x64xf32>
    %105 = arith.maximumf %103, %104 : vector<64x64xf32>
    %cst_169 = arith.constant dense<0.000000e+00> : vector<128xf32>
    %106 = vector.multi_reduction <add>, %10, %cst_169 [0] : vector<64x128xf32> to vector<128xf32>
    %107 = vector.shape_cast %106 : vector<128xf32> to vector<1x128xf32>
    %cst_170 = arith.constant 6.400000e+01 : f32
    %108 = vector.broadcast %cst_170 : f32 to vector<1x128xf32>
    %109 = arith.divf %107, %108 : vector<1x128xf32>
    %cst_171 = arith.constant dense<0.000000e+00> : vector<192xf32>
    %110 = vector.multi_reduction <add>, %34, %cst_171 [0] : vector<64x192xf32> to vector<192xf32>
    %111 = vector.shape_cast %110 : vector<192xf32> to vector<1x192xf32>
    %cst_172 = arith.constant 6.400000e+01 : f32
    %112 = vector.broadcast %cst_172 : f32 to vector<1x192xf32>
    %113 = arith.divf %111, %112 : vector<1x192xf32>
    %cst_173 = arith.constant dense<0.000000e+00> : vector<96xf32>
    %114 = vector.multi_reduction <add>, %76, %cst_173 [0] : vector<64x96xf32> to vector<96xf32>
    %115 = vector.shape_cast %114 : vector<96xf32> to vector<1x96xf32>
    %cst_174 = arith.constant 6.400000e+01 : f32
    %116 = vector.broadcast %cst_174 : f32 to vector<1x96xf32>
    %117 = arith.divf %115, %116 : vector<1x96xf32>
    %cst_175 = arith.constant dense<0.000000e+00> : vector<64xf32>
    %118 = vector.multi_reduction <add>, %105, %cst_175 [0] : vector<64x64xf32> to vector<64xf32>
    %119 = vector.shape_cast %118 : vector<64xf32> to vector<1x64xf32>
    %cst_176 = arith.constant 6.400000e+01 : f32
    %120 = vector.broadcast %cst_176 : f32 to vector<1x64xf32>
    %121 = arith.divf %119, %120 : vector<1x64xf32>
    %122 = tpu.concatenate %109, %113, %117, %121 in 1 : vector<1x128xf32>, vector<1x192xf32>, vector<1x96xf32>, vector<1x64xf32> -> vector<1x480xf32>
    %c0_177 = arith.constant 0 : index
    %c0_178 = arith.constant 0 : index
    %123 = vector.load %arg10[%c0_177, %c0_178] : memref<480x10xf32, #tpu.memory_space<vmem>>, vector<480x10xf32>
    %cst_179 = arith.constant dense<0.000000e+00> : vector<1x10xf32>
    %124 = tpu.matmul %122, %123, %cst_179 {dimension_numbers = #tpu.dot_dimension_numbers<[1], [0], [0], [1], [0, 0, 1, 1], [], []>} : vector<1x480xf32>, vector<480x10xf32>, vector<1x10xf32> -> vector<1x10xf32>
    %c0_180 = arith.constant 0 : index
    %c0_181 = arith.constant 0 : index
    %125 = vector.load %arg11[%c0_180, %c0_181] : memref<1x10xf32, #tpu.memory_space<vmem>>, vector<1x10xf32>
    %126 = arith.addf %124, %125 : vector<1x10xf32>
    %c0_182 = arith.constant 0 : index
    %c0_183 = arith.constant 0 : index
    %c0_184 = arith.constant 0 : index
    %127 = vector.load %arg12[%c0_182, %c0_183, %c0_184] : memref<1x1x10xf32, #tpu.memory_space<vmem>>, vector<1x1x10xf32>
    %128 = vector.shape_cast %127 : vector<1x1x10xf32> to vector<1x10xf32>
    %129 = vector.shape_cast %126 : vector<1x10xf32> to vector<1x1x10xf32>
    tpu.vector_store %arg12[%c0_182, %c0_183, %c0_184], %129 {strides = array<i32>} : memref<1x1x10xf32, #tpu.memory_space<vmem>>, vector<1x1x10xf32>,
    return
  }
  func.func @transform_0(%arg0: i32) -> (i32, i32, i32, i32) {
    %c0_i32 = arith.constant 0 : i32
    %c0_i32_0 = arith.constant 0 : i32
    %c0_i32_1 = arith.constant 0 : i32
    %c0_i32_2 = arith.constant 0 : i32
    return %arg0, %c0_i32, %c0_i32_0, %c0_i32_1 : i32, i32, i32, i32
  }
  func.func @transform_1(%arg0: i32) -> (i32, i32) {
    %c0_i32 = arith.constant 0 : i32
    %c0_i32_0 = arith.constant 0 : i32
    %c0_i32_1 = arith.constant 0 : i32
    return %c0_i32, %c0_i32_0 : i32, i32
  }
  func.func @transform_2(%arg0: i32) -> (i32, i32) {
    %c0_i32 = arith.constant 0 : i32
    %c0_i32_0 = arith.constant 0 : i32
    %c0_i32_1 = arith.constant 0 : i32
    return %c0_i32, %c0_i32_0 : i32, i32
  }
  func.func @transform_3(%arg0: i32) -> (i32, i32) {
    %c0_i32 = arith.constant 0 : i32
    %c0_i32_0 = arith.constant 0 : i32
    %c0_i32_1 = arith.constant 0 : i32
    return %c0_i32, %c0_i32_0 : i32, i32
  }
  func.func @transform_4(%arg0: i32) -> (i32, i32) {
    %c0_i32 = arith.constant 0 : i32
    %c0_i32_0 = arith.constant 0 : i32
    %c0_i32_1 = arith.constant 0 : i32
    return %c0_i32, %c0_i32_0 : i32, i32
  }
  func.func @transform_5(%arg0: i32) -> (i32, i32) {
    %c0_i32 = arith.constant 0 : i32
    %c0_i32_0 = arith.constant 0 : i32
    %c0_i32_1 = arith.constant 0 : i32
    return %c0_i32, %c0_i32_0 : i32, i32
  }
  func.func @transform_6(%arg0: i32) -> (i32, i32) {
    %c0_i32 = arith.constant 0 : i32
    %c0_i32_0 = arith.constant 0 : i32
    %c0_i32_1 = arith.constant 0 : i32
    return %c0_i32, %c0_i32_0 : i32, i32
  }
  func.func @transform_7(%arg0: i32) -> (i32, i32) {
    %c0_i32 = arith.constant 0 : i32
    %c0_i32_0 = arith.constant 0 : i32
    %c0_i32_1 = arith.constant 0 : i32
    return %c0_i32, %c0_i32_0 : i32, i32
  }
  func.func @transform_8(%arg0: i32) -> (i32, i32) {
    %c0_i32 = arith.constant 0 : i32
    %c0_i32_0 = arith.constant 0 : i32
    %c0_i32_1 = arith.constant 0 : i32
    return %c0_i32, %c0_i32_0 : i32, i32
  }
  func.func @transform_9(%arg0: i32) -> (i32, i32) {
    %c0_i32 = arith.constant 0 : i32
    %c0_i32_0 = arith.constant 0 : i32
    %c0_i32_1 = arith.constant 0 : i32
    return %c0_i32, %c0_i32_0 : i32, i32
  }
  func.func @transform_10(%arg0: i32) -> (i32, i32) {
    %c0_i32 = arith.constant 0 : i32
    %c0_i32_0 = arith.constant 0 : i32
    %c0_i32_1 = arith.constant 0 : i32
    return %c0_i32, %c0_i32_0 : i32, i32
  }
  func.func @transform_11(%arg0: i32) -> (i32, i32, i32) {
    %c0_i32 = arith.constant 0 : i32
    %c0_i32_0 = arith.constant 0 : i32
    %c0_i32_1 = arith.constant 0 : i32
    return %arg0, %c0_i32, %c0_i32_0 : i32, i32, i32
  }
}

</mosaic_0001>

<bundles_post_ra>
// kernel: _lambda_.3
= control target key start
LH: loop header
LB: loop body
LE: loop exit
PB: predicated region body
PF: predicated region fallthrough
CT: control target
= control target key end

     0   :  { %s3225_s12 = smov 0   ;;  %s4634_s0 = inlined_call_operand.vmem [shape: f32[2,18,18,3], index: 0, kind: input, shape index: {}]   ;;  %s4635_s1 = inlined_call_operand.vmem [shape: bf16[27,64], index: 1, kind: input, shape index: {}]   ;;  %s4636_s2 = inlined_call_operand.vmem [shape: f32[1,64], index: 2, kind: input, shape index: {}]   ;;  %s4637_s3 = inlined_call_operand.vmem [shape: f32[2,8,8,64], index: 3, kind: output, shape index: {}]  }
   0x1 LB: > { %s2240_s13 = sadd.s32 4294967295, %s3194_s12   ;;  %p2244_p0 = scmp.ge.s32.totalorder %s3194_s12, 1  ;;  %s3194_s12 = sphi %s3225_s12, %s13_s12  }
   0x2   : > { %p137_p1 = scmp.lt.s32.totalorder %s3194_s12, 3 }
   0x4   : > { %p138_p2 = pnand %p2244_p0, %p137_p1 }
   0x6   : > { %141 = sbr.rel (%p138_p2) target bundleno = 626 (0x272), region = 32 }
   0xd   : > { %p161_p3 = scmp.lt.s32.totalorder %s2240_s13, 1  ;;  %s3196_s18 = smov 3   ;;  %vm1837_vm0 = vcmask 1044480   ;;  %vm1838_vm1 = vcmask 1045504   ;;  %vm1486_vm2 = vcmask 23552   ;;  %vm1519_vm3 = vcmask 48128  }
   0xe   : > { %s3197_s19 = smov 6   ;;  %s3198_s20 = smov 9   ;;  %vm1552_vm4 = vcmask 72704   ;;  %vm1585_vm5 = vcmask 97280   ;;  %vm1618_vm6 = vcmask 121856   ;;  %vm1651_vm7 = vcmask 146432  }
   0xf   : > { %s4715_s13 = smov (!%p161_p3, %s2240_s13), 1  ;;  %s3199_s21 = smov 12   ;;  %vm1684_vm8 = vcmask 171008   ;;  %vm1717_vm9 = vcmask 195584   ;;  %vm1788_vm10 = vcmask 220160   ;;  %vm2085_vm11 = vcmask 516096  }
  0x10   : > { %s2520_s14 = smul.u32 432, %s4715_s13  ;;  %s3200_s22 = smov 15   ;;  %vm2094_vm12 = vcmask 518146   ;;  %vm2103_vm13 = vcmask 520196   ;;  %vm2112_vm14 = vcmask 522246  }
  0x11   : > { %s3201_s23 = smov 18   ;;  %s3203_s28 = smov 21  }
  0x12   : > { %s3239_s17 = scalar_lea.vmem %s4634_s0, %s2520_s14  ;;  %s3204_s29 = smov 24  }
  0x13   : > { %v3242_v0 = vld [vmem:[%s3239_s17 + $0x31] sm:$0xff]  ;;  %v3245_v1 = vld [vmem:[%s3239_s17 + $0x39] sm:$0xff]  ;;  %v204_v2 = vld [vmem:[%s3239_s17 + $0x1] sm:$0xff]  ;;  %s2461_s5 = sshll.u32 %s4715_s13, 6 }
  0x14   : > { %v3250_v3 = vpack.i.bf16 %v3245_v1, %v3242_v0  ;;  %v205_v4 = vld [vmem:[%s3239_s17 + $0x9] sm:$0xff]  ;;  %v211_v6 = vld [vmem:[%s3239_s17 + $0x51] sm:$0xff]  ;;  %v206_v8 = vld [vmem:[%s3239_s17 + $0x19] sm:$0xff]  ;;  %s4477_s8 = scalar_lea.vmem %s4637_s3, %s2461_s5 }
  0x15   : > { %v210_v5 = vld [vmem:[%s3239_s17 + $0x49] sm:$0xff]  ;;  %v2538_v7 = vpack.i.bf16 %v205_v4, %v204_v2  ;;  %v207_v9 = vld [vmem:[%s3239_s17 + $0x21] sm:$0xff]  ;;  %v214_v12 = vld [vmem:[%s3239_s17 + $0x79] sm:$0xff] }
  0x16   : > { %2549 = vrot.lane.b32.xlu1 %v3250_v3, %s3196_s18  ;;  %v3259_v10 = vpack.i.bf16 %v211_v6, %v210_v5  ;;  %v3262_v11 = vpack.i.bf16 %v207_v9, %v206_v8  ;;  %v215_v13 = vld [vmem:[%s3239_s17 + $0x81] sm:$0xff]  ;;  %v213_v15 = vld [vmem:[%s3239_s17 + $0x69] sm:$0xff]  ;;  %v3269_v16 = vld [vmem:[%s3239_s17 + $0xd9] sm:$0xff] }
  0x17   : > { %2539 = vrot.lane.b32.xlu0 %v2538_v7, %s3196_s18  ;;  %v212_v14 = vld [vmem:[%s3239_s17 + $0x61] sm:$0xff]  ;;  %v2783_v18 = vpack.i.bf16 %v3269_v16, %v3242_v0  ;;  %v3280_v20 = vpack.i.bf16 %v215_v13, %v214_v12  ;;  %v218_v22 = vld [vmem:[%s3239_s17 + $0xa9] sm:$0xff]  ;;  %v219_v23 = vld [vmem:[%s3239_s17 + $0xb1] sm:$0xff] }
  0x18   : > { %v3272_v17 = vld [vmem:[%s3239_s17 + $0xe1] sm:$0xff]  ;;  %v3284_v21 = vpack.i.bf16 %v213_v15, %v212_v14  ;;  %v216_v24 = vld [vmem:[%s3239_s17 + $0x91] sm:$0xff]  ;;  %v217_v25 = vld [vmem:[%s3239_s17 + $0x99] sm:$0xff]  ;;  %v2573_v26 = vpack.i.bf16 %v219_v23, %v218_v22 }
  0x19   : > { %v2788_v19 = vpack.i.bf16 %v3245_v1, %v3272_v17  ;;  %v2568_v27 = vpack.i.bf16 %v217_v25, %v216_v24  ;;  %v220_v28 = vld [vmem:[%s3239_s17 + $0xc1] sm:$0xff]  ;;  %v221_v29 = vld [vmem:[%s3239_s17 + $0xc9] sm:$0xff]  ;;  %v2583_v30 = vpack.i.bf16 %v3272_v17, %v3269_v16  ;;  %v227_v33 = vld [vmem:[%s3239_s17 + $0x111] sm:$0xff] }
  0x1a   : > { %2554 = vrot.lane.b32.xlu1 %v3259_v10, %s3196_s18  ;;  %v2578_v31 = vpack.i.bf16 %v221_v29, %v220_v28  ;;  %v226_v32 = vld [vmem:[%s3239_s17 + $0x109] sm:$0xff]  ;;  %v224_v34 = vld [vmem:[%s3239_s17 + $0xf1] sm:$0xff]  ;;  %v225_v35 = vld [vmem:[%s3239_s17 + $0xf9] sm:$0xff] }
  0x1b   : > { %2544 = vrot.lane.b32.xlu0 %v3262_v11, %s3196_s18  ;;  %v3305_v36 = vpack.i.bf16 %v227_v33, %v226_v32  ;;  %v3308_v37 = vpack.i.bf16 %v225_v35, %v224_v34  ;;  %v230_v38 = vld [vmem:[%s3239_s17 + $0x139] sm:$0xff]  ;;  %v231_v39 = vld [vmem:[%s3239_s17 + $0x141] sm:$0xff]  ;;  %v229_v41 = vld [vmem:[%s3239_s17 + $0x129] sm:$0xff] }
  0x1c   : > { %v228_v40 = vld [vmem:[%s3239_s17 + $0x121] sm:$0xff]  ;;  %v3316_v42 = vpack.i.bf16 %v231_v39, %v230_v38  ;;  %v234_v44 = vld [vmem:[%s3239_s17 + $0x169] sm:$0xff]  ;;  %v235_v45 = vld [vmem:[%s3239_s17 + $0x171] sm:$0xff] }
  0x1d   : > { %v3320_v43 = vpack.i.bf16 %v229_v41, %v228_v40  ;;  %v232_v46 = vld [vmem:[%s3239_s17 + $0x151] sm:$0xff]  ;;  %v233_v47 = vld [vmem:[%s3239_s17 + $0x159] sm:$0xff]  ;;  %v2613_v48 = vpack.i.bf16 %v235_v45, %v234_v44  ;;  %v239_v51 = vld [vmem:[%s3239_s17 + $0x22] sm:$0xff] }
  0x1e   : > { %2564 = vrot.lane.b32.xlu1 %v3280_v20, %s3196_s18  ;;  %v3330_v49 = vpack.i.bf16 %v233_v47, %v232_v46  ;;  %v238_v50 = vld [vmem:[%s3239_s17 + $0x1a] sm:$0xff]  ;;  %v236_v52 = vld [vmem:[%s3239_s17 + $0x2] sm:$0xff]  ;;  %v237_v53 = vld [vmem:[%s3239_s17 + $0xa] sm:$0xff] }
  0x1f   : > { %2559 = vrot.lane.b32.xlu0 %v3284_v21, %s3196_s18  ;;  %v3337_v54 = vpack.i.bf16 %v239_v51, %v238_v50  ;;  %v2618_v55 = vpack.i.bf16 %v237_v53, %v236_v52  ;;  %v242_v56 = vld [vmem:[%s3239_s17 + $0x4a] sm:$0xff]  ;;  %v243_v57 = vld [vmem:[%s3239_s17 + $0x52] sm:$0xff]  ;;  %v241_v59 = vld [vmem:[%s3239_s17 + $0x3a] sm:$0xff] }
  0x20   : > { %v240_v58 = vld [vmem:[%s3239_s17 + $0x32] sm:$0xff]  ;;  %v3347_v60 = vpack.i.bf16 %v243_v57, %v242_v56  ;;  %v246_v62 = vld [vmem:[%s3239_s17 + $0x7a] sm:$0xff]  ;;  %v247_v63 = vld [vmem:[%s3239_s17 + $0x82] sm:$0xff] }
  0x21   : > { %v3350_v61 = vpack.i.bf16 %v241_v59, %v240_v58  ;;  %v244_v2 = vld [vmem:[%s3239_s17 + $0x62] sm:$0xff]  ;;  %v245_v4 = vld [vmem:[%s3239_s17 + $0x6a] sm:$0xff]  ;;  %v3358_v5 = vpack.i.bf16 %v247_v63, %v246_v62  ;;  %v251_v8 = vld [vmem:[%s3239_s17 + $0xb2] sm:$0xff] }
  0x22   : > { %2574 = vrot.lane.b32.xlu1 %v2573_v26, %s3196_s18  ;;  %v3362_v6 = vpack.i.bf16 %v245_v4, %v244_v2  ;;  %v250_v7 = vld [vmem:[%s3239_s17 + $0xaa] sm:$0xff]  ;;  %v248_v9 = vld [vmem:[%s3239_s17 + $0x92] sm:$0xff]  ;;  %v249_v12 = vld [vmem:[%s3239_s17 + $0x9a] sm:$0xff] }
  0x23   : > { %2569 = vrot.lane.b32.xlu0 %v2568_v27, %s3196_s18  ;;  %v2653_v13 = vpack.i.bf16 %v251_v8, %v250_v7  ;;  %v2648_v14 = vpack.i.bf16 %v249_v12, %v248_v9  ;;  %v254_v15 = vld [vmem:[%s3239_s17 + $0xda] sm:$0xff]  ;;  %v255_v22 = vld [vmem:[%s3239_s17 + $0xe2] sm:$0xff]  ;;  %v253_v24 = vld [vmem:[%s3239_s17 + $0xca] sm:$0xff] }
  0x24   : > { %v252_v23 = vld [vmem:[%s3239_s17 + $0xc2] sm:$0xff]  ;;  %v3377_v25 = vpack.i.bf16 %v255_v22, %v254_v15  ;;  %v258_v27 = vld [vmem:[%s3239_s17 + $0x10a] sm:$0xff]  ;;  %v259_v28 = vld [vmem:[%s3239_s17 + $0x112] sm:$0xff] }
  0x25   : > { %v2658_v26 = vpack.i.bf16 %v253_v24, %v252_v23  ;;  %v256_v29 = vld [vmem:[%s3239_s17 + $0xf2] sm:$0xff]  ;;  %v262_v33 = vld [vmem:[%s3239_s17 + $0x13a] sm:$0xff]  ;;  %v263_v34 = vld [vmem:[%s3239_s17 + $0x142] sm:$0xff] }
  0x26   : > { %2584 = vrot.lane.b32.xlu1 %v2583_v30, %s3196_s18  ;;  %v257_v30 = vld [vmem:[%s3239_s17 + $0xfa] sm:$0xff]  ;;  %v260_v35 = vld [vmem:[%s3239_s17 + $0x122] sm:$0xff]  ;;  %v261_v38 = vld [vmem:[%s3239_s17 + $0x12a] sm:$0xff]  ;;  %v3397_v39 = vpack.i.bf16 %v263_v34, %v262_v33 }
  0x27   : > { %2579 = vrot.lane.b32.xlu0 %v2578_v31, %s3196_s18  ;;  %v3386_v31 = vpack.i.bf16 %v259_v28, %v258_v27  ;;  %v3389_v32 = vpack.i.bf16 %v257_v30, %v256_v29  ;;  %v3401_v40 = vpack.i.bf16 %v261_v38, %v260_v35  ;;  %v266_v41 = vld [vmem:[%s3239_s17 + $0x16a] sm:$0xff]  ;;  %v267_v44 = vld [vmem:[%s3239_s17 + $0x172] sm:$0xff]  ;;  %v265_v46 = vld [vmem:[%s3239_s17 + $0x15a] sm:$0xff] }
  0x28   : > { %v264_v45 = vld [vmem:[%s3239_s17 + $0x152] sm:$0xff]  ;;  %v2693_v47 = vpack.i.bf16 %v267_v44, %v266_v41  ;;  %v3419_v53 = vld [vmem:[%s3239_s17 + $0x20] sm:$0xff]  ;;  %v3432_v58 = vld [vmem:[%s3239_s17 + $0x68] sm:$0xff] }
  0x29   : > { %v2250_v50 = vld [vmem:[%s3239_s17 + $0x30] sm:$0xff]  ;;  %v2251_v51 = vld [vmem:[%s3239_s17 + $0x38] sm:$0xff]  ;;  %v3429_v57 = vld [vmem:[%s3239_s17 + $0x60] sm:$0xff] }
  0x2a   : > { %2594 = vrot.lane.b32.xlu1 %v3305_v36, %s3196_s18  ;;  %v3416_v52 = vld [vmem:[%s3239_s17 + $0x18] sm:$0xff]  ;;  %v2252_v59 = vld [vmem:[%s3239_s17 + $0x48] sm:$0xff]  ;;  %v2253_v62 = vld [vmem:[%s3239_s17 + $0x50] sm:$0xff]  ;;  %v3440_v63 = vpack.i.bf16 %v3432_v58, %v3429_v57 }
  0x2b   : > { %2589 = vrot.lane.b32.xlu0 %v3308_v37, %s3196_s18  ;;  %v2698_v56 = vpack.i.bf16 %v3419_v53, %v3416_v52  ;;  %v3443_v2 = vpack.i.bf16 %v2253_v62, %v2252_v59  ;;  %v3446_v4 = vld [vmem:[%s3239_s17 + $0x90] sm:$0xff]  ;;  %v3449_v7 = vld [vmem:[%s3239_s17 + $0x98] sm:$0xff]  ;;  %v3455_v9 = vld [vmem:[%s3239_s17 + $0x80] sm:$0xff] }
  0x2c   : > { %v3452_v8 = vld [vmem:[%s3239_s17 + $0x78] sm:$0xff]  ;;  %v3461_v12 = vpack.i.bf16 %v3449_v7, %v3446_v4  ;;  %v3473_v15 = vld [vmem:[%s3239_s17 + $0xc8] sm:$0xff]  ;;  %v3479_v23 = vld [vmem:[%s3239_s17 + $0xb0] sm:$0xff] }
  0x2d   : > { %4651 = vst [vmem:[#allocation3_spill] sm:$0xff] %v3473_v15  ;;  %v3476_v22 = vld [vmem:[%s3239_s17 + $0xa8] sm:$0xff]  ;;  %v2266_v27 = vld [vmem:[%s3239_s17 + $0xf0] sm:$0xff]  ;;  %v2267_v28 = vld [vmem:[%s3239_s17 + $0xf8] sm:$0xff] }
  0x2e   : > { %2604 = vrot.lane.b32.xlu1 %v3316_v42, %s3196_s18  ;;  %v3494_v29 = vld [vmem:[%s3239_s17 + $0xd8] sm:$0xff]  ;;  %v3497_v30 = vld [vmem:[%s3239_s17 + $0xe0] sm:$0xff]  ;;  %v2743_v33 = vpack.i.bf16 %v2267_v28, %v2266_v27  ;;  %v3508_v38 = vld [vmem:[%s3239_s17 + $0x128] sm:$0xff] }
  0x2f   : > { %2599 = vrot.lane.b32.xlu0 %v3320_v43, %s3196_s18  ;;  %v2738_v34 = vpack.i.bf16 %v3497_v30, %v3494_v29  ;;  %v3505_v35 = vld [vmem:[%s3239_s17 + $0x120] sm:$0xff]  ;;  %v2268_v41 = vld [vmem:[%s3239_s17 + $0x108] sm:$0xff]  ;;  %v2269_v44 = vld [vmem:[%s3239_s17 + $0x110] sm:$0xff] }
  0x30   : > { %v2279_v27 = vld [vmem:[%s3239_s17 + $0x188] sm:$0xff] }
  0x31   : > { %v3544_v28 = vld [vmem:[%s3239_s17 + $0x168] sm:$0xff] }
  0x32   : > { %2614 = vrot.lane.b32.xlu1 %v2613_v48, %s3196_s18  ;;  %v3411_v48 = vpack.i.bf16 %v265_v46, %v264_v45  ;;  %v3515_v45 = vpack.i.bf16 %v3508_v38, %v3505_v35  ;;  %v2748_v46 = vpack.i.bf16 %v2269_v44, %v2268_v41  ;;  %v3179_v16 = vld [vmem:[%s4635_s1 + $0x8] sm:$0x3f]  }
  0x33   : > { %2609 = vrot.lane.b32.xlu0 %v3330_v49, %s3196_s18 }
  0x36   : > { %2624 = vrot.lane.b32.xlu1 %v3337_v54, %s3197_s19 }
  0x37   : > { %2619 = vrot.lane.b32.xlu0 %v2618_v55, %s3197_s19  ;;  %v3422_v55 = vpack.i.bf16 %v2251_v51, %v2250_v50  ;;  %v3522_v50 = vld [vmem:[%s3239_s17 + $0x158] sm:$0xff] }
  0x38   : > { %v3525_v51 = vld [vmem:[%s3239_s17 + $0x138] sm:$0xff] }
  0x3a   : > { %2634 = vrot.lane.b32.xlu1 %v3347_v60, %s3197_s19 }
  0x3b   : > { %2629 = vrot.lane.b32.xlu0 %v3350_v61, %s3197_s19 }
  0x3e   : > { %2644 = vrot.lane.b32.xlu1 %v3358_v5, %s3197_s19 }
  0x3f   : > { %2639 = vrot.lane.b32.xlu0 %v3362_v6, %s3197_s19 }
  0x42   : > { %2654 = vrot.lane.b32.xlu1 %v2653_v13, %s3197_s19  ;;  %v3467_v13 = vpack.i.bf16 %v3455_v9, %v3452_v8 }
  0x43   : > { %2649 = vrot.lane.b32.xlu0 %v2648_v14, %s3197_s19  ;;  %v3470_v14 = vld [vmem:[%s3239_s17 + $0xc0] sm:$0xff] }
  0x44   : > { %4650 = vst [vmem:[#allocation2_spill] sm:$0xff] %v3470_v14  ;;  %v2733_v24 = vpack.i.bf16 %v3473_v15, %v3470_v14 }
  0x46   : > { %2664 = vrot.lane.b32.xlu1 %v3377_v25, %s3197_s19 }
  0x47   : > { %2659 = vrot.lane.b32.xlu0 %v2658_v26, %s3197_s19  ;;  %v3489_v26 = vpack.i.bf16 %v3479_v23, %v3476_v22 }
  0x4a   : > { %2674 = vrot.lane.b32.xlu1 %v3386_v31, %s3197_s19 }
  0x4b   : > { %2669 = vrot.lane.b32.xlu0 %v3389_v32, %s3197_s19 }
  0x4e   : > { %2684 = vrot.lane.b32.xlu1 %v3397_v39, %s3197_s19 }
  0x4f   : > { %2679 = vrot.lane.b32.xlu0 %v3401_v40, %s3197_s19 }
  0x52   : > { %2694 = vrot.lane.b32.xlu1 %v2693_v47, %s3197_s19  ;;  %v3519_v47 = vld [vmem:[%s3239_s17 + $0x150] sm:$0xff] }
  0x53   : > { %2689 = vrot.lane.b32.xlu0 %v3411_v48, %s3197_s19  ;;  %v3534_v59 = vpack.i.bf16 %v3522_v50, %v3519_v47 }
  0x56   : > { %2704 = vrot.lane.b32.xlu1 %v3422_v55, %s3198_s20 }
  0x57   : > { %2699 = vrot.lane.b32.xlu0 %v2698_v56, %s3198_s20  ;;  %v3528_v56 = vld [vmem:[%s3239_s17 + $0x140] sm:$0xff] }
  0x58   : > { %v3539_v62 = vpack.i.bf16 %v3528_v56, %v3525_v51 }
  0x5a   : > { %2714 = vrot.lane.b32.xlu1 %v3440_v63, %s3198_s20 }
  0x5b   : > { %2709 = vrot.lane.b32.xlu0 %v3443_v2, %s3198_s20 }
  0x5e   : > { %2724 = vrot.lane.b32.xlu1 %v3461_v12, %s3198_s20 }
  0x5f   : > { %2719 = vrot.lane.b32.xlu0 %v3467_v13, %s3198_s20 }
  0x62   : > { %2734 = vrot.lane.b32.xlu1 %v2733_v24, %s3198_s20  ;;  %v2278_v24 = vld [vmem:[%s3239_s17 + $0x180] sm:$0xff] }
  0x63   : > { %2729 = vrot.lane.b32.xlu0 %v3489_v26, %s3198_s20  ;;  %v2773_v41 = vpack.i.bf16 %v2279_v27, %v2278_v24 }
  0x66   : > { %2744 = vrot.lane.b32.xlu1 %v2743_v33, %s3198_s20 }
  0x67   : > { %2739 = vrot.lane.b32.xlu0 %v2738_v34, %s3198_s20  ;;  %v3547_v34 = vld [vmem:[%s3239_s17 + $0x170] sm:$0xff] }
  0x68   : > { %v3555_v44 = vpack.i.bf16 %v3547_v34, %v3544_v28 }
  0x6a   : > { %2754 = vrot.lane.b32.xlu1 %v3515_v45, %s3198_s20 }
  0x6b   : > { %2749 = vrot.lane.b32.xlu0 %v2748_v46, %s3198_s20 }
  0x6e   : > { %2764 = vrot.lane.b32.xlu1 %v3534_v59, %s3198_s20 }
  0x6f   : > { %2759 = vrot.lane.b32.xlu0 %v3539_v62, %s3198_s20 }
  0x72   : > { %2774 = vrot.lane.b32.xlu1 %v2773_v41, %s3198_s20 }
  0x73   : > { %2769 = vrot.lane.b32.xlu0 %v3555_v44, %s3198_s20 }
  0x76   : > { %2784 = vrot.lane.b32.xlu1 %v2783_v18, %s3199_s21 }
  0x77   : > { %2779 = vrot.lane.b32.xlu0 %v3262_v11, %s3199_s21  ;;  %v3178_v11 = vld [vmem:[%s4635_s1] sm:$0xff]  }
  0x78   : > { %2480 = vmatprep.subr.bf16.mxu0 %v3178_v11  ;;  %2516 = vmatprep.subr.bf16.mxu1 %v3178_v11 }
  0x79   : > { %2481 = vmatpush3.bf16.msra.mxu0 %v3178_v11  ;;  %2518 = vmatpush3.bf16.msra.mxu1 %v3178_v11 }
  0x7a   : > { %2794 = vrot.lane.b32.xlu1 %v3308_v37, %s3199_s21 }
  0x7b   : > { %2789 = vrot.lane.b32.xlu0 %v2788_v19, %s3199_s21  ;;  %v3202_v19 = vmov 65535  }
  0x7e   : > { %2804 = vrot.lane.b32.xlu1 %v3377_v25, %s3200_s22 }
  0x7f   : > { %2799 = vrot.lane.b32.xlu0 %v3337_v54, %s3200_s22  ;;  %v1839_v54 = vsel %vm1837_vm0, 4294967295, %v3202_v19 }
  0x80   : > { %v1840_v25 = vsel %vm1838_vm1, %v1839_v54, 0 }
  0x82   : > { %2814 = vrot.lane.b32.xlu1 %v3389_v32, %s3200_s22 }
  0x83   : > { %2809 = vrot.lane.b32.xlu0 %v3350_v61, %s3200_s22 }
  0x86   : > { %2824 = vrot.lane.b32.xlu1 %v2743_v33, %s3201_s23 }
  0x87   : > { %2819 = vrot.lane.b32.xlu0 %v3422_v55, %s3201_s23  ;;  %v1842_v55 = vand.u32 %v3179_v16, %v1840_v25 }
  0x88   : > { %v3583_v0 = vpop.permute.xlu1 %2549 }
  0x89   : > { %4652 = vst [vmem:[#allocation4_spill] sm:$0xff] %v3583_v0  ;;  %v3585_v1 = vpop.permute.xlu0 %2539  ;;  %2482 = vmatprep.subr.bf16.mxu0 %v1842_v55  ;;  %2517 = vmatprep.subr.bf16.mxu1 %v1842_v55 }
  0x8a   : > { %2834 = vrot.lane.b32.xlu1 %v2748_v46, %s3201_s23  ;;  %2483 = vmatpush3.bf16.msra.mxu0 %v1842_v55 }
  0x8b   : > { %2829 = vrot.lane.b32.xlu0 %v3443_v2, %s3201_s23  ;;  %2519 = vmatpush3.bf16.msra.mxu1 %v1842_v55 }
  0x8c   : > { %v3596_v17 = vpop.permute.xlu1 %2554 }
  0x8d   : > { %4653 = vst [vmem:[#allocation5_spill] sm:$0xff] %v3596_v17  ;;  %v3598_v18 = vpop.permute.xlu0 %2544 }
  0x8e   : > { %2844 = vrot.lane.b32.xlu1 %v3308_v37, %s3203_s28 }
  0x8f   : > { %2839 = vrot.lane.b32.xlu0 %v3250_v3, %s3203_s28 }
  0x90   : > { %v2565_v2 = vpop.permute.xlu1 %2564 }
  0x91   : > { %v2560_v33 = vpop.permute.xlu0 %2559  ;;  %v2567_v19 = vunpack.i.h.bf16 %v2565_v2  ;;  %v2566_v54 = vunpack.i.l.bf16 %v2565_v2 }
  0x92   : > { %2854 = vrot.lane.b32.xlu1 %v3305_v36, %s3203_s28  ;;  %v2562_v55 = vunpack.i.h.bf16 %v2560_v33 }
  0x93   : > { %2849 = vrot.lane.b32.xlu0 %v3259_v10, %s3203_s28 }
  0x94   : > { %v2575_v46 = vpop.permute.xlu1 %2574 }
  0x95   : > { %v3608_v24 = vpop.permute.xlu0 %2569  ;;  %v2577_v0 = vunpack.i.h.bf16 %v2575_v46  ;;  %v2576_v15 = vunpack.i.l.bf16 %v2575_v46 }
  0x96   : > { %2864 = vrot.lane.b32.xlu1 %v3389_v32, %s3204_s29 }
  0x97   : > { %2859 = vrot.lane.b32.xlu0 %v3350_v61, %s3204_s29 }
  0x98   : > { %v3614_v3 = vpop.permute.xlu1 %2584 }
  0x99   : > { %v3616_v37 = vpop.permute.xlu0 %2579 }
  0x9a   : > { %2874 = vrot.lane.b32.xlu1 %v3386_v31, %s3204_s29 }
  0x9b   : > { %2869 = vrot.lane.b32.xlu0 %v3347_v60, %s3204_s29 }
  0x9c   : > { %v3622_v27 = vpop.permute.xlu1 %2594 }
  0x9d   : > { %4654 = vst [vmem:[#allocation6_spill] sm:$0xff] %v3622_v27  ;;  %v3624_v41 = vpop.permute.xlu0 %2589  ;;  %v1498_v27 = vsel %vm1486_vm2, %v3455_v9, %v2567_v19  ;;  %v2571_v9 = vunpack.i.l.bf16 %v3608_v24 }
  0x9e   : > { %4655 = vst [vmem:[#allocation7_spill] sm:$0xff] %v3624_v41  ;;  %2884 = vrot.lane.b32.xlu1 %v3305_v36, %s3199_s21  ;;  %v2561_v41 = vunpack.i.l.bf16 %v2560_v33 }
  0x9f   : > { %2879 = vrot.lane.b32.xlu0 %v3259_v10, %s3199_s21 }
  0xa0   : > { %v3630_v61 = vpop.permute.xlu1 %2604  ;;  %v1495_v33 = vsel %vm1486_vm2, %v3429_v57, %v2561_v41 }
  0xa1   : > { %v3632_v32 = vpop.permute.xlu0 %2599 }
  0xa2   : > { %2894 = vrot.lane.b32.xlu1 %v3320_v43, %s3199_s21 }
  0xa3   : > { %2889 = vrot.lane.b32.xlu0 %v3284_v21, %s3199_s21 }
  0xa4   : > { %v3638_v11 = vpop.permute.xlu1 %2614 }
  0xa5   : > { %v3640_v16 = vpop.permute.xlu0 %2609 }
  0xa6   : > { %2904 = vrot.lane.b32.xlu1 %v3386_v31, %s3200_s22 }
  0xa7   : > { %2899 = vrot.lane.b32.xlu0 %v3347_v60, %s3200_s22  ;;  %v1497_v60 = vsel %vm1486_vm2, %v3452_v8, %v2566_v54  ;;  %v2572_v8 = vunpack.i.h.bf16 %v3608_v24  ;;  %v1501_v24 = vsel %vm1486_vm2, %v3476_v22, %v2576_v15 }
  0xa8   : > { %v3646_v10 = vpop.permute.xlu1 %2624 }
  0xa9   : > { %v3648_v36 = vpop.permute.xlu0 %2619 }
  0xaa   : > { %2914 = vrot.lane.b32.xlu1 %v3401_v40, %s3200_s22 }
  0xab   : > { %2909 = vrot.lane.b32.xlu0 %v3362_v6, %s3200_s22 }
  0xac   : > { %v3654_v25 = vpop.permute.xlu1 %2634 }
  0xad   : > { %4656 = vst [vmem:[#allocation8_spill] sm:$0xff] %v3654_v25  ;;  %v3656_v31 = vpop.permute.xlu0 %2629 }
  0xae   : > { %4657 = vst [vmem:[#allocation9_spill] sm:$0xff] %v3656_v31  ;;  %2924 = vrot.lane.b32.xlu1 %v3515_v45, %s3201_s23  ;;  %v1496_v31 = vsel %vm1486_vm2, %v3432_v58, %v2562_v55 }
  0xaf   : > { %2919 = vrot.lane.b32.xlu0 %v3440_v63, %s3201_s23 }
  0xb0   : > { %v2645_v2 = vpop.permute.xlu1 %2644 }
  0xb1   : > { %v2647_v25 = vunpack.i.h.bf16 %v2645_v2  ;;  %v2646_v45 = vunpack.i.l.bf16 %v2645_v2  ;;  %v2640_v17 = vpop.permute.xlu0 %2639  ;;  %v2601_v2 = vunpack.i.l.bf16 %v3632_v32 }
  0xb2   : > { %v2642_v63 = vunpack.i.h.bf16 %v2640_v17  ;;  %v2641_v14 = vunpack.i.l.bf16 %v2640_v17  ;;  %2934 = vrot.lane.b32.xlu1 %v3539_v62, %s3201_s23 }
  0xb3   : > { %v3675_v19 = vsel %vm1519_vm3, %v1497_v60, %v2646_v45  ;;  %v3678_v57 = vsel %vm1519_vm3, %v1498_v27, %v2647_v25  ;;  %2929 = vrot.lane.b32.xlu0 %v3467_v13, %s3201_s23  ;;  %v1502_v27 = vsel %vm1486_vm2, %v3479_v23, %v2577_v0  ;;  %v1499_v13 = vsel %vm1486_vm2, %v3446_v4, %v2571_v9  ;;  %v2288_v45 = vld [vmem:[%s3239_s17 + $0x79] sm:$0xff] }
  0xb4   : > { %v3683_v58 = vsel %vm1519_vm3, %v1495_v33, %v2641_v14  ;;  %v3686_v17 = vsel %vm1519_vm3, %v1496_v31, %v2642_v63  ;;  %v2655_v62 = vpop.permute.xlu1 %2654  ;;  %v1500_v14 = vsel %vm1486_vm2, %v3449_v7, %v2572_v8  ;;  %v2607_v23 = vunpack.i.h.bf16 %v3630_v61  ;;  %v2289_v63 = vld [vmem:[%s3239_s17 + $0x81] sm:$0xff] }
  0xb5   : > { %v2657_v46 = vunpack.i.h.bf16 %v2655_v62  ;;  %v2656_v41 = vunpack.i.l.bf16 %v2655_v62  ;;  %v2650_v54 = vpop.permute.xlu0 %2649  ;;  %v2602_v60 = vunpack.i.h.bf16 %v3632_v32  ;;  %v2978_v32 = vpack.i.bf16 %v2289_v63, %v2288_v45 }
  0xb6   : > { %v2652_v25 = vunpack.i.h.bf16 %v2650_v54  ;;  %v2651_v55 = vunpack.i.l.bf16 %v2650_v54  ;;  %2944 = vrot.lane.b32.xlu1 %v3320_v43, %s3203_s28  ;;  %v1511_v9 = vsel %vm1486_vm2, %v3505_v35, %v2601_v2  ;;  %v2616_v54 = vunpack.i.l.bf16 %v3638_v11 }
  0xb7   : > { %v3699_v31 = vsel %vm1519_vm3, %v1501_v24, %v2656_v41  ;;  %v3702_v15 = vsel %vm1519_vm3, %v1502_v27, %v2657_v46  ;;  %2939 = vrot.lane.b32.xlu0 %v3284_v21, %s3203_s28  ;;  %v2606_v21 = vunpack.i.l.bf16 %v3630_v61  ;;  %v1514_v61 = vsel %vm1486_vm2, %v3528_v56, %v2607_v23  ;;  %v2290_v56 = vld [vmem:[%s3239_s17 + $0x91] sm:$0xff]  ;;  %v2291_v27 = vld [vmem:[%s3239_s17 + $0x99] sm:$0xff] }
  0xb8   : > { %v3707_v22 = vsel %vm1519_vm3, %v1499_v13, %v2651_v55  ;;  %v3710_v43 = vsel %vm1519_vm3, %v1500_v14, %v2652_v25  ;;  %v3712_v4 = vpop.permute.xlu1 %2664  ;;  %v1512_v62 = vsel %vm1486_vm2, %v3508_v38, %v2602_v60  ;;  %v2612_v25 = vunpack.i.h.bf16 %v3640_v16 }
  0xb9   : > { %v3714_v7 = vpop.permute.xlu0 %2659  ;;  %v2611_v35 = vunpack.i.l.bf16 %v3640_v16  ;;  %v3764_v60 = vpack.i.bf16 %v2291_v27, %v2290_v56  ;;  %v1517_v2 = vsel %vm1486_vm2, %v3544_v28, %v2616_v54 }
  0xba   : > { %2954 = vrot.lane.b32.xlu1 %v3316_v42, %s3203_s28 }
  0xbb   : > { %2949 = vrot.lane.b32.xlu0 %v3280_v20, %s3203_s28  ;;  %v1513_v20 = vsel %vm1486_vm2, %v3525_v51, %v2606_v21 }
  0xbc   : > { %v3722_v0 = vpop.permute.xlu1 %2674 }
  0xbd   : > { %v3726_v33 = vpop.permute.xlu0 %2669 }
  0xbe   : > { %2964 = vrot.lane.b32.xlu1 %v3401_v40, %s3204_s29 }
  0xbf   : > { %2959 = vrot.lane.b32.xlu0 %v3362_v6, %s3204_s29  ;;  %v2617_v6 = vunpack.i.h.bf16 %v3638_v11 }
  0xc0   : > { %v2685_v8 = vpop.permute.xlu1 %2684 }
  0xc1   : > { %v2687_v40 = vunpack.i.h.bf16 %v2685_v8  ;;  %v2686_v46 = vunpack.i.l.bf16 %v2685_v8  ;;  %v2680_v41 = vpop.permute.xlu0 %2679 }
  0xc2   : > { %v2682_v24 = vunpack.i.h.bf16 %v2680_v41  ;;  %v2681_v51 = vunpack.i.l.bf16 %v2680_v41  ;;  %2974 = vrot.lane.b32.xlu1 %v3397_v39, %s3204_s29  ;;  %v2323_v41 = vld [vmem:[%s3239_s17 + $0x9a] sm:$0xff] }
  0xc3   : > { %v3751_v38 = vsel %vm1519_vm3, %v1513_v20, %v2686_v46  ;;  %v3754_v55 = vsel %vm1519_vm3, %v1514_v61, %v2687_v40  ;;  %2969 = vrot.lane.b32.xlu0 %v3358_v5, %s3204_s29  ;;  %v1518_v5 = vsel %vm1486_vm2, %v3547_v34, %v2617_v6  ;;  %v1515_v20 = vsel %vm1486_vm2, %v3519_v47, %v2611_v35  ;;  %v2320_v47 = vld [vmem:[%s3239_s17 + $0x7a] sm:$0xff]  ;;  %v2322_v46 = vld [vmem:[%s3239_s17 + $0x92] sm:$0xff] }
  0xc4   : > { %v3759_v11 = vsel %vm1519_vm3, %v1511_v9, %v2681_v51  ;;  %v3762_v13 = vsel %vm1519_vm3, %v1512_v62, %v2682_v24  ;;  %v2695_v14 = vpop.permute.xlu1 %2694  ;;  %v1516_v61 = vsel %vm1486_vm2, %v3522_v50, %v2612_v25  ;;  %v2321_v62 = vld [vmem:[%s3239_s17 + $0x82] sm:$0xff]  ;;  %v3808_v54 = vpack.i.bf16 %v2323_v41, %v2322_v46  ;;  %v2433_v46 = vld [vmem:[%s3239_s17 + $0x15a] sm:$0xff] }
  0xc5   : > { %v2697_v23 = vunpack.i.h.bf16 %v2695_v14  ;;  %v2696_v21 = vunpack.i.l.bf16 %v2695_v14  ;;  %v2690_v16 = vpop.permute.xlu0 %2689  ;;  %v2998_v50 = vpack.i.bf16 %v2321_v62, %v2320_v47  ;;  %v2386_v47 = vld [vmem:[%s3239_s17 + $0xa9] sm:$0xff] }
  0xc6   : > { %v2692_v45 = vunpack.i.h.bf16 %v2690_v16  ;;  %v2691_v63 = vunpack.i.l.bf16 %v2690_v16  ;;  %2984 = vrot.lane.b32.xlu1 %v3316_v42, %s3199_s21 }
  0xc7   : > { %v3777_v8 = vsel %vm1519_vm3, %v1517_v2, %v2696_v21  ;;  %v3780_v28 = vsel %vm1519_vm3, %v1518_v5, %v2697_v23  ;;  %2979 = vrot.lane.b32.xlu0 %v2978_v32, %s3199_s21  ;;  %v2400_v5 = vld [vmem:[%s3239_s17 + $0x151] sm:$0xff] }
  0xc8   : > { %v3784_v34 = vsel %vm1519_vm3, %v1515_v20, %v2691_v63  ;;  %v3787_v42 = vsel %vm1519_vm3, %v1516_v61, %v2692_v45  ;;  %v3789_v9 = vpop.permute.xlu1 %2704  ;;  %v2401_v45 = vld [vmem:[%s3239_s17 + $0x159] sm:$0xff] }
  0xc9   : > { %v3793_v40 = vpop.permute.xlu0 %2699 }
  0xca   : > { %2994 = vrot.lane.b32.xlu1 %v3330_v49, %s3199_s21 }
  0xcb   : > { %2989 = vrot.lane.b32.xlu0 %v3764_v60, %s3199_s21 }
  0xcc   : > { %v3799_v32 = vpop.permute.xlu1 %2714 }
  0xcd   : > { %4658 = vst [vmem:[#allocation10_spill] sm:$0xff] %v3799_v32  ;;  %v3803_v6 = vpop.permute.xlu0 %2709 }
  0xce   : > { %4659 = vst [vmem:[#allocation11_spill] sm:$0xff] %v3803_v6  ;;  %3004 = vrot.lane.b32.xlu1 %v3397_v39, %s3200_s22 }
  0xcf   : > { %2999 = vrot.lane.b32.xlu0 %v2998_v50, %s3200_s22 }
  0xd0   : > { %v2725_v24 = vpop.permute.xlu1 %2724 }
  0xd1   : > { %v2727_v51 = vunpack.i.h.bf16 %v2725_v24  ;;  %v2726_v49 = vunpack.i.l.bf16 %v2725_v24  ;;  %v2720_v56 = vpop.permute.xlu0 %2719 }
  0xd2   : > { %v2722_v27 = vunpack.i.h.bf16 %v2720_v56  ;;  %v2721_v25 = vunpack.i.l.bf16 %v2720_v56  ;;  %3014 = vrot.lane.b32.xlu1 %v3411_v48, %s3200_s22 }
  0xd3   : > { %v3814_v35 = vsel %vm1552_vm4, %v3675_v19, %v2726_v49  ;;  %v3818_v39 = vsel %vm1552_vm4, %v3678_v57, %v2727_v51  ;;  %3009 = vrot.lane.b32.xlu0 %v3808_v54, %s3200_s22 }
  0xd4   : > { %4660 = vst [vmem:[#allocation12_spill] sm:$0xff] %v3814_v35  ;;  %4661 = vst [vmem:[#allocation13_spill] sm:$0xff] %v3818_v39  ;;  %v3824_v14 = vsel %vm1552_vm4, %v3683_v58, %v2721_v25  ;;  %v3828_v48 = vsel %vm1552_vm4, %v3686_v17, %v2722_v27  ;;  %v2735_v23 = vpop.permute.xlu1 %2734 }
  0xd5   : > { %4662 = vst [vmem:[#allocation14_spill] sm:$0xff] %v3824_v14  ;;  %4663 = vst [vmem:[#allocation15_spill] sm:$0xff] %v3828_v48  ;;  %v2737_v21 = vunpack.i.h.bf16 %v2735_v23  ;;  %v2736_v19 = vunpack.i.l.bf16 %v2735_v23  ;;  %v2730_v16 = vpop.permute.xlu0 %2729  ;;  %v2661_v48 = vunpack.i.l.bf16 %v3714_v7 }
  0xd6   : > { %v2732_v2 = vunpack.i.h.bf16 %v2730_v16  ;;  %v2731_v57 = vunpack.i.l.bf16 %v2730_v16  ;;  %3024 = vrot.lane.b32.xlu1 %v3534_v59, %s3201_s23 }
  0xd7   : > { %v3834_v58 = vsel %vm1552_vm4, %v3699_v31, %v2736_v19  ;;  %v3838_v17 = vsel %vm1552_vm4, %v3702_v15, %v2737_v21  ;;  %3019 = vrot.lane.b32.xlu0 %v3461_v12, %s3201_s23  ;;  %v3043_v12 = vpack.i.bf16 %v2401_v45, %v2400_v5  ;;  %v2402_v15 = vld [vmem:[%s3239_s17 + $0x169] sm:$0xff]  ;;  %v2435_v19 = vld [vmem:[%s3239_s17 + $0x172] sm:$0xff] }
  0xd8   : > { %4664 = vst [vmem:[#allocation16_spill] sm:$0xff] %v3834_v58  ;;  %4665 = vst [vmem:[#allocation17_spill] sm:$0xff] %v3838_v17  ;;  %v3846_v63 = vsel %vm1552_vm4, %v3707_v22, %v2731_v57  ;;  %v3850_v59 = vsel %vm1552_vm4, %v3710_v43, %v2732_v2  ;;  %v3852_v31 = vpop.permute.xlu1 %2744  ;;  %v2403_v22 = vld [vmem:[%s3239_s17 + $0x171] sm:$0xff]  ;;  %v3968_v17 = vld [vmem:[%s3239_s17 + $0xe0] sm:$0xff] }
  0xd9   : > { %4666 = vst [vmem:[#allocation18_spill] sm:$0xff] %v3846_v63  ;;  %4667 = vst [vmem:[#allocation19_spill] sm:$0xff] %v3850_v59  ;;  %v3854_v20 = vpop.permute.xlu0 %2739  ;;  %v2387_v43 = vld [vmem:[%s3239_s17 + $0xb1] sm:$0xff]  ;;  %v3869_v50 = vpack.i.bf16 %v2403_v22, %v2402_v15  ;;  %v3971_v58 = vld [vmem:[%s3239_s17 + $0x199] sm:$0xff]  ;;  %v2547_v59 = vunpack.i.h.bf16 %v3598_v18 }
  0xda   : > { %3034 = vrot.lane.b32.xlu1 %v3555_v44, %s3201_s23  ;;  %v3873_v44 = vpack.i.bf16 %v2387_v43, %v2386_v47  ;;  %v2434_v21 = vld [vmem:[%s3239_s17 + $0x16a] sm:$0xff]  ;;  %v2419_v5 = vld [vmem:[%s3239_s17 + $0xb2] sm:$0xff] }
  0xdb   : > { %3029 = vrot.lane.b32.xlu0 %v3489_v26, %s3201_s23  ;;  %v2432_v26 = vld [vmem:[%s3239_s17 + $0x152] sm:$0xff] }
  0xdc   : > { %v3862_v61 = vpop.permute.xlu1 %2754  ;;  %v3063_v25 = vpack.i.bf16 %v2433_v46, %v2432_v26 }
  0xdd   : > { %4668 = vst [vmem:[#allocation20_spill] sm:$0xff] %v3862_v61  ;;  %v3866_v62 = vpop.permute.xlu0 %2749 }
  0xde   : > { %4669 = vst [vmem:[#allocation21_spill] sm:$0xff] %v3866_v62  ;;  %3044 = vrot.lane.b32.xlu1 %v3043_v12, %s3203_s28  ;;  %v4679_v62 = vld [vmem:[#allocation3_spill] sm:$0xff] }
  0xdf   : > { %3039 = vrot.lane.b32.xlu0 %v3764_v60, %s3203_s28 }
  0xe0   : > { %v2765_v41 = vpop.permute.xlu1 %2764 }
  0xe1   : > { %v2767_v24 = vunpack.i.h.bf16 %v2765_v41  ;;  %v2766_v51 = vunpack.i.l.bf16 %v2765_v41  ;;  %v2760_v49 = vpop.permute.xlu0 %2759  ;;  %v2311_v41 = vld [vmem:[%s3239_s17 + $0x189] sm:$0xff] }
  0xe2   : > { %v2762_v56 = vunpack.i.h.bf16 %v2760_v49  ;;  %v2761_v27 = vunpack.i.l.bf16 %v2760_v49  ;;  %3054 = vrot.lane.b32.xlu1 %v3869_v50, %s3203_s28  ;;  %v2342_v49 = vld [vmem:[%s3239_s17 + $0x182] sm:$0xff] }
  0xe3   : > { %v3881_v60 = vsel %vm1552_vm4, %v3751_v38, %v2766_v51  ;;  %v3885_v23 = vsel %vm1552_vm4, %v3754_v55, %v2767_v24  ;;  %3049 = vrot.lane.b32.xlu0 %v3873_v44, %s3203_s28  ;;  %v2418_v38 = vld [vmem:[%s3239_s17 + $0xaa] sm:$0xff]  ;;  %v2294_v24 = vld [vmem:[%s3239_s17 + $0xc1] sm:$0xff] }
  0xe4   : > { %4670 = vst [vmem:[#allocation22_spill] sm:$0xff] %v3881_v60  ;;  %4671 = vst [vmem:[#allocation23_spill] sm:$0xff] %v3885_v23  ;;  %v3893_v16 = vsel %vm1552_vm4, %v3759_v11, %v2761_v27  ;;  %v3897_v2 = vsel %vm1552_vm4, %v3762_v13, %v2762_v56  ;;  %v2775_v57 = vpop.permute.xlu1 %2774  ;;  %v3902_v11 = vpack.i.bf16 %v2435_v19, %v2434_v21  ;;  %v2295_v51 = vld [vmem:[%s3239_s17 + $0xc9] sm:$0xff]  ;;  %v3945_v21 = vld [vmem:[%s3239_s17 + $0xc0] sm:$0xff]  ;;  %v2662_v60 = vunpack.i.h.bf16 %v3714_v7 }
  0xe5   : > { %4672 = vst [vmem:[#allocation24_spill] sm:$0xff] %v3893_v16  ;;  %4673 = vst [vmem:[#allocation25_spill] sm:$0xff] %v3897_v2  ;;  %v2777_v55 = vunpack.i.h.bf16 %v2775_v57  ;;  %v2776_v45 = vunpack.i.l.bf16 %v2775_v57  ;;  %v2770_v12 = vpop.permute.xlu0 %2769  ;;  %v3914_v43 = vpack.i.bf16 %v2419_v5, %v2418_v38  ;;  %v2326_v56 = vld [vmem:[%s3239_s17 + $0xc2] sm:$0xff]  ;;  %v2327_v27 = vld [vmem:[%s3239_s17 + $0xca] sm:$0xff]  ;;  %v3990_v39 = vpack.i.bf16 %v2295_v51, %v2294_v24 }
  0xe6   : > { %v2772_v15 = vunpack.i.h.bf16 %v2770_v12  ;;  %v2771_v22 = vunpack.i.l.bf16 %v2770_v12  ;;  %3064 = vrot.lane.b32.xlu1 %v3063_v25, %s3204_s29  ;;  %v3942_v25 = vld [vmem:[%s3239_s17 + $0x188] sm:$0xff]  ;;  %v172_v57 = vld [vmem:[%s3239_s17] sm:$0xff]  ;;  %v3954_v38 = vld [vmem:[%s3239_s17 + $0x198] sm:$0xff]  ;;  %v2541_v12 = vunpack.i.l.bf16 %v3585_v1  ;;  %v3994_v23 = vpack.i.bf16 %v2327_v27, %v2326_v56 }
  0xe7   : > { %v3906_v13 = vsel %vm1552_vm4, %v3777_v8, %v2776_v45  ;;  %v3910_v47 = vsel %vm1552_vm4, %v3780_v28, %v2777_v55  ;;  %3059 = vrot.lane.b32.xlu0 %v3808_v54, %s3204_s29  ;;  %v2310_v28 = vld [vmem:[%s3239_s17 + $0x181] sm:$0xff]  ;;  %v3960_v55 = vld [vmem:[%s3239_s17 + $0xd8] sm:$0xff]  ;;  %v2542_v45 = vunpack.i.h.bf16 %v3585_v1  ;;  %v1490_v24 = vsel %vm1486_vm2, %v3419_v53, %v2547_v59 }
  0xe8   : > { %4674 = vst [vmem:[#allocation26_spill] sm:$0xff] %v3906_v13  ;;  %4675 = vst [vmem:[#allocation27_spill] sm:$0xff] %v3910_v47  ;;  %v3918_v26 = vsel %vm1552_vm4, %v3784_v34, %v2771_v22  ;;  %v3922_v8 = vsel %vm1552_vm4, %v3787_v42, %v2772_v15  ;;  %v3924_v46 = vpop.permute.xlu1 %2784  ;;  %v2343_v34 = vld [vmem:[%s3239_s17 + $0x18a] sm:$0xff]  ;;  %v3937_v42 = vld [vmem:[%s3239_s17 + $0x180] sm:$0xff]  ;;  %v2546_v15 = vunpack.i.l.bf16 %v3598_v18  ;;  %v2626_v27 = vunpack.i.l.bf16 %v3646_v10 }
  0xe9   : > { %4676 = vst [vmem:[#allocation28_spill] sm:$0xff] %v3918_v26  ;;  %4677 = vst [vmem:[#allocation29_spill] sm:$0xff] %v3922_v8  ;;  %v3928_v54 = vpop.permute.xlu0 %2779  ;;  %v3948_v19 = vld [vmem:[%s3239_s17 + $0xc8] sm:$0xff]  ;;  %v3957_v5 = vld [vmem:[%s3239_s17 + $0x1a0] sm:$0xff]  ;;  %v3980_v8 = vpack.i.bf16 %v2311_v41, %v2310_v28  ;;  %v3992_v35 = vpack.i.bf16 %v2343_v34, %v2342_v49  ;;  %v1487_v49 = vsel %vm1486_vm2, %v172_v57, %v2541_v12  ;;  %v2587_v57 = vunpack.i.h.bf16 %v3614_v3 }
  0xea   : > { %3074 = vrot.lane.b32.xlu1 %v3902_v11, %s3204_s29  ;;  %v3974_v47 = vld [vmem:[%s3239_s17 + $0x1a1] sm:$0xff]  ;;  %v3983_v26 = vld [vmem:[%s3239_s17 + $0xd9] sm:$0xff]  ;;  %v2582_v12 = vunpack.i.h.bf16 %v3616_v37  ;;  %v2621_v18 = vunpack.i.l.bf16 %v3648_v36  ;;  %v2622_v53 = vunpack.i.h.bf16 %v3648_v36  ;;  %v2666_v59 = vunpack.i.l.bf16 %v3712_v4 }
  0xeb   : > { %3069 = vrot.lane.b32.xlu0 %v3914_v43, %s3204_s29  ;;  %v173_v13 = vld [vmem:[%s3239_s17 + $0x8] sm:$0xff]  ;;  %v4009_v51 = vld [vmem:[%s3239_s17 + $0x19a] sm:$0xff]  ;;  %v2706_v36 = vunpack.i.l.bf16 %v3789_v9  ;;  %v1506_v16 = vsel %vm1486_vm2, %v3497_v30, %v2587_v57 }
  0xec   : > { %v3965_v22 = vpop.permute.xlu1 %2794  ;;  %v3986_v1 = vld [vmem:[%s3239_s17 + $0xe1] sm:$0xff]  ;;  %v1488_v34 = vsel %vm1486_vm2, %v173_v13, %v2542_v45  ;;  %v2586_v13 = vunpack.i.l.bf16 %v3614_v3  ;;  %v1504_v7 = vsel %vm1486_vm2, %v4679_v62, %v2582_v12 }
  0xed   : > { %v3978_v63 = vpop.permute.xlu0 %2789  ;;  %v4023_v41 = vld [vmem:[%s3239_s17 + $0xda] sm:$0xff]  ;;  %v4026_v28 = vld [vmem:[%s3239_s17 + $0xe2] sm:$0xff]  ;;  %v1521_v30 = vsel %vm1519_vm3, %v1488_v34, %v2622_v53 }
  0xee   : > { %3084 = vrot.lane.b32.xlu1 %v3869_v50, %s3199_s21  ;;  %v4020_v50 = vld [vmem:[%s3239_s17 + $0x1a2] sm:$0xff]  ;;  %v1505_v2 = vsel %vm1486_vm2, %v3494_v29, %v2586_v13  ;;  %v1520_v29 = vsel %vm1519_vm3, %v1487_v49, %v2621_v18  ;;  %v2701_v13 = vunpack.i.l.bf16 %v3793_v40  ;;  %v1537_v18 = vsel %vm1519_vm3, %v1504_v7, %v2662_v60 }
  0xef   : > { %3079 = vrot.lane.b32.xlu0 %v3873_v44, %s3199_s21  ;;  %v1489_v44 = vsel %vm1486_vm2, %v3416_v52, %v2546_v15  ;;  %v2581_v52 = vunpack.i.l.bf16 %v3616_v37  ;;  %v2627_v15 = vunpack.i.h.bf16 %v3646_v10  ;;  %v2667_v10 = vunpack.i.h.bf16 %v3712_v4  ;;  %v4678_v3 = vld [vmem:[#allocation2_spill] sm:$0xff] }
  0xf0   : > { %v4015_v56 = vpop.permute.xlu1 %2804  ;;  %v2707_v37 = vunpack.i.h.bf16 %v3789_v9  ;;  %v1522_v6 = vsel %vm1519_vm3, %v1489_v44, %v2626_v27  ;;  %v1538_v57 = vsel %vm1519_vm3, %v1505_v2, %v2666_v59  ;;  %v2702_v9 = vunpack.i.h.bf16 %v3793_v40 }
  0xf1   : > { %v4033_v45 = vpop.permute.xlu0 %2799  ;;  %v1503_v61 = vsel %vm1486_vm2, %v4678_v3, %v2581_v52  ;;  %v1523_v32 = vsel %vm1519_vm3, %v1490_v24, %v2627_v15  ;;  %v1539_v62 = vsel %vm1519_vm3, %v1506_v16, %v2667_v10  ;;  %v1555_v49 = vsel %vm1552_vm4, %v1522_v6, %v2706_v36 }
  0xf2   : > { %3094 = vrot.lane.b32.xlu1 %v3980_v8, %s3199_s21  ;;  %v1536_v24 = vsel %vm1519_vm3, %v1503_v61, %v2661_v48  ;;  %v1556_v34 = vsel %vm1552_vm4, %v1523_v32, %v2707_v37  ;;  %v2747_v2 = vunpack.i.h.bf16 %v3852_v31  ;;  %v2746_v44 = vunpack.i.l.bf16 %v3852_v31 }
  0xf3   : > { %3089 = vrot.lane.b32.xlu0 %v3990_v39, %s3199_s21  ;;  %v2741_v40 = vunpack.i.l.bf16 %v3854_v20  ;;  %v2742_v16 = vunpack.i.h.bf16 %v3854_v20  ;;  %v2787_v48 = vunpack.i.h.bf16 %v3924_v46  ;;  %v2786_v61 = vunpack.i.l.bf16 %v3924_v46 }
  0xf4   : > { %v4053_v14 = vpop.permute.xlu1 %2814  ;;  %v2781_v6 = vunpack.i.l.bf16 %v3928_v54  ;;  %v1553_v32 = vsel %vm1552_vm4, %v1520_v29, %v2701_v13  ;;  %v1554_v60 = vsel %vm1552_vm4, %v1521_v30, %v2702_v9  ;;  %v2782_v31 = vunpack.i.h.bf16 %v3928_v54 }
  0xf5   : > { %v4062_v4 = vpop.permute.xlu0 %2809  ;;  %v2797_v20 = vunpack.i.h.bf16 %v3965_v22  ;;  %v2792_v46 = vunpack.i.h.bf16 %v3978_v63  ;;  %v2791_v52 = vunpack.i.l.bf16 %v3978_v63  ;;  %v2806_v12 = vunpack.i.l.bf16 %v4015_v56 }
  0xf6   : > { %3104 = vrot.lane.b32.xlu1 %v3902_v11, %s3200_s22  ;;  %v1571_v53 = vsel %vm1552_vm4, %v1538_v57, %v2746_v44  ;;  %v1572_v59 = vsel %vm1552_vm4, %v1539_v62, %v2747_v2  ;;  %v1569_v54 = vsel %vm1552_vm4, %v1536_v24, %v2741_v40  ;;  %v2807_v3 = vunpack.i.h.bf16 %v4015_v56 }
  0xf7   : > { %3099 = vrot.lane.b32.xlu0 %v3914_v43, %s3200_s22  ;;  %v2796_v43 = vunpack.i.l.bf16 %v3965_v22  ;;  %v1570_v22 = vsel %vm1552_vm4, %v1537_v18, %v2742_v16  ;;  %v1588_v10 = vsel %vm1585_vm5, %v1555_v49, %v2786_v61  ;;  %v1602_v63 = vsel %vm1585_vm5, %v1569_v54, %v2787_v48 }
  0xf8   : > { %v4081_v11 = vpop.permute.xlu1 %2824  ;;  %v1586_v36 = vsel %vm1585_vm5, %v1553_v32, %v2781_v6  ;;  %v4680_v7 = vpack.i.bf16 %v3942_v25, %v3937_v42  ;;  %v1587_v29 = vsel %vm1585_vm5, %v1554_v60, %v2782_v31  ;;  %v2802_v30 = vunpack.i.h.bf16 %v4033_v45 }
  0xf9   : > { %v4087_v27 = vpop.permute.xlu0 %2819  ;;  %v1604_v56 = vsel %vm1585_vm5, %v1571_v53, %v2796_v43  ;;  %v2801_v57 = vunpack.i.l.bf16 %v4033_v45  ;;  %v4681_v9 = vpack.i.bf16 %v3948_v19, %v3945_v21  ;;  %v1605_v13 = vsel %vm1585_vm5, %v1572_v59, %v2797_v20 }
  0xfa   : > { %3114 = vrot.lane.b32.xlu1 %v3992_v35, %s3200_s22  ;;  %v1589_v62 = vsel %vm1585_vm5, %v1556_v34, %v2792_v46  ;;  %v1603_v42 = vsel %vm1585_vm5, %v1570_v22, %v2791_v52  ;;  %v1635_v25 = vsel %vm1618_vm6, %v1602_v63, %v2806_v12  ;;  %v2817_v49 = vunpack.i.h.bf16 %v4053_v14 }
  0xfb   : > { %3109 = vrot.lane.b32.xlu0 %v3994_v23, %s3200_s22  ;;  %v1636_v18 = vsel %vm1618_vm6, %v1603_v42, %v2807_v3  ;;  %v2816_v45 = vunpack.i.l.bf16 %v4053_v14  ;;  %v2811_v2 = vunpack.i.l.bf16 %v4062_v4  ;;  %v2812_v19 = vunpack.i.h.bf16 %v4062_v4 }
  0xfc   : > { %v2835_v15 = vpop.permute.xlu1 %2834  ;;  %v2827_v44 = vunpack.i.h.bf16 %v4081_v11  ;;  %v2826_v34 = vunpack.i.l.bf16 %v4081_v11  ;;  %v2821_v40 = vunpack.i.l.bf16 %v4087_v27  ;;  %v4682_v16 = vpack.i.bf16 %v3957_v5, %v3954_v38 }
  0xfd   : > { %v4109_v37 = vpop.permute.xlu0 %2829  ;;  %v1619_v48 = vsel %vm1618_vm6, %v1586_v36, %v2801_v57  ;;  %v1620_v14 = vsel %vm1618_vm6, %v1587_v29, %v2802_v30  ;;  %v2822_v61 = vunpack.i.h.bf16 %v4087_v27  ;;  %v2836_v6 = vunpack.i.l.bf16 %v2835_v15 }
  0xfe   : > { %3124 = vrot.lane.b32.xlu1 %v4680_v7, %s3201_s23  ;;  %v4683_v4 = vpack.i.bf16 %v3968_v17, %v3960_v55  ;;  %v2837_v11 = vunpack.i.h.bf16 %v2835_v15  ;;  %v2831_v32 = vunpack.i.l.bf16 %v4109_v37  ;;  %v1637_v5 = vsel %vm1618_vm6, %v1604_v56, %v2816_v45 }
  0xff   : > { %3119 = vrot.lane.b32.xlu0 %v4681_v9, %s3201_s23  ;;  %v1638_v43 = vsel %vm1618_vm6, %v1605_v13, %v2817_v49  ;;  %v1621_v20 = vsel %vm1618_vm6, %v1588_v10, %v2811_v2  ;;  %v1622_v52 = vsel %vm1618_vm6, %v1589_v62, %v2812_v19  ;;  %v1668_v17 = vsel %vm1651_vm7, %v1635_v25, %v2826_v34 }
 0x100   : > { %v2845_v24 = vpop.permute.xlu1 %2844  ;;  %v1669_v55 = vsel %vm1651_vm7, %v1636_v18, %v2827_v44  ;;  %v1652_v12 = vsel %vm1651_vm7, %v1619_v48, %v2821_v40  ;;  %v1653_v15 = vsel %vm1651_vm7, %v1620_v14, %v2822_v61  ;;  %v1670_v53 = vsel %vm1651_vm7, %v1637_v5, %v2836_v6 }
 0x101   : > { %v2840_v21 = vpop.permute.xlu0 %2839  ;;  %v2847_v60 = vunpack.i.h.bf16 %v2845_v24  ;;  %v2846_v31 = vunpack.i.l.bf16 %v2845_v24  ;;  %v2832_v59 = vunpack.i.h.bf16 %v4109_v37  ;;  %v1671_v3 = vsel %vm1651_vm7, %v1638_v43, %v2837_v11  ;;  %v4688_v43 = vld [vmem:[#allocation4_spill] sm:$0xff] }
 0x102   : > { %3134 = vrot.lane.b32.xlu1 %v4682_v16, %s3201_s23  ;;  %v2841_v27 = vunpack.i.l.bf16 %v2840_v21  ;;  %v2842_v54 = vunpack.i.h.bf16 %v2840_v21  ;;  %v1654_v22 = vsel %vm1651_vm7, %v1621_v20, %v2831_v32  ;;  %v4685_v42 = vpack.i.bf16 %v3986_v1, %v3983_v26 }
 0x103   : > { %3129 = vrot.lane.b32.xlu0 %v4683_v4, %s3201_s23  ;;  %v1701_v63 = vsel %vm1684_vm8, %v1668_v17, %v2846_v31  ;;  %v1702_v36 = vsel %vm1684_vm8, %v1669_v55, %v2847_v60  ;;  %v1655_v49 = vsel %vm1651_vm7, %v1622_v52, %v2832_v59  ;;  %v2552_v20 = vunpack.i.h.bf16 %v4688_v43  ;;  %v3181_v55 = vld [vmem:[%s3239_s17 + $0x38] sm:$0xff] }
 0x104   : > { %v2855_v38 = vpop.permute.xlu1 %2854  ;;  %v1685_v30 = vsel %vm1684_vm8, %v1652_v12, %v2841_v27  ;;  %v1686_v25 = vsel %vm1684_vm8, %v1653_v15, %v2842_v54  ;;  %v2551_v27 = vunpack.i.l.bf16 %v4688_v43  ;;  %v4690_v15 = vld [vmem:[#allocation6_spill] sm:$0xff] }
 0x105   : > { %v2850_v46 = vpop.permute.xlu0 %2849  ;;  %v2857_v37 = vunpack.i.h.bf16 %v2855_v38  ;;  %v1492_v12 = vsel %vm1486_vm2, %v3181_v55, %v2552_v20  ;;  %v2596_v59 = vunpack.i.l.bf16 %v4690_v15 }
 0x106   : > { %3144 = vrot.lane.b32.xlu1 %v3980_v8, %s3203_s28  ;;  %v2856_v8 = vunpack.i.l.bf16 %v2855_v38  ;;  %v2851_v57 = vunpack.i.l.bf16 %v2850_v46  ;;  %v2852_v62 = vunpack.i.h.bf16 %v2850_v46  ;;  %v4686_v38 = vpack.i.bf16 %v4020_v50, %v4009_v51  ;;  %v4689_v50 = vld [vmem:[#allocation5_spill] sm:$0xff] }
 0x107   : > { %3139 = vrot.lane.b32.xlu0 %v3990_v39, %s3203_s28  ;;  %v4684_v39 = vpack.i.bf16 %v3974_v47, %v3971_v58  ;;  %v1704_v34 = vsel %vm1684_vm8, %v1671_v3, %v2857_v37  ;;  %v2557_v51 = vunpack.i.h.bf16 %v4689_v50  ;;  %v2556_v52 = vunpack.i.l.bf16 %v4689_v50  ;;  %v4691_v3 = vld [vmem:[#allocation7_spill] sm:$0xff]  ;;  %v4693_v37 = vld [vmem:[#allocation9_spill] sm:$0xff]  ;;  %v4697_v50 = vld [vmem:[#allocation20_spill] sm:$0xff] }
 0x108   : > { %v2865_v10 = vpop.permute.xlu1 %2864  ;;  %v1703_v21 = vsel %vm1684_vm8, %v1670_v53, %v2856_v8  ;;  %v1687_v40 = vsel %vm1684_vm8, %v1654_v22, %v2851_v57  ;;  %v1688_v14 = vsel %vm1684_vm8, %v1655_v49, %v2852_v62  ;;  %v2597_v53 = vunpack.i.h.bf16 %v4690_v15  ;;  %v3185_v49 = vld [vmem:[%s3239_s17 + $0x110] sm:$0xff] }
 0x109   : > { %v2867_v7 = vunpack.i.h.bf16 %v2865_v10  ;;  %v2866_v29 = vunpack.i.l.bf16 %v2865_v10  ;;  %v2860_v56 = vpop.permute.xlu0 %2859  ;;  %v2592_v22 = vunpack.i.h.bf16 %v4691_v3  ;;  %v2591_v10 = vunpack.i.l.bf16 %v4691_v3 }
 0x10a   : > { %v2862_v9 = vunpack.i.h.bf16 %v2860_v56  ;;  %v2861_v13 = vunpack.i.l.bf16 %v2860_v56  ;;  %3154 = vrot.lane.b32.xlu1 %v4684_v39, %s3203_s28  ;;  %v3183_v56 = vld [vmem:[%s3239_s17 + $0x50] sm:$0xff]  ;;  %v2632_v57 = vunpack.i.h.bf16 %v4693_v37  ;;  %v2676_v39 = vunpack.i.l.bf16 %v3722_v0 }
 0x10b   : > { %3149 = vrot.lane.b32.xlu0 %v4685_v42, %s3203_s28  ;;  %v1734_v24 = vsel %vm1717_vm9, %v1701_v63, %v2866_v29  ;;  %v1735_v18 = vsel %vm1717_vm9, %v1702_v36, %v2867_v7  ;;  %v4692_v63 = vld [vmem:[#allocation8_spill] sm:$0xff]  ;;  %v3182_v7 = vld [vmem:[%s3239_s17 + $0x48] sm:$0xff]  ;;  %v2672_v62 = vunpack.i.h.bf16 %v3726_v33  ;;  %v2671_v42 = vunpack.i.l.bf16 %v3726_v33 }
 0x10c   : > { %v2875_v45 = vpop.permute.xlu1 %2874  ;;  %v1718_v2 = vsel %vm1717_vm9, %v1685_v30, %v2861_v13  ;;  %v1719_v58 = vsel %vm1717_vm9, %v1686_v25, %v2862_v9  ;;  %v1758_v47 = vpack.c.bf16 %v1735_v18, %v1734_v24  ;;  %v2637_v36 = vunpack.i.h.bf16 %v4692_v63  ;;  %v3184_v24 = vld [vmem:[%s3239_s17 + $0x108] sm:$0xff] }
 0x10d   : > { %v2877_v19 = vunpack.i.h.bf16 %v2875_v45  ;;  %v2876_v44 = vunpack.i.l.bf16 %v2875_v45  ;;  %v2870_v26 = vpop.permute.xlu0 %2869  ;;  %v1750_v1 = vpack.c.bf16 %v1719_v58, %v1718_v2  ;;  %v2636_v8 = vunpack.i.l.bf16 %v4692_v63  ;;  %v4694_v2 = vld [vmem:[#allocation10_spill] sm:$0xff] }
 0x10e   : > { %v2872_v16 = vunpack.i.h.bf16 %v2870_v26  ;;  %v2871_v48 = vunpack.i.l.bf16 %v2870_v26  ;;  %3164 = vrot.lane.b32.xlu1 %v3992_v35, %s3204_s29  ;;  %2500 = vmatprep.mubr.msk.bf16.mxu1 %vm1788_vm10, %v1758_v47  ;;  %v1493_v29 = vsel %vm1486_vm2, %v3182_v7, %v2556_v52  ;;  %v1494_v30 = vsel %vm1486_vm2, %v3183_v56, %v2557_v51 }
 0x10f   : > { %v1736_v61 = vsel %vm1717_vm9, %v1703_v21, %v2876_v44  ;;  %v1737_v6 = vsel %vm1717_vm9, %v1704_v34, %v2877_v19  ;;  %3159 = vrot.lane.b32.xlu0 %v3994_v23, %s3204_s29  ;;  %2484 = vmatprep.mubr.msk.bf16.mxu0 %vm1788_vm10, %v1750_v1  ;;  %v4687_v23 = vpack.i.bf16 %v4026_v28, %v4023_v41  ;;  %v3180_v28 = vld [vmem:[%s3239_s17 + $0x30] sm:$0xff]  ;;  %v2631_v9 = vunpack.i.l.bf16 %v4693_v37  ;;  %v3187_v44 = vld [vmem:[%s3239_s17 + $0xf8] sm:$0xff] }
 0x110   : > { %v1759_v4 = vpack.c.bf16 %v1737_v6, %v1736_v61  ;;  %v1720_v11 = vsel %vm1717_vm9, %v1687_v40, %v2871_v48  ;;  %v1721_v32 = vsel %vm1717_vm9, %v1688_v14, %v2872_v16  ;;  %v4198_v35 = vpop.permute.xlu1 %2884  ;;  %v1491_v41 = vsel %vm1486_vm2, %v3180_v28, %v2551_v27  ;;  %v3186_v19 = vld [vmem:[%s3239_s17 + $0xf0] sm:$0xff]  ;;  %v4695_v16 = vld [vmem:[#allocation11_spill] sm:$0xff] }
 0x111   : > { %v1751_v60 = vpack.c.bf16 %v1721_v32, %v1720_v11  ;;  %v4200_v31 = vpop.permute.xlu0 %2879  ;;  %v2677_v13 = vunpack.i.h.bf16 %v3722_v0  ;;  %v1509_v18 = vsel %vm1486_vm2, %v3184_v24, %v2596_v59  ;;  %v1510_v45 = vsel %vm1486_vm2, %v3185_v49, %v2597_v53 }
 0x112   : > { %3174 = vrot.lane.b32.xlu1 %v4686_v38, %s3204_s29  ;;  %2501 = vmatmul.mubr.msk.bf16.vlgmr.msra.gmra.mrb[0].mxu1 %vm1788_vm10, %v1759_v4  ;;  %v2717_v58 = vunpack.i.h.bf16 %v4694_v2  ;;  %v2716_v47 = vunpack.i.l.bf16 %v4694_v2  ;;  %v1507_v0 = vsel %vm1486_vm2, %v3186_v19, %v2591_v10  ;;  %v1508_v33 = vsel %vm1486_vm2, %v3187_v44, %v2592_v22 }
 0x113   : > { %3169 = vrot.lane.b32.xlu0 %v4687_v23, %s3204_s29  ;;  %2485 = vmatmul.mubr.msk.bf16.vlgmr.msra.gmra.mrb[0].mxu0 %vm1788_vm10, %v1751_v60  ;;  %v1526_v26 = vsel %vm1519_vm3, %v1493_v29, %v2636_v8  ;;  %v1527_v1 = vsel %vm1519_vm3, %v1494_v30, %v2637_v36  ;;  %v1524_v34 = vsel %vm1519_vm3, %v1491_v41, %v2631_v9  ;;  %v2712_v48 = vunpack.i.h.bf16 %v4695_v16  ;;  %v4696_v23 = vld [vmem:[#allocation21_spill] sm:$0xff] }
 0x114   : > { %v4212_v5 = vpop.permute.xlu1 %2894  ;;  %v1525_v40 = vsel %vm1519_vm3, %v1492_v12, %v2632_v57  ;;  %v2711_v14 = vunpack.i.l.bf16 %v4695_v16  ;;  %v1542_v61 = vsel %vm1519_vm3, %v1509_v18, %v2676_v39  ;;  %v1543_v6 = vsel %vm1519_vm3, %v1510_v45, %v2677_v13 }
 0x115   : > { %v4216_v46 = vpop.permute.xlu0 %2889  ;;  %v1540_v4 = vsel %vm1519_vm3, %v1507_v0, %v2671_v42  ;;  %v1541_v11 = vsel %vm1519_vm3, %v1508_v33, %v2672_v62  ;;  %v1559_v60 = vsel %vm1552_vm4, %v1526_v26, %v2716_v47  ;;  %v1560_v38 = vsel %vm1552_vm4, %v1527_v1, %v2717_v58 }
 0x116   : > { %v2752_v43 = vunpack.i.h.bf16 %v4696_v23  ;;  %v2751_v20 = vunpack.i.l.bf16 %v4696_v23  ;;  %v2757_v51 = vunpack.i.h.bf16 %v4697_v50  ;;  %v2756_v52 = vunpack.i.l.bf16 %v4697_v50 }
 0x117   : > { %v2887_v28 = vunpack.i.h.bf16 %v4198_v35  ;;  %v2886_v41 = vunpack.i.l.bf16 %v4198_v35  ;;  %v1557_v55 = vsel %vm1552_vm4, %v1524_v34, %v2711_v14  ;;  %v1558_v12 = vsel %vm1552_vm4, %v1525_v40, %v2712_v48 }
 0x118   : > { %v4220_v17 = vpop.permute.xlu1 %2904  ;;  %v2882_v15 = vunpack.i.h.bf16 %v4200_v31  ;;  %v2881_v53 = vunpack.i.l.bf16 %v4200_v31  ;;  %v2897_v59 = vunpack.i.h.bf16 %v4212_v5  ;;  %v2896_v3 = vunpack.i.l.bf16 %v4212_v5 }
 0x119   : > { %v4228_v54 = vpop.permute.xlu0 %2899  ;;  %v2892_v22 = vunpack.i.h.bf16 %v4216_v46  ;;  %v2891_v10 = vunpack.i.l.bf16 %v4216_v46  ;;  %v1573_v36 = vsel %vm1552_vm4, %v1540_v4, %v2751_v20  ;;  %v1574_v35 = vsel %vm1552_vm4, %v1541_v11, %v2752_v43 }
 0x11a   : > { %v2907_v8 = vunpack.i.h.bf16 %v4220_v17  ;;  %v2906_v7 = vunpack.i.l.bf16 %v4220_v17  ;;  %v1575_v31 = vsel %vm1552_vm4, %v1542_v61, %v2756_v52  ;;  %v1576_v56 = vsel %vm1552_vm4, %v1543_v6, %v2757_v51 }
 0x11b   : > { %v1606_v5 = vsel %vm1585_vm5, %v1573_v36, %v2886_v41  ;;  %v1607_v30 = vsel %vm1585_vm5, %v1574_v35, %v2887_v28  ;;  %v1590_v46 = vsel %vm1585_vm5, %v1557_v55, %v2881_v53  ;;  %v1591_v37 = vsel %vm1585_vm5, %v1558_v12, %v2882_v15 }
 0x11c   : > { %v4244_v25 = vpop.permute.xlu1 %2914  ;;  %v2902_v57 = vunpack.i.h.bf16 %v4228_v54  ;;  %v2901_v9 = vunpack.i.l.bf16 %v4228_v54  ;;  %v1608_v17 = vsel %vm1585_vm5, %v1575_v31, %v2896_v3  ;;  %v1609_v13 = vsel %vm1585_vm5, %v1576_v56, %v2897_v59 }
 0x11d   : > { %v4252_v21 = vpop.permute.xlu0 %2909  ;;  %v1592_v39 = vsel %vm1585_vm5, %v1559_v60, %v2891_v10  ;;  %v1593_v62 = vsel %vm1585_vm5, %v1560_v38, %v2892_v22  ;;  %v1639_v24 = vsel %vm1618_vm6, %v1606_v5, %v2906_v7  ;;  %v1640_v18 = vsel %vm1618_vm6, %v1607_v30, %v2907_v8 }
 0x11e   : > { %v2917_v49 = vunpack.i.h.bf16 %v4244_v25  ;;  %v2916_v45 = vunpack.i.l.bf16 %v4244_v25  ;;  %v2912_v54 = vunpack.i.h.bf16 %v4252_v21  ;;  %v2911_v58 = vunpack.i.l.bf16 %v4252_v21 }
 0x11f   : > { %v1623_v0 = vsel %vm1618_vm6, %v1590_v46, %v2901_v9  ;;  %v1624_v44 = vsel %vm1618_vm6, %v1591_v37, %v2902_v57 }
 0x120   : > { %v4268_v32 = vpop.permute.xlu1 %2924  ;;  %v1641_v48 = vsel %vm1618_vm6, %v1608_v17, %v2916_v45  ;;  %v1642_v14 = vsel %vm1618_vm6, %v1609_v13, %v2917_v49  ;;  %v1625_v4 = vsel %vm1618_vm6, %v1592_v39, %v2911_v58  ;;  %v1626_v11 = vsel %vm1618_vm6, %v1593_v62, %v2912_v54 }
 0x121   : > { %v2920_v27 = vpop.permute.xlu0 %2919  ;;  %v2927_v47 = vunpack.i.h.bf16 %v4268_v32  ;;  %v2926_v19 = vunpack.i.l.bf16 %v4268_v32 }
 0x122   : > { %v2922_v33 = vunpack.i.h.bf16 %v2920_v27  ;;  %v2921_v26 = vunpack.i.l.bf16 %v2920_v27 }
 0x123   : > { %v1672_v32 = vsel %vm1651_vm7, %v1639_v24, %v2926_v19  ;;  %v1673_v60 = vsel %vm1651_vm7, %v1640_v18, %v2927_v47 }
 0x124   : > { %v2935_v63 = vpop.permute.xlu1 %2934  ;;  %v1656_v38 = vsel %vm1651_vm7, %v1623_v0, %v2921_v26  ;;  %v1657_v23 = vsel %vm1651_vm7, %v1624_v44, %v2922_v33 }
 0x125   : > { %v4290_v29 = vpop.permute.xlu0 %2929  ;;  %v2937_v1 = vunpack.i.h.bf16 %v2935_v63  ;;  %v2936_v34 = vunpack.i.l.bf16 %v2935_v63 }
 0x126   : > { %v2932_v43 = vunpack.i.h.bf16 %v4290_v29  ;;  %v2931_v20 = vunpack.i.l.bf16 %v4290_v29 }
 0x127   : > { %v1674_v27 = vsel %vm1651_vm7, %v1641_v48, %v2936_v34  ;;  %v1675_v50 = vsel %vm1651_vm7, %v1642_v14, %v2937_v1 }
 0x128   : > { %v2945_v42 = vpop.permute.xlu1 %2944  ;;  %v1658_v7 = vsel %vm1651_vm7, %v1625_v4, %v2931_v20  ;;  %v1659_v30 = vsel %vm1651_vm7, %v1626_v11, %v2932_v43  ;;  %v4698_v43 = vld [vmem:[#allocation24_spill] sm:$0xff] }
 0x129   : > { %v2940_v2 = vpop.permute.xlu0 %2939  ;;  %v2947_v40 = vunpack.i.h.bf16 %v2945_v42  ;;  %v2946_v16 = vunpack.i.l.bf16 %v2945_v42 }
 0x12a   : > { %v2942_v21 = vunpack.i.h.bf16 %v2940_v2  ;;  %v2941_v61 = vunpack.i.l.bf16 %v2940_v2 }
 0x12b   : > { %v1705_v51 = vsel %vm1684_vm8, %v1672_v32, %v2946_v16  ;;  %v1706_v52 = vsel %vm1684_vm8, %v1673_v60, %v2947_v40 }
 0x12c   : > { %v2955_v25 = vpop.permute.xlu1 %2954  ;;  %v1689_v41 = vsel %vm1684_vm8, %v1656_v38, %v2941_v61  ;;  %v1690_v55 = vsel %vm1684_vm8, %v1657_v23, %v2942_v21 }
 0x12d   : > { %v2950_v6 = vpop.permute.xlu0 %2949  ;;  %v2957_v59 = vunpack.i.h.bf16 %v2955_v25  ;;  %v2956_v3 = vunpack.i.l.bf16 %v2955_v25 }
 0x12e   : > { %v2952_v63 = vunpack.i.h.bf16 %v2950_v6  ;;  %v2951_v36 = vunpack.i.l.bf16 %v2950_v6 }
 0x12f   : > { %v1707_v17 = vsel %vm1684_vm8, %v1674_v27, %v2956_v3  ;;  %v1708_v13 = vsel %vm1684_vm8, %v1675_v50, %v2957_v59  ;;  %v4699_v27 = vld [vmem:[#allocation25_spill] sm:$0xff]  ;;  %v4703_v59 = vld [vmem:[#allocation23_spill] sm:$0xff] }
 0x130   : > { %v2965_v28 = vpop.permute.xlu1 %2964  ;;  %v1691_v42 = vsel %vm1684_vm8, %v1658_v7, %v2951_v36  ;;  %v1692_v24 = vsel %vm1684_vm8, %v1659_v30, %v2952_v63  ;;  %v4705_v63 = vld [vmem:[#allocation13_spill] sm:$0xff] }
 0x131   : > { %v2967_v12 = vunpack.i.h.bf16 %v2965_v28  ;;  %v2966_v15 = vunpack.i.l.bf16 %v2965_v28  ;;  %v2960_v53 = vpop.permute.xlu0 %2959  ;;  %v4701_v28 = vld [vmem:[#allocation15_spill] sm:$0xff] }
 0x132   : > { %v2962_v22 = vunpack.i.h.bf16 %v2960_v53  ;;  %v2961_v10 = vunpack.i.l.bf16 %v2960_v53 }
 0x133   : > { %v1738_v35 = vsel %vm1717_vm9, %v1705_v51, %v2966_v15  ;;  %v1739_v8 = vsel %vm1717_vm9, %v1706_v52, %v2967_v12  ;;  %v4700_v51 = vld [vmem:[#allocation14_spill] sm:$0xff] }
 0x134   : > { %v1760_v29 = vpack.c.bf16 %v1739_v8, %v1738_v35  ;;  %v1722_v31 = vsel %vm1717_vm9, %v1689_v41, %v2961_v10  ;;  %v1723_v56 = vsel %vm1717_vm9, %v1690_v55, %v2962_v22  ;;  %v2975_v5 = vpop.permute.xlu1 %2974  ;;  %v4702_v15 = vld [vmem:[#allocation22_spill] sm:$0xff]  ;;  %v4704_v22 = vld [vmem:[#allocation12_spill] sm:$0xff] }
 0x135   : > { %v1752_v46 = vpack.c.bf16 %v1723_v56, %v1722_v31  ;;  %v2977_v37 = vunpack.i.h.bf16 %v2975_v5  ;;  %v2976_v57 = vunpack.i.l.bf16 %v2975_v5  ;;  %v2970_v9 = vpop.permute.xlu0 %2969 }
 0x136   : > { %v2972_v39 = vunpack.i.h.bf16 %v2970_v9  ;;  %v2971_v62 = vunpack.i.l.bf16 %v2970_v9  ;;  %2504 = vmatprep.mubr.msk.bf16.mxu1 %vm1788_vm10, %v1760_v29 }
 0x137   : > { %v1740_v18 = vsel %vm1717_vm9, %v1707_v17, %v2976_v57  ;;  %v1741_v49 = vsel %vm1717_vm9, %v1708_v13, %v2977_v37  ;;  %2488 = vmatprep.mubr.msk.bf16.mxu0 %vm1788_vm10, %v1752_v46 }
 0x138   : > { %v1761_v45 = vpack.c.bf16 %v1741_v49, %v1740_v18  ;;  %v1724_v2 = vsel %vm1717_vm9, %v1691_v42, %v2971_v62  ;;  %v1725_v54 = vsel %vm1717_vm9, %v1692_v24, %v2972_v39  ;;  %v2985_v58 = vpop.permute.xlu1 %2984 }
 0x139   : > { %v1753_v47 = vpack.c.bf16 %v1725_v54, %v1724_v2  ;;  %v2980_v19 = vpop.permute.xlu0 %2979  ;;  %v2987_v25 = vunpack.i.h.bf16 %v2985_v58  ;;  %v2986_v48 = vunpack.i.l.bf16 %v2985_v58 }
 0x13a   : > { %2505 = vmatmul.mubr.msk.bf16.gmra.mrb[4].mxu1 %vm1788_vm10, %v1761_v45  ;;  %v2982_v14 = vunpack.i.h.bf16 %v2980_v19  ;;  %v2981_v21 = vunpack.i.l.bf16 %v2980_v19 }
 0x13b   : > { %2489 = vmatmul.mubr.msk.bf16.gmra.mrb[4].mxu0 %vm1788_vm10, %v1753_v47  ;;  %v1610_v20 = vsel %vm1585_vm5, %v4698_v43, %v2986_v48  ;;  %v1611_v50 = vsel %vm1585_vm5, %v4699_v27, %v2987_v25 }
 0x13c   : > { %v2995_v0 = vpop.permute.xlu1 %2994  ;;  %v1594_v52 = vsel %vm1585_vm5, %v4700_v51, %v2981_v21  ;;  %v1595_v41 = vsel %vm1585_vm5, %v4701_v28, %v2982_v14 }
 0x13d   : > { %v2990_v44 = vpop.permute.xlu0 %2989  ;;  %v2997_v61 = vunpack.i.h.bf16 %v2995_v0  ;;  %v2996_v6 = vunpack.i.l.bf16 %v2995_v0 }
 0x13e   : > { %v2992_v4 = vunpack.i.h.bf16 %v2990_v44  ;;  %v2991_v11 = vunpack.i.l.bf16 %v2990_v44 }
 0x13f   : > { %v1612_v53 = vsel %vm1585_vm5, %v4702_v15, %v2996_v6  ;;  %v1613_v3 = vsel %vm1585_vm5, %v4703_v59, %v2997_v61 }
 0x140   : > { %v3005_v33 = vpop.permute.xlu1 %3004  ;;  %v1596_v10 = vsel %vm1585_vm5, %v4704_v22, %v2991_v11  ;;  %v1597_v36 = vsel %vm1585_vm5, %v4705_v63, %v2992_v4 }
 0x141   : > { %v3000_v26 = vpop.permute.xlu0 %2999  ;;  %v3007_v60 = vunpack.i.h.bf16 %v3005_v33  ;;  %v3006_v38 = vunpack.i.l.bf16 %v3005_v33 }
 0x142   : > { %v3002_v55 = vunpack.i.h.bf16 %v3000_v26  ;;  %v3001_v12 = vunpack.i.l.bf16 %v3000_v26 }
 0x143   : > { %v1643_v8 = vsel %vm1618_vm6, %v1610_v20, %v3006_v38  ;;  %v1644_v7 = vsel %vm1618_vm6, %v1611_v50, %v3007_v60 }
 0x144   : > { %v3015_v1 = vpop.permute.xlu1 %3014  ;;  %v1627_v57 = vsel %vm1618_vm6, %v1594_v52, %v3001_v12  ;;  %v1628_v9 = vsel %vm1618_vm6, %v1595_v41, %v3002_v55 }
 0x145   : > { %v3010_v34 = vpop.permute.xlu0 %3009  ;;  %v3017_v29 = vunpack.i.h.bf16 %v3015_v1  ;;  %v3016_v31 = vunpack.i.l.bf16 %v3015_v1 }
 0x146   : > { %v3012_v5 = vunpack.i.h.bf16 %v3010_v34  ;;  %v3011_v30 = vunpack.i.l.bf16 %v3010_v34 }
 0x147   : > { %v1645_v49 = vsel %vm1618_vm6, %v1612_v53, %v3016_v31  ;;  %v1646_v45 = vsel %vm1618_vm6, %v1613_v3, %v3017_v29 }
 0x148   : > { %v3025_v40 = vpop.permute.xlu1 %3024  ;;  %v1629_v47 = vsel %vm1618_vm6, %v1596_v10, %v3011_v30  ;;  %v1630_v19 = vsel %vm1618_vm6, %v1597_v36, %v3012_v5 }
 0x149   : > { %v3020_v16 = vpop.permute.xlu0 %3019  ;;  %v3027_v46 = vunpack.i.h.bf16 %v3025_v40  ;;  %v3026_v37 = vunpack.i.l.bf16 %v3025_v40 }
 0x14a   : > { %v3022_v17 = vunpack.i.h.bf16 %v3020_v16  ;;  %v3021_v13 = vunpack.i.l.bf16 %v3020_v16 }
 0x14b   : > { %v1676_v0 = vsel %vm1651_vm7, %v1643_v8, %v3026_v37  ;;  %v1677_v44 = vsel %vm1651_vm7, %v1644_v7, %v3027_v46 }
 0x14c   : > { %v3035_v32 = vpop.permute.xlu1 %3034  ;;  %v1660_v33 = vsel %vm1651_vm7, %v1627_v57, %v3021_v13  ;;  %v1661_v26 = vsel %vm1651_vm7, %v1628_v9, %v3022_v17 }
 0x14d   : > { %v4348_v23 = vpop.permute.xlu0 %3029  ;;  %v3037_v39 = vunpack.i.h.bf16 %v3035_v32  ;;  %v3036_v62 = vunpack.i.l.bf16 %v3035_v32 }
 0x14e   : > { %v3032_v1 = vunpack.i.h.bf16 %v4348_v23  ;;  %v3031_v34 = vunpack.i.l.bf16 %v4348_v23 }
 0x14f   : > { %v1678_v40 = vsel %vm1651_vm7, %v1645_v49, %v3036_v62  ;;  %v1679_v16 = vsel %vm1651_vm7, %v1646_v45, %v3037_v39 }
 0x150   : > { %v3045_v35 = vpop.permute.xlu1 %3044  ;;  %v1662_v51 = vsel %vm1651_vm7, %v1629_v47, %v3031_v34  ;;  %v1663_v12 = vsel %vm1651_vm7, %v1630_v19, %v3032_v1  ;;  %v4706_v1 = vld [vmem:[#allocation28_spill] sm:$0xff] }
 0x151   : > { %v3040_v56 = vpop.permute.xlu0 %3039  ;;  %v3047_v42 = vunpack.i.h.bf16 %v3045_v35  ;;  %v3046_v24 = vunpack.i.l.bf16 %v3045_v35 }
 0x152   : > { %v3042_v2 = vunpack.i.h.bf16 %v3040_v56  ;;  %v3041_v54 = vunpack.i.l.bf16 %v3040_v56 }
 0x153   : > { %v1709_v25 = vsel %vm1684_vm8, %v1676_v0, %v3046_v24  ;;  %v1710_v48 = vsel %vm1684_vm8, %v1677_v44, %v3047_v42 }
 0x154   : > { %v3055_v18 = vpop.permute.xlu1 %3054  ;;  %v1693_v21 = vsel %vm1684_vm8, %v1660_v33, %v3041_v54  ;;  %v1694_v61 = vsel %vm1684_vm8, %v1661_v26, %v3042_v2 }
 0x155   : > { %v3050_v58 = vpop.permute.xlu0 %3049  ;;  %v3057_v32 = vunpack.i.h.bf16 %v3055_v18  ;;  %v3056_v60 = vunpack.i.l.bf16 %v3055_v18 }
 0x156   : > { %v3052_v43 = vunpack.i.h.bf16 %v3050_v58  ;;  %v3051_v20 = vunpack.i.l.bf16 %v3050_v58 }
 0x157   : > { %v1711_v22 = vsel %vm1684_vm8, %v1678_v40, %v3056_v60  ;;  %v1712_v10 = vsel %vm1684_vm8, %v1679_v16, %v3057_v32  ;;  %v4707_v40 = vld [vmem:[#allocation29_spill] sm:$0xff]  ;;  %v4711_v32 = vld [vmem:[#allocation27_spill] sm:$0xff] }
 0x158   : > { %v3065_v14 = vpop.permute.xlu1 %3064  ;;  %v1695_v35 = vsel %vm1684_vm8, %v1662_v51, %v3051_v20  ;;  %v1696_v8 = vsel %vm1684_vm8, %v1663_v12, %v3052_v43  ;;  %v4713_v43 = vld [vmem:[#allocation17_spill] sm:$0xff] }
 0x159   : > { %v3067_v6 = vunpack.i.h.bf16 %v3065_v14  ;;  %v3066_v4 = vunpack.i.l.bf16 %v3065_v14  ;;  %v3060_v11 = vpop.permute.xlu0 %3059  ;;  %v4709_v14 = vld [vmem:[#allocation19_spill] sm:$0xff] }
 0x15a   : > { %v3062_v38 = vunpack.i.h.bf16 %v3060_v11  ;;  %v3061_v23 = vunpack.i.l.bf16 %v3060_v11 }
 0x15b   : > { %v1742_v27 = vsel %vm1717_vm9, %v1709_v25, %v3066_v4  ;;  %v1743_v50 = vsel %vm1717_vm9, %v1710_v48, %v3067_v6  ;;  %v4708_v25 = vld [vmem:[#allocation18_spill] sm:$0xff] }
 0x15c   : > { %v1762_v52 = vpack.c.bf16 %v1743_v50, %v1742_v27  ;;  %v1726_v28 = vsel %vm1717_vm9, %v1693_v21, %v3061_v23  ;;  %v1727_v41 = vsel %vm1717_vm9, %v1694_v61, %v3062_v38  ;;  %v3075_v55 = vpop.permute.xlu1 %3074  ;;  %v4710_v4 = vld [vmem:[#allocation26_spill] sm:$0xff]  ;;  %v4712_v38 = vld [vmem:[#allocation16_spill] sm:$0xff] }
 0x15d   : > { %v1754_v15 = vpack.c.bf16 %v1727_v41, %v1726_v28  ;;  %v3077_v53 = vunpack.i.h.bf16 %v3075_v55  ;;  %v3076_v59 = vunpack.i.l.bf16 %v3075_v55  ;;  %v3070_v3 = vpop.permute.xlu0 %3069 }
 0x15e   : > { %v3072_v63 = vunpack.i.h.bf16 %v3070_v3  ;;  %v3071_v36 = vunpack.i.l.bf16 %v3070_v3  ;;  %2508 = vmatprep.mubr.msk.bf16.mxu1 %vm1788_vm10, %v1762_v52 }
 0x15f   : > { %v1744_v7 = vsel %vm1717_vm9, %v1711_v22, %v3076_v59  ;;  %v1745_v29 = vsel %vm1717_vm9, %v1712_v10, %v3077_v53  ;;  %2492 = vmatprep.mubr.msk.bf16.mxu0 %vm1788_vm10, %v1754_v15 }
 0x160   : > { %v1763_v31 = vpack.c.bf16 %v1745_v29, %v1744_v7  ;;  %v1728_v56 = vsel %vm1717_vm9, %v1695_v35, %v3071_v36  ;;  %v1729_v5 = vsel %vm1717_vm9, %v1696_v8, %v3072_v63  ;;  %v3085_v30 = vpop.permute.xlu1 %3084 }
 0x161   : > { %v1755_v46 = vpack.c.bf16 %v1729_v5, %v1728_v56  ;;  %v3080_v37 = vpop.permute.xlu0 %3079  ;;  %v3087_v18 = vunpack.i.h.bf16 %v3085_v30  ;;  %v3086_v49 = vunpack.i.l.bf16 %v3085_v30 }
 0x162   : > { %2509 = vmatmul.mubr.msk.bf16.gmra.mrb[8].mxu1 %vm1788_vm10, %v1763_v31  ;;  %v3082_v45 = vunpack.i.h.bf16 %v3080_v37  ;;  %v3081_v2 = vunpack.i.l.bf16 %v3080_v37 }
 0x163   : > { %2493 = vmatmul.mubr.msk.bf16.gmra.mrb[8].mxu0 %vm1788_vm10, %v1755_v46  ;;  %v1614_v34 = vsel %vm1585_vm5, %v4706_v1, %v3086_v49  ;;  %v1615_v16 = vsel %vm1585_vm5, %v4707_v40, %v3087_v18 }
 0x164   : > { %v3095_v57 = vpop.permute.xlu1 %3094  ;;  %v1598_v48 = vsel %vm1585_vm5, %v4708_v25, %v3081_v2  ;;  %v1599_v21 = vsel %vm1585_vm5, %v4709_v14, %v3082_v45 }
 0x165   : > { %v3090_v9 = vpop.permute.xlu0 %3089  ;;  %v3097_v54 = vunpack.i.h.bf16 %v3095_v57  ;;  %v3096_v58 = vunpack.i.l.bf16 %v3095_v57 }
 0x166   : > { %v3092_v47 = vunpack.i.h.bf16 %v3090_v9  ;;  %v3091_v19 = vunpack.i.l.bf16 %v3090_v9 }
 0x167   : > { %v1616_v11 = vsel %vm1585_vm5, %v4710_v4, %v3096_v58  ;;  %v1617_v60 = vsel %vm1585_vm5, %v4711_v32, %v3097_v54 }
 0x168   : > { %v3105_v17 = vpop.permute.xlu1 %3104  ;;  %v1600_v23 = vsel %vm1585_vm5, %v4712_v38, %v3091_v19  ;;  %v1601_v20 = vsel %vm1585_vm5, %v4713_v43, %v3092_v47 }
 0x169   : > { %v3100_v13 = vpop.permute.xlu0 %3099  ;;  %v3107_v44 = vunpack.i.h.bf16 %v3105_v17  ;;  %v3106_v33 = vunpack.i.l.bf16 %v3105_v17 }
 0x16a   : > { %v3102_v61 = vunpack.i.h.bf16 %v3100_v13  ;;  %v3101_v6 = vunpack.i.l.bf16 %v3100_v13 }
 0x16b   : > { %v1647_v50 = vsel %vm1618_vm6, %v1614_v34, %v3106_v33  ;;  %v1648_v51 = vsel %vm1618_vm6, %v1615_v16, %v3107_v44 }
 0x16c   : > { %v3115_v39 = vpop.permute.xlu1 %3114  ;;  %v1631_v59 = vsel %vm1618_vm6, %v1598_v48, %v3101_v6  ;;  %v1632_v3 = vsel %vm1618_vm6, %v1599_v21, %v3102_v61 }
 0x16d   : > { %v3110_v62 = vpop.permute.xlu0 %3109  ;;  %v3117_v52 = vunpack.i.h.bf16 %v3115_v39  ;;  %v3116_v28 = vunpack.i.l.bf16 %v3115_v39 }
 0x16e   : > { %v3112_v55 = vunpack.i.h.bf16 %v3110_v62  ;;  %v3111_v12 = vunpack.i.l.bf16 %v3110_v62 }
 0x16f   : > { %v1649_v29 = vsel %vm1618_vm6, %v1616_v11, %v3116_v28  ;;  %v1650_v31 = vsel %vm1618_vm6, %v1617_v60, %v3117_v52 }
 0x170   : > { %v3125_v42 = vpop.permute.xlu1 %3124  ;;  %v1633_v46 = vsel %vm1618_vm6, %v1600_v23, %v3111_v12  ;;  %v1634_v37 = vsel %vm1618_vm6, %v1601_v20, %v3112_v55 }
 0x171   : > { %v3120_v24 = vpop.permute.xlu0 %3119  ;;  %v3127_v15 = vunpack.i.h.bf16 %v3125_v42  ;;  %v3126_v53 = vunpack.i.l.bf16 %v3125_v42 }
 0x172   : > { %v3122_v22 = vunpack.i.h.bf16 %v3120_v24  ;;  %v3121_v10 = vunpack.i.l.bf16 %v3120_v24 }
 0x173   : > { %v1680_v57 = vsel %vm1651_vm7, %v1647_v50, %v3126_v53  ;;  %v1681_v9 = vsel %vm1651_vm7, %v1648_v51, %v3127_v15  ;;  %v4463_v15 = vld [vmem:[%s4636_s2] ss:$0 sm:$0xff] }
 0x174   : > { %v3135_v0 = vpop.permute.xlu1 %3134  ;;  %v1664_v17 = vsel %vm1651_vm7, %v1631_v59, %v3121_v10  ;;  %v1665_v13 = vsel %vm1651_vm7, %v1632_v3, %v3122_v22 }
 0x175   : > { %v4404_v26 = vpop.permute.xlu0 %3129  ;;  %v3137_v63 = vunpack.i.h.bf16 %v3135_v0  ;;  %v3136_v36 = vunpack.i.l.bf16 %v3135_v0 }
 0x176   : > { %v3132_v39 = vunpack.i.h.bf16 %v4404_v26  ;;  %v3131_v62 = vunpack.i.l.bf16 %v4404_v26 }
 0x177   : > { %v1682_v42 = vsel %vm1651_vm7, %v1649_v29, %v3136_v36  ;;  %v1683_v24 = vsel %vm1651_vm7, %v1650_v31, %v3137_v63 }
 0x178   : > { %v3145_v27 = vpop.permute.xlu1 %3144  ;;  %v1666_v25 = vsel %vm1651_vm7, %v1633_v46, %v3131_v62  ;;  %v1667_v6 = vsel %vm1651_vm7, %v1634_v37, %v3132_v39 }
 0x179   : > { %v3140_v41 = vpop.permute.xlu0 %3139  ;;  %v3147_v35 = vunpack.i.h.bf16 %v3145_v27  ;;  %v3146_v8 = vunpack.i.l.bf16 %v3145_v27 }
 0x17a   : > { %v3142_v56 = vunpack.i.h.bf16 %v3140_v41  ;;  %v3141_v5 = vunpack.i.l.bf16 %v3140_v41 }
 0x17b   : > { %v1713_v18 = vsel %vm1684_vm8, %v1680_v57, %v3146_v8  ;;  %v1714_v49 = vsel %vm1684_vm8, %v1681_v9, %v3147_v35 }
 0x17c   : > { %v3155_v7 = vpop.permute.xlu1 %3154  ;;  %v1697_v2 = vsel %vm1684_vm8, %v1664_v17, %v3141_v5  ;;  %v1698_v54 = vsel %vm1684_vm8, %v1665_v13, %v3142_v56 }
 0x17d   : > { %v3150_v30 = vpop.permute.xlu0 %3149  ;;  %v3157_v0 = vunpack.i.h.bf16 %v3155_v7  ;;  %v3156_v44 = vunpack.i.l.bf16 %v3155_v7 }
 0x17e   : > { %v3152_v1 = vunpack.i.h.bf16 %v3150_v30  ;;  %v3151_v34 = vunpack.i.l.bf16 %v3150_v30 }
 0x17f   : > { %v1715_v38 = vsel %vm1684_vm8, %v1682_v42, %v3156_v44  ;;  %v1716_v23 = vsel %vm1684_vm8, %v1683_v24, %v3157_v0 }
 0x180   : > { %v3165_v45 = vpop.permute.xlu1 %3164  ;;  %v1699_v27 = vsel %vm1684_vm8, %v1666_v25, %v3151_v34  ;;  %v1700_v50 = vsel %vm1684_vm8, %v1667_v6, %v3152_v1 }
 0x181   : > { %v3167_v58 = vunpack.i.h.bf16 %v3165_v45  ;;  %v3166_v47 = vunpack.i.l.bf16 %v3165_v45  ;;  %v3160_v19 = vpop.permute.xlu0 %3159 }
 0x182   : > { %v3162_v33 = vunpack.i.h.bf16 %v3160_v19  ;;  %v3161_v26 = vunpack.i.l.bf16 %v3160_v19 }
 0x183   : > { %v1746_v40 = vsel %vm1717_vm9, %v1713_v18, %v3166_v47  ;;  %v1747_v16 = vsel %vm1717_vm9, %v1714_v49, %v3167_v58 }
 0x184   : > { %v1764_v48 = vpack.c.bf16 %v1747_v16, %v1746_v40  ;;  %v1730_v14 = vsel %vm1717_vm9, %v1697_v2, %v3161_v26  ;;  %v1731_v21 = vsel %vm1717_vm9, %v1698_v54, %v3162_v33  ;;  %v3175_v61 = vpop.permute.xlu1 %3174 }
 0x185   : > { %v1756_v4 = vpack.c.bf16 %v1731_v21, %v1730_v14  ;;  %v3177_v11 = vunpack.i.h.bf16 %v3175_v61  ;;  %v3176_v32 = vunpack.i.l.bf16 %v3175_v61  ;;  %v3170_v60 = vpop.permute.xlu0 %3169 }
 0x186   : > { %v3172_v43 = vunpack.i.h.bf16 %v3170_v60  ;;  %v3171_v20 = vunpack.i.l.bf16 %v3170_v60  ;;  %2512 = vmatprep.mubr.msk.bf16.mxu1 %vm1788_vm10, %v1764_v48 }
 0x187   : > { %v1748_v51 = vsel %vm1717_vm9, %v1715_v38, %v3176_v32  ;;  %v1749_v52 = vsel %vm1717_vm9, %v1716_v23, %v3177_v11  ;;  %2496 = vmatprep.mubr.msk.bf16.mxu0 %vm1788_vm10, %v1756_v4 }
 0x188   : > { %v1765_v28 = vpack.c.bf16 %v1749_v52, %v1748_v51  ;;  %v1732_v41 = vsel %vm1717_vm9, %v1699_v27, %v3171_v20  ;;  %v1733_v55 = vsel %vm1717_vm9, %v1700_v50, %v3172_v43 }
 0x189   : > { %v1757_v12 = vpack.c.bf16 %v1733_v55, %v1732_v41 }
 0x18a   : > { %2513 = vmatmul.mubr.msk.bf16.gmra.mrb[12].mxu1 %vm1788_vm10, %v1765_v28 }
 0x18b   : > { %2497 = vmatmul.mubr.msk.bf16.gmra.mrb[12].mxu0 %vm1788_vm10, %v1757_v12 }
 0x1e5   : > { %v2502_v53 = vpop.f32.mrb[0].mxu1 }
 0x1e6   : > { %v2486_v59 = vpop.f32.mrb[0].mxu0  ;;  %v1951_v3 = vadd.f32 %v2502_v53, %v4463_v15  ;;  %v1942_v22 = vpop.f32.mrb[1].mxu1 }
 0x1e7   : > { %v1887_v10 = vadd.f32 %v2486_v59, %v4463_v15  ;;  %v1878_v63 = vpop.f32.mrb[1].mxu0  ;;  %v1943_v36 = vadd.f32 %v4463_v15, %v1942_v22  ;;  %v2503_v35 = vpop.f32.mrb[2].mxu1 }
 0x1e8   : > { %v2023_v8 = vmax.f32 %v1951_v3, 0.0  ;;  %v1879_v7 = vadd.f32 %v4463_v15, %v1878_v63  ;;  %v2487_v29 = vpop.f32.mrb[2].mxu0  ;;  %v1954_v31 = vadd.f32 %v2503_v35, %v4463_v15  ;;  %v1945_v56 = vpop.f32.mrb[3].mxu1 }
 0x1e9   : > { %v2007_v5 = vmax.f32 %v1887_v10, 0.0  ;;  %v2021_v30 = vmax.f32 %v1943_v36, 0.0  ;;  %v1890_v46 = vadd.f32 %v2487_v29, %v4463_v15  ;;  %v1881_v37 = vpop.f32.mrb[3].mxu0  ;;  %v1946_v57 = vadd.f32 %v4463_v15, %v1945_v56 }
 0x1ea   : > { %v2005_v9 = vmax.f32 %v1879_v7, 0.0  ;;  %v2024_v17 = vmax.f32 %v1954_v31, 0.0  ;;  %v1882_v13 = vadd.f32 %v4463_v15, %v1881_v37 }
 0x1eb   : > { %v2045_v39 = vmax.f32 %v2021_v30, %v2023_v8  ;;  %v2008_v62 = vmax.f32 %v1890_v46, 0.0  ;;  %v2022_v42 = vmax.f32 %v1946_v57, 0.0 }
 0x1ec   : > { %v2037_v24 = vmax.f32 %v2005_v9, %v2007_v5  ;;  %v2006_v18 = vmax.f32 %v1882_v13, 0.0 }
 0x1ed   : > { %v2065_v49 = vrot.slane %v2045_v39, 1  ;;  %v2046_v45 = vmax.f32 %v2022_v42, %v2024_v17 }
 0x1ee   : > { %v2061_v2 = vrot.slane %v2037_v24, 1  ;;  %v2038_v54 = vmax.f32 %v2006_v18, %v2008_v62 }
 0x1ef   : > { %v2081_v58 = vmax.f32 %v2045_v39, %v2065_v49  ;;  %v2133_v47 = vrot.slane %v2046_v45, 1 }
 0x1f0   : > { %v2077_v19 = vmax.f32 %v2037_v24, %v2061_v2  ;;  %v2129_v0 = vrot.slane %v2038_v54, 1 }
 0x1f1   : > { %2090 = vst.msk [vmem:[%s4477_s8 + $0x20] sm:$0x1] %vm2085_vm11, %v2081_v58  ;;  %v2149_v44 = vmax.f32 %v2046_v45, %v2133_v47 }
 0x1f2   : > { %2099 = vst.msk [vmem:[%s4477_s8 + $0x1f] sm:$0x4] %vm2094_vm12, %v2081_v58  ;;  %2095 = vst.msk [vmem:[%s4477_s8 - $0x1] sm:$0x4] %vm2094_vm12, %v2077_v19  ;;  %v2145_v33 = vmax.f32 %v2038_v54, %v2129_v0 }
 0x1f3   : > { %2108 = vst.msk [vmem:[%s4477_s8 + $0x1e] sm:$0x10] %vm2103_vm13, %v2081_v58  ;;  %2104 = vst.msk [vmem:[%s4477_s8 - $0x2] sm:$0x10] %vm2103_vm13, %v2077_v19 }
 0x1f4   : > { %2117 = vst.msk [vmem:[%s4477_s8 + $0x1d] sm:$0x40] %vm2112_vm14, %v2081_v58  ;;  %2113 = vst.msk [vmem:[%s4477_s8 - $0x3] sm:$0x40] %vm2112_vm14, %v2077_v19 }
 0x1f5   : > { %2086 = vst.msk [vmem:[%s4477_s8] sm:$0x1] %vm2085_vm11, %v2077_v19  ;;  %2157 = vst.msk [vmem:[%s4477_s8 + $0x24] sm:$0x1] %vm2085_vm11, %v2149_v44 }
 0x1f6   : > { %2165 = vst.msk [vmem:[%s4477_s8 + $0x23] sm:$0x4] %vm2094_vm12, %v2149_v44  ;;  %2161 = vst.msk [vmem:[%s4477_s8 + $0x3] sm:$0x4] %vm2094_vm12, %v2145_v33 }
 0x1f7   : > { %2173 = vst.msk [vmem:[%s4477_s8 + $0x22] sm:$0x10] %vm2103_vm13, %v2149_v44  ;;  %2169 = vst.msk [vmem:[%s4477_s8 + $0x2] sm:$0x10] %vm2103_vm13, %v2145_v33 }
 0x1f8   : > { %2181 = vst.msk [vmem:[%s4477_s8 + $0x21] sm:$0x40] %vm2112_vm14, %v2149_v44  ;;  %2177 = vst.msk [vmem:[%s4477_s8 + $0x1] sm:$0x40] %vm2112_vm14, %v2145_v33 }
 0x1f9   : > { %2153 = vst.msk [vmem:[%s4477_s8 + $0x4] sm:$0x1] %vm2085_vm11, %v2145_v33 }
 0x20d   : > { %v2506_v26 = vpop.f32.mrb[4].mxu1 }
 0x20e   : > { %v2490_v1 = vpop.f32.mrb[4].mxu0  ;;  %v1967_v34 = vadd.f32 %v2506_v26, %v4463_v15  ;;  %v1958_v40 = vpop.f32.mrb[5].mxu1 }
 0x20f   : > { %v1903_v16 = vadd.f32 %v2490_v1, %v4463_v15  ;;  %v1894_v25 = vpop.f32.mrb[5].mxu0  ;;  %v1959_v48 = vadd.f32 %v4463_v15, %v1958_v40  ;;  %v2507_v14 = vpop.f32.mrb[6].mxu1 }
 0x210   : > { %v2027_v21 = vmax.f32 %v1967_v34, 0.0  ;;  %v1895_v61 = vadd.f32 %v4463_v15, %v1894_v25  ;;  %v2491_v6 = vpop.f32.mrb[6].mxu0  ;;  %v1970_v4 = vadd.f32 %v2507_v14, %v4463_v15  ;;  %v1961_v11 = vpop.f32.mrb[7].mxu1 }
 0x211   : > { %v2011_v32 = vmax.f32 %v1903_v16, 0.0  ;;  %v2025_v60 = vmax.f32 %v1959_v48, 0.0  ;;  %v1906_v38 = vadd.f32 %v2491_v6, %v4463_v15  ;;  %v1897_v23 = vpop.f32.mrb[7].mxu0  ;;  %v1962_v43 = vadd.f32 %v4463_v15, %v1961_v11 }
 0x212   : > { %v2009_v20 = vmax.f32 %v1895_v61, 0.0  ;;  %v2028_v27 = vmax.f32 %v1970_v4, 0.0  ;;  %v1898_v50 = vadd.f32 %v4463_v15, %v1897_v23 }
 0x213   : > { %v2047_v51 = vmax.f32 %v2025_v60, %v2027_v21  ;;  %v2012_v52 = vmax.f32 %v1906_v38, 0.0  ;;  %v2026_v28 = vmax.f32 %v1962_v43, 0.0 }
 0x214   : > { %v2039_v41 = vmax.f32 %v2009_v20, %v2011_v32  ;;  %v2010_v55 = vmax.f32 %v1898_v50, 0.0 }
 0x215   : > { %v2066_v12 = vrot.slane %v2047_v51, 1  ;;  %v2048_v53 = vmax.f32 %v2026_v28, %v2028_v27 }
 0x216   : > { %v2062_v59 = vrot.slane %v2039_v41, 1  ;;  %v2040_v3 = vmax.f32 %v2010_v55, %v2012_v52 }
 0x217   : > { %v2082_v22 = vmax.f32 %v2047_v51, %v2066_v12  ;;  %v2134_v10 = vrot.slane %v2048_v53, 1 }
 0x218   : > { %v2078_v63 = vmax.f32 %v2039_v41, %v2062_v59  ;;  %v2130_v36 = vrot.slane %v2040_v3, 1 }
 0x219   : > { %2091 = vst.msk [vmem:[%s4477_s8 + $0x28] sm:$0x1] %vm2085_vm11, %v2082_v22  ;;  %v2150_v35 = vmax.f32 %v2048_v53, %v2134_v10 }
 0x21a   : > { %2100 = vst.msk [vmem:[%s4477_s8 + $0x27] sm:$0x4] %vm2094_vm12, %v2082_v22  ;;  %2096 = vst.msk [vmem:[%s4477_s8 + $0x7] sm:$0x4] %vm2094_vm12, %v2078_v63  ;;  %v2146_v8 = vmax.f32 %v2040_v3, %v2130_v36 }
 0x21b   : > { %2109 = vst.msk [vmem:[%s4477_s8 + $0x26] sm:$0x10] %vm2103_vm13, %v2082_v22  ;;  %2105 = vst.msk [vmem:[%s4477_s8 + $0x6] sm:$0x10] %vm2103_vm13, %v2078_v63 }
 0x21c   : > { %2118 = vst.msk [vmem:[%s4477_s8 + $0x25] sm:$0x40] %vm2112_vm14, %v2082_v22  ;;  %2114 = vst.msk [vmem:[%s4477_s8 + $0x5] sm:$0x40] %vm2112_vm14, %v2078_v63 }
 0x21d   : > { %2087 = vst.msk [vmem:[%s4477_s8 + $0x8] sm:$0x1] %vm2085_vm11, %v2078_v63  ;;  %2158 = vst.msk [vmem:[%s4477_s8 + $0x2c] sm:$0x1] %vm2085_vm11, %v2150_v35 }
 0x21e   : > { %2166 = vst.msk [vmem:[%s4477_s8 + $0x2b] sm:$0x4] %vm2094_vm12, %v2150_v35  ;;  %2162 = vst.msk [vmem:[%s4477_s8 + $0xb] sm:$0x4] %vm2094_vm12, %v2146_v8 }
 0x21f   : > { %2174 = vst.msk [vmem:[%s4477_s8 + $0x2a] sm:$0x10] %vm2103_vm13, %v2150_v35  ;;  %2170 = vst.msk [vmem:[%s4477_s8 + $0xa] sm:$0x10] %vm2103_vm13, %v2146_v8 }
 0x220   : > { %2182 = vst.msk [vmem:[%s4477_s8 + $0x29] sm:$0x40] %vm2112_vm14, %v2150_v35  ;;  %2178 = vst.msk [vmem:[%s4477_s8 + $0x9] sm:$0x40] %vm2112_vm14, %v2146_v8 }
 0x221   : > { %2154 = vst.msk [vmem:[%s4477_s8 + $0xc] sm:$0x1] %vm2085_vm11, %v2146_v8 }
 0x235   : > { %v2510_v7 = vpop.f32.mrb[8].mxu1 }
 0x236   : > { %v2494_v29 = vpop.f32.mrb[8].mxu0  ;;  %v1983_v31 = vadd.f32 %v2510_v7, %v4463_v15  ;;  %v1974_v56 = vpop.f32.mrb[9].mxu1 }
 0x237   : > { %v1919_v5 = vadd.f32 %v2494_v29, %v4463_v15  ;;  %v1910_v30 = vpop.f32.mrb[9].mxu0  ;;  %v1975_v46 = vadd.f32 %v4463_v15, %v1974_v56  ;;  %v2511_v37 = vpop.f32.mrb[10].mxu1 }
 0x238   : > { %v2031_v57 = vmax.f32 %v1983_v31, 0.0  ;;  %v1911_v9 = vadd.f32 %v4463_v15, %v1910_v30  ;;  %v2495_v17 = vpop.f32.mrb[10].mxu0  ;;  %v1986_v13 = vadd.f32 %v2511_v37, %v4463_v15  ;;  %v1977_v39 = vpop.f32.mrb[11].mxu1 }
 0x239   : > { %v2015_v62 = vmax.f32 %v1919_v5, 0.0  ;;  %v2029_v42 = vmax.f32 %v1975_v46, 0.0  ;;  %v1922_v24 = vadd.f32 %v2495_v17, %v4463_v15  ;;  %v1913_v18 = vpop.f32.mrb[11].mxu0  ;;  %v1978_v49 = vadd.f32 %v4463_v15, %v1977_v39 }
 0x23a   : > { %v2013_v45 = vmax.f32 %v1911_v9, 0.0  ;;  %v2032_v2 = vmax.f32 %v1986_v13, 0.0  ;;  %v1914_v54 = vadd.f32 %v4463_v15, %v1913_v18 }
 0x23b   : > { %v2049_v58 = vmax.f32 %v2029_v42, %v2031_v57  ;;  %v2016_v47 = vmax.f32 %v1922_v24, 0.0  ;;  %v2030_v19 = vmax.f32 %v1978_v49, 0.0 }
 0x23c   : > { %v2041_v0 = vmax.f32 %v2013_v45, %v2015_v62  ;;  %v2014_v44 = vmax.f32 %v1914_v54, 0.0 }
 0x23d   : > { %v2067_v33 = vrot.slane %v2049_v58, 1  ;;  %v2050_v26 = vmax.f32 %v2030_v19, %v2032_v2 }
 0x23e   : > { %v2063_v1 = vrot.slane %v2041_v0, 1  ;;  %v2042_v34 = vmax.f32 %v2014_v44, %v2016_v47 }
 0x23f   : > { %v2083_v40 = vmax.f32 %v2049_v58, %v2067_v33  ;;  %v2135_v16 = vrot.slane %v2050_v26, 1 }
 0x240   : > { %v2079_v25 = vmax.f32 %v2041_v0, %v2063_v1  ;;  %v2131_v48 = vrot.slane %v2042_v34, 1 }
 0x241   : > { %2092 = vst.msk [vmem:[%s4477_s8 + $0x30] sm:$0x1] %vm2085_vm11, %v2083_v40  ;;  %v2151_v14 = vmax.f32 %v2050_v26, %v2135_v16 }
 0x242   : > { %2101 = vst.msk [vmem:[%s4477_s8 + $0x2f] sm:$0x4] %vm2094_vm12, %v2083_v40  ;;  %2097 = vst.msk [vmem:[%s4477_s8 + $0xf] sm:$0x4] %vm2094_vm12, %v2079_v25  ;;  %v2147_v21 = vmax.f32 %v2042_v34, %v2131_v48 }
 0x243   : > { %2110 = vst.msk [vmem:[%s4477_s8 + $0x2e] sm:$0x10] %vm2103_vm13, %v2083_v40  ;;  %2106 = vst.msk [vmem:[%s4477_s8 + $0xe] sm:$0x10] %vm2103_vm13, %v2079_v25 }
 0x244   : > { %2119 = vst.msk [vmem:[%s4477_s8 + $0x2d] sm:$0x40] %vm2112_vm14, %v2083_v40  ;;  %2115 = vst.msk [vmem:[%s4477_s8 + $0xd] sm:$0x40] %vm2112_vm14, %v2079_v25 }
 0x245   : > { %2088 = vst.msk [vmem:[%s4477_s8 + $0x10] sm:$0x1] %vm2085_vm11, %v2079_v25  ;;  %2159 = vst.msk [vmem:[%s4477_s8 + $0x34] sm:$0x1] %vm2085_vm11, %v2151_v14 }
 0x246   : > { %2167 = vst.msk [vmem:[%s4477_s8 + $0x33] sm:$0x4] %vm2094_vm12, %v2151_v14  ;;  %2163 = vst.msk [vmem:[%s4477_s8 + $0x13] sm:$0x4] %vm2094_vm12, %v2147_v21 }
 0x247   : > { %2175 = vst.msk [vmem:[%s4477_s8 + $0x32] sm:$0x10] %vm2103_vm13, %v2151_v14  ;;  %2171 = vst.msk [vmem:[%s4477_s8 + $0x12] sm:$0x10] %vm2103_vm13, %v2147_v21 }
 0x248   : > { %2183 = vst.msk [vmem:[%s4477_s8 + $0x31] sm:$0x40] %vm2112_vm14, %v2151_v14  ;;  %2179 = vst.msk [vmem:[%s4477_s8 + $0x11] sm:$0x40] %vm2112_vm14, %v2147_v21 }
 0x249   : > { %2155 = vst.msk [vmem:[%s4477_s8 + $0x14] sm:$0x1] %vm2085_vm11, %v2147_v21 }
 0x25d   : > { %v2514_v61 = vpop.f32.mrb[12].mxu1 }
 0x25e   : > { %v2498_v6 = vpop.f32.mrb[12].mxu0  ;;  %v1999_v4 = vadd.f32 %v2514_v61, %v4463_v15  ;;  %v1990_v11 = vpop.f32.mrb[13].mxu1 }
 0x25f   : > { %v1935_v32 = vadd.f32 %v2498_v6, %v4463_v15  ;;  %v1926_v60 = vpop.f32.mrb[13].mxu0  ;;  %v1991_v38 = vadd.f32 %v4463_v15, %v1990_v11  ;;  %v2515_v23 = vpop.f32.mrb[14].mxu1 }
 0x260   : > { %v2035_v43 = vmax.f32 %v1999_v4, 0.0  ;;  %v1927_v20 = vadd.f32 %v4463_v15, %v1926_v60  ;;  %v2499_v27 = vpop.f32.mrb[14].mxu0  ;;  %v2002_v50 = vadd.f32 %v2515_v23, %v4463_v15  ;;  %v1993_v51 = vpop.f32.mrb[15].mxu1 }
 0x261   : > { %v2019_v52 = vmax.f32 %v1935_v32, 0.0  ;;  %v2033_v28 = vmax.f32 %v1991_v38, 0.0  ;;  %v1938_v41 = vadd.f32 %v2499_v27, %v4463_v15  ;;  %v1929_v55 = vpop.f32.mrb[15].mxu0  ;;  %v1994_v12 = vadd.f32 %v4463_v15, %v1993_v51 }
 0x262   : > { %v2017_v53 = vmax.f32 %v1927_v20, 0.0  ;;  %v2036_v59 = vmax.f32 %v2002_v50, 0.0  ;;  %v1930_v3 = vadd.f32 %v4463_v15, %v1929_v55 }
 0x263   : > { %v2051_v22 = vmax.f32 %v2033_v28, %v2035_v43  ;;  %v2020_v10 = vmax.f32 %v1938_v41, 0.0  ;;  %v2034_v63 = vmax.f32 %v1994_v12, 0.0 }
 0x264   : > { %v2043_v36 = vmax.f32 %v2017_v53, %v2019_v52  ;;  %v2018_v35 = vmax.f32 %v1930_v3, 0.0 }
 0x265   : > { %v2068_v8 = vrot.slane %v2051_v22, 1  ;;  %v2052_v7 = vmax.f32 %v2034_v63, %v2036_v59 }
 0x266   : > { %v2064_v29 = vrot.slane %v2043_v36, 1  ;;  %v2044_v31 = vmax.f32 %v2018_v35, %v2020_v10 }
 0x267   : > { %v2084_v56 = vmax.f32 %v2051_v22, %v2068_v8  ;;  %v2136_v15 = vrot.slane %v2052_v7, 1 }
 0x268   : > { %v2080_v5 = vmax.f32 %v2043_v36, %v2064_v29  ;;  %v2132_v30 = vrot.slane %v2044_v31, 1 }
 0x269   : > { %2093 = vst.msk [vmem:[%s4477_s8 + $0x38] sm:$0x1] %vm2085_vm11, %v2084_v56  ;;  %v2152_v46 = vmax.f32 %v2052_v7, %v2136_v15 }
 0x26a   : > { %2102 = vst.msk [vmem:[%s4477_s8 + $0x37] sm:$0x4] %vm2094_vm12, %v2084_v56  ;;  %2098 = vst.msk [vmem:[%s4477_s8 + $0x17] sm:$0x4] %vm2094_vm12, %v2080_v5  ;;  %v2148_v37 = vmax.f32 %v2044_v31, %v2132_v30 }
 0x26b   : > { %2111 = vst.msk [vmem:[%s4477_s8 + $0x36] sm:$0x10] %vm2103_vm13, %v2084_v56  ;;  %2107 = vst.msk [vmem:[%s4477_s8 + $0x16] sm:$0x10] %vm2103_vm13, %v2080_v5 }
 0x26c   : > { %2120 = vst.msk [vmem:[%s4477_s8 + $0x35] sm:$0x40] %vm2112_vm14, %v2084_v56  ;;  %2116 = vst.msk [vmem:[%s4477_s8 + $0x15] sm:$0x40] %vm2112_vm14, %v2080_v5 }
 0x26d   : > { %2089 = vst.msk [vmem:[%s4477_s8 + $0x18] sm:$0x1] %vm2085_vm11, %v2080_v5  ;;  %2160 = vst.msk [vmem:[%s4477_s8 + $0x3c] sm:$0x1] %vm2085_vm11, %v2152_v46 }
 0x26e   : > { %2168 = vst.msk [vmem:[%s4477_s8 + $0x3b] sm:$0x4] %vm2094_vm12, %v2152_v46  ;;  %2164 = vst.msk [vmem:[%s4477_s8 + $0x1b] sm:$0x4] %vm2094_vm12, %v2148_v37 }
 0x26f   : > { %2176 = vst.msk [vmem:[%s4477_s8 + $0x3a] sm:$0x10] %vm2103_vm13, %v2152_v46  ;;  %2172 = vst.msk [vmem:[%s4477_s8 + $0x1a] sm:$0x10] %vm2103_vm13, %v2148_v37 }
 0x270   : > { %2184 = vst.msk [vmem:[%s4477_s8 + $0x39] sm:$0x40] %vm2112_vm14, %v2152_v46  ;;  %2180 = vst.msk [vmem:[%s4477_s8 + $0x19] sm:$0x40] %vm2112_vm14, %v2148_v37 }
 0x271   : > { %2156 = vst.msk [vmem:[%s4477_s8 + $0x1c] sm:$0x1] %vm2085_vm11, %v2148_v37 }
 0x272 PF: > { %s13_s12 = sadd.s32 1, %s3194_s12  }
 0x273   : > { %p10_p4 = scmp.ge.s32.totalorder %s13_s12, 4  }
 0x275   :  { %12 = sbr.rel (!%p10_p4) target bundleno = 1 (0x1), region = 64 }

// kernel: _lambda_.4
= control target key start
LH: loop header
LB: loop body
LE: loop exit
PB: predicated region body
PF: predicated region fallthrough
CT: control target
= control target key end

     0   :  { %s4815_s30 = smov 0   ;;  %s6523_s0 = inlined_call_operand.vmem [shape: f32[2,8,8,64], index: 0, kind: input, shape index: {}]   ;;  %s6524_s1 = inlined_call_operand.vmem [shape: bf16[64,176], index: 1, kind: input, shape index: {}]   ;;  %s6525_s2 = inlined_call_operand.vmem [shape: f32[1,176], index: 2, kind: input, shape index: {}]   ;;  %s6526_s3 = inlined_call_operand.vmem [shape: bf16[864,128], index: 3, kind: input, shape index: {}]   ;;  %s6527_s4 = inlined_call_operand.vmem [shape: f32[1,128], index: 4, kind: input, shape index: {}]   ;;  %s6528_s5 = inlined_call_operand.vmem [shape: bf16[400,32], index: 5, kind: input, shape index: {}]   ;;  %s6529_s6 = inlined_call_operand.vmem [shape: f32[1,32], index: 6, kind: input, shape index: {}]   ;;  %s6530_s7 = inlined_call_operand.vmem [shape: bf16[64,32], index: 7, kind: input, shape index: {}]   ;;  %s6531_s8 = inlined_call_operand.vmem [shape: f32[1,32], index: 8, kind: input, shape index: {}]   ;;  %s6532_s9 = inlined_call_operand.vmem [shape: bf16[2,8,8,256], index: 9, kind: output, shape index: {}]  }
   0x1 LB: > { %s3676_s10 = sadd.s32 4294967295, %s4753_s30   ;;  %p3680_p0 = scmp.ge.s32.totalorder %s4753_s30, 1  ;;  %s4753_s30 = sphi %s4815_s30, %s19_s30  }
   0x2   : > { %p287_p1 = scmp.lt.s32.totalorder %s4753_s30, 3 }
   0x4   : > { %p288_p2 = pnand %p3680_p0, %p287_p1 }
   0x6   : > { %291 = sbr.rel (%p288_p2) target bundleno = 1059 (0x423), region = 56 }
   0xd   : > { %v4647_v0 = vld [vmem:[%s6524_s1 + $0x4] ss:$8 sps:$4 sm:$0xff]   ;;  %p323_p3 = scmp.lt.s32.totalorder %s3676_s10, 1  ;;  %v4649_v1 = vld [vmem:[%s6524_s1] ss:$8 sps:$4 sm:$0xff]   ;;  %v6541_v2 = vmov 0   ;;  %v356_v35 = vlaneseq }
   0xe   : > { %451 = vmatprep.mubr.bf16.mxu0 %v6541_v2  ;;  %vm406_vm0 = vcmask 523264   ;;  %419 = vmatprep.subr.bf16.mxu0 %v4647_v0  ;;  %v4650_v3 = vld [vmem:[%s6524_s1 + $0x14] ss:$8 sps:$4 sm:$0xff]   ;;  %v4756_v4 = vmov -inf   ;;  %v4652_v5 = vld [vmem:[%s6524_s1 + $0x10] ss:$8 sps:$4 sm:$0xff]  }
   0xf   : > { %s6632_s10 = smov (!%p323_p3, %s3676_s10), 1  ;;  %3142 = vst.msk [vmem:[#allocation4] sm:$0xff] %vm406_vm0, %v4756_v4  ;;  %3145 = vst.msk [vmem:[#allocation4 + $0x10] sm:$0xff] %vm406_vm0, %v4756_v4  ;;  %420 = vmatpush1.bf16.msra.mxu0 %v4649_v1  ;;  %vm3143_vm1 = vcmask 517120   ;;  %v4653_v6 = vld [vmem:[%s6524_s1 + $0x24] ss:$8 sps:$4 sm:$0xff]  }
  0x10   : > { %3147 = vst.msk [vmem:[#allocation4 + $0x20] sm:$0xff] %vm406_vm0, %v4756_v4  ;;  %3149 = vst.msk [vmem:[#allocation4 + $0x30] sm:$0xff] %vm406_vm0, %v4756_v4  ;;  %421 = vmatprep.subr.bf16.mxu0 %v4650_v3  ;;  %s3805_s21 = sshll.u32 %s6632_s10, 6  ;;  %v4655_v7 = vld [vmem:[%s6524_s1 + $0x20] ss:$8 sps:$4 sm:$0xff]   ;;  %vm1664_vm2 = vcmask 130048  }
  0x11   : > { %3151 = vst.msk [vmem:[#allocation4 + $0x40] sm:$0xff] %vm406_vm0, %v4756_v4  ;;  %3153 = vst.msk [vmem:[#allocation4 + $0x50] sm:$0xff] %vm406_vm0, %v4756_v4  ;;  %s4860_s26 = scalar_lea.vmem %s6523_s0, %s3805_s21  ;;  %vm1666_vm3 = vcmask 125952   ;;  %v4757_v11 = vmov 0.0   ;;  %v4656_v15 = vld [vmem:[%s6524_s1 + $0x34] ss:$8 sps:$4 sm:$0xff]   ;;  %s6476_s24 = scalar_lea.vmem %s6532_s9, %s3805_s21 }
  0x12   : > { %3155 = vst.msk [vmem:[#allocation4 + $0x60] sm:$0xff] %vm406_vm0, %v4756_v4  ;;  %3157 = vst.msk [vmem:[#allocation4 + $0x70] sm:$0xff] %vm406_vm0, %v4756_v4  ;;  %v4863_v8 = vld [vmem:[%s4860_s26] sm:$0xff]  ;;  %v4866_v9 = vld [vmem:[%s4860_s26 + $0x8] sm:$0xff]  ;;  %s4758_s12 = smov 16   ;;  %s4759_s13 = smov 32  }
  0x13   : > { %3159 = vst.msk [vmem:[#allocation4 + $0x80] sm:$0xff] %vm406_vm0, %v4756_v4  ;;  %3161 = vst.msk [vmem:[#allocation4 + $0x90] sm:$0xff] %vm406_vm0, %v4756_v4  ;;  %v4869_v10 = vld [vmem:[%s4860_s26 + $0x10] sm:$0xff]  ;;  %422 = vmatpush1.bf16.msra.mxu0 %v4652_v5  ;;  %v4924_v12 = vld [vmem:[%s4860_s26 + $0x18] sm:$0xff]  ;;  %v342_v21 = vpack.c.bf16 %v4866_v9, %v4863_v8  ;;  %s4760_s14 = smov 48   ;;  %s4761_s15 = smov 64  }
  0x14   : > { %3144 = vst.msk [vmem:[#allocation4 + $0x8] sm:$0x3] %vm3143_vm1, %v4756_v4  ;;  %3146 = vst.msk [vmem:[#allocation4 + $0x18] sm:$0x3] %vm3143_vm1, %v4756_v4  ;;  %v4929_v13 = vld [vmem:[%s4860_s26 + $0x20] sm:$0xff]  ;;  %v4932_v14 = vld [vmem:[%s4860_s26 + $0x28] sm:$0xff]  ;;  %423 = vmatprep.subr.bf16.mxu0 %v4653_v6  ;;  %v343_v25 = vpack.c.bf16 %v4924_v12, %v4869_v10 }
  0x15   : > { %3148 = vst.msk [vmem:[#allocation4 + $0x28] sm:$0x3] %vm3143_vm1, %v4756_v4  ;;  %3150 = vst.msk [vmem:[#allocation4 + $0x38] sm:$0x3] %vm3143_vm1, %v4756_v4  ;;  %v4944_v16 = vld [vmem:[%s4860_s26 + $0x30] sm:$0xff]  ;;  %v4947_v17 = vld [vmem:[%s4860_s26 + $0x38] sm:$0xff]  ;;  %v344_v33 = vpack.c.bf16 %v4932_v14, %v4929_v13 }
  0x16   : > { %3152 = vst.msk [vmem:[#allocation4 + $0x48] sm:$0x3] %vm3143_vm1, %v4756_v4  ;;  %3154 = vst.msk [vmem:[#allocation4 + $0x58] sm:$0x3] %vm3143_vm1, %v4756_v4  ;;  %v4658_v18 = vld [vmem:[%s6524_s1 + $0x30] ss:$8 sps:$4 sm:$0xff]   ;;  %v345_v34 = vpack.c.bf16 %v4947_v17, %v4944_v16 }
  0x17   : > { %3156 = vst.msk [vmem:[#allocation4 + $0x68] sm:$0x3] %vm3143_vm1, %v4756_v4  ;;  %3158 = vst.msk [vmem:[#allocation4 + $0x78] sm:$0x3] %vm3143_vm1, %v4756_v4  ;;  %424 = vmatpush1.bf16.msra.mxu0 %v4655_v7  ;;  %v357_v36 = vshrl.u32 %v356_v35, 7  ;;  %vm508_vm4 = vcmask 785408  }
  0x18   : > { %3160 = vst.msk [vmem:[#allocation4 + $0x88] sm:$0x3] %vm3143_vm1, %v4756_v4  ;;  %3162 = vst.msk [vmem:[#allocation4 + $0x98] sm:$0x3] %vm3143_vm1, %v4756_v4  ;;  %425 = vmatprep.subr.bf16.mxu0 %v4656_v15  ;;  %vm510_vm5 = vcmask 779264   ;;  %s4762_s18 = smov 96  }
  0x19   : > { %1665 = vst.msk [vmem:[#allocation3] sm:$0xff] %vm1664_vm2, %v4757_v11  ;;  %1668 = vst.msk [vmem:[#allocation3 + $0x10] sm:$0xff] %vm1664_vm2, %v4757_v11  ;;  %v358_v37 = vsub.s32 0, %v357_v36  ;;  %v354_v38 = vld [vmem:[%s6525_s2] sm:$0x3]  ;;  %v362_v39 = vsub.s32 1, %v357_v36 }
  0x1a   : > { %1667 = vst.msk [vmem:[#allocation3 + $0x8] sm:$0xf] %vm1666_vm3, %v4757_v11  ;;  %1669 = vst.msk [vmem:[#allocation3 + $0x18] sm:$0xf] %vm1666_vm3, %v4757_v11  ;;  %s4763_s23 = smov 80   ;;  %s4764_s17 = smov 112  }
  0x1b   : > { %1670 = vst.msk [vmem:[#allocation3 + $0x20] sm:$0xff] %vm1664_vm2, %v4757_v11  ;;  %1672 = vst.msk [vmem:[#allocation3 + $0x30] sm:$0xff] %vm1664_vm2, %v4757_v11  ;;  %426 = vmatpush1.bf16.msra.mxu0 %v4658_v18  ;;  %v5027_v40 = vrot.slane %v354_v38, %v358_v37  ;;  %v5029_v41 = vrot.slane %v354_v38, %v362_v39  ;;  %v4659_v39 = vld [vmem:[%s6526_s3 + $0x40] sm:$0xff]   ;;  %vm884_vm6 = vcmask 261120   ;;  %vm2390_vm7 = vcmask 392192  }
  0x1c   : > { %1671 = vst.msk [vmem:[#allocation3 + $0x28] sm:$0xf] %vm1666_vm3, %v4757_v11  ;;  %1673 = vst.msk [vmem:[#allocation3 + $0x38] sm:$0xf] %vm1666_vm3, %v4757_v11  ;;  %3815 = vmatprep.subr.bf16.mxu1 %v4659_v39  ;;  %v4678_v39 = vld [vmem:[%s6526_s3 + $0x38] sm:$0xff]   ;;  %vm2407_vm8 = vcmask 654336  }
  0x1d   : > { %1674 = vst.msk [vmem:[#allocation3 + $0x40] sm:$0xff] %vm1664_vm2, %v4757_v11  ;;  %1676 = vst.msk [vmem:[#allocation3 + $0x50] sm:$0xff] %vm1664_vm2, %v4757_v11  ;;  %vm2424_vm9 = vcmask 916480  }
  0x1e   : > { %1675 = vst.msk [vmem:[#allocation3 + $0x48] sm:$0xf] %vm1666_vm3, %v4757_v11  ;;  %1677 = vst.msk [vmem:[#allocation3 + $0x58] sm:$0xf] %vm1666_vm3, %v4757_v11  ;;  %3693 = vmatmul.mubr.msk.bf16.vlgmr.msra.gmra.mrb[0].mxu0 %vm406_vm0, %v342_v21 }
  0x1f   : > { %1678 = vst.msk [vmem:[#allocation3 + $0x60] sm:$0xff] %vm1664_vm2, %v4757_v11  ;;  %1680 = vst.msk [vmem:[#allocation3 + $0x70] sm:$0xff] %vm1664_vm2, %v4757_v11  ;;  %461 = vmatprep.mubr.bf16.mxu0 %v6541_v2 }
  0x20   : > { %1679 = vst.msk [vmem:[#allocation3 + $0x68] sm:$0xf] %vm1666_vm3, %v4757_v11  ;;  %1681 = vst.msk [vmem:[#allocation3 + $0x78] sm:$0xf] %vm1666_vm3, %v4757_v11 }
  0x21   : > { %1682 = vst.msk [vmem:[#allocation3 + $0x80] sm:$0xff] %vm1664_vm2, %v4757_v11  ;;  %1684 = vst.msk [vmem:[#allocation3 + $0x90] sm:$0xff] %vm1664_vm2, %v4757_v11  ;;  %v1731_v19 = vld [vmem:[#allocation3 + $0x1] sm:$0xff]  ;;  %v4956_v20 = vld [vmem:[#allocation3 + $0x11] sm:$0xff] }
  0x22   : > { %1683 = vst.msk [vmem:[#allocation3 + $0x88] sm:$0xf] %vm1666_vm3, %v4757_v11  ;;  %1685 = vst.msk [vmem:[#allocation3 + $0x98] sm:$0xf] %vm1666_vm3, %v4757_v11  ;;  %v4047_v22 = vpack.i.bf16 %v4956_v20, %v1731_v19  ;;  %v1739_v23 = vld [vmem:[#allocation3 + $0x2] sm:$0xff]  ;;  %v4964_v24 = vld [vmem:[#allocation3 + $0x12] sm:$0xff] }
  0x23   : > { %1686 = vst.msk [vmem:[#allocation3 + $0xa0] sm:$0xff] %vm1664_vm2, %v4757_v11  ;;  %1688 = vst.msk [vmem:[#allocation3 + $0xb0] sm:$0xff] %vm1664_vm2, %v4757_v11  ;;  %v1747_v26 = vld [vmem:[#allocation3 + $0x3] sm:$0xff]  ;;  %v1748_v27 = vld [vmem:[#allocation3 + $0x13] sm:$0xff]  ;;  %v4052_v28 = vpack.i.bf16 %v4964_v24, %v1739_v23 }
  0x24   : > { %1687 = vst.msk [vmem:[#allocation3 + $0xa8] sm:$0xf] %vm1666_vm3, %v4757_v11  ;;  %1689 = vst.msk [vmem:[#allocation3 + $0xb8] sm:$0xf] %vm1666_vm3, %v4757_v11  ;;  %4048 = vrot.lane.b32.xlu1 %v4047_v22, %s4758_s12  ;;  %v1755_v29 = vld [vmem:[#allocation3 + $0x4] sm:$0xff]  ;;  %v4969_v30 = vld [vmem:[#allocation3 + $0x14] sm:$0xff]  ;;  %v4057_v31 = vpack.i.bf16 %v1748_v27, %v1747_v26 }
  0x25   : > { %3164 = vst.msk [vmem:[#allocation4 + $0x11] sm:$0xff] %vm406_vm0, %v4863_v8  ;;  %3165 = vst.msk [vmem:[#allocation4 + $0x21] sm:$0xff] %vm406_vm0, %v4866_v9  ;;  %v4062_v32 = vpack.i.bf16 %v4969_v30, %v1755_v29 }
  0x26   : > { %3166 = vst.msk [vmem:[#allocation4 + $0x31] sm:$0xff] %vm406_vm0, %v4869_v10  ;;  %3167 = vst.msk [vmem:[#allocation4 + $0x41] sm:$0xff] %vm406_vm0, %v4924_v12  ;;  %3694 = vmatmul.mubr.msk.bf16.gmra.mrb[4].mxu0 %vm406_vm0, %v343_v25 }
  0x27   : > { %3168 = vst.msk [vmem:[#allocation4 + $0x51] sm:$0xff] %vm406_vm0, %v4929_v13  ;;  %3169 = vst.msk [vmem:[#allocation4 + $0x61] sm:$0xff] %vm406_vm0, %v4932_v14  ;;  %471 = vmatprep.mubr.bf16.mxu0 %v6541_v2 }
  0x28   : > { %3170 = vst.msk [vmem:[#allocation4 + $0x71] sm:$0xff] %vm406_vm0, %v4944_v16  ;;  %3171 = vst.msk [vmem:[#allocation4 + $0x81] sm:$0xff] %vm406_vm0, %v4947_v17  ;;  %4053 = vrot.lane.b32.xlu1 %v4052_v28, %s4759_s13 }
  0x29   : > { %512 = vst.msk [vmem:[#allocation2 + $0x10] sm:$0xff] %vm508_vm4, %v4757_v11  ;;  %509 = vst.msk [vmem:[#allocation2] sm:$0xff] %vm508_vm4, %v4757_v11 }
  0x2a   : > { %513 = vst.msk [vmem:[#allocation2 + $0x18] sm:$0x3] %vm510_vm5, %v4757_v11  ;;  %511 = vst.msk [vmem:[#allocation2 + $0x8] sm:$0x3] %vm510_vm5, %v4757_v11 }
  0x2b   : > { %514 = vst.msk [vmem:[#allocation2 + $0x20] sm:$0xff] %vm508_vm4, %v4757_v11  ;;  %516 = vst.msk [vmem:[#allocation2 + $0x30] sm:$0xff] %vm508_vm4, %v4757_v11 }
  0x2c   : > { %4058 = vrot.lane.b32.xlu1 %v4057_v31, %s4760_s14  ;;  %515 = vst.msk [vmem:[#allocation2 + $0x28] sm:$0x3] %vm510_vm5, %v4757_v11  ;;  %517 = vst.msk [vmem:[#allocation2 + $0x38] sm:$0x3] %vm510_vm5, %v4757_v11 }
  0x2d   : > { %518 = vst.msk [vmem:[#allocation2 + $0x40] sm:$0xff] %vm508_vm4, %v4757_v11  ;;  %520 = vst.msk [vmem:[#allocation2 + $0x50] sm:$0xff] %vm508_vm4, %v4757_v11 }
  0x2e   : > { %3695 = vmatmul.mubr.msk.bf16.gmra.mrb[8].mxu0 %vm406_vm0, %v344_v33  ;;  %519 = vst.msk [vmem:[#allocation2 + $0x48] sm:$0x3] %vm510_vm5, %v4757_v11  ;;  %521 = vst.msk [vmem:[#allocation2 + $0x58] sm:$0x3] %vm510_vm5, %v4757_v11 }
  0x2f   : > { %481 = vmatprep.mubr.bf16.mxu0 %v6541_v2  ;;  %522 = vst.msk [vmem:[#allocation2 + $0x60] sm:$0xff] %vm508_vm4, %v4757_v11  ;;  %524 = vst.msk [vmem:[#allocation2 + $0x70] sm:$0xff] %vm508_vm4, %v4757_v11 }
  0x30   : > { %4063 = vrot.lane.b32.xlu1 %v4062_v32, %s4761_s15  ;;  %523 = vst.msk [vmem:[#allocation2 + $0x68] sm:$0x3] %vm510_vm5, %v4757_v11  ;;  %525 = vst.msk [vmem:[#allocation2 + $0x78] sm:$0x3] %vm510_vm5, %v4757_v11 }
  0x31   : > { %526 = vst.msk [vmem:[#allocation2 + $0x80] sm:$0xff] %vm508_vm4, %v4757_v11  ;;  %528 = vst.msk [vmem:[#allocation2 + $0x90] sm:$0xff] %vm508_vm4, %v4757_v11 }
  0x32   : > { %527 = vst.msk [vmem:[#allocation2 + $0x88] sm:$0x3] %vm510_vm5, %v4757_v11  ;;  %529 = vst.msk [vmem:[#allocation2 + $0x98] sm:$0x3] %vm510_vm5, %v4757_v11 }
  0x36   : > { %3696 = vmatmul.mubr.msk.bf16.gmra.mrb[12].mxu0 %vm406_vm0, %v345_v34 }
  0x96   : > { %v5111_v38 = vpop.permute.xlu1 %4048 }
  0xf1   : > { %v453_v42 = vpop.f32.mrb[0].mxu0 }
  0xf2   : > { %v5032_v43 = vadd.f32 %v453_v42, %v5027_v40  ;;  %v455_v44 = vpop.f32.mrb[1].mxu0  ;;  %v4662_v42 = vld [vmem:[%s6526_s3 + $0x8] sm:$0xff]  }
  0xf3   : > { %v456_v45 = vadd.f32 %v455_v44, %v5029_v41  ;;  %v457_v46 = vpop.f32.mrb[2].mxu0  ;;  %v5125_v44 = vpop.permute.xlu1 %4053 }
  0xf4   : > { %6569 = vst [vmem:[#allocation5_spill] sm:$0xff] %v5032_v43  ;;  %v6539_v47 = vmax.f32 %v5032_v43, 0.0  ;;  %v459_v48 = vpop.f32.mrb[3].mxu0  ;;  %v5037_v50 = vadd.f32 %v457_v46, %v5027_v40  ;;  %v4664_v46 = vld [vmem:[%s6526_s3 + $0x10] sm:$0xff]  }
  0xf5   : > { %v493_v49 = vmax.f32 %v456_v45, 0.0  ;;  %v460_v51 = vadd.f32 %v459_v48, %v5029_v41  ;;  %v4663_v45 = vld [vmem:[%s6526_s3 + $0x50] sm:$0xff]  }
  0xf6   : > { %6570 = vst [vmem:[#allocation6_spill] sm:$0xff] %v5037_v50  ;;  %546 = vrot.lane.b32.xlu0 %v6539_v47, %s4761_s15  ;;  %v6540_v52 = vmax.f32 %v5037_v50, 0.0 }
  0xf7   : > { %1690 = vrot.lane.b32.xlu1 %v493_v49, %s4762_s18  ;;  %v495_v58 = vmax.f32 %v460_v51, 0.0  ;;  %v5133_v48 = vpop.permute.xlu1 %4058  ;;  %v4666_v51 = vld [vmem:[%s6526_s3 + $0x18] sm:$0xff]  }
  0xf9   : > { %v463_v53 = vpop.f32.mrb[4].mxu0 }
  0xfa   : > { %548 = vrot.lane.b32.xlu0 %v493_v49, %s4761_s15  ;;  %v5047_v54 = vadd.f32 %v463_v53, %v5027_v40  ;;  %v465_v55 = vpop.f32.mrb[5].mxu0  ;;  %v4665_v49 = vld [vmem:[%s6526_s3 + $0x58] sm:$0xff]   ;;  %v4667_v53 = vld [vmem:[%s6526_s3 + $0x60] sm:$0xff]  }
  0xfb   : > { %550 = vrot.lane.b32.xlu1 %v6540_v52, %s4761_s15  ;;  %v466_v56 = vadd.f32 %v465_v55, %v5029_v41  ;;  %v467_v57 = vpop.f32.mrb[6].mxu0  ;;  %v4668_v55 = vld [vmem:[%s6526_s3 + $0x20] sm:$0xff]  }
  0xfc   : > { %6571 = vst [vmem:[#allocation7_spill] sm:$0xff] %v5047_v54  ;;  %v469_v59 = vpop.f32.mrb[7].mxu0  ;;  %v6537_v60 = vmax.f32 %v5047_v54, 0.0  ;;  %v5056_v61 = vadd.f32 %v467_v57, %v5027_v40 }
  0xfd   : > { %v497_v62 = vmax.f32 %v466_v56, 0.0  ;;  %v470_v4 = vadd.f32 %v469_v59, %v5029_v41  ;;  %v5147_v56 = vpop.permute.xlu1 %4063 }
  0xfe   : > { %1692 = vrot.lane.b32.xlu0 %v495_v58, %s4762_s18  ;;  %6572 = vst [vmem:[#allocation8_spill] sm:$0xff] %v5056_v61  ;;  %v6538_v0 = vmax.f32 %v5056_v61, 0.0 }
  0xff   : > { %552 = vrot.lane.b32.xlu1 %v495_v58, %s4761_s15  ;;  %v499_v15 = vmax.f32 %v470_v4, 0.0  ;;  %v4669_v58 = vld [vmem:[%s6526_s3 + $0x68] sm:$0xff]   ;;  %v4672_v4 = vld [vmem:[%s6526_s3 + $0x70] sm:$0xff]  }
 0x101   : > { %v473_v63 = vpop.f32.mrb[8].mxu0 }
 0x102   : > { %554 = vrot.lane.b32.xlu0 %v6537_v60, %s4761_s15  ;;  %v5064_v1 = vadd.f32 %v473_v63, %v5027_v40  ;;  %v475_v3 = vpop.f32.mrb[9].mxu0  ;;  %v4671_v63 = vld [vmem:[%s6526_s3 + $0xc0] sm:$0xff]  }
 0x103   : > { %556 = vrot.lane.b32.xlu1 %v497_v62, %s4761_s15  ;;  %v477_v5 = vpop.f32.mrb[10].mxu0  ;;  %v476_v11 = vadd.f32 %v475_v3, %v5029_v41  ;;  %3855 = vmatprep.subr.bf16.mxu0 %v4671_v63  ;;  %v603_v60 = vld [vmem:[#allocation2] sm:$0xff] }
 0x104   : > { %6573 = vst [vmem:[#allocation9_spill] sm:$0xff] %v5064_v1  ;;  %v479_v6 = vpop.f32.mrb[11].mxu0  ;;  %v6535_v7 = vmax.f32 %v5064_v1, 0.0  ;;  %v5078_v21 = vadd.f32 %v477_v5, %v5027_v40  ;;  %v4673_v5 = vld [vmem:[%s6526_s3 + $0x80] sm:$0xff]  }
 0x105   : > { %v501_v19 = vmax.f32 %v476_v11, 0.0  ;;  %v480_v27 = vadd.f32 %v479_v6, %v5029_v41  ;;  %3856 = vmatpush3.bf16.msra.mxu0 %v4673_v5 }
 0x106   : > { %558 = vrot.lane.b32.xlu0 %v6538_v0, %s4761_s15  ;;  %6574 = vst [vmem:[#allocation10_spill] sm:$0xff] %v5078_v21  ;;  %v6536_v26 = vmax.f32 %v5078_v21, 0.0 }
 0x107   : > { %1694 = vrot.lane.b32.xlu1 %v497_v62, %s4762_s18  ;;  %v503_v29 = vmax.f32 %v480_v27, 0.0  ;;  %v4670_v62 = vld [vmem:[%s6526_s3 + $0x28] sm:$0xff]  }
 0x109   : > { %v483_v18 = vpop.f32.mrb[12].mxu0 }
 0x10a   : > { %562 = vrot.lane.b32.xlu0 %v6535_v7, %s4761_s15  ;;  %v485_v22 = vpop.f32.mrb[13].mxu0  ;;  %v5086_v28 = vadd.f32 %v483_v18, %v5027_v40  ;;  %v4675_v18 = vld [vmem:[%s6526_s3 + $0xc8] sm:$0xff]  }
 0x10b   : > { %560 = vrot.lane.b32.xlu1 %v499_v15, %s4761_s15  ;;  %v487_v23 = vpop.f32.mrb[14].mxu0  ;;  %v486_v31 = vadd.f32 %v485_v22, %v5029_v41  ;;  %v4676_v22 = vld [vmem:[%s6526_s3 + $0x78] sm:$0xff]   ;;  %3857 = vmatprep.subr.bf16.mxu0 %v4675_v18 }
 0x10c   : > { %v489_v25 = vpop.f32.mrb[15].mxu0  ;;  %6575 = vst [vmem:[#allocation11_spill] sm:$0xff] %v5086_v28  ;;  %v6533_v32 = vmax.f32 %v5086_v28, 0.0  ;;  %v5096_v33 = vadd.f32 %v487_v23, %v5027_v40  ;;  %v4660_v40 = vld [vmem:[%s6526_s3] sm:$0xff]   ;;  %v4677_v23 = vld [vmem:[%s6526_s3 + $0x88] sm:$0xff]  }
 0x10d   : > { %v505_v34 = vmax.f32 %v486_v31, 0.0  ;;  %v490_v36 = vadd.f32 %v489_v25, %v5029_v41  ;;  %3816 = vmatpush3.bf16.msra.mxu1 %v4660_v40  ;;  %v4661_v41 = vld [vmem:[%s6526_s3 + $0x48] sm:$0xff]   ;;  %v1724_v25 = vld [vmem:[#allocation3 + $0x10] sm:$0xff]  ;;  %3858 = vmatpush3.bf16.msra.mxu0 %v4677_v23 }
 0x10e   : > { %1698 = vrot.lane.b32.xlu0 %v501_v19, %s4762_s18  ;;  %6576 = vst [vmem:[#allocation12_spill] sm:$0xff] %v5096_v33  ;;  %v6534_v35 = vmax.f32 %v5096_v33, 0.0  ;;  %3817 = vmatprep.subr.bf16.mxu1 %v4661_v41  ;;  %v611_v41 = vld [vmem:[#allocation2 + $0x1] sm:$0xff] }
 0x10f   : > { %1696 = vrot.lane.b32.xlu1 %v499_v15, %s4762_s18  ;;  %v507_v37 = vmax.f32 %v490_v36, 0.0  ;;  %v4674_v15 = vld [vmem:[%s6526_s3 + $0x30] sm:$0xff]  }
 0x111   : > { %3818 = vmatpush3.bf16.msra.mxu1 %v4662_v42  ;;  %v4679_v42 = vld [vmem:[%s6526_s3 + $0xd0] sm:$0xff]  }
 0x112   : > { %566 = vrot.lane.b32.xlu0 %v6536_v26, %s4761_s15  ;;  %3819 = vmatprep.subr.bf16.mxu1 %v4663_v45  ;;  %v4680_v45 = vld [vmem:[%s6526_s3 + $0x90] sm:$0xff]  }
 0x113   : > { %564 = vrot.lane.b32.xlu1 %v501_v19, %s4761_s15  ;;  %3859 = vmatprep.subr.bf16.mxu0 %v4679_v42  ;;  %v4687_v42 = vld [vmem:[%s6526_s3 + $0xf0] sm:$0xff]  }
 0x114   : > { %3860 = vmatpush3.bf16.msra.mxu0 %v4680_v45  ;;  %v4688_v45 = vld [vmem:[%s6526_s3 + $0xb0] sm:$0xff]  }
 0x115   : > { %3820 = vmatpush3.bf16.msra.mxu1 %v4664_v46 }
 0x116   : > { %1700 = vrot.lane.b32.xlu0 %v503_v29, %s4762_s18  ;;  %3821 = vmatprep.subr.bf16.mxu1 %v4665_v49 }
 0x117   : > { %568 = vrot.lane.b32.xlu1 %v503_v29, %s4761_s15 }
 0x119   : > { %3822 = vmatpush3.bf16.msra.mxu1 %v4666_v51 }
 0x11a   : > { %570 = vrot.lane.b32.xlu0 %v6533_v32, %s4761_s15  ;;  %3823 = vmatprep.subr.bf16.mxu1 %v4667_v53 }
 0x11b   : > { %572 = vrot.lane.b32.xlu1 %v505_v34, %s4761_s15 }
 0x11d   : > { %3824 = vmatpush3.bf16.msra.mxu1 %v4668_v55 }
 0x11e   : > { %574 = vrot.lane.b32.xlu0 %v6534_v35, %s4761_s15  ;;  %3825 = vmatprep.subr.bf16.mxu1 %v4669_v58 }
 0x11f   : > { %1702 = vrot.lane.b32.xlu1 %v505_v34, %s4762_s18 }
 0x121   : > { %3826 = vmatpush3.bf16.msra.mxu1 %v4670_v62  ;;  %v4681_v62 = vld [vmem:[%s6526_s3 + $0xd8] sm:$0xff]  }
 0x122   : > { %3827 = vmatprep.subr.bf16.mxu1 %v4672_v4  ;;  %3861 = vmatprep.subr.bf16.mxu0 %v4681_v62 }
 0x123   : > { %576 = vrot.lane.b32.xlu1 %v507_v37, %s4761_s15 }
 0x125   : > { %3828 = vmatpush3.bf16.msra.mxu1 %v4674_v15  ;;  %v4683_v15 = vld [vmem:[%s6526_s3 + $0xe0] sm:$0xff]  }
 0x126   : > { %3829 = vmatprep.subr.bf16.mxu1 %v4676_v22 }
 0x127   : > { %1704 = vrot.lane.b32.xlu1 %v507_v37, %s4762_s18 }
 0x129   : > { %3830 = vmatpush3.bf16.msra.mxu1 %v4678_v39 }
 0x168   : > { %v547_v57 = vpop.permute.xlu0 %546 }
 0x169   : > { %v1691_v59 = vpop.permute.xlu1 %1690 }
 0x16a   : > { %1715 = vst.msk [vmem:[#allocation3 + $0x22] sm:$0xff] %vm1664_vm2, %v1691_v59 }
 0x16c   : > { %v549_v3 = vpop.permute.xlu0 %548 }
 0x16d   : > { %v578_v6 = vsel %vm406_vm0, %v547_v57, %v549_v3  ;;  %v551_v11 = vpop.permute.xlu1 %550  ;;  %v619_v57 = vld [vmem:[#allocation2 + $0x2] sm:$0xff] }
 0x16e   : > { %595 = vst.msk [vmem:[#allocation2 + $0x11] sm:$0xff] %vm508_vm4, %v578_v6 }
 0x170   : > { %v1693_v19 = vpop.permute.xlu0 %1692 }
 0x171   : > { %1716 = vst.msk [vmem:[#allocation3 + $0x32] sm:$0xff] %vm1664_vm2, %v1693_v19  ;;  %v553_v27 = vpop.permute.xlu1 %552  ;;  %v5180_v29 = vld [vmem:[#allocation3 + $0x20] sm:$0xff] }
 0x172   : > { %v5182_v31 = vld [vmem:[#allocation3 + $0x24] sm:$0xff]  ;;  %v579_v34 = vsel %vm406_vm0, %v551_v11, %v553_v27  ;;  %v4072_v36 = vpack.i.bf16 %v5180_v29, %v1724_v25 }
 0x173   : > { %v4067_v37 = vpack.i.bf16 %v5182_v31, %v4969_v30  ;;  %596 = vst.msk [vmem:[#allocation2 + $0x21] sm:$0xff] %vm508_vm4, %v579_v34  ;;  %v1773_v40 = vld [vmem:[#allocation3 + $0x21] sm:$0xff] }
 0x174   : > { %4073 = vrot.lane.b32.xlu1 %v4072_v36, %s4763_s23  ;;  %v555_v30 = vpop.permute.xlu0 %554  ;;  %v4077_v53 = vpack.i.bf16 %v1773_v40, %v4956_v20  ;;  %v1781_v58 = vld [vmem:[#allocation3 + $0x22] sm:$0xff]  ;;  %v4682_v20 = vld [vmem:[%s6526_s3 + $0x98] sm:$0xff]  }
 0x175   : > { %4068 = vrot.lane.b32.xlu0 %v4067_v37, %s4758_s12  ;;  %v557_v46 = vpop.permute.xlu1 %556  ;;  %v612_v49 = vld [vmem:[#allocation2 + $0x11] sm:$0xff]  ;;  %v4082_v4 = vpack.i.bf16 %v1781_v58, %v4964_v24  ;;  %3862 = vmatpush3.bf16.msra.mxu0 %v4682_v20  ;;  %v4684_v24 = vld [vmem:[%s6526_s3 + $0xa0] sm:$0xff]   ;;  %v4685_v34 = vld [vmem:[%s6526_s3 + $0xe8] sm:$0xff]  }
 0x176   : > { %v580_v51 = vsel %vm406_vm0, %v555_v30, %v557_v46  ;;  %v4087_v55 = vpack.i.bf16 %v612_v49, %v611_v41  ;;  %v5203_v59 = vld [vmem:[#allocation2 + $0x12] sm:$0xff]  ;;  %3863 = vmatprep.subr.bf16.mxu0 %v4683_v15  ;;  %v4686_v37 = vld [vmem:[%s6526_s3 + $0xa8] sm:$0xff]  }
 0x177   : > { %597 = vst.msk [vmem:[#allocation2 + $0x31] sm:$0xff] %vm508_vm4, %v580_v51  ;;  %v4092_v5 = vpack.i.bf16 %v5203_v59, %v619_v57  ;;  %v1749_v49 = vld [vmem:[#allocation3 + $0x23] sm:$0xff]  ;;  %v4689_v57 = vld [vmem:[%s6526_s3 + $0xf8] sm:$0xff]  }
 0x178   : > { %4078 = vrot.lane.b32.xlu1 %v4077_v53, %s4762_s18  ;;  %v559_v63 = vpop.permute.xlu0 %558  ;;  %v5216_v6 = vld [vmem:[#allocation3 + $0x30] sm:$0xff] }
 0x179   : > { %4088 = vrot.lane.b32.xlu0 %v4087_v55, %s4762_s18  ;;  %v1695_v3 = vpop.permute.xlu1 %1694  ;;  %v5218_v11 = vld [vmem:[#allocation3 + $0x31] sm:$0xff]  ;;  %v4097_v22 = vpack.i.bf16 %v5216_v6, %v5180_v29  ;;  %3864 = vmatpush3.bf16.msra.mxu0 %v4684_v24 }
 0x17a   : > { %1717 = vst.msk [vmem:[#allocation3 + $0x42] sm:$0xff] %vm1664_vm2, %v1695_v3  ;;  %v4122_v23 = vpack.i.bf16 %v5218_v11, %v1773_v40  ;;  %v5233_v27 = vld [vmem:[#allocation3 + $0x32] sm:$0xff]  ;;  %3865 = vmatprep.subr.bf16.mxu0 %v4685_v34  ;;  %v644_v20 = vld [vmem:[#allocation2 + $0x22] sm:$0xff] }
 0x17b   : > { %v4127_v40 = vpack.i.bf16 %v5233_v27, %v1781_v58  ;;  %v5246_v41 = vld [vmem:[#allocation3 + $0x33] sm:$0xff]  ;;  %v628_v24 = vld [vmem:[#allocation2 + $0x20] sm:$0xff] }
 0x17c   : > { %4083 = vrot.lane.b32.xlu1 %v4082_v4, %s4764_s17  ;;  %v563_v18 = vpop.permute.xlu0 %562  ;;  %v4132_v53 = vpack.i.bf16 %v5246_v41, %v1749_v49  ;;  %v1758_v55 = vld [vmem:[#allocation3 + $0x34] sm:$0xff] }
 0x17d   : > { %4093 = vrot.lane.b32.xlu0 %v4092_v5, %s4761_s15  ;;  %v561_v19 = vpop.permute.xlu1 %560  ;;  %3866 = vmatpush3.bf16.msra.mxu0 %v4686_v37  ;;  %v4690_v4 = vld [vmem:[%s6526_s3 + $0xb8] sm:$0xff]  }
 0x17e   : > { %v581_v25 = vsel %vm406_vm0, %v559_v63, %v561_v19  ;;  %3867 = vmatprep.subr.bf16.mxu0 %v4687_v42  ;;  %v4137_v63 = vpack.i.bf16 %v1758_v55, %v5182_v31  ;;  %v635_v43 = vld [vmem:[#allocation2 + $0x11] sm:$0xff] }
 0x17f   : > { %598 = vst.msk [vmem:[#allocation2 + $0x41] sm:$0xff] %vm508_vm4, %v581_v25 }
 0x180   : > { %4123 = vrot.lane.b32.xlu1 %v4122_v23, %s4758_s12  ;;  %v1699_v36 = vpop.permute.xlu0 %1698 }
 0x181   : > { %4098 = vrot.lane.b32.xlu0 %v4097_v22, %s4759_s13  ;;  %v1697_v39 = vpop.permute.xlu1 %1696  ;;  %1719 = vst.msk [vmem:[#allocation3 + $0x62] sm:$0xff] %vm1664_vm2, %v1699_v36  ;;  %3868 = vmatpush3.bf16.msra.mxu0 %v4688_v45  ;;  %v1767_v19 = vld [vmem:[#allocation3 + $0x40] sm:$0xff]  ;;  %v5278_v22 = vld [vmem:[#allocation2 + $0x10] sm:$0xff] }
 0x182   : > { %1718 = vst.msk [vmem:[#allocation3 + $0x52] sm:$0xff] %vm1664_vm2, %v1697_v39  ;;  %3869 = vmatprep.subr.bf16.mxu0 %v4689_v57  ;;  %v4142_v25 = vpack.i.bf16 %v628_v24, %v5278_v22  ;;  %v4162_v34 = vpack.i.bf16 %v1767_v19, %v5216_v6  ;;  %v1799_v42 = vld [vmem:[#allocation3 + $0x44] sm:$0xff] }
 0x184   : > { %4128 = vrot.lane.b32.xlu1 %v4127_v40, %s4759_s13  ;;  %v567_v30 = vpop.permute.xlu0 %566 }
 0x185   : > { %4103 = vrot.lane.b32.xlu0 %v4122_v23, %s4760_s14  ;;  %v565_v46 = vpop.permute.xlu1 %564  ;;  %3870 = vmatpush3.bf16.msra.mxu0 %v4690_v4 }
 0x186   : > { %v582_v51 = vsel %vm406_vm0, %v563_v18, %v565_v46  ;;  %v4147_v18 = vpack.i.bf16 %v644_v20, %v5203_v59  ;;  %v1775_v59 = vld [vmem:[#allocation3 + $0x41] sm:$0xff]  ;;  %v4157_v46 = vpack.i.bf16 %v1799_v42, %v1758_v55 }
 0x187   : > { %599 = vst.msk [vmem:[#allocation2 + $0x51] sm:$0xff] %vm508_vm4, %v582_v51  ;;  %v4167_v39 = vpack.i.bf16 %v1775_v59, %v5218_v11  ;;  %v5292_v51 = vld [vmem:[#allocation3 + $0x43] sm:$0xff] }
 0x188   : > { %4133 = vrot.lane.b32.xlu1 %v4132_v53, %s4760_s14  ;;  %v1701_v58 = vpop.permute.xlu0 %1700  ;;  %v4182_v11 = vpack.i.bf16 %v5292_v51, %v5246_v41  ;;  %v622_v41 = vld [vmem:[#allocation2 + $0x32] sm:$0xff] }
 0x189   : > { %4108 = vrot.lane.b32.xlu0 %v4127_v40, %s4761_s15  ;;  %v569_v62 = vpop.permute.xlu1 %568  ;;  %1720 = vst.msk [vmem:[#allocation3 + $0x72] sm:$0xff] %vm1664_vm2, %v1701_v58  ;;  %v1807_v55 = vld [vmem:[#allocation3 + $0x50] sm:$0xff] }
 0x18a   : > { %v583_v3 = vsel %vm406_vm0, %v567_v30, %v569_v62  ;;  %v1783_v30 = vld [vmem:[#allocation3 + $0x42] sm:$0xff]  ;;  %v614_v58 = vld [vmem:[#allocation2 + $0x31] sm:$0xff]  ;;  %v4212_v62 = vpack.i.bf16 %v1807_v55, %v1767_v19 }
 0x18b   : > { %600 = vst.msk [vmem:[#allocation2 + $0x61] sm:$0xff] %vm508_vm4, %v583_v3  ;;  %v4172_v49 = vpack.i.bf16 %v1783_v30, %v5233_v27  ;;  %v5302_v27 = vld [vmem:[#allocation2 + $0x21] sm:$0xff]  ;;  %v5305_v3 = vld [vmem:[#allocation3 + $0x51] sm:$0xff] }
 0x18c   : > { %4138 = vrot.lane.b32.xlu1 %v4137_v63, %s4761_s15  ;;  %v571_v5 = vpop.permute.xlu0 %570  ;;  %v4217_v4 = vpack.i.bf16 %v5305_v3, %v1775_v59  ;;  %v1839_v19 = vld [vmem:[#allocation3 + $0x54] sm:$0xff] }
 0x18d   : > { %4113 = vrot.lane.b32.xlu0 %v4132_v53, %s4763_s23  ;;  %v573_v15 = vpop.permute.xlu1 %572  ;;  %v653_v53 = vld [vmem:[#allocation2 + $0x30] sm:$0xff] }
 0x18e   : > { %v584_v31 = vsel %vm406_vm0, %v571_v5, %v573_v15  ;;  %v4202_v57 = vpack.i.bf16 %v653_v53, %v628_v24  ;;  %v4197_v5 = vpack.i.bf16 %v622_v41, %v644_v20  ;;  %v1823_v15 = vld [vmem:[#allocation3 + $0x52] sm:$0xff]  ;;  %v4232_v20 = vpack.i.bf16 %v1839_v19, %v1799_v42 }
 0x18f   : > { %601 = vst.msk [vmem:[#allocation2 + $0x71] sm:$0xff] %vm508_vm4, %v584_v31  ;;  %v5312_v31 = vld [vmem:[#allocation3 + $0x53] sm:$0xff] }
 0x190   : > { %4148 = vrot.lane.b32.xlu1 %v4147_v18, %s4762_s18  ;;  %v575_v36 = vpop.permute.xlu0 %574  ;;  %v4222_v18 = vpack.i.bf16 %v1823_v15, %v1783_v30  ;;  %v4227_v24 = vpack.i.bf16 %v5312_v31, %v5292_v51  ;;  %v5342_v42 = vld [vmem:[#allocation3 + $0x71] sm:$0xff] }
 0x191   : > { %4118 = vrot.lane.b32.xlu0 %v4137_v63, %s4762_s18  ;;  %v1703_v23 = vpop.permute.xlu1 %1702  ;;  %v4192_v63 = vpack.i.bf16 %v614_v58, %v5302_v27 }
 0x192   : > { %1721 = vst.msk [vmem:[#allocation3 + $0x82] sm:$0xff] %vm1664_vm2, %v1703_v23  ;;  %v5322_v23 = vld [vmem:[#allocation2 + $0x40] sm:$0xff] }
 0x193   : > { %v632_v33 = vld [vmem:[#allocation2 + $0x60] sm:$0xff] }
 0x194   : > { %4163 = vrot.lane.b32.xlu1 %v4162_v34, %s4763_s23 }
 0x195   : > { %4143 = vrot.lane.b32.xlu0 %v4142_v25, %s4759_s13  ;;  %v577_v37 = vpop.permute.xlu1 %576  ;;  %v4277_v25 = vpack.i.bf16 %v5322_v23, %v653_v53 }
 0x196   : > { %v585_v40 = vsel %vm406_vm0, %v575_v36, %v577_v37  ;;  %v5332_v36 = vld [vmem:[#allocation3 + $0x62] sm:$0xff] }
 0x197   : > { %602 = vst.msk [vmem:[#allocation2 + $0x81] sm:$0xff] %vm508_vm4, %v585_v40  ;;  %v5337_v37 = vpack.i.bf16 %v5332_v36, %v1823_v15  ;;  %v663_v40 = vld [vmem:[#allocation2 + $0x51] sm:$0xff]  ;;  %v617_v15 = vld [vmem:[#allocation2 + $0x61] sm:$0xff] }
 0x198   : > { %4168 = vrot.lane.b32.xlu1 %v4167_v39, %s4762_s18  ;;  %v662_v39 = vld [vmem:[#allocation2 + $0x41] sm:$0xff] }
 0x199   : > { %4153 = vrot.lane.b32.xlu0 %v4162_v34, %s4764_s17  ;;  %v1705_v45 = vpop.permute.xlu1 %1704  ;;  %v5327_v34 = vld [vmem:[#allocation3 + $0x60] sm:$0xff]  ;;  %v4327_v30 = vpack.i.bf16 %v663_v40, %v662_v39  ;;  %v5380_v39 = vld [vmem:[#allocation2 + $0x52] sm:$0xff] }
 0x19a   : > { %1722 = vst.msk [vmem:[#allocation3 + $0x92] sm:$0xff] %vm1664_vm2, %v1705_v45  ;;  %v4297_v59 = vpack.i.bf16 %v5327_v34, %v1807_v55  ;;  %v646_v45 = vld [vmem:[#allocation2 + $0x42] sm:$0xff]  ;;  %v1802_v40 = vld [vmem:[#allocation3 + $0x74] sm:$0xff] }
 0x19b   : > { %v4282_v53 = vpack.i.bf16 %v646_v45, %v622_v41  ;;  %v5357_v55 = vld [vmem:[#allocation3 + $0x63] sm:$0xff] }
 0x19c   : > { %4173 = vrot.lane.b32.xlu1 %v4172_v49, %s4764_s17 }
 0x19d   : > { %4158 = vrot.lane.b32.xlu0 %v4157_v46, %s4758_s12 }
 0x19e   : > { %v650_v7 = vld [vmem:[#allocation2 + $0x82] sm:$0xff] }
 0x1a0   : > { %4178 = vrot.lane.b32.xlu1 %v4172_v49, %s4758_s12 }
 0x1a1   : > { %4183 = vrot.lane.b32.xlu0 %v4182_v11, %s4759_s13  ;;  %v4691_v11 = vld [vmem:[%s6526_s3 + $0x140] sm:$0xff]  }
 0x1a2   : > { %3895 = vmatprep.subr.bf16.mxu1 %v4691_v11  ;;  %v5382_v11 = vld [vmem:[#allocation3 + $0x84] sm:$0xff] }
 0x1a4   : > { %4188 = vrot.lane.b32.xlu1 %v4157_v46, %s4760_s14  ;;  %v1816_v46 = vld [vmem:[#allocation3 + $0x61] sm:$0xff] }
 0x1a5   : > { %4203 = vrot.lane.b32.xlu0 %v4202_v57, %s4761_s15  ;;  %v5347_v49 = vpack.i.bf16 %v5342_v42, %v1816_v46  ;;  %v5352_v57 = vld [vmem:[#allocation3 + $0x73] sm:$0xff] }
 0x1a6   : > { %v5361_v58 = vpack.i.bf16 %v5352_v57, %v5357_v55 }
 0x1a8   : > { %4193 = vrot.lane.b32.xlu1 %v4192_v63, %s4762_s18 }
 0x1a9   : > { %4213 = vrot.lane.b32.xlu0 %v4212_v62, %s4759_s13 }
 0x1ac   : > { %4198 = vrot.lane.b32.xlu1 %v4197_v5, %s4761_s15 }
 0x1ad   : > { %4218 = vrot.lane.b32.xlu0 %v4217_v4, %s4760_s14 }
 0x1b0   : > { %4208 = vrot.lane.b32.xlu1 %v4192_v63, %s4759_s13  ;;  %v1849_v63 = vld [vmem:[#allocation3 + $0x70] sm:$0xff] }
 0x1b1   : > { %4223 = vrot.lane.b32.xlu0 %v4222_v18, %s4761_s15  ;;  %v5410_v32 = vpack.i.bf16 %v1849_v63, %v5327_v34 }
 0x1b4   : > { %4238 = vrot.lane.b32.xlu1 %v4217_v4, %s4758_s12 }
 0x1b5   : > { %4228 = vrot.lane.b32.xlu0 %v4227_v24, %s4763_s23 }
 0x1b8   : > { %4248 = vrot.lane.b32.xlu1 %v4227_v24, %s4760_s14 }
 0x1b9   : > { %4233 = vrot.lane.b32.xlu0 %v4232_v20, %s4762_s18 }
 0x1bc   : > { %4263 = vrot.lane.b32.xlu1 %v4217_v4, %s4763_s23  ;;  %v1850_v4 = vld [vmem:[#allocation3 + $0x80] sm:$0xff] }
 0x1bd   : > { %4243 = vrot.lane.b32.xlu0 %v4222_v18, %s4759_s13  ;;  %v5368_v5 = vpack.i.bf16 %v1850_v4, %v1849_v63 }
 0x1c0   : > { %4278 = vrot.lane.b32.xlu1 %v4277_v25, %s4759_s13  ;;  %v5375_v25 = vld [vmem:[#allocation2 + $0x62] sm:$0xff] }
 0x1c1   : > { %4253 = vrot.lane.b32.xlu0 %v4232_v20, %s4761_s15 }
 0x1c4   : > { %4298 = vrot.lane.b32.xlu1 %v4297_v59, %s4763_s23 }
 0x1c5   : > { %4258 = vrot.lane.b32.xlu0 %v4212_v62, %s4761_s15  ;;  %v1801_v62 = vld [vmem:[#allocation3 + $0x64] sm:$0xff] }
 0x1c6   : > { %v5366_v41 = vpack.i.bf16 %v1801_v62, %v1839_v19  ;;  %v5448_v28 = vpack.i.bf16 %v1802_v40, %v1801_v62 }
 0x1c8   : > { %4308 = vrot.lane.b32.xlu1 %v5337_v37, %s4764_s17 }
 0x1c9   : > { %4268 = vrot.lane.b32.xlu0 %v4222_v18, %s4762_s18  ;;  %v618_v18 = vld [vmem:[#allocation2 + $0x71] sm:$0xff] }
 0x1ca   : > { %v4372_v20 = vpack.i.bf16 %v618_v18, %v617_v15 }
 0x1cc   : > { %4328 = vrot.lane.b32.xlu1 %v4327_v30, %s4759_s13 }
 0x1cd   : > { %4273 = vrot.lane.b32.xlu0 %v4227_v24, %s4764_s17  ;;  %v4302_v24 = vpack.i.bf16 %v1816_v46, %v5305_v3  ;;  %v4317_v3 = vpack.i.bf16 %v5380_v39, %v646_v45  ;;  %v5388_v46 = vpack.i.bf16 %v5382_v11, %v1802_v40  ;;  %v5405_v45 = vld [vmem:[%s6526_s3 + $0x180] sm:$0xff]  }
 0x1ce   : > { %3993 = vmatprep.subr.bf16.mxu0 %v5405_v45 }
 0x1d0   : > { %4338 = vrot.lane.b32.xlu1 %v5347_v49, %s4760_s14 }
 0x1d1   : > { %4283 = vrot.lane.b32.xlu0 %v4282_v53, %s4762_s18  ;;  %v655_v53 = vld [vmem:[#allocation2 + $0x50] sm:$0xff] }
 0x1d4   : > { %4348 = vrot.lane.b32.xlu1 %v5361_v58, %s4763_s23 }
 0x1d5   : > { %4288 = vrot.lane.b32.xlu0 %v4297_v59, %s4764_s17  ;;  %v626_v59 = vld [vmem:[#allocation2 + $0x72] sm:$0xff] }
 0x1d6   : > { %v4377_v19 = vpack.i.bf16 %v626_v59, %v5375_v25 }
 0x1d8   : > { %4368 = vrot.lane.b32.xlu1 %v5368_v5, %s4764_s17 }
 0x1d9   : > { %4293 = vrot.lane.b32.xlu0 %v5366_v41, %s4758_s12 }
 0x1dc   : > { %4373 = vrot.lane.b32.xlu1 %v4372_v20, %s4762_s18 }
 0x1dd   : > { %4303 = vrot.lane.b32.xlu0 %v4302_v24, %s4762_s18  ;;  %v4322_v24 = vpack.i.bf16 %v655_v53, %v5322_v23  ;;  %v5415_v23 = vld [vmem:[#allocation3 + $0x72] sm:$0xff] }
 0x1de   : > { %v5428_v63 = vpack.i.bf16 %v5415_v23, %v5332_v36 }
 0x1e0   : > { %4378 = vrot.lane.b32.xlu1 %v4377_v19, %s4761_s15 }
 0x1e1   : > { %4313 = vrot.lane.b32.xlu0 %v4327_v30, %s4762_s18  ;;  %v5398_v30 = vld [vmem:[#allocation3 + $0x90] sm:$0xff] }
 0x1e2   : > { %v5413_v35 = vpack.i.bf16 %v5398_v30, %v1850_v4  ;;  %v4417_v4 = vpack.i.bf16 %v650_v7, %v626_v59 }
 0x1e4   : > { %4383 = vrot.lane.b32.xlu1 %v5388_v46, %s4758_s12 }
 0x1e5   : > { %4318 = vrot.lane.b32.xlu0 %v4317_v3, %s4761_s15 }
 0x1e6   : > { %v5393_v15 = vpop.permute.xlu1 %4073 }
 0x1e7   : > { %6577 = vst [vmem:[#allocation13_spill] sm:$0xff] %v5393_v15  ;;  %v5395_v18 = vpop.permute.xlu0 %4068 }
 0x1e8   : > { %4398 = vrot.lane.b32.xlu1 %v4372_v20, %s4759_s13 }
 0x1e9   : > { %4323 = vrot.lane.b32.xlu0 %v4322_v24, %s4761_s15 }
 0x1ea   : > { %v5407_v19 = vpop.permute.xlu1 %4078 }
 0x1eb   : > { %6578 = vst [vmem:[#allocation14_spill] sm:$0xff] %v5407_v19  ;;  %v4089_v3 = vpop.permute.xlu0 %4088 }
 0x1ec   : > { %4403 = vrot.lane.b32.xlu1 %v5413_v35, %s4759_s13  ;;  %v4091_v20 = vunpack.i.h.bf16 %v4089_v3  ;;  %v4090_v24 = vunpack.i.l.bf16 %v4089_v3 }
 0x1ed   : > { %4333 = vrot.lane.b32.xlu0 %v5410_v32, %s4759_s13 }
 0x1ee   : > { %v5422_v26 = vpop.permute.xlu1 %4083  ;;  %v868_v7 = vsel %vm508_vm4, %v603_v60, %v4090_v24  ;;  %v869_v59 = vsel %vm508_vm4, %v5278_v22, %v4091_v20  ;;  %v4693_v22 = vld [vmem:[%s6526_s3 + $0x148] sm:$0xff]  }
 0x1ef   : > { %6579 = vst [vmem:[#allocation15_spill] sm:$0xff] %v5422_v26  ;;  %v5424_v34 = vpop.permute.xlu0 %4093  ;;  %v917_v60 = vpack.c.bf16 %v869_v59, %v868_v7  ;;  %v5471_v7 = vld [vmem:[#allocation3 + $0x82] sm:$0xff] }
 0x1f0   : > { %v6546_v0 = vunpack.i.h.bf16 %v5424_v34  ;;  %v6545_v47 = vunpack.i.l.bf16 %v5424_v34  ;;  %4418 = vrot.lane.b32.xlu1 %v4417_v4, %s4762_s18 }
 0x1f1   : > { %4343 = vrot.lane.b32.xlu0 %v5428_v63, %s4761_s15 }
 0x1f2   : > { %v876_v3 = vsel %vm406_vm0, %v4090_v24, %v6545_v47  ;;  %v877_v36 = vsel %vm406_vm0, %v4091_v20, %v6546_v0  ;;  %v5444_v52 = vpop.permute.xlu1 %4123  ;;  %v4692_v47 = vld [vmem:[%s6526_s3 + $0x100] sm:$0xff]   ;;  %v4357_v20 = vpack.i.bf16 %v632_v33, %v655_v53  ;;  %v4432_v24 = vpack.i.bf16 %v5357_v55, %v5312_v31  ;;  %v4695_v53 = vld [vmem:[%s6526_s3 + $0x150] sm:$0xff]  }
 0x1f3   : > { %v5446_v2 = vpop.permute.xlu0 %4098  ;;  %v918_v4 = vpack.c.bf16 %v877_v36, %v876_v3  ;;  %v5464_v3 = vld [vmem:[#allocation3 + $0x92] sm:$0xff]  ;;  %v4694_v36 = vld [vmem:[%s6526_s3 + $0x108] sm:$0xff]   ;;  %v4125_v1 = vunpack.i.l.bf16 %v5444_v52 }
 0x1f4   : > { %4423 = vrot.lane.b32.xlu1 %v5428_v63, %s4759_s13  ;;  %v5482_v55 = vpack.i.bf16 %v5464_v3, %v5471_v7  ;;  %v5495_v0 = vld [vmem:[#allocation2 + $0x70] sm:$0xff] }
 0x1f5   : > { %4353 = vrot.lane.b32.xlu0 %v5448_v28, %s4762_s18  ;;  %1428 = vmatprep.mubr.bf16.mxu1 %v918_v4  ;;  %v666_v4 = vld [vmem:[#allocation2 + $0x81] sm:$0xff] }
 0x1f6   : > { %1429 = vmatmul.mubr.bf16.vlgmr.msra.gmra.mrb[0].mxu1 %v917_v60  ;;  %v4129_v62 = vpop.permute.xlu1 %4128  ;;  %v667_v60 = vld [vmem:[#allocation2 + $0x91] sm:$0xff] }
 0x1f7   : > { %v5460_v40 = vpop.permute.xlu0 %4103  ;;  %3896 = vmatpush3.bf16.msra.mxu1 %v4692_v47  ;;  %v4362_v47 = vpack.i.bf16 %v5375_v25, %v5380_v39  ;;  %v4697_v25 = vld [vmem:[%s6526_s3 + $0x158] sm:$0xff]   ;;  %v4130_v21 = vunpack.i.l.bf16 %v4129_v62 }
 0x1f8   : > { %4433 = vrot.lane.b32.xlu1 %v4432_v24, %s4759_s13  ;;  %3897 = vmatprep.subr.bf16.mxu1 %v4693_v22  ;;  %v4696_v22 = vld [vmem:[%s6526_s3 + $0x110] sm:$0xff]   ;;  %v4457_v24 = vpack.i.bf16 %v667_v60, %v666_v4  ;;  %v4699_v4 = vld [vmem:[%s6526_s3 + $0x160] sm:$0xff]  }
 0x1f9   : > { %4358 = vrot.lane.b32.xlu0 %v4357_v20, %s4759_s13 }
 0x1fa   : > { %v4134_v59 = vpop.permute.xlu1 %4133 }
 0x1fb   : > { %v5476_v31 = vpop.permute.xlu0 %4108  ;;  %3898 = vmatpush3.bf16.msra.mxu1 %v4694_v36  ;;  %v4698_v36 = vld [vmem:[%s6526_s3 + $0x118] sm:$0xff]   ;;  %v4136_v60 = vunpack.i.h.bf16 %v4134_v59 }
 0x1fc   : > { %4443 = vrot.lane.b32.xlu1 %v5482_v55, %s4761_s15  ;;  %3899 = vmatprep.subr.bf16.mxu1 %v4695_v53  ;;  %v4131_v53 = vunpack.i.h.bf16 %v4129_v62  ;;  %v5515_v62 = vld [vmem:[#allocation2 + $0x80] sm:$0xff] }
 0x1fd   : > { %4363 = vrot.lane.b32.xlu0 %v4362_v47, %s4762_s18  ;;  %v4126_v47 = vunpack.i.h.bf16 %v5444_v52  ;;  %v4392_v52 = vpack.i.bf16 %v5495_v0, %v632_v33 }
 0x1fe   : > { %v4139_v39 = vpop.permute.xlu1 %4138 }
 0x1ff   : > { %v5493_v20 = vpop.permute.xlu0 %4113  ;;  %3900 = vmatpush3.bf16.msra.mxu1 %v4696_v22  ;;  %v4135_v22 = vunpack.i.l.bf16 %v4134_v59  ;;  %v2376_v59 = vsel %vm1664_vm2, %v5180_v29, %v4125_v1  ;;  %v2377_v50 = vsel %vm1664_vm2, %v5216_v6, %v4126_v47  ;;  %v4141_v33 = vunpack.i.h.bf16 %v4139_v39 }
 0x200   : > { %4458 = vrot.lane.b32.xlu1 %v4457_v24, %s4759_s13  ;;  %3901 = vmatprep.subr.bf16.mxu1 %v4697_v25  ;;  %v4700_v25 = vld [vmem:[%s6526_s3 + $0x120] sm:$0xff]   ;;  %v4140_v26 = vunpack.i.l.bf16 %v4139_v39  ;;  %v2385_v24 = vsel %vm884_vm6, %v2377_v50, %v4131_v53  ;;  %v4407_v50 = vpack.i.bf16 %v5515_v62, %v5495_v0 }
 0x201   : > { %4388 = vrot.lane.b32.xlu0 %v5347_v49, %s4758_s12  ;;  %v2394_v39 = vsel %vm2390_vm7, %v2385_v24, %v4136_v60 }
 0x202   : > { %v5508_v54 = vpop.permute.xlu1 %4148  ;;  %v2402_v60 = vsel %vm406_vm0, %v2394_v39, %v4141_v33 }
 0x203   : > { %v5510_v61 = vpop.permute.xlu0 %4118  ;;  %3902 = vmatpush3.bf16.msra.mxu1 %v4698_v36  ;;  %v2384_v36 = vsel %vm884_vm6, %v2376_v59, %v4130_v21  ;;  %v6580_v19 = vunpack.i.l.bf16 %v5508_v54  ;;  %v6581_v1 = vunpack.i.h.bf16 %v5508_v54 }
 0x204   : > { %4463 = vrot.lane.b32.xlu1 %v5448_v28, %s4761_s15  ;;  %3903 = vmatprep.subr.bf16.mxu1 %v4699_v4  ;;  %v2393_v6 = vsel %vm2390_vm7, %v2384_v36, %v4135_v22  ;;  %v4702_v4 = vld [vmem:[%s6526_s3 + $0x128] sm:$0xff]   ;;  %v6582_v36 = vunpack.i.l.bf16 %v5424_v34 }
 0x205   : > { %4393 = vrot.lane.b32.xlu0 %v4392_v52, %s4761_s15  ;;  %v893_v15 = vsel %vm508_vm4, %v635_v43, %v6580_v19  ;;  %v894_v29 = vsel %vm508_vm4, %v5302_v27, %v6581_v1  ;;  %v4701_v43 = vld [vmem:[%s6526_s3 + $0x168] sm:$0xff]   ;;  %v5543_v27 = vld [vmem:[#allocation3 + $0x94] sm:$0xff]  ;;  %v6583_v1 = vunpack.i.h.bf16 %v5424_v34 }
 0x206   : > { %v4164_v28 = vpop.permute.xlu1 %4163  ;;  %v920_v52 = vpack.c.bf16 %v894_v29, %v893_v15  ;;  %v2401_v15 = vsel %vm406_vm0, %v2393_v6, %v4140_v26  ;;  %v4703_v26 = vld [vmem:[%s6526_s3 + $0x170] sm:$0xff]   ;;  %v4482_v39 = vpack.i.bf16 %v5543_v27, %v5382_v11  ;;  %v4705_v11 = vld [vmem:[%s6526_s3 + $0x178] sm:$0xff]  }
 0x207   : > { %v4144_v47 = vpop.permute.xlu0 %4143  ;;  %v4166_v21 = vunpack.i.h.bf16 %v4164_v28  ;;  %v4165_v19 = vunpack.i.l.bf16 %v4164_v28  ;;  %3904 = vmatpush3.bf16.msra.mxu1 %v4700_v25  ;;  %v4704_v34 = vld [vmem:[%s6526_s3 + $0x130] sm:$0xff]  }
 0x208   : > { %v4146_v53 = vunpack.i.h.bf16 %v4144_v47  ;;  %v4145_v59 = vunpack.i.l.bf16 %v4144_v47  ;;  %1493 = vmatprep.mubr.bf16.mxu0 %v920_v52  ;;  %4473 = vrot.lane.b32.xlu1 %v5410_v32, %s4761_s15  ;;  %v1779_v52 = vld [vmem:[#allocation3 + $0x81] sm:$0xff] }
 0x209   : > { %v2410_v22 = vsel %vm2407_vm8, %v2401_v15, %v4165_v19  ;;  %v2411_v24 = vsel %vm2407_vm8, %v2402_v60, %v4166_v21  ;;  %4408 = vrot.lane.b32.xlu0 %v4407_v50, %s4759_s13  ;;  %3905 = vmatprep.subr.bf16.mxu1 %v4701_v43  ;;  %v4708_v50 = vld [vmem:[%s6526_s3 + $0x188] sm:$0xff]   ;;  %v1819_v21 = vld [vmem:[#allocation3 + $0x91] sm:$0xff] }
 0x20a   : > { %v885_v25 = vsel %vm884_vm6, %v6582_v36, %v4145_v59  ;;  %v886_v29 = vsel %vm884_vm6, %v6583_v1, %v4146_v53  ;;  %v4169_v32 = vpop.permute.xlu1 %4168  ;;  %v5586_v36 = vpack.i.bf16 %v1819_v21, %v1779_v52 }
 0x20b   : > { %v919_v33 = vpack.c.bf16 %v886_v29, %v885_v25  ;;  %v5564_v6 = vpop.permute.xlu0 %4153  ;;  %v4171_v28 = vunpack.i.h.bf16 %v4169_v32  ;;  %v4170_v47 = vunpack.i.l.bf16 %v4169_v32  ;;  %3906 = vmatpush3.bf16.msra.mxu1 %v4702_v4  ;;  %v4492_v4 = vpack.i.bf16 %v1779_v52, %v5342_v42  ;;  %v4711_v42 = vld [vmem:[%s6528_s5 + $0x40] sm:$0xff]   ;;  %v4710_v32 = vld [vmem:[%s6526_s3 + $0x198] sm:$0xff]  }
 0x20c   : > { %4483 = vrot.lane.b32.xlu1 %v4482_v39, %s4762_s18  ;;  %3907 = vmatprep.subr.bf16.mxu1 %v4703_v26  ;;  %v1853_v39 = vld [vmem:[#allocation3 + $0x31] sm:$0xff] }
 0x20d   : > { %1494 = vmatmul.mubr.bf16.vlgmr.msra.gmra.mrb[16].mxu0 %v919_v33  ;;  %v2418_v43 = vsel %vm508_vm4, %v2410_v22, %v4170_v47  ;;  %v2419_v19 = vsel %vm508_vm4, %v2411_v24, %v4171_v28  ;;  %4413 = vrot.lane.b32.xlu0 %v5337_v37, %s4758_s12  ;;  %v4707_v22 = vld [vmem:[%s6526_s3 + $0x138] sm:$0xff]   ;;  %v4709_v37 = vld [vmem:[%s6526_s3 + $0x190] sm:$0xff]   ;;  %v1854_v28 = vld [vmem:[#allocation3 + $0x41] sm:$0xff] }
 0x20e   : > { %v4174_v53 = vpop.permute.xlu1 %4173  ;;  %3994 = vmatpush3.bf16.msra.mxu0 %v5405_v45 }
 0x20f   : > { %v5582_v59 = vpop.permute.xlu0 %4158  ;;  %v4176_v15 = vunpack.i.h.bf16 %v4174_v53  ;;  %v4175_v60 = vunpack.i.l.bf16 %v4174_v53  ;;  %3908 = vmatpush3.bf16.msra.mxu1 %v4704_v34  ;;  %3995 = vmatprep.subr.bf16.mxu0 %v4708_v50 }
 0x210   : > { %4493 = vrot.lane.b32.xlu1 %v4492_v4, %s4762_s18  ;;  %3909 = vmatprep.subr.bf16.mxu1 %v4705_v11 }
 0x211   : > { %4428 = vrot.lane.b32.xlu0 %v5586_v36, %s4760_s14  ;;  %v5601_v45 = vsel %vm2424_vm9, %v2418_v43, %v4175_v60  ;;  %v5604_v24 = vsel %vm2424_vm9, %v2419_v19, %v4176_v15  ;;  %v1874_v15 = vld [vmem:[#allocation3 + $0x83] sm:$0xff] }
 0x212   : > { %6584 = vst [vmem:[#allocation16_spill] sm:$0xff] %v5601_v45  ;;  %6585 = vst [vmem:[#allocation17_spill] sm:$0xff] %v5604_v24  ;;  %v4179_v25 = vpop.permute.xlu1 %4178  ;;  %3996 = vmatpush3.bf16.msra.mxu0 %v4708_v50 }
 0x213   : > { %v4184_v1 = vpop.permute.xlu0 %4183  ;;  %v4181_v26 = vunpack.i.h.bf16 %v4179_v25  ;;  %v4180_v33 = vunpack.i.l.bf16 %v4179_v25  ;;  %3910 = vmatpush3.bf16.msra.mxu1 %v4707_v22  ;;  %3997 = vmatprep.subr.bf16.mxu0 %v4709_v37 }
 0x214   : > { %v4186_v47 = vunpack.i.h.bf16 %v4184_v1  ;;  %v4185_v52 = vunpack.i.l.bf16 %v4184_v1  ;;  %4503 = vrot.lane.b32.xlu1 %v5428_v63, %s4762_s18  ;;  %3945 = vmatprep.subr.bf16.mxu1 %v4711_v42  ;;  %v4713_v63 = vld [vmem:[%s6526_s3 + $0x1a0] sm:$0xff]   ;;  %v6586_v1 = vunpack.i.h.bf16 %v5508_v54 }
 0x215   : > { %v2714_v34 = vsel %vm1664_vm2, %v1854_v28, %v4181_v26  ;;  %v2713_v50 = vsel %vm1664_vm2, %v1853_v39, %v4180_v33  ;;  %4438 = vrot.lane.b32.xlu0 %v5361_v58, %s4760_s14  ;;  %v6587_v33 = vunpack.i.l.bf16 %v5508_v54  ;;  %v4161_v39 = vunpack.i.h.bf16 %v5582_v59 }
 0x216   : > { %v4189_v21 = vpop.permute.xlu1 %4188  ;;  %3998 = vmatpush3.bf16.msra.mxu0 %v4709_v37  ;;  %v2722_v60 = vsel %vm884_vm6, %v2714_v34, %v4186_v47  ;;  %v2721_v22 = vsel %vm884_vm6, %v2713_v50, %v4185_v52  ;;  %v659_v37 = vld [vmem:[#allocation2 + $0x90] sm:$0xff]  ;;  %v4160_v28 = vunpack.i.l.bf16 %v5582_v59  ;;  %v4522_v50 = vpack.i.bf16 %v1874_v15, %v5352_v57 }
 0x217   : > { %v5617_v11 = vpop.permute.xlu0 %4203  ;;  %v4191_v43 = vunpack.i.h.bf16 %v4189_v21  ;;  %v4190_v19 = vunpack.i.l.bf16 %v4189_v21  ;;  %3999 = vmatprep.subr.bf16.mxu0 %v4710_v32  ;;  %v4452_v54 = vpack.i.bf16 %v659_v37, %v5515_v62  ;;  %v5656_v21 = vld [vmem:[#allocation3 + $0x93] sm:$0xff]  ;;  %v2436_v57 = vsel %vm1664_vm2, %v5292_v51, %v4161_v39 }
 0x218   : > { %v6556_v53 = vunpack.i.h.bf16 %v5617_v11  ;;  %v6557_v4 = vunpack.i.l.bf16 %v5617_v11  ;;  %4513 = vrot.lane.b32.xlu1 %v5361_v58, %s4764_s17  ;;  %v606_v47 = vld [vmem:[#allocation2 + $0x30] sm:$0xff] }
 0x219   : > { %v5629_v42 = vsel %vm2390_vm7, %v2721_v22, %v4190_v19  ;;  %v5632_v25 = vsel %vm2390_vm7, %v2722_v60, %v4191_v43  ;;  %4448 = vrot.lane.b32.xlu0 %v5366_v41, %s4760_s14  ;;  %v4716_v41 = vld [vmem:[%s6526_s3 + $0x1a8] sm:$0xff]   ;;  %v1790_v22 = vld [vmem:[#allocation3 + $0x33] sm:$0xff] }
 0x21a   : > { %v5639_v26 = vsel %vm406_vm0, %v6586_v1, %v6556_v53  ;;  %v5646_v58 = vsel %vm406_vm0, %v6587_v33, %v6557_v4  ;;  %v4194_v52 = vpop.permute.xlu1 %4193  ;;  %4000 = vmatpush3.bf16.msra.mxu0 %v4710_v32  ;;  %v2435_v62 = vsel %vm1664_vm2, %v1790_v22, %v4160_v28  ;;  %v5669_v1 = vpack.i.bf16 %v5656_v21, %v1874_v15  ;;  %v3174_v33 = vld [vmem:[#allocation4 + $0x20] sm:$0xff]  ;;  %v3173_v22 = vld [vmem:[#allocation4 + $0x10] sm:$0xff] }
 0x21b   : > { %v4214_v34 = vpop.permute.xlu0 %4213  ;;  %4001 = vmatprep.subr.bf16.mxu0 %v4713_v63  ;;  %v4196_v43 = vunpack.i.h.bf16 %v4194_v52  ;;  %v4195_v19 = vunpack.i.l.bf16 %v4194_v52  ;;  %v3172_v28 = vld [vmem:[#allocation4] sm:$0xff] }
 0x21c   : > { %v4216_v59 = vunpack.i.h.bf16 %v4214_v34  ;;  %v4215_v60 = vunpack.i.l.bf16 %v4214_v34  ;;  %4523 = vrot.lane.b32.xlu1 %v4522_v50, %s4759_s13  ;;  %v5694_v4 = vld [vmem:[#allocation3 + $0xa2] sm:$0xff] }
 0x21d   : > { %4453 = vrot.lane.b32.xlu0 %v4452_v54, %s4761_s15  ;;  %v605_v54 = vld [vmem:[#allocation2 + $0x20] sm:$0xff] }
 0x21e   : > { %v5666_v32 = vpop.permute.xlu1 %4198  ;;  %4002 = vmatpush3.bf16.msra.mxu0 %v4713_v63  ;;  %v2443_v51 = vsel %vm884_vm6, %v2435_v62, %v4215_v60  ;;  %v2444_v39 = vsel %vm884_vm6, %v2436_v57, %v4216_v59  ;;  %v870_v15 = vsel %vm508_vm4, %v605_v54, %v4195_v19  ;;  %v871_v63 = vsel %vm508_vm4, %v606_v47, %v4196_v43  ;;  %v5689_v60 = vld [vmem:[#allocation4 + $0x30] sm:$0xff] }
 0x21f   : > { %v4219_v37 = vpop.permute.xlu0 %4218  ;;  %v6559_v52 = vunpack.i.h.bf16 %v5666_v32  ;;  %v6558_v34 = vunpack.i.l.bf16 %v5666_v32  ;;  %4003 = vmatprep.subr.bf16.mxu0 %v4716_v41  ;;  %v3182_v47 = vmax.f32 %v4869_v10, %v3174_v33  ;;  %v3188_v10 = vld [vmem:[#allocation4 + $0x1] sm:$0xff] }
 0x220   : > { %v4221_v50 = vunpack.i.h.bf16 %v4219_v37  ;;  %v4220_v29 = vunpack.i.l.bf16 %v4219_v37  ;;  %4533 = vrot.lane.b32.xlu1 %v5413_v35, %s4761_s15 }
 0x221   : > { %4468 = vrot.lane.b32.xlu0 %v5669_v1, %s4763_s23  ;;  %v878_v59 = vsel %vm406_vm0, %v4195_v19, %v6558_v34  ;;  %v879_v35 = vsel %vm406_vm0, %v4196_v43, %v6559_v52  ;;  %v6588_v19 = vmov 0   ;;  %v3180_v34 = vmax.f32 %v4863_v8, %v3172_v28  ;;  %v3191_v8 = vld [vmem:[#allocation4 + $0x31] sm:$0xff] }
 0x222   : > { %v2451_v53 = vsel %vm2390_vm7, %v2443_v51, %v4220_v29  ;;  %v2452_v37 = vsel %vm2390_vm7, %v2444_v39, %v4221_v50  ;;  %v5692_v57 = vpop.permute.xlu1 %4208  ;;  %v925_v62 = vpack.c.bf16 %v879_v35, %v878_v59  ;;  %4004 = vmatpush3.bf16.msra.mxu0 %v4716_v41  ;;  %v3190_v50 = vld [vmem:[#allocation4 + $0x21] sm:$0xff]  ;;  %v924_v39 = vpack.c.bf16 %v871_v63, %v870_v15  ;;  %v3189_v63 = vld [vmem:[#allocation4 + $0x11] sm:$0xff] }
 0x223   : > { %v4224_v29 = vpop.permute.xlu0 %4223  ;;  %3069 = vmatprep.subr.bf16.mxu0 %v6588_v19  ;;  %v3181_v43 = vmax.f32 %v4866_v9, %v3173_v22  ;;  %v3183_v41 = vmax.f32 %v4924_v12, %v5689_v60  ;;  %v3198_v28 = vmax.f32 %v3182_v47, %v3190_v50  ;;  %v3206_v9 = vld [vmem:[#allocation4 + $0x22] sm:$0xff]  ;;  %v3177_v12 = vld [vmem:[#allocation4 + $0x50] sm:$0xff] }
 0x224   : > { %v4226_v54 = vunpack.i.h.bf16 %v4224_v29  ;;  %v4225_v51 = vunpack.i.l.bf16 %v4224_v29  ;;  %4543 = vrot.lane.b32.xlu1 %v5482_v55, %s4762_s18  ;;  %1436 = vmatprep.mubr.bf16.mxu1 %v925_v62  ;;  %v4552_v55 = vpack.i.bf16 %v5694_v4, %v5464_v3  ;;  %v5709_v35 = vld [vmem:[#allocation4 + $0x40] sm:$0xff] }
 0x225   : > { %4478 = vrot.lane.b32.xlu0 %v5368_v5, %s4763_s23  ;;  %1437 = vmatmul.mubr.bf16.gmra.mrb[4].mxu1 %v924_v39  ;;  %v1884_v62 = vld [vmem:[#allocation3 + $0xa4] sm:$0xff]  ;;  %v3199_v50 = vmax.f32 %v3183_v41, %v3191_v8 }
 0x226   : > { %v2459_v33 = vsel %vm406_vm0, %v2451_v53, %v4225_v51  ;;  %v2460_v15 = vsel %vm406_vm0, %v2452_v37, %v4226_v54  ;;  %v4239_v22 = vpop.permute.xlu1 %4238  ;;  %v5711_v37 = vmax.f32 %v3180_v34, %v3188_v10  ;;  %v5714_v5 = vld [vmem:[#allocation3 + $0xa0] sm:$0xff]  ;;  %v5716_v54 = vmax.f32 %v3181_v43, %v3189_v63  ;;  %v5724_v34 = vld [vmem:[#allocation4 + $0x12] sm:$0xff] }
 0x227   : > { %v4229_v59 = vpop.permute.xlu0 %4228  ;;  %v5718_v47 = vld [vmem:[#allocation4 + $0x2] sm:$0xff]  ;;  %v5726_v10 = vld [vmem:[#allocation4 + $0x32] sm:$0xff]  ;;  %v3184_v43 = vmax.f32 %v4929_v13, %v5709_v35  ;;  %v3185_v63 = vmax.f32 %v4932_v14, %v3177_v12  ;;  %v4497_v45 = vpack.i.bf16 %v5714_v5, %v5398_v30  ;;  %v4240_v24 = vunpack.i.l.bf16 %v4239_v22 }
 0x228   : > { %v4231_v29 = vunpack.i.h.bf16 %v4229_v59  ;;  %v4230_v53 = vunpack.i.l.bf16 %v4229_v59  ;;  %4553 = vrot.lane.b32.xlu1 %v4552_v55, %s4758_s12  ;;  %v1900_v39 = vld [vmem:[#allocation3 + $0xa1] sm:$0xff]  ;;  %v1901_v59 = vld [vmem:[#allocation3 + $0xb1] sm:$0xff]  ;;  %v3214_v55 = vmax.f32 %v3198_v28, %v3206_v9  ;;  %v3212_v28 = vmax.f32 %v5711_v37, %v5718_v47 }
 0x229   : > { %4488 = vrot.lane.b32.xlu0 %v5347_v49, %s4763_s23  ;;  %v4241_v9 = vunpack.i.h.bf16 %v4239_v22  ;;  %v4572_v13 = vpack.i.bf16 %v1901_v59, %v1900_v39  ;;  %v1917_v14 = vld [vmem:[#allocation3 + $0xb3] sm:$0xff]  ;;  %v3215_v12 = vmax.f32 %v3199_v50, %v5726_v10  ;;  %v5755_v59 = vld [vmem:[#allocation3 + $0xa3] sm:$0xff] }
 0x22a   : > { %v2467_v51 = vsel %vm2407_vm8, %v2459_v33, %v4230_v53  ;;  %v2468_v3 = vsel %vm2407_vm8, %v2460_v15, %v4231_v29  ;;  %v4249_v41 = vpop.permute.xlu1 %4248  ;;  %v4562_v33 = vpack.i.bf16 %v1884_v62, %v5543_v27  ;;  %v3192_v15 = vld [vmem:[#allocation4 + $0x41] sm:$0xff]  ;;  %v3193_v29 = vld [vmem:[#allocation4 + $0x51] sm:$0xff]  ;;  %v3213_v27 = vmax.f32 %v5716_v54, %v5724_v34 }
 0x22b   : > { %v4234_v8 = vpop.permute.xlu0 %4233  ;;  %v3178_v53 = vld [vmem:[#allocation4 + $0x60] sm:$0xff]  ;;  %v3230_v30 = vmax.f32 %v3214_v55, %v5689_v60  ;;  %v5748_v22 = vmax.f32 %v3184_v43, %v3192_v15  ;;  %v5750_v37 = vmax.f32 %v3185_v63, %v3193_v29  ;;  %v3179_v47 = vld [vmem:[#allocation4 + $0x70] sm:$0xff]  ;;  %v4582_v60 = vpack.i.bf16 %v1917_v14, %v5755_v59 }
 0x22c   : > { %v4236_v49 = vunpack.i.h.bf16 %v4234_v8  ;;  %v4235_v52 = vunpack.i.l.bf16 %v4234_v8  ;;  %4563 = vrot.lane.b32.xlu1 %v4562_v33, %s4760_s14  ;;  %v3186_v39 = vmax.f32 %v4944_v16, %v3178_v53  ;;  %v4251_v16 = vunpack.i.h.bf16 %v4249_v41  ;;  %v5766_v29 = vld [vmem:[#allocation4 + $0x52] sm:$0xff] }
 0x22d   : > { %4498 = vrot.lane.b32.xlu0 %v4497_v45, %s4764_s17  ;;  %v4507_v45 = vpack.i.bf16 %v5471_v7, %v5415_v23  ;;  %v4250_v63 = vunpack.i.l.bf16 %v4249_v41  ;;  %v5764_v15 = vmax.f32 %v3215_v12, %v5709_v35  ;;  %v3187_v53 = vmax.f32 %v4947_v17, %v3179_v47  ;;  %v5772_v7 = vld [vmem:[#allocation4 + $0x42] sm:$0xff]  ;;  %v3195_v41 = vld [vmem:[#allocation4 + $0x71] sm:$0xff] }
 0x22e   : > { %v5741_v62 = vsel %vm508_vm4, %v2467_v51, %v4235_v52  ;;  %v5744_v8 = vsel %vm508_vm4, %v2468_v3, %v4236_v49  ;;  %v5753_v54 = vpop.permute.xlu1 %4263  ;;  %v3194_v52 = vld [vmem:[#allocation4 + $0x61] sm:$0xff]  ;;  %v1728_v3 = vld [vmem:[#allocation3 + $0x50] sm:$0xff] }
 0x22f   : > { %v4244_v50 = vpop.permute.xlu0 %4243  ;;  %v1727_v51 = vld [vmem:[#allocation3 + $0x40] sm:$0xff]  ;;  %v2379_v55 = vsel %vm1664_vm2, %v1728_v3, %v4241_v9  ;;  %v5775_v9 = vmax.f32 %v3186_v39, %v3194_v52  ;;  %v3220_v3 = vld [vmem:[#allocation4 + $0x10] sm:$0xff]  ;;  %v3247_v52 = vmax.f32 %v5764_v15, %v5772_v7 }
 0x230   : > { %v4246_v34 = vunpack.i.h.bf16 %v4244_v50  ;;  %v4245_v33 = vunpack.i.l.bf16 %v4244_v50  ;;  %v2378_v43 = vsel %vm1664_vm2, %v1727_v51, %v4240_v24  ;;  %4573 = vrot.lane.b32.xlu1 %v4572_v13, %s4763_s23  ;;  %v3246_v24 = vmax.f32 %v3230_v30, %v5726_v10  ;;  %v5781_v47 = vld [vmem:[#allocation4 + $0x62] sm:$0xff] }
 0x231   : > { %4508 = vrot.lane.b32.xlu0 %v4507_v45, %s4764_s17  ;;  %v3217_v10 = vmax.f32 %v5750_v37, %v5766_v29  ;;  %v3228_v30 = vmax.f32 %v3212_v28, %v3220_v3  ;;  %v3218_v37 = vmax.f32 %v5775_v9, %v5781_v47  ;;  %v3270_v3 = vld [vmem:[#allocation4 + $0x31] sm:$0xff] }
 0x232   : > { %v2387_v49 = vsel %vm884_vm6, %v2379_v55, %v4246_v34  ;;  %v2386_v23 = vsel %vm884_vm6, %v2378_v43, %v4245_v33  ;;  %v5777_v13 = vpop.permute.xlu1 %4278  ;;  %v3221_v34 = vld [vmem:[#allocation4 + $0x20] sm:$0xff]  ;;  %v3216_v33 = vmax.f32 %v5748_v22, %v5772_v7  ;;  %v5790_v55 = vmax.f32 %v3187_v53, %v3195_v41  ;;  %v3254_v41 = vld [vmem:[#allocation4 + $0x30] sm:$0xff] }
 0x233   : > { %v4254_v14 = vpop.permute.xlu0 %4253  ;;  %v2395_v12 = vsel %vm2390_vm7, %v2386_v23, %v4250_v63  ;;  %v2396_v17 = vsel %vm2390_vm7, %v2387_v49, %v4251_v16  ;;  %v3229_v39 = vmax.f32 %v3213_v27, %v3221_v34  ;;  %v3236_v63 = vld [vmem:[#allocation4 + $0x12] sm:$0xff]  ;;  %v3237_v22 = vld [vmem:[#allocation4 + $0x22] sm:$0xff]  ;;  %v3263_v49 = vmax.f32 %v3246_v24, %v5709_v35 }
 0x234   : > { %v4256_v50 = vunpack.i.h.bf16 %v4254_v14  ;;  %v4255_v51 = vunpack.i.l.bf16 %v4254_v14  ;;  %4583 = vrot.lane.b32.xlu1 %v4582_v60, %s4764_s17  ;;  %v3244_v60 = vmax.f32 %v3228_v30, %v3236_v63  ;;  %v3211_v14 = vld [vmem:[#allocation4 + $0x72] sm:$0xff] }
 0x235   : > { %4518 = vrot.lane.b32.xlu0 %v4507_v45, %s4758_s12  ;;  %v3245_v29 = vmax.f32 %v3229_v39, %v3237_v22  ;;  %v4265_v45 = vunpack.i.l.bf16 %v5753_v54 }
 0x236   : > { %v2403_v43 = vsel %vm406_vm0, %v2395_v12, %v4255_v51  ;;  %v2404_v16 = vsel %vm406_vm0, %v2396_v17, %v4256_v50  ;;  %v4299_v28 = vpop.permute.xlu1 %4298  ;;  %v4266_v12 = vunpack.i.h.bf16 %v5753_v54  ;;  %v3261_v17 = vmax.f32 %v3244_v60, %v3221_v34  ;;  %v3269_v51 = vld [vmem:[#allocation4 + $0x21] sm:$0xff]  ;;  %v3256_v54 = vld [vmem:[#allocation4 + $0x50] sm:$0xff] }
 0x237   : > { %v4259_v27 = vpop.permute.xlu0 %4258  ;;  %v4301_v15 = vunpack.i.h.bf16 %v4299_v28  ;;  %v4300_v53 = vunpack.i.l.bf16 %v4299_v28  ;;  %v3262_v50 = vmax.f32 %v3245_v29, %v3254_v41  ;;  %v3271_v28 = vld [vmem:[#allocation4 + $0x41] sm:$0xff]  ;;  %v3286_v60 = vld [vmem:[#allocation4 + $0x32] sm:$0xff] }
 0x238   : > { %v4261_v23 = vunpack.i.h.bf16 %v4259_v27  ;;  %v4260_v7 = vunpack.i.l.bf16 %v4259_v27  ;;  %v3272_v29 = vld [vmem:[#allocation4 + $0x51] sm:$0xff]  ;;  %v3287_v41 = vld [vmem:[#allocation4 + $0x42] sm:$0xff] }
 0x239   : > { %v5801_v35 = vsel %vm2407_vm8, %v2403_v43, %v4300_v53  ;;  %v5804_v24 = vsel %vm2407_vm8, %v2404_v16, %v4301_v15  ;;  %4528 = vrot.lane.b32.xlu0 %v5388_v46, %s4760_s14  ;;  %v3277_v16 = vmax.f32 %v3261_v17, %v3269_v51  ;;  %v3278_v63 = vmax.f32 %v3262_v50, %v3270_v3  ;;  %v3225_v46 = vld [vmem:[#allocation4 + $0x60] sm:$0xff] }
 0x23a   : > { %v2737_v9 = vsel %vm406_vm0, %v5629_v42, %v4260_v7  ;;  %v2738_v47 = vsel %vm406_vm0, %v5632_v25, %v4261_v23  ;;  %v5812_v34 = vpop.permute.xlu1 %4308  ;;  %v3219_v42 = vmax.f32 %v5790_v55, %v3211_v14  ;;  %v3264_v23 = vmax.f32 %v3247_v52, %v3256_v54  ;;  %v3288_v55 = vld [vmem:[#allocation4 + $0x52] sm:$0xff] }
 0x23b   : > { %v4269_v30 = vpop.permute.xlu0 %4268  ;;  %v2745_v39 = vsel %vm2407_vm8, %v2737_v9, %v4265_v45  ;;  %v2746_v43 = vsel %vm2407_vm8, %v2738_v47, %v4266_v12  ;;  %v5817_v15 = vmax.f32 %v3277_v16, %v3237_v22  ;;  %v5819_v53 = vmax.f32 %v3278_v63, %v3286_v60  ;;  %v3258_v45 = vld [vmem:[#allocation4 + $0x70] sm:$0xff]  ;;  %v3241_v9 = vld [vmem:[#allocation4 + $0x62] sm:$0xff] }
 0x23c   : > { %v4271_v27 = vunpack.i.h.bf16 %v4269_v30  ;;  %v4270_v25 = vunpack.i.l.bf16 %v4269_v30  ;;  %v3279_v7 = vmax.f32 %v3263_v49, %v3271_v28  ;;  %v3232_v14 = vmax.f32 %v3216_v33, %v3256_v54  ;;  %v3227_v47 = vld [vmem:[#allocation4 + $0x80] sm:$0xff]  ;;  %v3290_v30 = vld [vmem:[#allocation4 + $0x72] sm:$0xff] }
 0x23d   : > { %4538 = vrot.lane.b32.xlu0 %v5586_v36, %s4763_s23  ;;  %v3233_v50 = vmax.f32 %v3217_v10, %v3225_v46  ;;  %v3280_v49 = vmax.f32 %v3264_v23, %v3272_v29  ;;  %v4280_v36 = vunpack.i.l.bf16 %v5777_v13  ;;  %v3235_v28 = vmax.f32 %v3219_v42, %v3227_v47  ;;  %v3274_v60 = vld [vmem:[#allocation4 + $0x71] sm:$0xff]  ;;  %v3243_v29 = vld [vmem:[#allocation4 + $0x82] sm:$0xff] }
 0x23e   : > { %v2753_v12 = vsel %vm508_vm4, %v2745_v39, %v4270_v25  ;;  %v2754_v17 = vsel %vm508_vm4, %v2746_v43, %v4271_v27  ;;  %v5825_v22 = vpop.permute.xlu1 %4328  ;;  %v5829_v3 = vmax.f32 %v3279_v7, %v3287_v41  ;;  %v3234_v39 = vmax.f32 %v3218_v37, %v3258_v45  ;;  %v3273_v37 = vld [vmem:[#allocation4 + $0x61] sm:$0xff]  ;;  %v1893_v42 = vld [vmem:[#allocation3 + $0xb0] sm:$0xff] }
 0x23f   : > { %v4274_v51 = vpop.permute.xlu0 %4273  ;;  %v4281_v43 = vunpack.i.h.bf16 %v5777_v13  ;;  %v5833_v10 = vmax.f32 %v3280_v49, %v3288_v55  ;;  %v3248_v54 = vmax.f32 %v3232_v14, %v3288_v55  ;;  %v3249_v63 = vmax.f32 %v3233_v50, %v3241_v9 }
 0x240   : > { %v4276_v16 = vunpack.i.h.bf16 %v4274_v51  ;;  %v4275_v33 = vunpack.i.l.bf16 %v4274_v51  ;;  %v3250_v13 = vmax.f32 %v3234_v39, %v3290_v30  ;;  %v4557_v50 = vpack.i.bf16 %v5755_v59, %v5656_v21  ;;  %v3260_v39 = vld [vmem:[#allocation4 + $0x90] sm:$0xff] }
 0x241   : > { %4548 = vrot.lane.b32.xlu0 %v5669_v1, %s4764_s17  ;;  %v3266_v55 = vmax.f32 %v3249_v63, %v3258_v45  ;;  %v6589_v51 = vunpack.i.l.bf16 %v5666_v32  ;;  %v6590_v52 = vunpack.i.h.bf16 %v5666_v32  ;;  %v4567_v63 = vpack.i.bf16 %v1893_v42, %v5714_v5  ;;  %v3276_v32 = vld [vmem:[#allocation4 + $0x91] sm:$0xff] }
 0x242   : > { %v5836_v27 = vsel %vm2424_vm9, %v2753_v12, %v4275_v33  ;;  %v5839_v25 = vsel %vm2424_vm9, %v2754_v17, %v4276_v16  ;;  %v5845_v7 = vpop.permute.xlu1 %4338  ;;  %v3265_v17 = vmax.f32 %v3248_v54, %v3225_v46  ;;  %v637_v16 = vld [vmem:[#allocation2 + $0x31] sm:$0xff]  ;;  %v638_v33 = vld [vmem:[#allocation2 + $0x41] sm:$0xff]  ;;  %v3251_v54 = vmax.f32 %v3235_v28, %v3243_v29 }
 0x243   : > { %v5847_v41 = vpop.permute.xlu0 %4283  ;;  %v887_v49 = vsel %vm884_vm6, %v6589_v51, %v4280_v36  ;;  %v888_v12 = vsel %vm884_vm6, %v6590_v52, %v4281_v43  ;;  %v3282_v45 = vmax.f32 %v3266_v55, %v3274_v60  ;;  %v3267_v36 = vmax.f32 %v3250_v13, %v3227_v47  ;;  %v3275_v51 = vld [vmem:[#allocation4 + $0x81] sm:$0xff]  ;;  %v1909_v28 = vld [vmem:[#allocation3 + $0xb2] sm:$0xff] }
 0x244   : > { %v6564_v14 = vunpack.i.h.bf16 %v5847_v41  ;;  %v6565_v1 = vunpack.i.l.bf16 %v5847_v41  ;;  %v3281_v46 = vmax.f32 %v3265_v17, %v3273_v37  ;;  %v3268_v5 = vmax.f32 %v3251_v54, %v3260_v39 }
 0x245   : > { %4558 = vrot.lane.b32.xlu0 %v4557_v50, %s4759_s13  ;;  %v5873_v60 = vmax.f32 %v3282_v45, %v3290_v30  ;;  %v926_v55 = vpack.c.bf16 %v888_v12, %v887_v49  ;;  %v3292_v50 = vld [vmem:[#allocation4 + $0x92] sm:$0xff]  ;;  %v3283_v13 = vmax.f32 %v3267_v36, %v3275_v51 }
 0x246   : > { %v895_v21 = vsel %vm508_vm4, %v637_v16, %v6565_v1  ;;  %v896_v59 = vsel %vm508_vm4, %v638_v33, %v6564_v14  ;;  %v5869_v23 = vpop.permute.xlu1 %4348  ;;  %v5871_v37 = vmax.f32 %v3281_v46, %v3241_v9  ;;  %v3284_v16 = vmax.f32 %v3268_v5, %v3276_v32  ;;  %v1792_v1 = vld [vmem:[#allocation3 + $0x53] sm:$0xff] }
 0x247   : > { %v4289_v52 = vpop.permute.xlu0 %4288  ;;  %v927_v43 = vpack.c.bf16 %v896_v59, %v895_v21  ;;  %v4577_v33 = vpack.i.bf16 %v1909_v28, %v5694_v4  ;;  %v5891_v46 = vmax.f32 %v3283_v13, %v3243_v29  ;;  %v4311_v21 = vunpack.i.h.bf16 %v5812_v34 }
 0x248   : > { %v4291_v42 = vunpack.i.h.bf16 %v4289_v52  ;;  %v4290_v17 = vunpack.i.l.bf16 %v4289_v52  ;;  %v5893_v45 = vmax.f32 %v3284_v16, %v3292_v50  ;;  %v4310_v59 = vunpack.i.l.bf16 %v5812_v34 }
 0x249   : > { %1501 = vmatprep.mubr.bf16.mxu0 %v927_v43  ;;  %4568 = vrot.lane.b32.xlu0 %v4567_v63, %s4761_s15  ;;  %v4210_v34 = vunpack.i.l.bf16 %v5692_v57  ;;  %v4340_v14 = vunpack.i.l.bf16 %v5845_v7 }
 0x24a   : > { %1502 = vmatmul.mubr.bf16.gmra.mrb[20].mxu0 %v926_v55  ;;  %v5881_v9 = vsel %vm2424_vm9, %v5741_v62, %v4290_v17  ;;  %v5885_v30 = vsel %vm2424_vm9, %v5744_v8, %v4291_v42  ;;  %v5887_v12 = vpop.permute.xlu1 %4368 }
 0x24b   : > { %v4294_v49 = vpop.permute.xlu0 %4293 }
 0x24c   : > { %v4296_v4 = vunpack.i.h.bf16 %v4294_v49 }
 0x24d   : > { %4578 = vrot.lane.b32.xlu0 %v4577_v33, %s4762_s18  ;;  %v607_v33 = vld [vmem:[#allocation2 + $0x40] sm:$0xff] }
 0x24e   : > { %v4374_v62 = vpop.permute.xlu1 %4373 }
 0x24f   : > { %v4304_v54 = vpop.permute.xlu0 %4303  ;;  %v4376_v55 = vunpack.i.h.bf16 %v4374_v62  ;;  %v4375_v50 = vunpack.i.l.bf16 %v4374_v62 }
 0x250   : > { %v4306_v63 = vunpack.i.h.bf16 %v4304_v54  ;;  %v4305_v8 = vunpack.i.l.bf16 %v4304_v54  ;;  %v608_v54 = vld [vmem:[#allocation2 + $0x50] sm:$0xff] }
 0x252   : > { %v2420_v36 = vsel %vm508_vm4, %v5801_v35, %v4305_v8  ;;  %v2421_v29 = vsel %vm508_vm4, %v5804_v24, %v4306_v63  ;;  %v5904_v51 = vpop.permute.xlu1 %4378 }
 0x253   : > { %v4314_v32 = vpop.permute.xlu0 %4313  ;;  %v5907_v52 = vsel %vm2424_vm9, %v2420_v36, %v4310_v59  ;;  %v5910_v43 = vsel %vm2424_vm9, %v2421_v29, %v4311_v21  ;;  %v6563_v42 = vunpack.i.h.bf16 %v5904_v51  ;;  %v6562_v35 = vunpack.i.l.bf16 %v5904_v51 }
 0x254   : > { %v4316_v28 = vunpack.i.h.bf16 %v4314_v32  ;;  %v4315_v5 = vunpack.i.l.bf16 %v4314_v32 }
 0x255   : > { %v882_v62 = vsel %vm406_vm0, %v4375_v50, %v6562_v35  ;;  %v883_v36 = vsel %vm406_vm0, %v4376_v55, %v6563_v42  ;;  %v4341_v42 = vunpack.i.h.bf16 %v5845_v7  ;;  %v6591_v7 = vunpack.i.l.bf16 %v5617_v11 }
 0x256   : > { %v5916_v17 = vpop.permute.xlu1 %4383  ;;  %v872_v63 = vsel %vm508_vm4, %v607_v33, %v4315_v5  ;;  %v873_v8 = vsel %vm508_vm4, %v608_v54, %v4316_v28  ;;  %v939_v47 = vpack.c.bf16 %v883_v36, %v882_v62  ;;  %v875_v36 = vsel %vm508_vm4, %v5495_v0, %v4376_v55 }
 0x257   : > { %v5918_v24 = vpop.permute.xlu0 %4318  ;;  %v931_v54 = vpack.c.bf16 %v873_v8, %v872_v63 }
 0x258   : > { %v6566_v13 = vunpack.i.h.bf16 %v5918_v24  ;;  %v4320_v16 = vunpack.i.l.bf16 %v5918_v24 }
 0x25a   : > { %v880_v21 = vsel %vm406_vm0, %v4315_v5, %v4320_v16  ;;  %v881_v59 = vsel %vm406_vm0, %v4316_v28, %v6566_v13  ;;  %v5936_v29 = vpop.permute.xlu1 %4398  ;;  %v4295_v5 = vunpack.i.l.bf16 %v4294_v49  ;;  %v4211_v28 = vunpack.i.h.bf16 %v5692_v57  ;;  %v609_v49 = vld [vmem:[#allocation2 + $0x60] sm:$0xff] }
 0x25b   : > { %v5938_v32 = vpop.permute.xlu0 %4323  ;;  %v932_v33 = vpack.c.bf16 %v881_v59, %v880_v21  ;;  %v1793_v21 = vld [vmem:[#allocation3 + $0x63] sm:$0xff]  ;;  %v874_v57 = vsel %vm508_vm4, %v609_v49, %v4375_v50 }
 0x25c   : > { %v2438_v59 = vsel %vm1664_vm2, %v1793_v21, %v4296_v4  ;;  %v2437_v62 = vsel %vm1664_vm2, %v1792_v1, %v4295_v5  ;;  %v938_v21 = vpack.c.bf16 %v875_v36, %v874_v57 }
 0x25d   : > { %1444 = vmatprep.mubr.bf16.mxu1 %v932_v33 }
 0x25e   : > { %1445 = vmatmul.mubr.bf16.gmra.mrb[8].mxu1 %v931_v54  ;;  %v5942_v39 = vpop.permute.xlu1 %4403  ;;  %v909_v54 = vsel %vm884_vm6, %v6591_v7, %v4210_v34  ;;  %v4326_v34 = vunpack.i.h.bf16 %v5938_v32 }
 0x25f   : > { %v4334_v35 = vpop.permute.xlu0 %4333  ;;  %1452 = vmatprep.mubr.bf16.mxu1 %v939_v47 }
 0x260   : > { %v4336_v63 = vunpack.i.h.bf16 %v4334_v35  ;;  %v4335_v8 = vunpack.i.l.bf16 %v4334_v35  ;;  %v6592_v35 = vunpack.i.h.bf16 %v5617_v11  ;;  %v4325_v11 = vunpack.i.l.bf16 %v5938_v32 }
 0x261   : > { %v4371_v32 = vunpack.i.h.bf16 %v5887_v12 }
 0x262   : > { %v2445_v47 = vsel %vm884_vm6, %v2437_v62, %v4335_v8  ;;  %v2446_v33 = vsel %vm884_vm6, %v2438_v59, %v4336_v63  ;;  %v910_v13 = vsel %vm884_vm6, %v6592_v35, %v4211_v28  ;;  %v5959_v4 = vpop.permute.xlu1 %4418  ;;  %v4351_v63 = vunpack.i.h.bf16 %v5869_v23 }
 0x263   : > { %v4344_v1 = vpop.permute.xlu0 %4343  ;;  %v2453_v50 = vsel %vm2390_vm7, %v2445_v47, %v4340_v14  ;;  %v2454_v5 = vsel %vm2390_vm7, %v2446_v33, %v4341_v42  ;;  %v4350_v8 = vunpack.i.l.bf16 %v5869_v23  ;;  %v922_v49 = vpack.c.bf16 %v910_v13, %v909_v54 }
 0x264   : > { %v4346_v0 = vunpack.i.h.bf16 %v4344_v1  ;;  %v4345_v55 = vunpack.i.l.bf16 %v4344_v1  ;;  %v4331_v23 = vunpack.i.h.bf16 %v5825_v22  ;;  %v4330_v13 = vunpack.i.l.bf16 %v5825_v22  ;;  %v4712_v22 = vld [vmem:[%s6528_s5] sm:$0xff]  }
 0x265   : > { %v4370_v33 = vunpack.i.l.bf16 %v5887_v12 }
 0x266   : > { %v2461_v28 = vsel %vm406_vm0, %v2453_v50, %v4345_v55  ;;  %v2462_v59 = vsel %vm406_vm0, %v2454_v5, %v4346_v0  ;;  %1453 = vmatmul.mubr.bf16.gmra.mrb[12].mxu1 %v938_v21  ;;  %v5969_v14 = vpop.permute.xlu1 %4423  ;;  %v911_v35 = vsel %vm884_vm6, %v4325_v11, %v4330_v13  ;;  %v912_v1 = vsel %vm884_vm6, %v4326_v34, %v4331_v23  ;;  %v4714_v55 = vld [vmem:[%s6528_s5 + $0x48] sm:$0xff]  }
 0x267   : > { %v4354_v42 = vpop.permute.xlu0 %4353  ;;  %v2469_v62 = vsel %vm2407_vm8, %v2461_v28, %v4350_v8  ;;  %v2470_v57 = vsel %vm2407_vm8, %v2462_v59, %v4351_v63  ;;  %1558 = vmatprep.mubr.bf16.mxu1 %v922_v49  ;;  %v929_v8 = vpack.c.bf16 %v912_v1, %v911_v35  ;;  %v6567_v28 = vunpack.i.h.bf16 %v5959_v4  ;;  %v4715_v23 = vld [vmem:[%s6528_s5 + $0x8] sm:$0xff]  }
 0x268   : > { %v4356_v36 = vunpack.i.h.bf16 %v4354_v42  ;;  %v4355_v47 = vunpack.i.l.bf16 %v4354_v42  ;;  %v6568_v59 = vunpack.i.l.bf16 %v5959_v4  ;;  %v6593_v42 = vpack.c.bf16 %v5639_v26, %v5646_v58 }
 0x269   : > { %v6594_v58 = vunpack.i.h.bf16 %v5918_v24  ;;  %v6596_v1 = vunpack.i.h.bf16 %v5847_v41 }
 0x26a   : > { %v2477_v7 = vsel %vm508_vm4, %v2469_v62, %v4355_v47  ;;  %v2478_v54 = vsel %vm508_vm4, %v2470_v57, %v4356_v36  ;;  %v5981_v50 = vpop.permute.xlu1 %4433  ;;  %v639_v47 = vld [vmem:[#allocation2 + $0x51] sm:$0xff] }
 0x26b   : > { %v4359_v5 = vpop.permute.xlu0 %4358  ;;  %v5987_v0 = vsel %vm2424_vm9, %v2477_v7, %v4370_v33  ;;  %v5990_v12 = vsel %vm2424_vm9, %v2478_v54, %v4371_v32  ;;  %v4717_v32 = vld [vmem:[%s6528_s5 + $0x50] sm:$0xff]   ;;  %v640_v33 = vld [vmem:[#allocation2 + $0x61] sm:$0xff]  ;;  %v6595_v54 = vunpack.i.l.bf16 %v5847_v41 }
 0x26c   : > { %v4361_v21 = vunpack.i.h.bf16 %v4359_v5  ;;  %v4360_v63 = vunpack.i.l.bf16 %v4359_v5  ;;  %v904_v5 = vsel %vm406_vm0, %v6596_v1, %v4326_v34  ;;  %v4718_v34 = vld [vmem:[%s6528_s5 + $0x10] sm:$0xff]   ;;  %v4723_v1 = vld [vmem:[%s6528_s5 + $0x60] sm:$0xff]  }
 0x26d   : > { %v903_v35 = vsel %vm406_vm0, %v6595_v54, %v4325_v11 }
 0x26e   : > { %1559 = vmatmul.mubr.bf16.vlgmr.msra.gmra.mrb[16].mxu1 %v6593_v42  ;;  %v6002_v62 = vpop.permute.xlu1 %4443  ;;  %v889_v26 = vsel %vm884_vm6, %v4320_v16, %v4360_v63  ;;  %v890_v7 = vsel %vm884_vm6, %v6594_v58, %v4361_v21 }
 0x26f   : > { %v4364_v57 = vpop.permute.xlu0 %4363  ;;  %1566 = vmatprep.mubr.bf16.mxu1 %v929_v8  ;;  %3946 = vmatpush3.bf16.msra.mxu1 %v4712_v22  ;;  %v641_v22 = vld [vmem:[#allocation2 + $0x71] sm:$0xff]  ;;  %v933_v63 = vpack.c.bf16 %v890_v7, %v889_v26  ;;  %v4401_v26 = vunpack.i.h.bf16 %v5936_v29 }
 0x270   : > { %v4366_v13 = vunpack.i.h.bf16 %v4364_v57  ;;  %v4365_v36 = vunpack.i.l.bf16 %v4364_v57  ;;  %3947 = vmatprep.subr.bf16.mxu1 %v4714_v55  ;;  %v642_v55 = vld [vmem:[#allocation2 + $0x81] sm:$0xff]  ;;  %v899_v24 = vsel %vm508_vm4, %v641_v22, %v6568_v59  ;;  %v928_v57 = vpack.c.bf16 %v904_v5, %v903_v35 }
 0x271   : > { %v900_v16 = vsel %vm508_vm4, %v642_v55, %v6567_v28  ;;  %v4116_v28 = vunpack.i.h.bf16 %v5493_v20 }
 0x272   : > { %v897_v8 = vsel %vm508_vm4, %v639_v47, %v4365_v36  ;;  %v898_v42 = vsel %vm508_vm4, %v640_v33, %v4366_v13  ;;  %v6030_v21 = vpop.permute.xlu1 %4458  ;;  %v4720_v47 = vld [vmem:[%s6528_s5 + $0x58] sm:$0xff]   ;;  %v941_v33 = vpack.c.bf16 %v900_v16, %v899_v24  ;;  %v4050_v16 = vunpack.i.l.bf16 %v5111_v38 }
 0x273   : > { %v6032_v11 = vpop.permute.xlu0 %4388  ;;  %v934_v41 = vpack.c.bf16 %v898_v42, %v897_v8  ;;  %3948 = vmatpush3.bf16.msra.mxu1 %v4715_v23  ;;  %v4721_v23 = vld [vmem:[%s6528_s5 + $0x18] sm:$0xff]  }
 0x274   : > { %3949 = vmatprep.subr.bf16.mxu1 %v4717_v32  ;;  %v4400_v32 = vunpack.i.l.bf16 %v5936_v29  ;;  %v4724_v29 = vld [vmem:[%s6528_s5 + $0x20] sm:$0xff]  }
 0x275   : > { %1509 = vmatprep.mubr.bf16.mxu0 %v934_v41 }
 0x276   : > { %1510 = vmatmul.mubr.bf16.gmra.mrb[24].mxu0 %v933_v63  ;;  %1567 = vmatmul.mubr.bf16.gmra.mrb[20].mxu1 %v928_v57  ;;  %v6040_v58 = vpop.permute.xlu1 %4463  ;;  %v4051_v63 = vunpack.i.h.bf16 %v5111_v38  ;;  %v4727_v38 = vld [vmem:[%s6528_s5 + $0x28] sm:$0xff]  }
 0x277   : > { %v4394_v54 = vpop.permute.xlu0 %4393  ;;  %1517 = vmatprep.mubr.bf16.mxu0 %v941_v33  ;;  %3950 = vmatpush3.bf16.msra.mxu1 %v4718_v34  ;;  %v4726_v34 = vld [vmem:[%s6528_s5 + $0x68] sm:$0xff]   ;;  %v669_v33 = vld [vmem:[#allocation2 + $0x32] sm:$0xff] }
 0x278   : > { %v4396_v7 = vunpack.i.h.bf16 %v4394_v54  ;;  %v4395_v35 = vunpack.i.l.bf16 %v4394_v54  ;;  %3951 = vmatprep.subr.bf16.mxu1 %v4720_v47  ;;  %v4055_v54 = vunpack.i.l.bf16 %v5125_v44 }
 0x27a   : > { %v913_v5 = vsel %vm884_vm6, %v4395_v35, %v4400_v32  ;;  %v914_v22 = vsel %vm884_vm6, %v4396_v7, %v4401_v26  ;;  %v905_v55 = vsel %vm406_vm0, %v4365_v36, %v4395_v35  ;;  %v906_v8 = vsel %vm406_vm0, %v4366_v13, %v4396_v7  ;;  %v1723_v36 = vld [vmem:[#allocation3] sm:$0xff]  ;;  %v6062_v57 = vpop.permute.xlu1 %4473 }
 0x27b   : > { %v936_v42 = vpack.c.bf16 %v914_v22, %v913_v5  ;;  %v935_v24 = vpack.c.bf16 %v906_v8, %v905_v55  ;;  %3952 = vmatpush3.bf16.msra.mxu1 %v4721_v23  ;;  %v4409_v41 = vpop.permute.xlu0 %4408  ;;  %v6597_v23 = vunpack.i.l.bf16 %v5904_v51  ;;  %v6598_v32 = vunpack.i.h.bf16 %v5904_v51  ;;  %v668_v55 = vld [vmem:[#allocation2 + $0x22] sm:$0xff]  ;;  %v4729_v51 = vld [vmem:[%s6528_s5 + $0x70] sm:$0xff]  }
 0x27c   : > { %3953 = vmatprep.subr.bf16.mxu1 %v4723_v1  ;;  %v4411_v13 = vunpack.i.h.bf16 %v4409_v41  ;;  %v4410_v47 = vunpack.i.l.bf16 %v4409_v41  ;;  %v2374_v35 = vsel %vm1664_vm2, %v1723_v36, %v4050_v16  ;;  %v4056_v1 = vunpack.i.h.bf16 %v5125_v44  ;;  %v4742_v8 = vld [vmem:[#allocation3 + $0x10] sm:$0xff] }
 0x27d   : > { %1574 = vmatprep.mubr.bf16.mxu1 %v936_v42  ;;  %v2375_v42 = vsel %vm1664_vm2, %v4742_v8, %v4051_v63  ;;  %v2382_v16 = vsel %vm884_vm6, %v2374_v35, %v4055_v54  ;;  %v4061_v44 = vunpack.i.h.bf16 %v5133_v48  ;;  %v4070_v35 = vunpack.i.l.bf16 %v5395_v18 }
 0x27e   : > { %1575 = vmatmul.mubr.bf16.gmra.mrb[24].mxu1 %v935_v24  ;;  %v891_v26 = vsel %vm884_vm6, %v6597_v23, %v4410_v47  ;;  %v892_v7 = vsel %vm884_vm6, %v6598_v32, %v4411_v13  ;;  %v923_v24 = vpack.c.bf16 %v669_v33, %v668_v55  ;;  %v6085_v41 = vpop.permute.xlu1 %4483  ;;  %v2383_v36 = vsel %vm884_vm6, %v2375_v42, %v4056_v1  ;;  %v4732_v13 = vld [vmem:[%s6528_s5 + $0x78] sm:$0xff]   ;;  %v670_v47 = vld [vmem:[#allocation2 + $0x42] sm:$0xff] }
 0x27f   : > { %3954 = vmatpush3.bf16.msra.mxu1 %v4724_v29  ;;  %v6076_v5 = vpop.permute.xlu0 %4413  ;;  %v940_v22 = vpack.c.bf16 %v892_v7, %v891_v26  ;;  %v4060_v29 = vunpack.i.l.bf16 %v5133_v48  ;;  %v4065_v48 = vunpack.i.l.bf16 %v5147_v56  ;;  %v671_v33 = vld [vmem:[#allocation2 + $0x52] sm:$0xff]  ;;  %v4066_v23 = vunpack.i.h.bf16 %v5147_v56  ;;  %v672_v26 = vld [vmem:[#allocation2 + $0x62] sm:$0xff] }
 0x280   : > { %3955 = vmatprep.subr.bf16.mxu1 %v4726_v34  ;;  %v4730_v34 = vld [vmem:[%s6528_s5 + $0x30] sm:$0xff]   ;;  %v2392_v7 = vsel %vm2390_vm7, %v2383_v36, %v4061_v44  ;;  %v4719_v1 = vld [vmem:[%s6528_s5 + $0x80] sm:$0xff]   ;;  %v4100_v56 = vunpack.i.l.bf16 %v5446_v2  ;;  %v930_v42 = vpack.c.bf16 %v671_v33, %v670_v47  ;;  %v4110_v47 = vunpack.i.l.bf16 %v5476_v31 }
 0x281   : > { %1518 = vmatmul.mubr.bf16.gmra.mrb[28].mxu0 %v940_v22  ;;  %v2391_v54 = vsel %vm2390_vm7, %v2382_v16, %v4060_v29  ;;  %v673_v32 = vld [vmem:[#allocation2 + $0x72] sm:$0xff]  ;;  %v6106_v22 = vld [vmem:[#allocation3 + $0x44] sm:$0xff]  ;;  %v4106_v29 = vunpack.i.h.bf16 %v5460_v40  ;;  %v4105_v16 = vunpack.i.l.bf16 %v5460_v40  ;;  %v2400_v36 = vsel %vm406_vm0, %v2392_v7, %v4066_v23 }
 0x282   : > { %4005 = vmatprep.mubr.msk.bf16.mxu0 %vm508_vm4, %v923_v24  ;;  %v6108_v55 = vld [vmem:[#allocation3 + $0x54] sm:$0xff]  ;;  %v2399_v24 = vsel %vm406_vm0, %v2391_v54, %v4065_v48  ;;  %v6120_v44 = vpop.permute.xlu1 %4493  ;;  %v674_v48 = vld [vmem:[#allocation2 + $0x82] sm:$0xff]  ;;  %v4115_v23 = vunpack.i.l.bf16 %v5493_v20 }
 0x283   : > { %3956 = vmatpush3.bf16.msra.mxu1 %v4727_v38  ;;  %v6092_v63 = vpop.permute.xlu0 %4428  ;;  %v4071_v38 = vunpack.i.h.bf16 %v5395_v18  ;;  %v4733_v18 = vld [vmem:[%s6528_s5 + $0x38] sm:$0xff]   ;;  %v2772_v40 = vpack.c.bf16 %v6108_v55, %v6106_v22  ;;  %v4743_v54 = vld [vmem:[#allocation3 + $0x23] sm:$0xff]  ;;  %v4120_v55 = vunpack.i.l.bf16 %v5510_v61 }
 0x284   : > { %3957 = vmatprep.subr.bf16.mxu1 %v4729_v51  ;;  %v4101_v51 = vunpack.i.h.bf16 %v5446_v2  ;;  %v6125_v2 = vld [vmem:[%s6530_s7] sm:$0xff]   ;;  %v675_v33 = vld [vmem:[#allocation2 + $0x92] sm:$0xff] }
 0x285   : > { %v6599_v20 = vld [vmem:[#allocation13_spill] sm:$0xff] }
 0x287   : > { %3958 = vmatpush3.bf16.msra.mxu1 %v4730_v34  ;;  %v6112_v8 = vpop.permute.xlu0 %4438  ;;  %v937_v34 = vpack.c.bf16 %v673_v32, %v672_v26  ;;  %v2434_v26 = vsel %vm1664_vm2, %v4743_v54, %v4071_v38  ;;  %v4744_v32 = vld [vmem:[#allocation3 + $0x13] sm:$0xff]  ;;  %v4121_v38 = vunpack.i.h.bf16 %v5510_v61  ;;  %v944_v54 = vpack.c.bf16 %v675_v33, %v674_v48 }
 0x288   : > { %3959 = vmatprep.subr.bf16.mxu1 %v4732_v13  ;;  %v4111_v13 = vunpack.i.h.bf16 %v5476_v31  ;;  %v2433_v49 = vsel %vm1664_vm2, %v4744_v32, %v4070_v35  ;;  %v4722_v31 = vld [vmem:[%s6528_s5 + $0x88] sm:$0xff]   ;;  %v2442_v22 = vsel %vm884_vm6, %v2434_v26, %v4101_v51  ;;  %v4156_v61 = vunpack.i.h.bf16 %v5564_v6  ;;  %v6601_v48 = vld [vmem:[#allocation15_spill] sm:$0xff] }
 0x289   : > { %4006 = vmatmul.mubr.msk.bf16.vlgmr.msra.gmra.mrb[32].mxu0 %vm508_vm4, %v930_v42  ;;  %v2441_v7 = vsel %vm884_vm6, %v2433_v49, %v4100_v56  ;;  %v4155_v56 = vunpack.i.l.bf16 %v5564_v6  ;;  %v4076_v26 = vunpack.i.h.bf16 %v6599_v20  ;;  %v4085_v33 = vunpack.i.l.bf16 %v6601_v48 }
 0x28a   : > { %3070 = vmatpush1.bf16.msra.mxu0 %v4719_v1  ;;  %4009 = vmatprep.mubr.msk.bf16.mxu0 %vm508_vm4, %v937_v34  ;;  %v4075_v1 = vunpack.i.l.bf16 %v6599_v20  ;;  %v2449_v42 = vsel %vm2390_vm7, %v2441_v7, %v4105_v16  ;;  %v2450_v34 = vsel %vm2390_vm7, %v2442_v22, %v4106_v29  ;;  %v6160_v29 = vpop.permute.xlu1 %4503  ;;  %v4460_v22 = vunpack.i.l.bf16 %v6030_v21 }
 0x28b   : > { %v6145_v35 = vpop.permute.xlu0 %4448  ;;  %3071 = vmatprep.subr.bf16.mxu0 %v6588_v19  ;;  %3960 = vmatpush3.bf16.msra.mxu1 %v4733_v18  ;;  %v2457_v49 = vsel %vm406_vm0, %v2449_v42, %v4110_v47  ;;  %v2458_v51 = vsel %vm406_vm0, %v2450_v34, %v4111_v13  ;;  %v6600_v18 = vld [vmem:[#allocation14_spill] sm:$0xff]  ;;  %v4725_v47 = vld [vmem:[%s6528_s5 + $0x90] sm:$0xff]   ;;  %v4086_v34 = vunpack.i.h.bf16 %v6601_v48 }
 0x28c   : > { %4013 = vmatprep.subr.bf16.mxu1 %v6125_v2  ;;  %v4081_v32 = vunpack.i.h.bf16 %v6600_v18  ;;  %v2465_v59 = vsel %vm2407_vm8, %v2457_v49, %v4115_v23  ;;  %v2466_v16 = vsel %vm2407_vm8, %v2458_v51, %v4116_v28  ;;  %v4080_v13 = vunpack.i.l.bf16 %v6600_v18 }
 0x28d   : > { %v2473_v7 = vsel %vm508_vm4, %v2465_v59, %v4120_v55  ;;  %v2474_v23 = vsel %vm508_vm4, %v2466_v16, %v4121_v38  ;;  %v4461_v28 = vunpack.i.h.bf16 %v6030_v21  ;;  %v2408_v42 = vsel %vm2407_vm8, %v2399_v24, %v4075_v1  ;;  %v4728_v21 = vld [vmem:[%s6528_s5 + $0x98] sm:$0xff]  }
 0x28e   : > { %3072 = vmatpush1.bf16.msra.mxu0 %v4722_v31  ;;  %v2481_v49 = vsel %vm2424_vm9, %v2473_v7, %v4155_v56  ;;  %v2482_v51 = vsel %vm2424_vm9, %v2474_v23, %v4156_v61  ;;  %v6602_v24 = vunpack.i.l.bf16 %v5959_v4  ;;  %v2409_v1 = vsel %vm2407_vm8, %v2400_v36, %v4076_v26  ;;  %v6196_v48 = vpop.permute.xlu1 %4513 }
 0x28f   : > { %v4454_v6 = vpop.permute.xlu0 %4453  ;;  %3073 = vmatprep.subr.bf16.mxu0 %v6588_v19  ;;  %v6603_v56 = vunpack.i.h.bf16 %v5959_v4  ;;  %v2417_v16 = vsel %vm508_vm4, %v2409_v1, %v4081_v32  ;;  %v4386_v26 = vunpack.i.h.bf16 %v5916_v17  ;;  %v2770_v7 = vpack.c.bf16 %v2482_v51, %v2481_v49  ;;  %v1729_v49 = vld [vmem:[#allocation3 + $0x60] sm:$0xff]  ;;  %v1730_v51 = vld [vmem:[#allocation3 + $0x70] sm:$0xff] }
 0x290   : > { %v4456_v31 = vunpack.i.h.bf16 %v4454_v6  ;;  %v4455_v20 = vunpack.i.l.bf16 %v4454_v6  ;;  %v2426_v36 = vsel %vm2424_vm9, %v2417_v16, %v4086_v34  ;;  %v4406_v23 = vunpack.i.h.bf16 %v5942_v39 }
 0x291   : > { %4010 = vmatmul.mubr.msk.bf16.gmra.mrb[36].mxu0 %vm508_vm4, %v944_v54  ;;  %v2416_v54 = vsel %vm508_vm4, %v2408_v42, %v4080_v13  ;;  %v4385_v13 = vunpack.i.l.bf16 %v5916_v17  ;;  %v4405_v4 = vunpack.i.l.bf16 %v5942_v39  ;;  %v4390_v32 = vunpack.i.l.bf16 %v6032_v11  ;;  %v1794_v39 = vld [vmem:[#allocation3 + $0x73] sm:$0xff]  ;;  %v4745_v42 = vld [vmem:[#allocation3 + $0x83] sm:$0xff] }
 0x292   : > { %3074 = vmatpush1.bf16.msra.mxu0 %v4725_v47  ;;  %3782 = vmatprep.mubr.msk.bf16.mxu0 %vm1664_vm2, %v2772_v40  ;;  %v915_v59 = vsel %vm884_vm6, %v4455_v20, %v4460_v22  ;;  %v916_v38 = vsel %vm884_vm6, %v4456_v31, %v4461_v28  ;;  %v907_v55 = vsel %vm406_vm0, %v6602_v24, %v4455_v20  ;;  %v4391_v28 = vunpack.i.h.bf16 %v6032_v11  ;;  %v6208_v22 = vld [vmem:[#allocation3 + $0x64] sm:$0xff]  ;;  %v6223_v1 = vpop.permute.xlu1 %4523 }
 0x293   : > { %v6188_v61 = vpop.permute.xlu0 %4468  ;;  %3075 = vmatprep.subr.bf16.mxu0 %v6588_v19  ;;  %v943_v40 = vpack.c.bf16 %v916_v38, %v915_v59  ;;  %v908_v18 = vsel %vm406_vm0, %v6603_v56, %v4456_v31  ;;  %v2425_v47 = vsel %vm2424_vm9, %v2416_v54, %v4085_v33  ;;  %v4731_v33 = vld [vmem:[%s6528_s5 + $0xa0] sm:$0xff]   ;;  %v6210_v31 = vld [vmem:[#allocation3 + $0x74] sm:$0xff]  ;;  %v2440_v11 = vsel %vm1664_vm2, %v4745_v42, %v4386_v26  ;;  %v4734_v54 = vld [vmem:[%s6528_s5 + $0xa8] sm:$0xff]  }
 0x294   : > { %v942_v6 = vpack.c.bf16 %v908_v18, %v907_v55  ;;  %v2769_v20 = vpack.c.bf16 %v2426_v36, %v2425_v47  ;;  %v2439_v34 = vsel %vm1664_vm2, %v1794_v39, %v4385_v13  ;;  %v2776_v59 = vpack.c.bf16 %v6210_v31, %v6208_v22  ;;  %v1856_v39 = vld [vmem:[#allocation3 + $0x61] sm:$0xff]  ;;  %v1923_v31 = vld [vmem:[#allocation3 + $0x94] sm:$0xff] }
 0x295   : > { %1582 = vmatprep.mubr.bf16.mxu1 %v943_v40  ;;  %v2447_v38 = vsel %vm884_vm6, %v2439_v34, %v4405_v4  ;;  %v2381_v24 = vsel %vm1664_vm2, %v1730_v51, %v4391_v28  ;;  %v2380_v55 = vsel %vm1664_vm2, %v1729_v49, %v4390_v32  ;;  %v4426_v40 = vunpack.i.h.bf16 %v5969_v14  ;;  %v4739_v4 = vld [vmem:[%s6530_s7 + $0x8] sm:$0xff]  }
 0x296   : > { %3076 = vmatpush1.bf16.msra.mxu0 %v4728_v21  ;;  %1583 = vmatmul.mubr.bf16.gmra.mrb[28].mxu1 %v942_v6  ;;  %v2448_v21 = vsel %vm884_vm6, %v2440_v11, %v4406_v23  ;;  %v4425_v56 = vunpack.i.l.bf16 %v5969_v14  ;;  %v4416_v18 = vunpack.i.h.bf16 %v6076_v5  ;;  %v4415_v16 = vunpack.i.l.bf16 %v6076_v5  ;;  %v1922_v22 = vld [vmem:[#allocation3 + $0x84] sm:$0xff] }
 0x297   : > { %v6212_v17 = vpop.permute.xlu0 %4478  ;;  %3036 = vmatprep.mubr.bf16.mxu1 %v2770_v7  ;;  %3077 = vmatprep.subr.bf16.mxu0 %v6588_v19  ;;  %v4436_v6 = vunpack.i.h.bf16 %v5981_v50  ;;  %v4435_v36 = vunpack.i.l.bf16 %v5981_v50  ;;  %v4431_v26 = vunpack.i.h.bf16 %v6092_v63  ;;  %v4430_v13 = vunpack.i.l.bf16 %v6092_v63 }
 0x298   : > { %v4446_v7 = vunpack.i.h.bf16 %v6002_v62  ;;  %v4445_v14 = vunpack.i.l.bf16 %v6002_v62  ;;  %v2388_v23 = vsel %vm884_vm6, %v2380_v55, %v4425_v56  ;;  %v2389_v5 = vsel %vm884_vm6, %v2381_v24, %v4426_v40  ;;  %v4735_v62 = vld [vmem:[%s6528_s5 + $0xb0] sm:$0xff]   ;;  %v6267_v40 = vpop.permute.xlu1 %4533 }
 0x299   : > { %v4466_v28 = vunpack.i.h.bf16 %v6040_v58  ;;  %v4465_v50 = vunpack.i.l.bf16 %v6040_v58  ;;  %v4476_v32 = vunpack.i.h.bf16 %v6062_v57  ;;  %v4475_v63 = vunpack.i.l.bf16 %v6062_v57 }
 0x29a   : > { %3078 = vmatpush1.bf16.msra.mxu0 %v4731_v33  ;;  %v1855_v33 = vld [vmem:[#allocation3 + $0x51] sm:$0xff]  ;;  %v4486_v42 = vunpack.i.h.bf16 %v6085_v41  ;;  %v4485_v11 = vunpack.i.l.bf16 %v6085_v41  ;;  %v2716_v34 = vsel %vm1664_vm2, %v1856_v39, %v4416_v18  ;;  %v6604_v57 = vpack.c.bf16 %v5885_v30, %v5881_v9 }
 0x29b   : > { %v6232_v47 = vpop.permute.xlu0 %4488  ;;  %3079 = vmatprep.subr.bf16.mxu0 %v6588_v19  ;;  %v2715_v49 = vsel %vm1664_vm2, %v1855_v33, %v4415_v16  ;;  %v2455_v24 = vsel %vm2390_vm7, %v2447_v38, %v4430_v13  ;;  %v4451_v55 = vunpack.i.h.bf16 %v6145_v35  ;;  %v4441_v56 = vunpack.i.h.bf16 %v6112_v8  ;;  %v4740_v38 = vld [vmem:[%s6530_s7 + $0x10] sm:$0xff]  }
 0x29c   : > { %v4440_v18 = vunpack.i.l.bf16 %v6112_v8  ;;  %v4471_v9 = vunpack.i.h.bf16 %v6188_v61  ;;  %v4470_v30 = vunpack.i.l.bf16 %v6188_v61  ;;  %v2723_v16 = vsel %vm884_vm6, %v2715_v49, %v4435_v36  ;;  %v4737_v8 = vld [vmem:[%s6528_s5 + $0xb8] sm:$0xff]  }
 0x29d   : > { %v4506_v61 = vunpack.i.h.bf16 %v6160_v29  ;;  %v2463_v13 = vsel %vm406_vm0, %v2455_v24, %v4445_v14  ;;  %v4481_v24 = vunpack.i.h.bf16 %v6212_v17 }
 0x29e   : > { %3080 = vmatpush1.bf16.msra.mxu0 %v4734_v54  ;;  %3037 = vmatmul.mubr.bf16.vlgmr.msra.gmra.mrb[32].mxu1 %v2769_v20  ;;  %v2456_v20 = vsel %vm2390_vm7, %v2448_v21, %v4431_v26  ;;  %v4450_v54 = vunpack.i.l.bf16 %v6145_v35  ;;  %v4496_v21 = vunpack.i.h.bf16 %v6120_v44  ;;  %v4495_v35 = vunpack.i.l.bf16 %v6120_v44 }
 0x29f   : > { %v6257_v51 = vpop.permute.xlu0 %4498  ;;  %3044 = vmatprep.mubr.bf16.mxu1 %v6604_v57  ;;  %3081 = vmatprep.subr.bf16.mxu0 %v6588_v19  ;;  %v4505_v26 = vunpack.i.l.bf16 %v6160_v29  ;;  %v2464_v33 = vsel %vm406_vm0, %v2456_v20, %v4446_v7  ;;  %v2397_v49 = vsel %vm2390_vm7, %v2388_v23, %v4440_v18  ;;  %v2398_v29 = vsel %vm2390_vm7, %v2389_v5, %v4441_v56  ;;  %v4741_v57 = vld [vmem:[%s6530_s7 + $0x18] sm:$0xff]   ;;  %v6302_v20 = vpop.permute.xlu1 %4543  ;;  %v6605_v5 = vld [vmem:[#allocation17_spill] sm:$0xff] }
 0x2a0   : > { %4014 = vmatpush3.bf16.msra.mxu1 %v6125_v2  ;;  %v2724_v2 = vsel %vm884_vm6, %v2716_v34, %v4436_v6  ;;  %v2731_v36 = vsel %vm2390_vm7, %v2723_v16, %v4450_v54  ;;  %v4490_v34 = vunpack.i.l.bf16 %v6232_v47  ;;  %v2471_v14 = vsel %vm2407_vm8, %v2463_v13, %v4470_v30  ;;  %v4738_v56 = vld [vmem:[%s6528_s5 + $0xc0] sm:$0xff]  }
 0x2a1   : > { %4015 = vmatprep.subr.bf16.mxu1 %v4739_v4  ;;  %v2732_v6 = vsel %vm2390_vm7, %v2724_v2, %v4451_v55  ;;  %v2472_v7 = vsel %vm2407_vm8, %v2464_v33, %v4471_v9  ;;  %v4500_v23 = vunpack.i.l.bf16 %v6257_v51  ;;  %v6606_v55 = vld [vmem:[#allocation16_spill] sm:$0xff]  ;;  %v4516_v18 = vunpack.i.h.bf16 %v6196_v48 }
 0x2a2   : > { %3082 = vmatpush1.bf16.msra.mxu0 %v4735_v62  ;;  %v4491_v62 = vunpack.i.h.bf16 %v6232_v47  ;;  %v4480_v47 = vunpack.i.l.bf16 %v6212_v17  ;;  %v6607_v54 = vpack.c.bf16 %v6605_v5, %v6606_v55  ;;  %v4515_v9 = vunpack.i.l.bf16 %v6196_v48 }
 0x2a3   : > { %v6288_v39 = vpop.permute.xlu0 %4508  ;;  %3083 = vmatprep.subr.bf16.mxu0 %v6588_v19  ;;  %v2739_v30 = vsel %vm406_vm0, %v2731_v36, %v4475_v63  ;;  %v2740_v17 = vsel %vm406_vm0, %v2732_v6, %v4476_v32  ;;  %v2405_v48 = vsel %vm406_vm0, %v2397_v49, %v4465_v50  ;;  %v2406_v32 = vsel %vm406_vm0, %v2398_v29, %v4466_v28  ;;  %v1857_v36 = vld [vmem:[#allocation3 + $0x71] sm:$0xff] }
 0x2a4   : > { %4016 = vmatpush3.bf16.msra.mxu1 %v4739_v4  ;;  %v4501_v4 = vunpack.i.h.bf16 %v6257_v51  ;;  %v6608_v51 = vpack.c.bf16 %v5990_v12, %v5987_v0  ;;  %v2747_v2 = vsel %vm2407_vm8, %v2739_v30, %v4490_v34  ;;  %v2479_v0 = vsel %vm508_vm4, %v2471_v14, %v4485_v11  ;;  %v1858_v11 = vld [vmem:[#allocation3 + $0x81] sm:$0xff] }
 0x2a5   : > { %4017 = vmatprep.subr.bf16.mxu1 %v4740_v38  ;;  %v2414_v12 = vsel %vm2407_vm8, %v2405_v48, %v4480_v47  ;;  %v2415_v63 = vsel %vm2407_vm8, %v2406_v32, %v4481_v24  ;;  %v2487_v50 = vsel %vm2424_vm9, %v2479_v0, %v4500_v23  ;;  %v4511_v28 = vunpack.i.h.bf16 %v6288_v39 }
 0x2a6   : > { %3084 = vmatpush1.bf16.msra.mxu0 %v4737_v8  ;;  %3045 = vmatmul.mubr.bf16.gmra.mrb[36].mxu1 %v6607_v54  ;;  %v2748_v8 = vsel %vm2407_vm8, %v2740_v17, %v4491_v62  ;;  %v2755_v41 = vsel %vm508_vm4, %v2747_v2, %v4505_v26  ;;  %v6344_v62 = vpop.permute.xlu1 %4553  ;;  %v6609_v24 = vpack.c.bf16 %v5839_v25, %v5836_v27  ;;  %v4535_v55 = vunpack.i.l.bf16 %v6267_v40 }
 0x2a7   : > { %v4519_v16 = vpop.permute.xlu0 %4518  ;;  %3052 = vmatprep.mubr.bf16.mxu1 %v6608_v51  ;;  %3085 = vmatprep.subr.bf16.mxu0 %v6588_v19  ;;  %v2480_v19 = vsel %vm508_vm4, %v2472_v7, %v4486_v42  ;;  %v2756_v42 = vsel %vm508_vm4, %v2748_v8, %v4506_v61  ;;  %v4526_v7 = vunpack.i.h.bf16 %v6223_v1  ;;  %v2422_v61 = vsel %vm508_vm4, %v2414_v12, %v4495_v35 }
 0x2a8   : > { %v4521_v13 = vunpack.i.h.bf16 %v4519_v16  ;;  %v4520_v33 = vunpack.i.l.bf16 %v4519_v16  ;;  %4018 = vmatpush3.bf16.msra.mxu1 %v4740_v38  ;;  %v2488_v58 = vsel %vm2424_vm9, %v2480_v19, %v4501_v4  ;;  %v4510_v38 = vunpack.i.l.bf16 %v6288_v39 }
 0x2a9   : > { %4019 = vmatprep.subr.bf16.mxu1 %v4741_v57  ;;  %v4525_v39 = vunpack.i.l.bf16 %v6223_v1  ;;  %v2782_v26 = vpack.c.bf16 %v2488_v58, %v2487_v50  ;;  %v2763_v1 = vsel %vm2424_vm9, %v2755_v41, %v4515_v9  ;;  %v2764_v47 = vsel %vm2424_vm9, %v2756_v42, %v4516_v18  ;;  %v1925_v58 = vld [vmem:[#allocation3 + $0xb4] sm:$0xff]  ;;  %v4746_v41 = vld [vmem:[#allocation3 + $0xa1] sm:$0xff] }
 0x2aa   : > { %3086 = vmatpush1.bf16.msra.mxu0 %v4738_v56  ;;  %v2718_v34 = vsel %vm1664_vm2, %v1858_v11, %v4521_v13  ;;  %v2717_v49 = vsel %vm1664_vm2, %v1857_v36, %v4520_v33  ;;  %v2423_v27 = vsel %vm508_vm4, %v2415_v63, %v4496_v21  ;;  %v4536_v21 = vunpack.i.h.bf16 %v6267_v40  ;;  %v4564_v54 = vpop.permute.xlu1 %4563 }
 0x2ab   : > { %v4529_v6 = vpop.permute.xlu0 %4528  ;;  %v2725_v25 = vsel %vm884_vm6, %v2717_v49, %v4525_v39  ;;  %v2726_v35 = vsel %vm884_vm6, %v2718_v34, %v4526_v7  ;;  %v2780_v56 = vpack.c.bf16 %v1923_v31, %v1922_v22  ;;  %v2775_v17 = vpack.c.bf16 %v2764_v47, %v2763_v1 }
 0x2ac   : > { %v4531_v29 = vunpack.i.h.bf16 %v4529_v6  ;;  %v4530_v14 = vunpack.i.l.bf16 %v4529_v6  ;;  %4020 = vmatpush3.bf16.msra.mxu1 %v4741_v57  ;;  %v6610_v57 = vpack.c.bf16 %v5910_v43, %v5907_v52  ;;  %v2432_v52 = vsel %vm2424_vm9, %v2423_v27, %v4511_v28  ;;  %v1859_v28 = vld [vmem:[#allocation3 + $0x91] sm:$0xff] }
 0x2ad   : > { %3102 = vmatmul.mubr.bf16.vlgmr.msra.gmra.mrb[40].mxu0 %v6609_v24  ;;  %v4546_v33 = vunpack.i.h.bf16 %v6302_v20  ;;  %v4545_v48 = vunpack.i.l.bf16 %v6302_v20  ;;  %v4556_v40 = vunpack.i.h.bf16 %v6344_v62  ;;  %v4555_v32 = vunpack.i.l.bf16 %v6344_v62  ;;  %v1924_v20 = vld [vmem:[#allocation3 + $0xa4] sm:$0xff] }
 0x2ae   : > { %3783 = vmatprep.mubr.msk.bf16.mxu0 %vm1664_vm2, %v2776_v59  ;;  %3053 = vmatmul.mubr.bf16.gmra.mrb[40].mxu1 %v6610_v57  ;;  %v2431_v59 = vsel %vm2424_vm9, %v2422_v61, %v4510_v38  ;;  %v2733_v43 = vsel %vm2390_vm7, %v2725_v25, %v4530_v14  ;;  %v2734_v23 = vsel %vm2390_vm7, %v2726_v35, %v4531_v29  ;;  %v4574_v0 = vpop.permute.xlu1 %4573  ;;  %v4566_v49 = vunpack.i.h.bf16 %v4564_v54 }
 0x2af   : > { %v4539_v4 = vpop.permute.xlu0 %4538  ;;  %3060 = vmatprep.mubr.bf16.mxu1 %v2782_v26  ;;  %v2741_v18 = vsel %vm406_vm0, %v2733_v43, %v4535_v55  ;;  %v2742_v9 = vsel %vm406_vm0, %v2734_v23, %v4536_v21  ;;  %v2781_v16 = vpack.c.bf16 %v2432_v52, %v2431_v59  ;;  %v6611_v50 = vpack.c.bf16 %v5819_v53, %v5817_v15 }
 0x2b0   : > { %v4541_v5 = vunpack.i.h.bf16 %v4539_v4  ;;  %v4540_v44 = vunpack.i.l.bf16 %v4539_v4  ;;  %v2720_v42 = vsel %vm1664_vm2, %v4746_v41, %v4556_v40  ;;  %v2719_v62 = vsel %vm1664_vm2, %v1859_v28, %v4555_v32 }
 0x2b1   : > { %v2784_v53 = vpack.c.bf16 %v1925_v58, %v1924_v20  ;;  %v4565_v29 = vunpack.i.l.bf16 %v4564_v54  ;;  %v4576_v1 = vunpack.i.h.bf16 %v4574_v0  ;;  %v4575_v47 = vunpack.i.l.bf16 %v4574_v0 }
 0x2b2   : > { %v2749_v51 = vsel %vm2407_vm8, %v2741_v18, %v4540_v44  ;;  %v2750_v2 = vsel %vm2407_vm8, %v2742_v9, %v4541_v5  ;;  %v4584_v26 = vpop.permute.xlu1 %4583  ;;  %v6612_v35 = vpack.c.bf16 %v5833_v10, %v5829_v3  ;;  %v6613_v59 = vpack.c.bf16 %v5873_v60, %v5871_v37 }
 0x2b3   : > { %v4549_v30 = vpop.permute.xlu0 %4548  ;;  %v2757_v12 = vsel %vm508_vm4, %v2749_v51, %v4545_v48  ;;  %v2758_v63 = vsel %vm508_vm4, %v2750_v2, %v4546_v33  ;;  %v4586_v22 = vunpack.i.h.bf16 %v4584_v26  ;;  %v4585_v31 = vunpack.i.l.bf16 %v4584_v26 }
 0x2b4   : > { %v4551_v8 = vunpack.i.h.bf16 %v4549_v30  ;;  %v4550_v13 = vunpack.i.l.bf16 %v4549_v30  ;;  %v6614_v37 = vpack.c.bf16 %v5893_v45, %v5891_v46 }
 0x2b5   : > { %3110 = vmatmul.mubr.bf16.gmra.mrb[44].mxu0 %v2775_v17  ;;  %v6423_v17 = vld [vmem:[%s6527_s4] ss:$0 sm:$0xff] }
 0x2b6   : > { %3784 = vmatprep.mubr.msk.bf16.mxu0 %vm1664_vm2, %v2780_v56  ;;  %3061 = vmatmul.mubr.bf16.gmra.mrb[44].mxu1 %v2781_v16  ;;  %v2765_v11 = vsel %vm2424_vm9, %v2757_v12, %v4550_v13  ;;  %v2766_v6 = vsel %vm2424_vm9, %v2758_v63, %v4551_v8 }
 0x2b7   : > { %v4559_v19 = vpop.permute.xlu0 %4558  ;;  %4021 = vmatprep.mubr.msk.bf16.mxu1 %vm406_vm0, %v6611_v50  ;;  %v2779_v7 = vpack.c.bf16 %v2766_v6, %v2765_v11 }
 0x2b8   : > { %v4561_v38 = vunpack.i.h.bf16 %v4559_v19  ;;  %v4560_v36 = vunpack.i.l.bf16 %v4559_v19 }
 0x2ba   : > { %v2728_v34 = vsel %vm884_vm6, %v2720_v42, %v4561_v38  ;;  %v2727_v15 = vsel %vm884_vm6, %v2719_v62, %v4560_v36 }
 0x2bb   : > { %v4569_v14 = vpop.permute.xlu0 %4568  ;;  %v2735_v61 = vsel %vm2390_vm7, %v2727_v15, %v4565_v29  ;;  %v2736_v57 = vsel %vm2390_vm7, %v2728_v34, %v4566_v49 }
 0x2bc   : > { %v4571_v39 = vunpack.i.h.bf16 %v4569_v14  ;;  %v4570_v24 = vunpack.i.l.bf16 %v4569_v14 }
 0x2bd   : > { %3118 = vmatmul.mubr.bf16.gmra.mrb[48].mxu0 %v2779_v7 }
 0x2be   : > { %v2743_v27 = vsel %vm406_vm0, %v2735_v61, %v4570_v24  ;;  %v2744_v25 = vsel %vm406_vm0, %v2736_v57, %v4571_v39  ;;  %4022 = vmatmul.mubr.msk.bf16.vlgmr.msra.gmra.mrb[48].mxu1 %vm406_vm0, %v6612_v35  ;;  %3785 = vmatprep.mubr.msk.bf16.mxu0 %vm1664_vm2, %v2784_v53 }
 0x2bf   : > { %v4579_v4 = vpop.permute.xlu0 %4578  ;;  %4025 = vmatprep.mubr.msk.bf16.mxu1 %vm406_vm0, %v6613_v59  ;;  %v2751_v23 = vsel %vm2407_vm8, %v2743_v27, %v4575_v47  ;;  %v2752_v5 = vsel %vm2407_vm8, %v2744_v25, %v4576_v1 }
 0x2c0   : > { %v4581_v52 = vunpack.i.h.bf16 %v4579_v4  ;;  %v4580_v43 = vunpack.i.l.bf16 %v4579_v4 }
 0x2c2   : > { %v2759_v3 = vsel %vm508_vm4, %v2751_v23, %v4580_v43  ;;  %v2760_v10 = vsel %vm508_vm4, %v2752_v5, %v4581_v52 }
 0x2c3   : > { %v2767_v44 = vsel %vm2424_vm9, %v2759_v3, %v4585_v31  ;;  %v2768_v21 = vsel %vm2424_vm9, %v2760_v10, %v4586_v22 }
 0x2c4   : > { %v2783_v55 = vpack.c.bf16 %v2768_v21, %v2767_v44 }
 0x2c6   : > { %3126 = vmatmul.mubr.bf16.gmra.mrb[52].mxu0 %v2783_v55  ;;  %4026 = vmatmul.mubr.msk.bf16.gmra.mrb[52].mxu1 %vm406_vm0, %v6614_v37 }
 0x2c9   : > { %v3831_v60 = vpop.f32.mrb[0].mxu1 }
 0x2ca   : > { %v3832_v54 = vpop.f32.mrb[1].mxu1 }
 0x2cb   : > { %v3833_v56 = vadd.f32 %v3832_v54, %v3831_v60  ;;  %v3834_v18 = vpop.f32.mrb[2].mxu1 }
 0x2cc   : > { %v3835_v9 = vpop.f32.mrb[3].mxu1 }
 0x2cd   : > { %v3836_v30 = vadd.f32 %v3835_v9, %v3834_v18  ;;  %v1431_v2 = vadd.f32 %v3833_v56, %v6423_v17 }
 0x2cf   : > { %v1434_v45 = vadd.f32 %v3836_v30, %v6423_v17 }
 0x2e0   : > { %v3871_v16 = vpop.f32.mrb[16].mxu0 }
 0x2e1   : > { %v3872_v51 = vpop.f32.mrb[17].mxu0 }
 0x2e2   : > { %v3873_v8 = vadd.f32 %v3872_v51, %v3871_v16  ;;  %v3874_v13 = vpop.f32.mrb[18].mxu0 }
 0x2e3   : > { %v3875_v46 = vpop.f32.mrb[19].mxu0 }
 0x2e4   : > { %v1496_v33 = vadd.f32 %v3873_v8, %v1431_v2  ;;  %v3876_v48 = vadd.f32 %v3875_v46, %v3874_v13 }
 0x2e6   : > { %v1499_v40 = vadd.f32 %v3876_v48, %v1434_v45 }
 0x2f8   : > { %v3837_v32 = vpop.f32.mrb[4].mxu1 }
 0x2f9   : > { %v3838_v0 = vpop.f32.mrb[5].mxu1 }
 0x2fa   : > { %v3839_v19 = vadd.f32 %v3838_v0, %v3837_v32  ;;  %v3840_v12 = vpop.f32.mrb[6].mxu1 }
 0x2fb   : > { %v3841_v63 = vpop.f32.mrb[7].mxu1 }
 0x2fc   : > { %v3842_v50 = vadd.f32 %v3841_v63, %v3840_v12  ;;  %v1439_v28 = vadd.f32 %v3839_v19, %v6423_v17 }
 0x2fe   : > { %v1442_v6 = vadd.f32 %v3842_v50, %v6423_v17 }
 0x31d   : > { %v3877_v20 = vpop.f32.mrb[20].mxu0 }
 0x31e   : > { %v3878_v58 = vpop.f32.mrb[21].mxu0 }
 0x31f   : > { %v3879_v38 = vadd.f32 %v3878_v58, %v3877_v20  ;;  %v3880_v36 = vpop.f32.mrb[22].mxu0 }
 0x320   : > { %v3881_v11 = vpop.f32.mrb[23].mxu0 }
 0x321   : > { %v1504_v41 = vadd.f32 %v3879_v38, %v1439_v28  ;;  %v3882_v42 = vadd.f32 %v3881_v11, %v3880_v36 }
 0x323   : > { %v1507_v62 = vadd.f32 %v3882_v42, %v1442_v6 }
 0x331   : > { %v3843_v34 = vpop.f32.mrb[8].mxu1 }
 0x332   : > { %v3844_v15 = vpop.f32.mrb[9].mxu1 }
 0x333   : > { %v3845_v53 = vadd.f32 %v3844_v15, %v3843_v34  ;;  %v3846_v49 = vpop.f32.mrb[10].mxu1 }
 0x334   : > { %v3847_v29 = vpop.f32.mrb[11].mxu1 }
 0x335   : > { %v3848_v14 = vadd.f32 %v3847_v29, %v3846_v49  ;;  %v1447_v5 = vadd.f32 %v3845_v53, %v6423_v17 }
 0x337   : > { %v1450_v55 = vadd.f32 %v3848_v14, %v6423_v17 }
 0x339   : > { %v3849_v7 = vpop.f32.mrb[12].mxu1 }
 0x33a   : > { %v3850_v39 = vpop.f32.mrb[13].mxu1 }
 0x33b   : > { %v3851_v24 = vadd.f32 %v3850_v39, %v3849_v7  ;;  %v3852_v26 = vpop.f32.mrb[14].mxu1 }
 0x33c   : > { %v3853_v61 = vpop.f32.mrb[15].mxu1 }
 0x33d   : > { %v3854_v57 = vadd.f32 %v3853_v61, %v3852_v26  ;;  %v1455_v32 = vadd.f32 %v3851_v24, %v6423_v17 }
 0x33f   : > { %v1458_v50 = vadd.f32 %v3854_v57, %v6423_v17 }
 0x341   : > { %v3911_v1 = vpop.f32.mrb[16].mxu1 }
 0x342   : > { %v3912_v47 = vpop.f32.mrb[17].mxu1 }
 0x343   : > { %v3913_v27 = vadd.f32 %v3912_v47, %v3911_v1  ;;  %v3914_v25 = vpop.f32.mrb[18].mxu1 }
 0x344   : > { %v3915_v35 = vpop.f32.mrb[19].mxu1 }
 0x345   : > { %v3916_v4 = vadd.f32 %v3915_v35, %v3914_v25  ;;  %v1561_v22 = vadd.f32 %v3913_v27, %v1496_v33 }
 0x347   : > { %v1564_v31 = vadd.f32 %v3916_v4, %v1499_v40 }
 0x349   : > { %v3883_v59 = vpop.f32.mrb[24].mxu0  ;;  %v3917_v52 = vpop.f32.mrb[20].mxu1 }
 0x34a   : > { %v3884_v43 = vpop.f32.mrb[25].mxu0  ;;  %v3918_v23 = vpop.f32.mrb[21].mxu1 }
 0x34b   : > { %v3885_v3 = vadd.f32 %v3884_v43, %v3883_v59  ;;  %v3919_v10 = vadd.f32 %v3918_v23, %v3917_v52  ;;  %v3886_v44 = vpop.f32.mrb[26].mxu0  ;;  %v3920_v21 = vpop.f32.mrb[22].mxu1 }
 0x34c   : > { %v3887_v37 = vpop.f32.mrb[27].mxu0  ;;  %v3921_v60 = vpop.f32.mrb[23].mxu1 }
 0x34d   : > { %v1512_v54 = vadd.f32 %v3885_v3, %v1447_v5  ;;  %v3888_v56 = vadd.f32 %v3887_v37, %v3886_v44  ;;  %v3922_v18 = vadd.f32 %v3921_v60, %v3920_v21  ;;  %v1569_v9 = vadd.f32 %v3919_v10, %v1504_v41 }
 0x34f   : > { %v1515_v30 = vadd.f32 %v3888_v56, %v1450_v55  ;;  %v1572_v16 = vadd.f32 %v3922_v18, %v1507_v62 }
 0x351   : > { %v3923_v51 = vpop.f32.mrb[24].mxu1 }
 0x352   : > { %v3924_v2 = vpop.f32.mrb[25].mxu1 }
 0x353   : > { %v3925_v8 = vadd.f32 %v3924_v2, %v3923_v51  ;;  %v3926_v13 = vpop.f32.mrb[26].mxu1  ;;  %v6440_v2 = vld [vmem:[%s6529_s6] ss:$0 sm:$0xff] }
 0x354   : > { %v3927_v46 = vpop.f32.mrb[27].mxu1  ;;  %v3889_v45 = vpop.f32.mrb[28].mxu0 }
 0x355   : > { %v3928_v33 = vadd.f32 %v3927_v46, %v3926_v13  ;;  %v1577_v48 = vadd.f32 %v3925_v8, %v1512_v54  ;;  %v3890_v40 = vpop.f32.mrb[29].mxu0 }
 0x356   : > { %v3891_v0 = vadd.f32 %v3890_v40, %v3889_v45  ;;  %v3892_v19 = vpop.f32.mrb[30].mxu0 }
 0x357   : > { %v1580_v12 = vadd.f32 %v3928_v33, %v1515_v30  ;;  %v3893_v63 = vpop.f32.mrb[31].mxu0 }
 0x358   : > { %v1520_v20 = vadd.f32 %v3891_v0, %v1455_v32  ;;  %v3894_v58 = vadd.f32 %v3893_v63, %v3892_v19 }
 0x35a   : > { %v1523_v28 = vadd.f32 %v3894_v58, %v1458_v50 }
 0x35c   : > { %v4007_v38 = vpop.f32.mrb[32].mxu0 }
 0x35d   : > { %v1634_v36 = vadd.f32 %v4007_v38, %v1569_v9  ;;  %v1625_v11 = vpop.f32.mrb[33].mxu0 }
 0x35e   : > { %v1626_v6 = vadd.f32 %v1625_v11, %v1561_v22  ;;  %v4008_v41 = vpop.f32.mrb[34].mxu0 }
 0x35f   : > { %v1637_v42 = vadd.f32 %v4008_v41, %v1572_v16  ;;  %v1628_v62 = vpop.f32.mrb[35].mxu0  ;;  %v1658_v15 = vmax.f32 %v1634_v36, 0.0 }
 0x360   : > { %v1629_v34 = vadd.f32 %v1628_v62, %v1564_v31  ;;  %v1656_v49 = vmax.f32 %v1626_v6, 0.0 }
 0x361   : > { %v1659_v53 = vmax.f32 %v1637_v42, 0.0 }
 0x362   : > { %v1657_v29 = vmax.f32 %v1629_v34, 0.0 }
 0x363   : > { %v4592_v14 = vpack.i.bf16 %v1659_v53, %v1658_v15 }
 0x364   : > { %v4587_v7 = vpack.i.bf16 %v1657_v29, %v1656_v49  ;;  %v4011_v39 = vpop.f32.mrb[36].mxu0 }
 0x365   : > { %v1641_v24 = vpop.f32.mrb[37].mxu0  ;;  %4593 = vrot.lane.b32.xlu1 %v4592_v14, %s4761_s15 }
 0x366   : > { %v1642_v17 = vadd.f32 %v1641_v24, %v1577_v48  ;;  %v4012_v26 = vpop.f32.mrb[38].mxu0  ;;  %4588 = vrot.lane.b32.xlu0 %v4587_v7, %s4761_s15 }
 0x367   : > { %v1644_v61 = vpop.f32.mrb[39].mxu0 }
 0x368   : > { %v1645_v57 = vadd.f32 %v1644_v61, %v1580_v12  ;;  %v1660_v47 = vmax.f32 %v1642_v17, 0.0 }
 0x369   : > { %v3929_v1 = vpop.f32.mrb[28].mxu1 }
 0x36a   : > { %v1661_v27 = vmax.f32 %v1645_v57, 0.0  ;;  %v3930_v25 = vpop.f32.mrb[29].mxu1 }
 0x36b   : > { %v3931_v35 = vadd.f32 %v3930_v25, %v3929_v1  ;;  %v3932_v4 = vpop.f32.mrb[30].mxu1 }
 0x36c   : > { %v4597_v22 = vpack.i.bf16 %v1661_v27, %v1660_v47  ;;  %v3933_v31 = vpop.f32.mrb[31].mxu1  ;;  %v3786_v47 = vld [vmem:[%s6531_s8] ss:$0 sm:$0xff] }
 0x36d   : > { %v1585_v59 = vadd.f32 %v3931_v35, %v1520_v20  ;;  %v3934_v52 = vadd.f32 %v3933_v31, %v3932_v4 }
 0x36e   : > { %4598 = vrot.lane.b32.xlu0 %v4597_v22, %s4761_s15 }
 0x36f   : > { %v1650_v43 = vadd.f32 %v4011_v39, %v1585_v59  ;;  %v1588_v23 = vadd.f32 %v3934_v52, %v1523_v28 }
 0x371   : > { %v1653_v5 = vadd.f32 %v4012_v26, %v1588_v23  ;;  %v3961_v3 = vpop.f32.mrb[32].mxu1  ;;  %v1662_v44 = vmax.f32 %v1650_v43, 0.0 }
 0x372   : > { %v3962_v10 = vpop.f32.mrb[33].mxu1 }
 0x373   : > { %v1663_v21 = vmax.f32 %v1653_v5, 0.0  ;;  %v3963_v55 = vadd.f32 %v3962_v10, %v3961_v3  ;;  %v3964_v37 = vpop.f32.mrb[34].mxu1 }
 0x374   : > { %v3965_v60 = vpop.f32.mrb[35].mxu1 }
 0x375   : > { %v4602_v54 = vpack.i.bf16 %v1663_v21, %v1662_v44  ;;  %v3966_v56 = vadd.f32 %v3965_v60, %v3964_v37  ;;  %v3039_v13 = vadd.f32 %v3963_v55, %v6440_v2 }
 0x377   : > { %4603 = vrot.lane.b32.xlu1 %v4602_v54, %s4761_s15  ;;  %v3042_v40 = vadd.f32 %v3966_v56, %v6440_v2 }
 0x379   : > { %v3967_v18 = vpop.f32.mrb[36].mxu1 }
 0x37a   : > { %v3968_v9 = vpop.f32.mrb[37].mxu1 }
 0x37b   : > { %v3969_v30 = vadd.f32 %v3968_v9, %v3967_v18  ;;  %v3970_v16 = vpop.f32.mrb[38].mxu1 }
 0x37c   : > { %v3971_v51 = vpop.f32.mrb[39].mxu1 }
 0x37d   : > { %v3972_v8 = vadd.f32 %v3971_v51, %v3970_v16  ;;  %v3047_v11 = vadd.f32 %v3969_v30, %v6440_v2 }
 0x37f   : > { %v3050_v34 = vadd.f32 %v3972_v8, %v6440_v2 }
 0x380   : > { %v3103_v46 = vpop.f32.mrb[40].mxu0 }
 0x381   : > { %v3104_v45 = vadd.f32 %v3103_v46, %v3039_v13  ;;  %v3105_v33 = vpop.f32.mrb[41].mxu0  ;;  %v3973_v48 = vpop.f32.mrb[40].mxu1 }
 0x382   : > { %v3106_v32 = vpop.f32.mrb[42].mxu0  ;;  %v3974_v0 = vpop.f32.mrb[41].mxu1 }
 0x383   : > { %v3107_v19 = vadd.f32 %v3106_v32, %v3042_v40  ;;  %v3975_v12 = vadd.f32 %v3974_v0, %v3973_v48  ;;  %v3108_v63 = vpop.f32.mrb[43].mxu0  ;;  %v3976_v50 = vpop.f32.mrb[42].mxu1  ;;  %v3134_v58 = vmax.f32 %v3104_v45, 0.0 }
 0x384   : > { %v3977_v20 = vpop.f32.mrb[43].mxu1 }
 0x385   : > { %v3135_v28 = vmax.f32 %v3107_v19, 0.0  ;;  %v3978_v38 = vadd.f32 %v3977_v20, %v3976_v50  ;;  %v3055_v57 = vadd.f32 %v3975_v12, %v6440_v2 }
 0x387   : > { %v4607_v36 = vpack.i.bf16 %v3135_v28, %v3134_v58  ;;  %v3058_v35 = vadd.f32 %v3978_v38, %v6440_v2 }
 0x388   : > { %v3111_v6 = vpop.f32.mrb[44].mxu0 }
 0x389   : > { %v3112_v41 = vadd.f32 %v3111_v6, %v3047_v11  ;;  %v3113_v42 = vpop.f32.mrb[45].mxu0  ;;  %4608 = vrot.lane.b32.xlu0 %v4607_v36, %s4761_s15  ;;  %v3979_v62 = vpop.f32.mrb[44].mxu1 }
 0x38a   : > { %v3114_v15 = vpop.f32.mrb[46].mxu0  ;;  %v3980_v53 = vpop.f32.mrb[45].mxu1 }
 0x38b   : > { %v3115_v49 = vadd.f32 %v3114_v15, %v3050_v34  ;;  %v3981_v29 = vadd.f32 %v3980_v53, %v3979_v62  ;;  %v3116_v14 = vpop.f32.mrb[47].mxu0  ;;  %v3982_v7 = vpop.f32.mrb[46].mxu1  ;;  %v3136_v24 = vmax.f32 %v3112_v41, 0.0 }
 0x38c   : > { %v3983_v39 = vpop.f32.mrb[47].mxu1 }
 0x38d   : > { %v3137_v17 = vmax.f32 %v3115_v49, 0.0  ;;  %v3984_v26 = vadd.f32 %v3983_v39, %v3982_v7  ;;  %v3063_v30 = vadd.f32 %v3981_v29, %v6440_v2 }
 0x38f   : > { %v4612_v61 = vpack.i.bf16 %v3137_v17, %v3136_v24  ;;  %v3066_v48 = vadd.f32 %v3984_v26, %v6440_v2 }
 0x390   : > { %v3119_v1 = vpop.f32.mrb[48].mxu0 }
 0x391   : > { %v3120_v27 = vadd.f32 %v3119_v1, %v3055_v57  ;;  %v3121_v25 = vpop.f32.mrb[49].mxu0  ;;  %4613 = vrot.lane.b32.xlu1 %v4612_v61, %s4761_s15  ;;  %v4023_v4 = vpop.f32.mrb[48].mxu1 }
 0x392   : > { %v3122_v22 = vpop.f32.mrb[50].mxu0  ;;  %v3399_v31 = vadd.f32 %v4023_v4, %v3786_v47  ;;  %v3390_v59 = vpop.f32.mrb[49].mxu1 }
 0x393   : > { %v3123_v52 = vadd.f32 %v3122_v22, %v3058_v35  ;;  %v3124_v43 = vpop.f32.mrb[51].mxu0  ;;  %v3391_v23 = vadd.f32 %v3786_v47, %v3390_v59  ;;  %v4024_v5 = vpop.f32.mrb[50].mxu1  ;;  %v3138_v21 = vmax.f32 %v3120_v27, 0.0  ;;  %v6615_v35 = vld [vmem:[#allocation6_spill] sm:$0xff] }
 0x394   : > { %v3423_v3 = vmax.f32 %v3399_v31, 0.0  ;;  %v3402_v10 = vadd.f32 %v4024_v5, %v3786_v47  ;;  %v3393_v44 = vpop.f32.mrb[51].mxu1  ;;  %v6616_v4 = vmax.f32 %v6615_v35, 0.0  ;;  %v6617_v31 = vld [vmem:[#allocation5_spill] sm:$0xff] }
 0x395   : > { %v3139_v55 = vmax.f32 %v3123_v52, 0.0  ;;  %v3421_v37 = vmax.f32 %v3391_v23, 0.0  ;;  %v3394_v60 = vadd.f32 %v3786_v47, %v3393_v44  ;;  %v6618_v59 = vmax.f32 %v6617_v31, 0.0 }
 0x396   : > { %v3424_v54 = vmax.f32 %v3402_v10, 0.0 }
 0x397   : > { %v4617_v56 = vpack.i.bf16 %v3139_v55, %v3138_v21  ;;  %v3422_v18 = vmax.f32 %v3394_v60, 0.0 }
 0x398   : > { %v4627_v9 = vpack.i.bf16 %v3424_v54, %v3423_v3 }
 0x399   : > { %v4632_v16 = vpack.i.bf16 %v3422_v18, %v3421_v37  ;;  %4618 = vrot.lane.b32.xlu0 %v4617_v56, %s4761_s15  ;;  %v3127_v51 = vpop.f32.mrb[52].mxu0  ;;  %v4027_v8 = vpop.f32.mrb[52].mxu1 }
 0x39a   : > { %v3128_v13 = vadd.f32 %v3127_v51, %v3063_v30  ;;  %v3415_v46 = vadd.f32 %v4027_v8, %v3786_v47  ;;  %v3129_v45 = vpop.f32.mrb[53].mxu0  ;;  %v3406_v33 = vpop.f32.mrb[53].mxu1  ;;  %v6619_v30 = vld [vmem:[#allocation8_spill] sm:$0xff]  ;;  %v6621_v8 = vld [vmem:[#allocation7_spill] sm:$0xff] }
 0x39b   : > { %v3407_v40 = vadd.f32 %v3786_v47, %v3406_v33  ;;  %v3130_v32 = vpop.f32.mrb[54].mxu0  ;;  %v4028_v0 = vpop.f32.mrb[54].mxu1 }
 0x39c   : > { %v3427_v19 = vmax.f32 %v3415_v46, 0.0  ;;  %v3131_v12 = vadd.f32 %v3130_v32, %v3066_v48  ;;  %v3418_v63 = vadd.f32 %v4028_v0, %v3786_v47  ;;  %v3132_v50 = vpop.f32.mrb[55].mxu0  ;;  %v3409_v20 = vpop.f32.mrb[55].mxu1  ;;  %v3140_v38 = vmax.f32 %v3128_v13, 0.0  ;;  %v6623_v48 = vld [vmem:[#allocation10_spill] sm:$0xff]  ;;  %v6625_v0 = vld [vmem:[#allocation9_spill] sm:$0xff] }
 0x39d   : > { %v3425_v58 = vmax.f32 %v3407_v40, 0.0  ;;  %v3410_v28 = vadd.f32 %v3786_v47, %v3409_v20  ;;  %4633 = vrot.lane.b32.xlu0 %v4632_v16, %s4762_s18  ;;  %v6620_v16 = vmax.f32 %v6619_v30, 0.0  ;;  %v6622_v13 = vmax.f32 %v6621_v8, 0.0 }
 0x39e   : > { %v3141_v36 = vmax.f32 %v3131_v12, 0.0  ;;  %v3428_v11 = vmax.f32 %v3418_v63, 0.0  ;;  %v6624_v40 = vmax.f32 %v6623_v48, 0.0 }
 0x39f   : > { %v3426_v6 = vmax.f32 %v3410_v28, 0.0 }
 0x3a0   : > { %v4622_v41 = vpack.i.bf16 %v3141_v36, %v3140_v38  ;;  %v4642_v42 = vpack.i.bf16 %v3428_v11, %v3427_v19  ;;  %v6626_v19 = vmax.f32 %v6625_v0, 0.0 }
 0x3a1   : > { %v4637_v62 = vpack.i.bf16 %v3426_v6, %v3425_v58 }
 0x3a2   : > { %4623 = vrot.lane.b32.xlu1 %v4622_v41, %s4761_s15 }
 0x3a3   : > { %4638 = vrot.lane.b32.xlu0 %v4637_v62, %s4762_s18 }
 0x3a6   : > { %4628 = vrot.lane.b32.xlu1 %v4627_v9, %s4762_s18 }
 0x3aa   : > { %4643 = vrot.lane.b32.xlu1 %v4642_v42, %s4762_s18 }
 0x3d7   : > { %v4594_v53 = vpop.permute.xlu1 %4593 }
 0x3d8   : > { %v4589_v2 = vpop.permute.xlu0 %4588  ;;  %v4596_v1 = vunpack.i.h.bf16 %v4594_v53  ;;  %v4595_v47 = vunpack.i.l.bf16 %v4594_v53 }
 0x3d9   : > { %v4591_v39 = vunpack.i.h.bf16 %v4589_v2  ;;  %v4590_v24 = vunpack.i.l.bf16 %v4589_v2 }
 0x3da   : > { %v3528_v51 = vsel %vm406_vm0, %v6620_v16, %v4596_v1  ;;  %v3527_v46 = vsel %vm406_vm0, %v6622_v13, %v4595_v47 }
 0x3db   : > { %v3526_v22 = vsel %vm406_vm0, %v6616_v4, %v4591_v39  ;;  %v3525_v52 = vsel %vm406_vm0, %v6618_v59, %v4590_v24 }
 0x3e0   : > { %v4599_v34 = vpop.permute.xlu0 %4598 }
 0x3e1   : > { %v4601_v21 = vunpack.i.h.bf16 %v4599_v34  ;;  %v4600_v55 = vunpack.i.l.bf16 %v4599_v34 }
 0x3e3   : > { %v3530_v32 = vsel %vm406_vm0, %v6624_v40, %v4601_v21  ;;  %v3529_v12 = vsel %vm406_vm0, %v6626_v19, %v4600_v55 }
 0x3e9   : > { %v6461_v29 = vpop.permute.xlu1 %4603 }
 0x3ea   : > { %v4606_v62 = vunpack.i.h.bf16 %v6461_v29  ;;  %v4605_v2 = vunpack.i.l.bf16 %v6461_v29  ;;  %v6627_v29 = vld [vmem:[#allocation12_spill] sm:$0xff] }
 0x3fb   : > { %v4609_v15 = vpop.permute.xlu0 %4608 }
 0x3fc   : > { %v4611_v14 = vunpack.i.h.bf16 %v4609_v15  ;;  %v4610_v7 = vunpack.i.l.bf16 %v4609_v15 }
 0x3fe   : > { %v3534_v27 = vsel %vm406_vm0, %v4591_v39, %v4611_v14  ;;  %v3533_v25 = vsel %vm406_vm0, %v4590_v24, %v4610_v7 }
 0x403   : > { %v4614_v26 = vpop.permute.xlu1 %4613 }
 0x404   : > { %v4616_v54 = vunpack.i.h.bf16 %v4614_v26  ;;  %v4615_v56 = vunpack.i.l.bf16 %v4614_v26  ;;  %v6628_v26 = vmax.f32 %v6627_v29, 0.0 }
 0x406   : > { %v3536_v11 = vsel %vm406_vm0, %v4596_v1, %v4616_v54  ;;  %v3535_v6 = vsel %vm406_vm0, %v4595_v47, %v4615_v56 }
 0x40b   : > { %v4619_v49 = vpop.permute.xlu0 %4618 }
 0x40c   : > { %v4621_v5 = vunpack.i.h.bf16 %v4619_v49  ;;  %v4620_v3 = vunpack.i.l.bf16 %v4619_v49 }
 0x40e   : > { %v3538_v45 = vsel %vm406_vm0, %v4601_v21, %v4621_v5  ;;  %v3537_v33 = vsel %vm406_vm0, %v4600_v55, %v4620_v3 }
 0x40f   : > { %v4634_v17 = vpop.permute.xlu0 %4633 }
 0x410   : > { %v4636_v61 = vunpack.i.h.bf16 %v4634_v17  ;;  %v4635_v57 = vunpack.i.l.bf16 %v4634_v17 }
 0x412   : > { %v3541_v43 = vsel %vm508_vm4, %v3533_v25, %v4635_v57  ;;  %v3542_v23 = vsel %vm508_vm4, %v3534_v27, %v4636_v61  ;;  %v3532_v61 = vsel %vm406_vm0, %v6628_v26, %v4606_v62  ;;  %v6629_v57 = vld [vmem:[#allocation11_spill] sm:$0xff] }
 0x413   : > { %v3807_v10 = vpack.c.bf16 %v3541_v43, %v3525_v52  ;;  %v3808_v44 = vpack.c.bf16 %v3542_v23, %v3526_v22  ;;  %v6630_v1 = vmax.f32 %v6629_v57, 0.0 }
 0x414   : > { %v4624_v37 = vpop.permute.xlu1 %4623 }
 0x415   : > { %3613 = vst [vmem:[%s6476_s24] sm:$0xff] %v3807_v10  ;;  %3614 = vst [vmem:[%s6476_s24 + $0x8] sm:$0xff] %v3808_v44  ;;  %v4639_v60 = vpop.permute.xlu0 %4638  ;;  %v4626_v41 = vunpack.i.h.bf16 %v4624_v37  ;;  %v4625_v42 = vunpack.i.l.bf16 %v4624_v37  ;;  %v3531_v47 = vsel %vm406_vm0, %v6630_v1, %v4605_v2 }
 0x416   : > { %v4641_v18 = vunpack.i.h.bf16 %v4639_v60  ;;  %v4640_v9 = vunpack.i.l.bf16 %v4639_v60 }
 0x417   : > { %v3540_v24 = vsel %vm406_vm0, %v4606_v62, %v4626_v41  ;;  %v3539_v17 = vsel %vm406_vm0, %v4605_v2, %v4625_v42 }
 0x418   : > { %v3545_v63 = vsel %vm508_vm4, %v3537_v33, %v4640_v9  ;;  %v3546_v50 = vsel %vm508_vm4, %v3538_v45, %v4641_v18  ;;  %v4629_v20 = vpop.permute.xlu1 %4628 }
 0x419   : > { %v3811_v58 = vpack.c.bf16 %v3545_v63, %v3529_v12  ;;  %v3812_v28 = vpack.c.bf16 %v3546_v50, %v3530_v32  ;;  %v4631_v38 = vunpack.i.h.bf16 %v4629_v20  ;;  %v4630_v36 = vunpack.i.l.bf16 %v4629_v20 }
 0x41b   : > { %3617 = vst [vmem:[%s6476_s24 + $0x20] sm:$0xff] %v3811_v58  ;;  %3618 = vst [vmem:[%s6476_s24 + $0x28] sm:$0xff] %v3812_v28  ;;  %v3543_v34 = vsel %vm508_vm4, %v3535_v6, %v4630_v36  ;;  %v3544_v15 = vsel %vm508_vm4, %v3536_v11, %v4631_v38 }
 0x41c   : > { %v3809_v53 = vpack.c.bf16 %v3543_v34, %v3527_v46  ;;  %v3810_v49 = vpack.c.bf16 %v3544_v15, %v3528_v51  ;;  %v4644_v14 = vpop.permute.xlu1 %4643 }
 0x41d   : > { %v4646_v7 = vunpack.i.h.bf16 %v4644_v14  ;;  %v4645_v39 = vunpack.i.l.bf16 %v4644_v14 }
 0x41e   : > { %3615 = vst [vmem:[%s6476_s24 + $0x10] sm:$0xff] %v3809_v53  ;;  %3616 = vst [vmem:[%s6476_s24 + $0x18] sm:$0xff] %v3810_v49 }
 0x41f   : > { %v3547_v27 = vsel %vm508_vm4, %v3539_v17, %v4645_v39  ;;  %v3548_v25 = vsel %vm508_vm4, %v3540_v24, %v4646_v7 }
 0x420   : > { %v3813_v35 = vpack.c.bf16 %v3547_v27, %v3531_v47  ;;  %v3814_v4 = vpack.c.bf16 %v3548_v25, %v3532_v61 }
 0x422   : > { %3619 = vst [vmem:[%s6476_s24 + $0x30] sm:$0xff] %v3813_v35  ;;  %3620 = vst [vmem:[%s6476_s24 + $0x38] sm:$0xff] %v3814_v4 }
 0x423 PF: > { %s19_s30 = sadd.s32 1, %s4753_s30  }
 0x424   : > { %p16_p4 = scmp.ge.s32.totalorder %s19_s30, 4  }
 0x426   :  { %18 = sbr.rel (!%p16_p4) target bundleno = 1 (0x1), region = 94 }

// kernel: _lambda_.5
= control target key start
LH: loop header
LB: loop body
LE: loop exit
PB: predicated region body
PF: predicated region fallthrough
CT: control target
= control target key end

     0   :  { %16 = vsyncpa [#allocation6], 0  ;;  %s9751_s0 = inlined_call_operand.vmem [shape: bf16[2,8,8,256], index: 0, kind: input, shape index: {}]   ;;  %s9752_s1 = inlined_call_operand.vmem [shape: bf16[256,288], index: 1, kind: input, shape index: {}]   ;;  %s9753_s2 = inlined_call_operand.vmem [shape: f32[1,288], index: 2, kind: input, shape index: {}]   ;;  %s9754_s3 = inlined_call_operand.vmem [shape: bf16[1152,192], index: 3, kind: input, shape index: {}]   ;;  %s9755_s4 = inlined_call_operand.vmem [shape: f32[1,192], index: 4, kind: input, shape index: {}]   ;;  %s9756_s5 = inlined_call_operand.vmem [shape: bf16[800,96], index: 5, kind: input, shape index: {}]   ;;  %s9757_s6 = inlined_call_operand.vmem [shape: f32[1,96], index: 6, kind: input, shape index: {}]   ;;  %s9758_s7 = inlined_call_operand.vmem [shape: bf16[256,64], index: 7, kind: input, shape index: {}]   ;;  %s9759_s8 = inlined_call_operand.vmem [shape: f32[1,64], index: 8, kind: input, shape index: {}]   ;;  %s9760_s9 = inlined_call_operand.vmem [shape: f32[480,10], index: 9, kind: input, shape index: {}]   ;;  %s9761_s10 = inlined_call_operand.vmem [shape: f32[1,10], index: 10, kind: input, shape index: {}]   ;;  %s9762_s11 = inlined_call_operand.hbm [shape: f32[2,1,10], index: 11, kind: output, shape index: {}]  }
   0x1   :  { %18 = vsyncpa [#allocation6 + $0x1], 0  ;;  %s7139_s17 = smov 0   ;;  %s7141_s18 = smov 0  }
   0x2   :  { %s7143_s19 = smov 0   ;;  %s7145_s20 = smov 0  }
   0x3 LB: > { %s7160_s21 = sadd.s32 4294967295, %s7069_s20   ;;  %s5553_s22 = sadd.s32 4294967294, %s7069_s20   ;;  %s7069_s20 = sphi %s7145_s20, %s9930_s20   ;;  %s7065_s19 = sphi %s7143_s19, %s9929_s19   ;;  %s7061_s18 = sphi %s7141_s18, %s9928_s18   ;;  %s7057_s17 = sphi %s7139_s17, %s9927_s17  }
   0x4   : > { %s7164_s23 = sadd.s32 1, %s7069_s20   ;;  %s267_s24 = sadd.s32 1, %s7065_s19 }
   0x5   : > { %s264_s25 = ssub.s32 %s7069_s20, %s7164_s23  ;;  %p277_p0 = scmp.ne.s32.totalorder %s7065_s19, %s7061_s18 }
   0x6   : > { %p265_p1 = scmp.eq.s32.totalorder %s264_s25, 0  ;;  %p278_p2 = scmp.eq.s32.totalorder %s7160_s21, 1 }
   0x7   : > { %p283_p3 = scmp.ne.s32.totalorder %s7061_s18, %s7057_s17  ;;  %p284_p4 = scmp.eq.s32.totalorder %s5553_s22, 1 }
   0x8   : > { %s7175_s26 = scalar_select %p265_p1, %s7065_s19, %s267_s24  }
   0x9   : > { %p7177_p5 = por %p278_p2, %p277_p0  ;;  %p7181_p6 = por %p284_p4, %p283_p3 }
   0xa   : > { %9811 = sst [smem:[#allocation8_spill]] %s7175_s26  ;;  %p5556_p7 = scmp.ge.s32.totalorder %s7069_s20, 1 }
   0xb   : > { %p340_p8 = scmp.lt.s32.totalorder %s7069_s20, 3 }
   0xd   : > { %p341_p9 = pnand %p5556_p7, %p340_p8 }
   0xf   : > { %344 = sbr.rel (%p341_p9) target bundleno = 1261 (0x4ed), region = 64 }
  0x16   : > { %v6649_v0 = vld [vmem:[%s9752_s1 + $0x4] ss:$12 sps:$4 sm:$0xff]   ;;  %v6651_v1 = vld [vmem:[%s9752_s1] ss:$12 sps:$4 sm:$0xff]   ;;  %v7071_v2 = vmov -inf   ;;  %p379_p10 = scmp.lt.s32.totalorder %s7160_s21, 1 }
  0x17   : > { %4018 = vst [vmem:[#allocation4] sm:$0xff] %v7071_v2  ;;  %4019 = vst [vmem:[#allocation4 + $0x8] sm:$0xff] %v7071_v2  ;;  %770 = vmatprep.subr.bf16.mxu0 %v6649_v0  ;;  %v6652_v3 = vld [vmem:[%s9752_s1 + $0x1c] ss:$12 sps:$4 sm:$0xff]   ;;  %v6654_v4 = vld [vmem:[%s9752_s1 + $0x18] ss:$12 sps:$4 sm:$0xff]  }
  0x18   : > { %4020 = vst [vmem:[#allocation4 + $0x10] sm:$0x3] %v7071_v2  ;;  %4021 = vst [vmem:[#allocation4 + $0x18] sm:$0x3] %v7071_v2  ;;  %771 = vmatpush1.bf16.msra.mxu0 %v6651_v1  ;;  %v6655_v5 = vld [vmem:[%s9752_s1 + $0x34] ss:$12 sps:$4 sm:$0xff]  }
  0x19   : > { %4022 = vst [vmem:[#allocation4 + $0x20] sm:$0xff] %v7071_v2  ;;  %4023 = vst [vmem:[#allocation4 + $0x28] sm:$0xff] %v7071_v2  ;;  %772 = vmatprep.subr.bf16.mxu0 %v6652_v3  ;;  %v6657_v6 = vld [vmem:[%s9752_s1 + $0x30] ss:$12 sps:$4 sm:$0xff]   ;;  %v6658_v7 = vld [vmem:[%s9752_s1 + $0x4c] ss:$12 sps:$4 sm:$0xff]  }
  0x1a   : > { %4024 = vst [vmem:[#allocation4 + $0x30] sm:$0x3] %v7071_v2  ;;  %4025 = vst [vmem:[#allocation4 + $0x38] sm:$0x3] %v7071_v2  ;;  %v6660_v8 = vld [vmem:[%s9752_s1 + $0x48] ss:$12 sps:$4 sm:$0xff]  }
  0x1b   : > { %4026 = vst [vmem:[#allocation4 + $0x40] sm:$0xff] %v7071_v2  ;;  %4027 = vst [vmem:[#allocation4 + $0x48] sm:$0xff] %v7071_v2  ;;  %s380_s16 = scalar_select %p379_p10, %s7160_s21, 1  ;;  %v6661_v9 = vld [vmem:[%s9752_s1 + $0x64] ss:$12 sps:$4 sm:$0xff]   ;;  %vm2327_vm0 = vcmask 261120  }
  0x1c   : > { %4028 = vst [vmem:[#allocation4 + $0x50] sm:$0x3] %v7071_v2  ;;  %4029 = vst [vmem:[#allocation4 + $0x58] sm:$0x3] %v7071_v2  ;;  %773 = vmatpush1.bf16.msra.mxu0 %v6654_v4  ;;  %v6663_v10 = vld [vmem:[%s9752_s1 + $0x60] ss:$12 sps:$4 sm:$0xff]  }
  0x1d   : > { %4030 = vst [vmem:[#allocation4 + $0x60] sm:$0xff] %v7071_v2  ;;  %4031 = vst [vmem:[#allocation4 + $0x68] sm:$0xff] %v7071_v2  ;;  %774 = vmatprep.subr.bf16.mxu0 %v6655_v5  ;;  %s5835_s30 = sshll.u32 %s380_s16, 6  ;;  %v6664_v11 = vld [vmem:[%s9752_s1 + $0x7c] ss:$12 sps:$4 sm:$0xff]   ;;  %vm2329_vm1 = vcmask 257024  }
  0x1e   : > { %4032 = vst [vmem:[#allocation4 + $0x70] sm:$0x3] %v7071_v2  ;;  %4033 = vst [vmem:[#allocation4 + $0x78] sm:$0x3] %v7071_v2  ;;  %s7225_s15 = scalar_lea.vmem %s9751_s0, %s5835_s30  ;;  %v6666_v12 = vld [vmem:[%s9752_s1 + $0x78] ss:$12 sps:$4 sm:$0xff]  }
  0x1f   : > { %4034 = vst [vmem:[#allocation4 + $0x80] sm:$0xff] %v7071_v2  ;;  %4035 = vst [vmem:[#allocation4 + $0x88] sm:$0xff] %v7071_v2  ;;  %v6667_v13 = vld [vmem:[%s9752_s1 + $0x94] ss:$12 sps:$4 sm:$0xff]   ;;  %v7237_v15 = vld [vmem:[%s7225_s15 + $0x8] sm:$0xff]  ;;  %s9810_s24 = smov 64  }
  0x20   : > { %4036 = vst [vmem:[#allocation4 + $0x90] sm:$0x3] %v7071_v2  ;;  %4037 = vst [vmem:[#allocation4 + $0x98] sm:$0x3] %v7071_v2  ;;  %775 = vmatpush1.bf16.msra.mxu0 %v6657_v6  ;;  %v7234_v14 = vld [vmem:[%s7225_s15] sm:$0xff]  ;;  %v4004_v19 = vunpack.c.l.bf16 %v7237_v15  ;;  %v4005_v21 = vunpack.c.h.bf16 %v7237_v15  ;;  %v7269_v29 = vld [vmem:[%s7225_s15 + $0x10] sm:$0xff] }
  0x21   : > { %4038 = vst [vmem:[#allocation4 + $0xa0] sm:$0xff] %v7071_v2  ;;  %4039 = vst [vmem:[#allocation4 + $0xa8] sm:$0xff] %v7071_v2  ;;  %776 = vmatprep.subr.bf16.mxu0 %v6658_v7  ;;  %v7241_v16 = vcombine.high %v7234_v14, %v7237_v15  ;;  %v4002_v17 = vunpack.c.l.bf16 %v7234_v14  ;;  %v4003_v18 = vunpack.c.h.bf16 %v7234_v14  ;;  %v6669_v20 = vld [vmem:[%s9752_s1 + $0x90] ss:$12 sps:$4 sm:$0xff]   ;;  %v6670_v22 = vld [vmem:[%s9752_s1 + $0xac] ss:$12 sps:$4 sm:$0xff]   ;;  %v4006_v31 = vunpack.c.l.bf16 %v7269_v29 }
  0x22   : > { %4040 = vst [vmem:[#allocation4 + $0xb0] sm:$0x3] %v7071_v2  ;;  %4041 = vst [vmem:[#allocation4 + $0xb8] sm:$0x3] %v7071_v2  ;;  %v4076_v25 = vrot.slane %v4004_v19, 7  ;;  %v4077_v26 = vrot.slane %v4005_v21, 7  ;;  %v9775_v32 = vunpack.c.h.bf16 %v7269_v29 }
  0x23   : > { %4042 = vst [vmem:[#allocation4 + $0xc0] sm:$0xff] %v7071_v2  ;;  %4043 = vst [vmem:[#allocation4 + $0xc8] sm:$0xff] %v7071_v2  ;;  %802 = vmatprep.mubr.bf16.mxu0 %v7241_v16  ;;  %v4074_v23 = vrot.slane %v4002_v17, 7  ;;  %v4075_v24 = vrot.slane %v4003_v18, 7  ;;  %v6672_v27 = vld [vmem:[%s9752_s1 + $0xa8] ss:$12 sps:$4 sm:$0xff]  }
  0x24   : > { %4044 = vst [vmem:[#allocation4 + $0xd0] sm:$0x3] %v7071_v2  ;;  %4045 = vst [vmem:[#allocation4 + $0xd8] sm:$0x3] %v7071_v2  ;;  %777 = vmatpush1.bf16.msra.mxu0 %v6660_v8  ;;  %v6673_v28 = vld [vmem:[%s9752_s1 + $0xc4] ss:$12 sps:$4 sm:$0xff]  }
  0x25   : > { %4046 = vst [vmem:[#allocation4 + $0xe0] sm:$0xff] %v7071_v2  ;;  %4047 = vst [vmem:[#allocation4 + $0xe8] sm:$0xff] %v7071_v2  ;;  %778 = vmatprep.subr.bf16.mxu0 %v6661_v9  ;;  %v7272_v30 = vld [vmem:[%s7225_s15 + $0x18] sm:$0xff]  ;;  %v7279_v35 = vld [vmem:[%s7225_s15 + $0x20] sm:$0xff]  ;;  %v4078_v38 = vrot.slane %v4006_v31, 7  ;;  %v4079_v39 = vrot.slane %v9775_v32, 7 }
  0x26   : > { %4048 = vst [vmem:[#allocation4 + $0xf0] sm:$0x3] %v7071_v2  ;;  %4049 = vst [vmem:[#allocation4 + $0xf8] sm:$0x3] %v7071_v2  ;;  %v9774_v33 = vunpack.c.l.bf16 %v7272_v30  ;;  %v9773_v34 = vunpack.c.h.bf16 %v7272_v30  ;;  %v9772_v36 = vunpack.c.l.bf16 %v7279_v35  ;;  %v6675_v37 = vld [vmem:[%s9752_s1 + $0xc0] ss:$12 sps:$4 sm:$0xff]   ;;  %v9771_v48 = vunpack.c.h.bf16 %v7279_v35 }
  0x27   : > { %4050 = vst [vmem:[#allocation4 + $0x100] sm:$0xff] %v7071_v2  ;;  %4051 = vst [vmem:[#allocation4 + $0x108] sm:$0xff] %v7071_v2  ;;  %v6676_v42 = vld [vmem:[%s9752_s1 + $0xdc] ss:$12 sps:$4 sm:$0xff]   ;;  %v6678_v44 = vld [vmem:[%s9752_s1 + $0xd8] ss:$12 sps:$4 sm:$0xff]  }
  0x28   : > { %4052 = vst [vmem:[#allocation4 + $0x110] sm:$0x3] %v7071_v2  ;;  %4053 = vst [vmem:[#allocation4 + $0x118] sm:$0x3] %v7071_v2  ;;  %779 = vmatpush1.bf16.msra.mxu0 %v6663_v10  ;;  %v4080_v40 = vrot.slane %v9774_v33, 7  ;;  %v4081_v41 = vrot.slane %v9773_v34, 7 }
  0x29   : > { %4054 = vst [vmem:[#allocation4 + $0x120] sm:$0xff] %v7071_v2  ;;  %4055 = vst [vmem:[#allocation4 + $0x128] sm:$0xff] %v7071_v2  ;;  %780 = vmatprep.subr.bf16.mxu0 %v6664_v11  ;;  %v4082_v43 = vrot.slane %v9772_v36, 7  ;;  %v6679_v45 = vld [vmem:[%s9752_s1 + $0xf4] ss:$12 sps:$4 sm:$0xff]   ;;  %v7315_v50 = vld [vmem:[%s7225_s15 + $0x28] sm:$0xff]  ;;  %v7372_v11 = vcombine.low %v7234_v14, %v7237_v15 }
  0x2a   : > { %4056 = vst [vmem:[#allocation4 + $0x130] sm:$0x3] %v7071_v2  ;;  %4057 = vst [vmem:[#allocation4 + $0x138] sm:$0x3] %v7071_v2  ;;  %v6681_v46 = vld [vmem:[%s9752_s1 + $0xf0] ss:$12 sps:$4 sm:$0xff]   ;;  %v9770_v52 = vunpack.c.l.bf16 %v7315_v50  ;;  %v9769_v53 = vunpack.c.h.bf16 %v7315_v50 }
  0x2b   : > { %4107 = vst [vmem:[#allocation4 + $0x20] sm:$0xfe] %v4074_v23  ;;  %4108 = vst [vmem:[#allocation4 + $0x28] sm:$0xfe] %v4075_v24  ;;  %v6682_v47 = vld [vmem:[%s9752_s1 + $0x10c] ss:$12 sps:$4 sm:$0xff]  }
  0x2c   : > { %781 = vmatpush1.bf16.msra.mxu0 %v6666_v12  ;;  %4109 = vst [vmem:[#allocation4 + $0x30] sm:$0x1] %v4074_v23  ;;  %4110 = vst [vmem:[#allocation4 + $0x38] sm:$0x1] %v4075_v24  ;;  %v6684_v49 = vld [vmem:[%s9752_s1 + $0x108] ss:$12 sps:$4 sm:$0xff]  }
  0x2d   : > { %782 = vmatprep.subr.bf16.mxu0 %v6667_v13  ;;  %4111 = vst [vmem:[#allocation4 + $0x40] sm:$0xfe] %v4076_v25  ;;  %4113 = vst [vmem:[#allocation4 + $0x50] sm:$0x1] %v4076_v25  ;;  %v6685_v51 = vld [vmem:[%s9752_s1 + $0x124] ss:$12 sps:$4 sm:$0xff]   ;;  %v7379_v13 = vcombine.high %v7269_v29, %v7272_v30 }
  0x2e   : > { %4112 = vst [vmem:[#allocation4 + $0x48] sm:$0xfe] %v4077_v26  ;;  %4114 = vst [vmem:[#allocation4 + $0x58] sm:$0x1] %v4077_v26  ;;  %v4083_v54 = vrot.slane %v9771_v48, 7  ;;  %v4084_v57 = vrot.slane %v9770_v52, 7 }
  0x2f   : > { %4115 = vst [vmem:[#allocation4 + $0x60] sm:$0xfe] %v4078_v38  ;;  %4116 = vst [vmem:[#allocation4 + $0x68] sm:$0xfe] %v4079_v39  ;;  %v6687_v55 = vld [vmem:[%s9752_s1 + $0x120] ss:$12 sps:$4 sm:$0xff]  }
  0x30   : > { %783 = vmatpush1.bf16.msra.mxu0 %v6669_v20  ;;  %4117 = vst [vmem:[#allocation4 + $0x70] sm:$0x1] %v4078_v38  ;;  %4118 = vst [vmem:[#allocation4 + $0x78] sm:$0x1] %v4079_v39  ;;  %v6688_v56 = vld [vmem:[%s9752_s1 + $0x13c] ss:$12 sps:$4 sm:$0xff]   ;;  %v7416_v39 = vcombine.high %v7279_v35, %v7315_v50 }
  0x31   : > { %784 = vmatprep.subr.bf16.mxu0 %v6670_v22  ;;  %4119 = vst [vmem:[#allocation4 + $0x80] sm:$0xfe] %v4080_v40  ;;  %4120 = vst [vmem:[#allocation4 + $0x88] sm:$0xfe] %v4081_v41  ;;  %v4085_v58 = vrot.slane %v9769_v53, 7  ;;  %v7335_v59 = vld [vmem:[%s7225_s15 + $0x30] sm:$0xff] }
  0x32   : > { %4121 = vst [vmem:[#allocation4 + $0x90] sm:$0x1] %v4080_v40  ;;  %4122 = vst [vmem:[#allocation4 + $0x98] sm:$0x1] %v4081_v41  ;;  %v9768_v60 = vunpack.c.l.bf16 %v7335_v59  ;;  %v6690_v61 = vld [vmem:[%s9752_s1 + $0x138] ss:$12 sps:$4 sm:$0xff]   ;;  %v9767_v63 = vunpack.c.h.bf16 %v7335_v59 }
  0x33   : > { %4123 = vst [vmem:[#allocation4 + $0xa0] sm:$0xfe] %v4082_v43  ;;  %4125 = vst [vmem:[#allocation4 + $0xb0] sm:$0x1] %v4082_v43  ;;  %v6691_v62 = vld [vmem:[%s9752_s1 + $0x154] ss:$12 sps:$4 sm:$0xff]  }
  0x34   : > { %785 = vmatpush1.bf16.msra.mxu0 %v6672_v27  ;;  %4124 = vst [vmem:[#allocation4 + $0xa8] sm:$0xfe] %v4083_v54  ;;  %4126 = vst [vmem:[#allocation4 + $0xb8] sm:$0x1] %v4083_v54  ;;  %v4086_v0 = vrot.slane %v9768_v60, 7  ;;  %v7354_v3 = vld [vmem:[%s7225_s15 + $0x38] sm:$0xff]  ;;  %v7403_v27 = vcombine.low %v7269_v29, %v7272_v30 }
  0x35   : > { %786 = vmatprep.subr.bf16.mxu0 %v6673_v28  ;;  %4127 = vst [vmem:[#allocation4 + $0xc0] sm:$0xfe] %v4084_v57  ;;  %4128 = vst [vmem:[#allocation4 + $0xc8] sm:$0xfe] %v4085_v58  ;;  %v6693_v1 = vld [vmem:[%s9752_s1 + $0x150] ss:$12 sps:$4 sm:$0xff]   ;;  %v9766_v5 = vunpack.c.l.bf16 %v7354_v3  ;;  %v9765_v6 = vunpack.c.h.bf16 %v7354_v3 }
  0x36   : > { %4129 = vst [vmem:[#allocation4 + $0xd0] sm:$0x1] %v4084_v57  ;;  %4130 = vst [vmem:[#allocation4 + $0xd8] sm:$0x1] %v4085_v58  ;;  %v6694_v2 = vld [vmem:[%s9752_s1 + $0x16c] ss:$12 sps:$4 sm:$0xff]  }
  0x37   : > { %4131 = vst [vmem:[#allocation4 + $0xe0] sm:$0xfe] %v4086_v0  ;;  %4133 = vst [vmem:[#allocation4 + $0xf0] sm:$0x1] %v4086_v0  ;;  %v4087_v4 = vrot.slane %v9767_v63, 7  ;;  %v4088_v9 = vrot.slane %v9766_v5, 7  ;;  %v5565_v0 = vcombine.low %v7335_v59, %v7354_v3 }
  0x38   : > { %787 = vmatpush1.bf16.msra.mxu0 %v6675_v37  ;;  %v6696_v7 = vld [vmem:[%s9752_s1 + $0x168] ss:$12 sps:$4 sm:$0xff]   ;;  %v4089_v10 = vrot.slane %v9765_v6, 7  ;;  %v6701_v20 = vld [vmem:[%s9752_s1 + $0xe0] ss:$12 sps:$4 sm:$0xff]   ;;  %s7074_s25 = smov 96  }
  0x39   : > { %788 = vmatprep.subr.bf16.mxu0 %v6676_v42  ;;  %4132 = vst [vmem:[#allocation4 + $0xe8] sm:$0xfe] %v4087_v4  ;;  %4134 = vst [vmem:[#allocation4 + $0xf8] sm:$0x1] %v4087_v4  ;;  %v6699_v8 = vld [vmem:[%s9752_s1 + $0xc8] ss:$12 sps:$4 sm:$0xff]  }
  0x3a   : > { %4135 = vst [vmem:[#allocation4 + $0x100] sm:$0xfe] %v4088_v9  ;;  %4136 = vst [vmem:[#allocation4 + $0x108] sm:$0xfe] %v4089_v10  ;;  %v6700_v12 = vld [vmem:[%s9752_s1 + $0x8] ss:$12 sps:$4 sm:$0xff]  }
  0x3b   : > { %4137 = vst [vmem:[#allocation4 + $0x110] sm:$0x1] %v4088_v9  ;;  %4138 = vst [vmem:[#allocation4 + $0x118] sm:$0x1] %v4089_v10  ;;  %v6702_v22 = vld [vmem:[%s9752_s1 + $0x20] ss:$12 sps:$4 sm:$0xff]  }
  0x3c   : > { %789 = vmatpush1.bf16.msra.mxu0 %v6678_v44  ;;  %v6705_v23 = vld [vmem:[%s9752_s1 + $0xf8] ss:$12 sps:$4 sm:$0xff]   ;;  %v6723_v25 = vld [vmem:[%s9754_s3] ss:$8 sps:$4 sm:$0xff]   ;;  %v6724_v26 = vld [vmem:[%s9754_s3 + $0x14] ss:$8 sps:$4 sm:$0xff]  }
  0x3d   : > { %790 = vmatprep.subr.bf16.mxu0 %v6679_v45  ;;  %v6721_v24 = vld [vmem:[%s9754_s3 + $0x4] ss:$8 sps:$4 sm:$0xff]   ;;  %v6726_v28 = vld [vmem:[%s9754_s3 + $0x10] ss:$8 sps:$4 sm:$0xff]   ;;  %v6729_v41 = vld [vmem:[%s9754_s3 + $0x20] ss:$8 sps:$4 sm:$0xff]   ;;  %v5563_v45 = vcombine.low %v7279_v35, %v7315_v50 }
  0x3e   : > { %1946 = vmatprep.subr.bf16.mxu1 %v6721_v24  ;;  %v6706_v37 = vld [vmem:[%s9752_s1 + $0x38] ss:$12 sps:$4 sm:$0xff]   ;;  %v6707_v38 = vld [vmem:[%s9752_s1 + $0x110] ss:$12 sps:$4 sm:$0xff]   ;;  %v6711_v44 = vld [vmem:[%s9752_s1 + $0x128] ss:$12 sps:$4 sm:$0xff]  }
  0x3f   : > { %1947 = vmatpush1.bf16.msra.mxu1 %v6723_v25  ;;  %v6727_v40 = vld [vmem:[%s9754_s3 + $0x24] ss:$8 sps:$4 sm:$0xff]   ;;  %v6708_v42 = vld [vmem:[%s9752_s1 + $0x50] ss:$12 sps:$4 sm:$0xff]   ;;  %v6735_v57 = vld [vmem:[%s9754_s3 + $0x40] ss:$8 sps:$4 sm:$0xff]  }
  0x40   : > { %791 = vmatpush1.bf16.msra.mxu0 %v6681_v46  ;;  %1948 = vmatprep.subr.bf16.mxu1 %v6724_v26  ;;  %v6730_v43 = vld [vmem:[%s9754_s3 + $0x34] ss:$8 sps:$4 sm:$0xff]   ;;  %v6732_v46 = vld [vmem:[%s9754_s3 + $0x30] ss:$8 sps:$4 sm:$0xff]   ;;  %v6733_v54 = vld [vmem:[%s9754_s3 + $0x44] ss:$8 sps:$4 sm:$0xff]  }
  0x41   : > { %792 = vmatprep.subr.bf16.mxu0 %v6682_v47  ;;  %v6712_v47 = vld [vmem:[%s9752_s1 + $0x68] ss:$12 sps:$4 sm:$0xff]   ;;  %v6744_v9 = vld [vmem:[%s9754_s3 + $0x70] ss:$8 sps:$4 sm:$0xff]   ;;  %v6745_v10 = vld [vmem:[%s9754_s3 + $0x84] ss:$8 sps:$4 sm:$0xff]  }
  0x42   : > { %v6736_v58 = vld [vmem:[%s9754_s3 + $0x54] ss:$8 sps:$4 sm:$0xff]   ;;  %v6741_v4 = vld [vmem:[%s9754_s3 + $0x60] ss:$8 sps:$4 sm:$0xff]   ;;  %v6757_v24 = vld [vmem:[%s9754_s3 + $0xc4] ss:$8 sps:$4 sm:$0xff]  }
  0x43   : > { %1949 = vmatpush1.bf16.msra.mxu1 %v6726_v28  ;;  %v7072_v25 = vmov 0.0   ;;  %v6759_v26 = vld [vmem:[%s9754_s3 + $0xc0] ss:$8 sps:$4 sm:$0xff]   ;;  %v6762_v28 = vld [vmem:[%s9754_s3 + $0xd0] ss:$8 sps:$4 sm:$0xff]   ;;  %s9809_s16 = smov 32  }
  0x44   : > { %793 = vmatpush1.bf16.msra.mxu0 %v6684_v49  ;;  %1950 = vmatprep.subr.bf16.mxu1 %v6727_v40  ;;  %v6713_v49 = vld [vmem:[%s9752_s1 + $0x140] ss:$12 sps:$4 sm:$0xff]   ;;  %934 = vst [vmem:[#allocation2 + $0x10] sm:$0xff] %v7072_v25  ;;  %935 = vst [vmem:[#allocation2 + $0x18] sm:$0x3] %v7072_v25  ;;  %vm4235_vm2 = vcmask 1046528  }
  0x45   : > { %794 = vmatprep.subr.bf16.mxu0 %v6685_v51  ;;  %v5566_v51 = vcombine.high %v7335_v59, %v7354_v3  ;;  %932 = vst [vmem:[#allocation2] sm:$0xff] %v7072_v25  ;;  %933 = vst [vmem:[#allocation2 + $0x8] sm:$0x3] %v7072_v25  ;;  %v6768_v40 = vld [vmem:[%s9754_s3 + $0xf0] ss:$8 sps:$4 sm:$0xff]   ;;  %vm4380_vm3 = vcmask 1045504  }
  0x46   : > { %936 = vst [vmem:[#allocation2 + $0x20] sm:$0xff] %v7072_v25  ;;  %937 = vst [vmem:[#allocation2 + $0x28] sm:$0x3] %v7072_v25  ;;  %v4176_v63 = vld [vmem:[#allocation4 + $0x28] sm:$0xfe]  ;;  %vm2957_vm4 = vcmask 523264  }
  0x47   : > { %1951 = vmatpush1.bf16.msra.mxu1 %v6729_v41  ;;  %938 = vst [vmem:[#allocation2 + $0x30] sm:$0xff] %v7072_v25  ;;  %939 = vst [vmem:[#allocation2 + $0x38] sm:$0x3] %v7072_v25  ;;  %v6771_v41 = vld [vmem:[%s9754_s3 + $0x104] ss:$8 sps:$4 sm:$0xff]   ;;  %vm2966_vm5 = vcmask 785408  }
  0x48   : > { %795 = vmatpush1.bf16.msra.mxu0 %v6687_v55  ;;  %1952 = vmatprep.subr.bf16.mxu1 %v6730_v43  ;;  %v6714_v55 = vld [vmem:[%s9752_s1 + $0x80] ss:$12 sps:$4 sm:$0xff]   ;;  %940 = vst [vmem:[#allocation2 + $0x40] sm:$0xff] %v7072_v25  ;;  %941 = vst [vmem:[#allocation2 + $0x48] sm:$0x3] %v7072_v25  ;;  %s377_s12 = sand.u32 1, %s7061_s18  }
  0x49   : > { %796 = vmatprep.subr.bf16.mxu0 %v6688_v56  ;;  %v6717_v56 = vld [vmem:[%s9752_s1 + $0x158] ss:$12 sps:$4 sm:$0xff]   ;;  %942 = vst [vmem:[#allocation2 + $0x50] sm:$0xff] %v7072_v25  ;;  %943 = vst [vmem:[#allocation2 + $0x58] sm:$0x3] %v7072_v25  ;;  %s378_s22 = scalar_lea.vmem [#allocation5], %s377_s12 }
  0x4a   : > { %944 = vst [vmem:[#allocation2 + $0x60] sm:$0xff] %v7072_v25  ;;  %945 = vst [vmem:[#allocation2 + $0x68] sm:$0x3] %v7072_v25  ;;  %v4319_v52 = vld [vmem:[#allocation4 + $0x18] sm:$0x3]  ;;  %s5498_s15 = sshll.u32 %s378_s22, 4  ;;  %s9711_s15 = int_to_ptr.vmem [resolvable:$true] %s5498_s15 }
  0x4b   : > { %1953 = vmatpush1.bf16.msra.mxu1 %v6732_v46  ;;  %946 = vst [vmem:[#allocation2 + $0x70] sm:$0xff] %v7072_v25  ;;  %947 = vst [vmem:[#allocation2 + $0x78] sm:$0x3] %v7072_v25  ;;  %v6881_v15 = vld [vmem:[%s9754_s3 + $0x330] ss:$8 sps:$4 sm:$0xff]   ;;  %vm5483_vm6 = vcmask 73728  }
  0x4c   : > { %797 = vmatpush1.bf16.msra.mxu0 %v6690_v61  ;;  %1954 = vmatprep.subr.bf16.mxu1 %v6733_v54  ;;  %v6738_v61 = vld [vmem:[%s9754_s3 + $0x50] ss:$8 sps:$4 sm:$0xff]   ;;  %948 = vst [vmem:[#allocation2 + $0x80] sm:$0xff] %v7072_v25  ;;  %949 = vst [vmem:[#allocation2 + $0x88] sm:$0x3] %v7072_v25  ;;  %s5486_s30 = scalar_lea.sflag [#allocation6], %s377_s12 }
  0x4d   : > { %798 = vmatprep.subr.bf16.mxu0 %v6691_v62  ;;  %v6718_v62 = vld [vmem:[%s9752_s1 + $0x98] ss:$12 sps:$4 sm:$0xff]   ;;  %950 = vst [vmem:[#allocation2 + $0x90] sm:$0xff] %v7072_v25  ;;  %951 = vst [vmem:[#allocation2 + $0x98] sm:$0x3] %v7072_v25 }
  0x4e   : > { %2333 = vst.msk [vmem:[#allocation3 + $0x20] sm:$0xff] %vm2327_vm0, %v7072_v25  ;;  %2328 = vst.msk [vmem:[#allocation3] sm:$0xff] %vm2327_vm0, %v7072_v25 }
  0x4f   : > { %1955 = vmatpush1.bf16.msra.mxu1 %v6735_v57  ;;  %2334 = vst.msk [vmem:[#allocation3 + $0x28] sm:$0xf] %vm2329_vm1, %v7072_v25  ;;  %2330 = vst.msk [vmem:[#allocation3 + $0x8] sm:$0xf] %vm2329_vm1, %v7072_v25 }
  0x50   : > { %799 = vmatpush1.bf16.msra.mxu0 %v6693_v1  ;;  %v6719_v1 = vld [vmem:[%s9752_s1 + $0x170] ss:$12 sps:$4 sm:$0xff]   ;;  %1956 = vmatprep.subr.bf16.mxu1 %v6736_v58  ;;  %2331 = vst.msk [vmem:[#allocation3 + $0x10] sm:$0xff] %vm2327_vm0, %v7072_v25  ;;  %2335 = vst.msk [vmem:[#allocation3 + $0x30] sm:$0xff] %vm2327_vm0, %v7072_v25  ;;  %v7628_v58 = vld [vmem:[%s9753_s2] sm:$0x7] }
  0x51   : > { %800 = vmatprep.subr.bf16.mxu0 %v6694_v2  ;;  %v6739_v2 = vld [vmem:[%s9754_s3 + $0x64] ss:$8 sps:$4 sm:$0xff]   ;;  %2332 = vst.msk [vmem:[#allocation3 + $0x18] sm:$0xf] %vm2329_vm1, %v7072_v25  ;;  %2336 = vst.msk [vmem:[#allocation3 + $0x38] sm:$0xf] %vm2329_vm1, %v7072_v25 }
  0x52   : > { %2337 = vst.msk [vmem:[#allocation3 + $0x40] sm:$0xff] %vm2327_vm0, %v7072_v25  ;;  %2339 = vst.msk [vmem:[#allocation3 + $0x50] sm:$0xff] %vm2327_vm0, %v7072_v25 }
  0x53   : > { %1957 = vmatpush1.bf16.msra.mxu1 %v6738_v61  ;;  %2338 = vst.msk [vmem:[#allocation3 + $0x48] sm:$0xf] %vm2329_vm1, %v7072_v25  ;;  %2340 = vst.msk [vmem:[#allocation3 + $0x58] sm:$0xf] %vm2329_vm1, %v7072_v25 }
  0x54   : > { %801 = vmatpush1.bf16.msra.mxu0 %v6696_v7  ;;  %v6720_v7 = vld [vmem:[%s9752_s1 + $0xb0] ss:$12 sps:$4 sm:$0xff]   ;;  %1958 = vmatprep.subr.bf16.mxu1 %v6739_v2  ;;  %2341 = vst.msk [vmem:[#allocation3 + $0x60] sm:$0xff] %vm2327_vm0, %v7072_v25  ;;  %2343 = vst.msk [vmem:[#allocation3 + $0x70] sm:$0xff] %vm2327_vm0, %v7072_v25 }
  0x55   : > { %5836 = vmatprep.subr.bf16.mxu0 %v6699_v8  ;;  %v6742_v8 = vld [vmem:[%s9754_s3 + $0x74] ss:$8 sps:$4 sm:$0xff]   ;;  %2342 = vst.msk [vmem:[#allocation3 + $0x68] sm:$0xf] %vm2329_vm1, %v7072_v25  ;;  %2344 = vst.msk [vmem:[#allocation3 + $0x78] sm:$0xf] %vm2329_vm1, %v7072_v25 }
  0x56   : > { %2345 = vst.msk [vmem:[#allocation3 + $0x80] sm:$0xff] %vm2327_vm0, %v7072_v25  ;;  %2347 = vst.msk [vmem:[#allocation3 + $0x90] sm:$0xff] %vm2327_vm0, %v7072_v25 }
  0x57   : > { %803 = vmatmul.mubr.bf16.vlgmr.msra.gmra.mrb[0].mxu0 %v7372_v11  ;;  %1959 = vmatpush1.bf16.msra.mxu1 %v6741_v4  ;;  %2346 = vst.msk [vmem:[#allocation3 + $0x88] sm:$0xf] %vm2329_vm1, %v7072_v25  ;;  %2348 = vst.msk [vmem:[#allocation3 + $0x98] sm:$0xf] %vm2329_vm1, %v7072_v25 }
  0x58   : > { %5837 = vmatpush3.bf16.msra.mxu0 %v6700_v12  ;;  %812 = vmatprep.mubr.bf16.mxu0 %v7379_v13  ;;  %v6747_v12 = vld [vmem:[%s9754_s3 + $0x80] ss:$8 sps:$4 sm:$0xff]   ;;  %2349 = vst.msk [vmem:[#allocation3 + $0xa0] sm:$0xff] %vm2327_vm0, %v7072_v25  ;;  %2351 = vst.msk [vmem:[#allocation3 + $0xb0] sm:$0xff] %vm2327_vm0, %v7072_v25  ;;  %v7613_v43 = vld [vmem:[#allocation3 + $0x12] sm:$0xff] }
  0x59   : > { %5838 = vmatprep.subr.bf16.mxu0 %v6701_v20  ;;  %1960 = vmatprep.subr.bf16.mxu1 %v6742_v8  ;;  %v6750_v20 = vld [vmem:[%s9754_s3 + $0x90] ss:$8 sps:$4 sm:$0xff]   ;;  %2350 = vst.msk [vmem:[#allocation3 + $0xa8] sm:$0xf] %vm2329_vm1, %v7072_v25  ;;  %2352 = vst.msk [vmem:[#allocation3 + $0xb8] sm:$0xf] %vm2329_vm1, %v7072_v25 }
  0x5a   : > { %v2387_v46 = vld [vmem:[#allocation3 + $0x13] sm:$0xff] }
  0x5b   : > { %1961 = vmatpush1.bf16.msra.mxu1 %v6744_v9 }
  0x5c   : > { %5839 = vmatpush3.bf16.msra.mxu0 %v6702_v22  ;;  %1962 = vmatprep.subr.bf16.mxu1 %v6745_v10  ;;  %v6751_v22 = vld [vmem:[%s9754_s3 + $0xa4] ss:$8 sps:$4 sm:$0xff]  }
  0x5d   : > { %5840 = vmatprep.subr.bf16.mxu0 %v6705_v23  ;;  %v6753_v23 = vld [vmem:[%s9754_s3 + $0xa0] ss:$8 sps:$4 sm:$0xff]  }
  0x5f   : > { %813 = vmatmul.mubr.bf16.gmra.mrb[4].mxu0 %v7403_v27  ;;  %1963 = vmatpush1.bf16.msra.mxu1 %v6747_v12  ;;  %v969_v12 = vld [vmem:[#allocation2 + $0x1] sm:$0xff] }
  0x60   : > { %5841 = vmatpush3.bf16.msra.mxu0 %v6706_v37  ;;  %822 = vmatprep.mubr.bf16.mxu0 %v7416_v39  ;;  %v6763_v37 = vld [vmem:[%s9754_s3 + $0xe4] ss:$8 sps:$4 sm:$0xff]  }
  0x61   : > { %5842 = vmatprep.subr.bf16.mxu0 %v6707_v38  ;;  %v6765_v38 = vld [vmem:[%s9754_s3 + $0xe0] ss:$8 sps:$4 sm:$0xff]  }
  0x64   : > { %5843 = vmatpush3.bf16.msra.mxu0 %v6708_v42  ;;  %v2378_v42 = vld [vmem:[#allocation3 + $0x2] sm:$0xff] }
  0x65   : > { %5844 = vmatprep.subr.bf16.mxu0 %v6711_v44  ;;  %v6294_v44 = vpack.i.bf16 %v7613_v43, %v2378_v42 }
  0x67   : > { %823 = vmatmul.mubr.bf16.gmra.mrb[8].mxu0 %v5563_v45  ;;  %6295 = vrot.lane.b32.xlu1 %v6294_v44, %s9810_s24 }
  0x68   : > { %5845 = vmatpush3.bf16.msra.mxu0 %v6712_v47  ;;  %832 = vmatprep.mubr.bf16.mxu0 %v5566_v51  ;;  %v2370_v47 = vld [vmem:[#allocation3 + $0x1] sm:$0xff] }
  0x69   : > { %5846 = vmatprep.subr.bf16.mxu0 %v6713_v49 }
  0x6c   : > { %5847 = vmatpush3.bf16.msra.mxu0 %v6714_v55  ;;  %v459_v55 = vlaneseq }
  0x6d   : > { %5848 = vmatprep.subr.bf16.mxu0 %v6717_v56 }
  0x6e   : > { %v7622_v56 = vshrl.u32 %v459_v55, 7 }
  0x6f   : > { %833 = vmatmul.mubr.bf16.gmra.mrb[12].mxu0 %v5565_v0 }
  0x70   : > { %5849 = vmatpush3.bf16.msra.mxu0 %v6718_v62  ;;  %875 = vmatprep.mubr.bf16.mxu0 %v7241_v16  ;;  %v6748_v16 = vld [vmem:[%s9754_s3 + $0x94] ss:$8 sps:$4 sm:$0xff]   ;;  %9814 = vst [vmem:[#allocation9_spill] sm:$0xff] %v7622_v56  ;;  %v9764_v57 = vsub.s32 0, %v7622_v56  ;;  %v9763_v61 = vsub.s32 1, %v7622_v56 }
  0x71   : > { %5850 = vmatprep.subr.bf16.mxu0 %v6719_v1  ;;  %1964 = vmatprep.subr.bf16.mxu1 %v6748_v16 }
  0x72   : > { %1965 = vmatpush1.bf16.msra.mxu1 %v6750_v20  ;;  %v7634_v62 = vrot.slane %v7628_v58, %v9764_v57  ;;  %v8150_v57 = vld [vmem:[#allocation4 + $0x8] sm:$0xfc] }
  0x73   : > { %1966 = vmatprep.subr.bf16.mxu1 %v6751_v22 }
  0x74   : > { %5851 = vmatpush3.bf16.msra.mxu0 %v6720_v7 }
  0x76   : > { %1967 = vmatpush1.bf16.msra.mxu1 %v6753_v23 }
  0x77   : > { %876 = vmatmul.mubr.bf16.vlgmr.msra.gmra.mrb[16].mxu0 %v7372_v11  ;;  %v6754_v11 = vld [vmem:[%s9754_s3 + $0xb4] ss:$8 sps:$4 sm:$0xff]  }
  0x78   : > { %883 = vmatprep.mubr.bf16.mxu0 %v7379_v13  ;;  %v6756_v13 = vld [vmem:[%s9754_s3 + $0xb0] ss:$8 sps:$4 sm:$0xff]   ;;  %1968 = vmatprep.subr.bf16.mxu1 %v6754_v11 }
  0x7a   : > { %1969 = vmatpush1.bf16.msra.mxu1 %v6756_v13 }
  0x7b   : > { %1970 = vmatprep.subr.bf16.mxu1 %v6757_v24 }
  0x7e   : > { %1971 = vmatpush1.bf16.msra.mxu1 %v6759_v26 }
  0x7f   : > { %884 = vmatmul.mubr.bf16.gmra.mrb[20].mxu0 %v7403_v27  ;;  %v6760_v27 = vld [vmem:[%s9754_s3 + $0xd4] ss:$8 sps:$4 sm:$0xff]  }
  0x80   : > { %891 = vmatprep.mubr.bf16.mxu0 %v7416_v39  ;;  %1972 = vmatprep.subr.bf16.mxu1 %v6760_v27  ;;  %v6766_v39 = vld [vmem:[%s9754_s3 + $0xf4] ss:$8 sps:$4 sm:$0xff]  }
  0x82   : > { %1973 = vmatpush1.bf16.msra.mxu1 %v6762_v28 }
  0x83   : > { %1974 = vmatprep.subr.bf16.mxu1 %v6763_v37 }
  0x86   : > { %1975 = vmatpush1.bf16.msra.mxu1 %v6765_v38 }
  0x87   : > { %892 = vmatmul.mubr.bf16.gmra.mrb[24].mxu0 %v5563_v45  ;;  %1976 = vmatprep.subr.bf16.mxu1 %v6766_v39  ;;  %v2386_v45 = vld [vmem:[#allocation3 + $0x3] sm:$0xff] }
  0x88   : > { %899 = vmatprep.mubr.bf16.mxu0 %v5566_v51  ;;  %v6299_v49 = vpack.i.bf16 %v2387_v46, %v2386_v45  ;;  %v7617_v51 = vld [vmem:[#allocation3 + $0x11] sm:$0xff] }
  0x89   : > { %v6289_v54 = vpack.i.bf16 %v7617_v51, %v2370_v47  ;;  %v6769_v47 = vld [vmem:[%s9754_s3 + $0x100] ss:$8 sps:$4 sm:$0xff]  }
  0x8a   : > { %1977 = vmatpush1.bf16.msra.mxu1 %v6768_v40  ;;  %6300 = vrot.lane.b32.xlu1 %v6299_v49, %s7074_s25 }
  0x8b   : > { %2019 = vmatprep.subr.bf16.mxu1 %v6771_v41  ;;  %6290 = vrot.lane.b32.xlu0 %v6289_v54, %s9809_s16 }
  0x8f   : > { %900 = vmatmul.mubr.bf16.gmra.mrb[28].mxu0 %v5565_v0  ;;  %v7639_v0 = vrot.slane %v7628_v58, %v9763_v61  ;;  %v7003_v61 = vld [vmem:[#allocation4] sm:$0xff] }
 0x12a   : > { %v804_v1 = vpop.f32.mrb[0].mxu0 }
 0x12b   : > { %v805_v2 = vadd.f32 %v804_v1, %v7634_v62  ;;  %v806_v4 = vpop.f32.mrb[1].mxu0  ;;  %v6774_v1 = vld [vmem:[%s9754_s3 + $0x114] ss:$8 sps:$4 sm:$0xff]  }
 0x12c   : > { %v807_v7 = vadd.f32 %v806_v4, %v7639_v0  ;;  %v808_v8 = vpop.f32.mrb[2].mxu0  ;;  %v6865_v4 = vld [vmem:[%s9756_s5 + $0x40] sm:$0xff]  }
 0x12d   : > { %v809_v9 = vadd.f32 %v808_v8, %v7634_v62  ;;  %v810_v10 = vpop.f32.mrb[3].mxu0  ;;  %v908_v22 = vmax.f32 %v805_v2, 0.0  ;;  %5876 = vmatprep.subr.bf16.mxu0 %v6865_v4 }
 0x12e   : > { %v909_v16 = vmax.f32 %v807_v7, 0.0  ;;  %v811_v20 = vadd.f32 %v810_v10, %v7639_v0 }
 0x12f   : > { %v911_v23 = vmax.f32 %v809_v9, 0.0  ;;  %v6869_v9 = vld [vmem:[%s9756_s5] sm:$0xff]  }
 0x130   : > { %953 = vst [vmem:[#allocation2 + $0x11] sm:$0xff] %v909_v16  ;;  %v912_v11 = vmax.f32 %v811_v20, 0.0  ;;  %v1035_v13 = vpack.c.bf16 %v909_v16, %v969_v12  ;;  %v6772_v12 = vld [vmem:[%s9754_s3 + $0x110] ss:$8 sps:$4 sm:$0xff]   ;;  %5877 = vmatpush3.bf16.msra.mxu0 %v6869_v9 }
 0x131   : > { %v5174_v24 = vadd.f32 %v911_v23, %v908_v22  ;;  %v6777_v22 = vld [vmem:[%s9754_s3 + $0x124] ss:$8 sps:$4 sm:$0xff]  }
 0x132   : > { %954 = vst [vmem:[#allocation2 + $0x21] sm:$0xff] %v912_v11  ;;  %v814_v26 = vpop.f32.mrb[4].mxu0  ;;  %1978 = vmatprep.mubr.bf16.mxu1 %v1035_v13  ;;  %v6870_v23 = vld [vmem:[%s9756_s5 + $0x48] sm:$0xff]  }
 0x133   : > { %v815_v27 = vadd.f32 %v814_v26, %v7634_v62  ;;  %v816_v28 = vpop.f32.mrb[5].mxu0  ;;  %v6874_v26 = vld [vmem:[%s9756_s5 + $0x8] sm:$0xff]   ;;  %5878 = vmatprep.subr.bf16.mxu0 %v6870_v23 }
 0x134   : > { %v817_v37 = vadd.f32 %v816_v28, %v7639_v0  ;;  %v818_v38 = vpop.f32.mrb[6].mxu0  ;;  %5879 = vmatpush3.bf16.msra.mxu0 %v6874_v26 }
 0x135   : > { %v914_v39 = vmax.f32 %v815_v27, 0.0  ;;  %v819_v40 = vadd.f32 %v818_v38, %v7634_v62  ;;  %v820_v41 = vpop.f32.mrb[7].mxu0 }
 0x136   : > { %v915_v42 = vmax.f32 %v817_v37, 0.0  ;;  %v821_v44 = vadd.f32 %v820_v41, %v7639_v0 }
 0x137   : > { %v5175_v45 = vadd.f32 %v5174_v24, %v914_v39  ;;  %v917_v46 = vmax.f32 %v819_v40, 0.0  ;;  %v7652_v49 = vld [vmem:[#allocation2 + $0x10] sm:$0xff]  ;;  %v6775_v39 = vld [vmem:[%s9754_s3 + $0x120] ss:$8 sps:$4 sm:$0xff]  }
 0x138   : > { %955 = vst [vmem:[#allocation2 + $0x31] sm:$0xff] %v915_v42  ;;  %v918_v54 = vmax.f32 %v821_v44, 0.0  ;;  %v1034_v55 = vpack.c.bf16 %v7652_v49, %v7072_v25  ;;  %v1044_v2 = vpack.c.bf16 %v915_v42, %v912_v11 }
 0x139   : > { %v5176_v7 = vadd.f32 %v5175_v45, %v917_v46  ;;  %v7684_v40 = vld [vmem:[#allocation2 + $0x20] sm:$0xff]  ;;  %v6780_v45 = vld [vmem:[%s9754_s3 + $0x134] ss:$8 sps:$4 sm:$0xff]  }
 0x13a   : > { %956 = vst [vmem:[#allocation2 + $0x41] sm:$0xff] %v918_v54  ;;  %v824_v8 = vpop.f32.mrb[8].mxu0  ;;  %1979 = vmatmul.mubr.bf16.vlgmr.msra.gmra.mrb[0].mxu1 %v1034_v55 }
 0x13b   : > { %v825_v25 = vadd.f32 %v824_v8, %v7634_v62  ;;  %v826_v10 = vpop.f32.mrb[9].mxu0  ;;  %2020 = vmatpush1.bf16.msra.mxu1 %v6769_v47  ;;  %1988 = vmatprep.mubr.bf16.mxu1 %v1044_v2  ;;  %v6875_v47 = vld [vmem:[%s9756_s5 + $0x50] sm:$0xff]  }
 0x13c   : > { %v827_v16 = vadd.f32 %v826_v10, %v7639_v0  ;;  %v828_v20 = vpop.f32.mrb[10].mxu0  ;;  %2021 = vmatprep.subr.bf16.mxu1 %v6774_v1  ;;  %5880 = vmatprep.subr.bf16.mxu0 %v6875_v47  ;;  %v6879_v2 = vld [vmem:[%s9756_s5 + $0x10] sm:$0xff]   ;;  %v6880_v10 = vld [vmem:[%s9756_s5 + $0x58] sm:$0xff]  }
 0x13d   : > { %v920_v11 = vmax.f32 %v825_v25, 0.0  ;;  %v829_v13 = vadd.f32 %v828_v20, %v7634_v62  ;;  %v830_v24 = vpop.f32.mrb[11].mxu0  ;;  %v6783_v25 = vld [vmem:[%s9754_s3 + $0x144] ss:$8 sps:$4 sm:$0xff]   ;;  %5881 = vmatpush3.bf16.msra.mxu0 %v6879_v2 }
 0x13e   : > { %v921_v27 = vmax.f32 %v827_v16, 0.0  ;;  %v831_v28 = vadd.f32 %v830_v24, %v7639_v0  ;;  %5882 = vmatprep.subr.bf16.mxu0 %v6880_v10  ;;  %v6787_v10 = vld [vmem:[%s9754_s3 + $0x160] ss:$8 sps:$4 sm:$0xff]  }
 0x13f   : > { %v5177_v37 = vadd.f32 %v5176_v7, %v920_v11  ;;  %v923_v38 = vmax.f32 %v829_v13, 0.0  ;;  %2022 = vmatpush1.bf16.msra.mxu1 %v6772_v12  ;;  %v7686_v41 = vld [vmem:[#allocation2 + $0x30] sm:$0xff]  ;;  %v469_v13 = vsub.s32 2, %v7622_v56  ;;  %v9847_v56 = vunpack.c.h.bf16 %v7354_v3 }
 0x140   : > { %957 = vst [vmem:[#allocation2 + $0x51] sm:$0xff] %v921_v27  ;;  %v924_v42 = vmax.f32 %v831_v28, 0.0  ;;  %2023 = vmatprep.subr.bf16.mxu1 %v6777_v22  ;;  %v1043_v44 = vpack.c.bf16 %v7686_v41, %v7684_v40  ;;  %v1053_v46 = vpack.c.bf16 %v921_v27, %v918_v54  ;;  %v6778_v54 = vld [vmem:[%s9754_s3 + $0x130] ss:$8 sps:$4 sm:$0xff]   ;;  %v6781_v27 = vld [vmem:[%s9754_s3 + $0x140] ss:$8 sps:$4 sm:$0xff]  }
 0x141   : > { %v5178_v55 = vadd.f32 %v5177_v37, %v923_v38  ;;  %v6884_v22 = vld [vmem:[%s9756_s5 + $0x18] sm:$0xff]   ;;  %v7719_v28 = vld [vmem:[#allocation2 + $0x40] sm:$0xff]  ;;  %v7734_v47 = vrot.slane %v7628_v58, %v469_v13  ;;  %v6895_v13 = vld [vmem:[%s9756_s5 + $0x70] sm:$0xff]  }
 0x142   : > { %958 = vst [vmem:[#allocation2 + $0x61] sm:$0xff] %v924_v42  ;;  %v834_v1 = vpop.f32.mrb[12].mxu0  ;;  %1989 = vmatmul.mubr.bf16.gmra.mrb[4].mxu1 %v1043_v44  ;;  %v6786_v38 = vld [vmem:[%s9754_s3 + $0x154] ss:$8 sps:$4 sm:$0xff]   ;;  %5883 = vmatpush3.bf16.msra.mxu0 %v6884_v22  ;;  %v6885_v44 = vld [vmem:[%s9756_s5 + $0x60] sm:$0xff]  }
 0x143   : > { %v835_v4 = vadd.f32 %v834_v1, %v7634_v62  ;;  %v836_v7 = vpop.f32.mrb[13].mxu0  ;;  %2024 = vmatpush1.bf16.msra.mxu1 %v6775_v39  ;;  %1998 = vmatprep.mubr.bf16.mxu1 %v1053_v46  ;;  %v6789_v58 = vld [vmem:[%s9754_s3 + $0x164] ss:$8 sps:$4 sm:$0xff]   ;;  %v8183_v32 = vld [vmem:[#allocation2 + $0x31] sm:$0xff] }
 0x144   : > { %v837_v8 = vadd.f32 %v836_v7, %v7639_v0  ;;  %v838_v9 = vpop.f32.mrb[14].mxu0  ;;  %2025 = vmatprep.subr.bf16.mxu1 %v6780_v45  ;;  %5884 = vmatprep.subr.bf16.mxu0 %v6885_v44  ;;  %v6890_v7 = vld [vmem:[%s9756_s5 + $0x68] sm:$0xff]   ;;  %v6900_v44 = vld [vmem:[%s9756_s5 + $0x78] sm:$0xff]  }
 0x145   : > { %v926_v12 = vmax.f32 %v835_v4, 0.0  ;;  %v839_v16 = vadd.f32 %v838_v9, %v7634_v62  ;;  %v840_v20 = vpop.f32.mrb[15].mxu0  ;;  %v8166_v48 = vld [vmem:[#allocation2 + $0x41] sm:$0xff] }
 0x146   : > { %v927_v23 = vmax.f32 %v837_v8, 0.0  ;;  %v841_v11 = vadd.f32 %v840_v20, %v7639_v0 }
 0x147   : > { %v5179_v24 = vadd.f32 %v5178_v55, %v926_v12  ;;  %v929_v26 = vmax.f32 %v839_v16, 0.0  ;;  %2026 = vmatpush1.bf16.msra.mxu1 %v6778_v54  ;;  %v7721_v62 = vld [vmem:[#allocation2 + $0x50] sm:$0xff]  ;;  %v6889_v55 = vld [vmem:[%s9756_s5 + $0x20] sm:$0xff]   ;;  %v6891_v54 = vld [vmem:[%s9756_s5 + $0x28] sm:$0xff]  }
 0x148   : > { %959 = vst [vmem:[#allocation2 + $0x71] sm:$0xff] %v927_v23  ;;  %v930_v37 = vmax.f32 %v841_v11, 0.0  ;;  %2027 = vmatprep.subr.bf16.mxu1 %v6783_v25  ;;  %v1052_v0 = vpack.c.bf16 %v7721_v62, %v7719_v28  ;;  %v1062_v39 = vpack.c.bf16 %v927_v23, %v924_v42  ;;  %v6784_v42 = vld [vmem:[%s9754_s3 + $0x150] ss:$8 sps:$4 sm:$0xff]   ;;  %5885 = vmatpush3.bf16.msra.mxu0 %v6889_v55  ;;  %v6792_v11 = vld [vmem:[%s9754_s3 + $0x174] ss:$8 sps:$4 sm:$0xff]  }
 0x149   : > { %v7731_v45 = vadd.f32 %v5179_v24, %v929_v26  ;;  %5886 = vmatprep.subr.bf16.mxu0 %v6890_v7  ;;  %v7755_v12 = vld [vmem:[#allocation2 + $0x60] sm:$0xff]  ;;  %v1037_v24 = vpack.c.bf16 %v7684_v40, %v7652_v49  ;;  %v6896_v26 = vld [vmem:[%s9756_s5 + $0x30] sm:$0xff]   ;;  %v6901_v55 = vld [vmem:[%s9756_s5 + $0x38] sm:$0xff]  }
 0x14a   : > { %960 = vst [vmem:[#allocation2 + $0x81] sm:$0xff] %v930_v37  ;;  %v5852_v46 = vpop.f32.mrb[16].mxu0  ;;  %1999 = vmatmul.mubr.bf16.gmra.mrb[8].mxu1 %v1052_v0 }
 0x14b   : > { %9815 = vst [vmem:[#allocation10_spill] sm:$0xff] %v7731_v45  ;;  %v5853_v1 = vpop.f32.mrb[17].mxu0  ;;  %2028 = vmatpush1.bf16.msra.mxu1 %v6781_v27  ;;  %2008 = vmatprep.mubr.bf16.mxu1 %v1062_v39  ;;  %v6795_v39 = vld [vmem:[%s9754_s3 + $0x184] ss:$8 sps:$4 sm:$0xff]  }
 0x14c   : > { %v5854_v2 = vadd.f32 %v5853_v1, %v5852_v46  ;;  %v5855_v4 = vpop.f32.mrb[18].mxu0  ;;  %2029 = vmatprep.subr.bf16.mxu1 %v6786_v38  ;;  %5887 = vmatpush3.bf16.msra.mxu0 %v6891_v54  ;;  %v6790_v38 = vld [vmem:[%s9754_s3 + $0x170] ss:$8 sps:$4 sm:$0xff]  }
 0x14d   : > { %v5856_v8 = vpop.f32.mrb[19].mxu0  ;;  %5888 = vmatprep.subr.bf16.mxu0 %v6895_v13  ;;  %v6796_v13 = vld [vmem:[%s9754_s3 + $0x190] ss:$8 sps:$4 sm:$0xff]  }
 0x14e   : > { %v878_v9 = vadd.f32 %v5854_v2, %v7734_v47  ;;  %v5857_v25 = vadd.f32 %v5856_v8, %v5855_v4  ;;  %v6793_v2 = vld [vmem:[%s9754_s3 + $0x180] ss:$8 sps:$4 sm:$0xff]   ;;  %v7791_v4 = vld [vmem:[#allocation3 + $0x10] sm:$0xff] }
 0x14f   : > { %2030 = vmatpush1.bf16.msra.mxu1 %v6784_v42  ;;  %v7757_v16 = vld [vmem:[#allocation2 + $0x70] sm:$0xff] }
 0x150   : > { %v910_v20 = vmax.f32 %v878_v9, 0.0  ;;  %v881_v22 = vadd.f32 %v5857_v25, %v7734_v47  ;;  %2031 = vmatprep.subr.bf16.mxu1 %v6789_v58  ;;  %v1061_v23 = vpack.c.bf16 %v7757_v16, %v7755_v12  ;;  %5889 = vmatpush3.bf16.msra.mxu0 %v6896_v26  ;;  %v6798_v9 = vld [vmem:[%s9754_s3 + $0x194] ss:$8 sps:$4 sm:$0xff]  }
 0x151   : > { %5890 = vmatprep.subr.bf16.mxu0 %v6900_v44  ;;  %v6799_v44 = vld [vmem:[%s9754_s3 + $0x1a0] ss:$8 sps:$4 sm:$0xff]  }
 0x152   : > { %2354 = vst.msk [vmem:[#allocation3 + $0x22] sm:$0xff] %vm2327_vm0, %v910_v20  ;;  %v913_v27 = vmax.f32 %v881_v22, 0.0  ;;  %v5858_v37 = vpop.f32.mrb[20].mxu0  ;;  %2009 = vmatmul.mubr.bf16.gmra.mrb[12].mxu1 %v1061_v23  ;;  %v2435_v23 = vld [vmem:[#allocation3 + $0x14] sm:$0xff] }
 0x153   : > { %v5859_v0 = vpop.f32.mrb[21].mxu0  ;;  %2032 = vmatpush1.bf16.msra.mxu1 %v6787_v10  ;;  %2051 = vmatprep.mubr.bf16.mxu1 %v1037_v24 }
 0x154   : > { %2355 = vst.msk [vmem:[#allocation3 + $0x32] sm:$0xff] %vm2327_vm0, %v913_v27  ;;  %v5860_v49 = vadd.f32 %v5859_v0, %v5858_v37  ;;  %2033 = vmatprep.subr.bf16.mxu1 %v6792_v11  ;;  %v5861_v40 = vpop.f32.mrb[22].mxu0  ;;  %5891 = vmatpush3.bf16.msra.mxu0 %v6901_v55  ;;  %v6801_v37 = vld [vmem:[%s9754_s3 + $0x1a4] ss:$8 sps:$4 sm:$0xff]  }
 0x155   : > { %v5862_v46 = vpop.f32.mrb[23].mxu0 }
 0x156   : > { %v886_v1 = vadd.f32 %v5860_v49, %v7734_v47  ;;  %v5863_v42 = vadd.f32 %v5862_v46, %v5861_v40 }
 0x157   : > { %2034 = vmatpush1.bf16.msra.mxu1 %v6790_v38 }
 0x158   : > { %v916_v58 = vmax.f32 %v886_v1, 0.0  ;;  %v889_v7 = vadd.f32 %v5863_v42, %v7734_v47  ;;  %2035 = vmatprep.subr.bf16.mxu1 %v6795_v39 }
 0x159   : > { %v2412_v54 = vld [vmem:[#allocation3 + $0x21] sm:$0xff] }
 0x15a   : > { %v7794_v8 = vld [vmem:[#allocation3 + $0x20] sm:$0xff]  ;;  %2356 = vst.msk [vmem:[#allocation3 + $0x42] sm:$0xff] %vm2327_vm0, %v916_v58  ;;  %v919_v25 = vmax.f32 %v889_v7, 0.0  ;;  %v5864_v10 = vpop.f32.mrb[24].mxu0  ;;  %v6309_v20 = vpack.i.bf16 %v2412_v54, %v7617_v51 }
 0x15b   : > { %v6304_v22 = vpack.i.bf16 %v7794_v8, %v7791_v4  ;;  %v5865_v11 = vpop.f32.mrb[25].mxu0  ;;  %2036 = vmatpush1.bf16.msra.mxu1 %v6793_v2  ;;  %v2436_v24 = vld [vmem:[#allocation3 + $0x24] sm:$0xff]  ;;  %v7817_v46 = vld [vmem:[#allocation3 + $0x33] sm:$0xff] }
 0x15c   : > { %v2420_v26 = vld [vmem:[#allocation3 + $0x22] sm:$0xff]  ;;  %2357 = vst.msk [vmem:[#allocation3 + $0x52] sm:$0xff] %vm2327_vm0, %v919_v25  ;;  %v5866_v27 = vadd.f32 %v5865_v11, %v5864_v10  ;;  %6310 = vrot.lane.b32.xlu1 %v6309_v20, %s9810_s24  ;;  %v5867_v51 = vpop.f32.mrb[26].mxu0  ;;  %2037 = vmatprep.subr.bf16.mxu1 %v6798_v9  ;;  %v6319_v49 = vpack.i.bf16 %v2436_v24, %v2435_v23  ;;  %v2373_v55 = vld [vmem:[#allocation3 + $0x31] sm:$0xff] }
 0x15d   : > { %6305 = vrot.lane.b32.xlu0 %v6304_v22, %s9809_s16  ;;  %v5868_v0 = vpop.f32.mrb[27].mxu0  ;;  %v6314_v40 = vpack.i.bf16 %v2420_v26, %v7613_v43  ;;  %v2467_v2 = vld [vmem:[#allocation3 + $0x23] sm:$0xff]  ;;  %v6804_v43 = vld [vmem:[%s9754_s3 + $0x1b4] ss:$8 sps:$4 sm:$0xff]   ;;  %v6324_v7 = vpack.i.bf16 %v2373_v55, %v2412_v54  ;;  %v6802_v10 = vld [vmem:[%s9754_s3 + $0x1b0] ss:$8 sps:$4 sm:$0xff]  }
 0x15e   : > { %v894_v38 = vadd.f32 %v5866_v27, %v7734_v47  ;;  %v5869_v39 = vadd.f32 %v5868_v0, %v5867_v51  ;;  %v6339_v58 = vpack.i.bf16 %v7817_v46, %v2467_v2  ;;  %v2476_v20 = vld [vmem:[#allocation3 + $0x34] sm:$0xff]  ;;  %v6807_v54 = vld [vmem:[%s9754_s3 + $0x1c4] ss:$8 sps:$4 sm:$0xff]  }
 0x15f   : > { %2038 = vmatpush1.bf16.msra.mxu1 %v6796_v13  ;;  %v2381_v22 = vld [vmem:[#allocation3 + $0x32] sm:$0xff]  ;;  %v6344_v51 = vpack.i.bf16 %v2476_v20, %v2436_v24 }
 0x160   : > { %v922_v1 = vmax.f32 %v894_v38, 0.0  ;;  %6320 = vrot.lane.b32.xlu1 %v6319_v49, %s9809_s16  ;;  %v897_v42 = vadd.f32 %v5869_v39, %v7734_v47  ;;  %2039 = vmatprep.subr.bf16.mxu1 %v6801_v37  ;;  %v6329_v37 = vpack.i.bf16 %v2381_v22, %v2420_v26  ;;  %v6805_v49 = vld [vmem:[%s9754_s3 + $0x1c0] ss:$8 sps:$4 sm:$0xff]   ;;  %v2405_v24 = vld [vmem:[#allocation3 + $0x30] sm:$0xff] }
 0x161   : > { %6315 = vrot.lane.b32.xlu0 %v6314_v40, %s7074_s25  ;;  %v7840_v40 = vld [vmem:[#allocation3 + $0x40] sm:$0xff]  ;;  %v6810_v26 = vld [vmem:[%s9754_s3 + $0x1d4] ss:$8 sps:$4 sm:$0xff]   ;;  %v6808_v2 = vld [vmem:[%s9754_s3 + $0x1d0] ss:$8 sps:$4 sm:$0xff]  }
 0x162   : > { %2358 = vst.msk [vmem:[#allocation3 + $0x62] sm:$0xff] %vm2327_vm0, %v922_v1  ;;  %v925_v9 = vmax.f32 %v897_v42, 0.0  ;;  %v5870_v25 = vpop.f32.mrb[28].mxu0  ;;  %v6359_v1 = vpack.i.bf16 %v7840_v40, %v2405_v24 }
 0x163   : > { %2040 = vmatpush1.bf16.msra.mxu1 %v6799_v44  ;;  %v5871_v23 = vpop.f32.mrb[29].mxu0 }
 0x164   : > { %6325 = vrot.lane.b32.xlu1 %v6324_v7, %s9809_s16  ;;  %2359 = vst.msk [vmem:[#allocation3 + $0x72] sm:$0xff] %vm2327_vm0, %v925_v9  ;;  %v5872_v11 = vadd.f32 %v5871_v23, %v5870_v25  ;;  %v5873_v13 = vpop.f32.mrb[30].mxu0  ;;  %2041 = vmatprep.subr.bf16.mxu1 %v6804_v43  ;;  %v2414_v43 = vld [vmem:[#allocation3 + $0x41] sm:$0xff]  ;;  %v6349_v25 = vpack.i.bf16 %v2405_v24, %v7794_v8  ;;  %v6814_v8 = vld [vmem:[%s9754_s3 + $0x1f0] ss:$8 sps:$4 sm:$0xff]  }
 0x165   : > { %6340 = vrot.lane.b32.xlu0 %v6339_v58, %s9809_s16  ;;  %v5874_v27 = vpop.f32.mrb[31].mxu0  ;;  %v6364_v9 = vpack.i.bf16 %v2414_v43, %v2373_v55  ;;  %v2422_v23 = vld [vmem:[#allocation3 + $0x42] sm:$0xff]  ;;  %v6820_v24 = vld [vmem:[%s9754_s3 + $0x210] ss:$8 sps:$4 sm:$0xff]  }
 0x166   : > { %v902_v0 = vadd.f32 %v5872_v11, %v7734_v47  ;;  %v5875_v38 = vadd.f32 %v5874_v27, %v5873_v13  ;;  %v7868_v11 = vpack.i.bf16 %v2422_v23, %v2381_v22  ;;  %v2438_v55 = vld [vmem:[#allocation3 + $0x44] sm:$0xff] }
 0x167   : > { %2042 = vmatpush1.bf16.msra.mxu1 %v6802_v10  ;;  %v6811_v10 = vld [vmem:[%s9754_s3 + $0x1e0] ss:$8 sps:$4 sm:$0xff]   ;;  %v6819_v22 = vld [vmem:[%s9754_s3 + $0x204] ss:$8 sps:$4 sm:$0xff]   ;;  %v7881_v27 = vpack.i.bf16 %v2438_v55, %v2476_v20  ;;  %v1046_v20 = vpack.c.bf16 %v7719_v28, %v7686_v41  ;;  %v2478_v41 = vld [vmem:[#allocation3 + $0x54] sm:$0xff] }
 0x168   : > { %6330 = vrot.lane.b32.xlu1 %v6329_v37, %s9810_s24  ;;  %v928_v39 = vmax.f32 %v902_v0, 0.0  ;;  %v905_v44 = vadd.f32 %v5875_v38, %v7734_v47  ;;  %2043 = vmatprep.subr.bf16.mxu1 %v6807_v54  ;;  %v6813_v47 = vld [vmem:[%s9754_s3 + $0x1e4] ss:$8 sps:$4 sm:$0xff]   ;;  %v7876_v54 = vld [vmem:[#allocation2 + $0x12] sm:$0xff] }
 0x169   : > { %6345 = vrot.lane.b32.xlu0 %v6344_v51, %s9810_s24  ;;  %v977_v13 = vld [vmem:[#allocation2 + $0x2] sm:$0xff]  ;;  %v7886_v37 = vld [vmem:[#allocation3 + $0x53] sm:$0xff] }
 0x16a   : > { %2360 = vst.msk [vmem:[#allocation3 + $0x82] sm:$0xff] %vm2327_vm0, %v928_v39  ;;  %v931_v42 = vmax.f32 %v905_v44, 0.0  ;;  %v6817_v51 = vld [vmem:[%s9754_s3 + $0x200] ss:$8 sps:$4 sm:$0xff]   ;;  %v2375_v0 = vld [vmem:[#allocation3 + $0x51] sm:$0xff] }
 0x16b   : > { %2044 = vmatpush1.bf16.msra.mxu1 %v6805_v49  ;;  %v7894_v38 = vld [vmem:[#allocation3 + $0x43] sm:$0xff]  ;;  %v6822_v49 = vld [vmem:[%s9754_s3 + $0x214] ss:$8 sps:$4 sm:$0xff]   ;;  %v7903_v44 = vpack.i.bf16 %v2375_v0, %v2414_v43 }
 0x16c   : > { %6335 = vrot.lane.b32.xlu1 %v6339_v58, %s7074_s25  ;;  %2361 = vst.msk [vmem:[#allocation3 + $0x92] sm:$0xff] %vm2327_vm0, %v931_v42  ;;  %2045 = vmatprep.subr.bf16.mxu1 %v6810_v26  ;;  %v6816_v58 = vld [vmem:[%s9754_s3 + $0x1f4] ss:$8 sps:$4 sm:$0xff]   ;;  %v7901_v39 = vpack.i.bf16 %v7886_v37, %v7894_v38  ;;  %v6404_v42 = vpack.i.bf16 %v2478_v41, %v2438_v55  ;;  %v6823_v43 = vld [vmem:[%s9754_s3 + $0x220] ss:$8 sps:$4 sm:$0xff]  }
 0x16d   : > { %6360 = vrot.lane.b32.xlu0 %v6359_v1, %s9809_s16  ;;  %v2383_v28 = vld [vmem:[#allocation3 + $0x52] sm:$0xff] }
 0x16e   : > { %v7912_v26 = vld [vmem:[#allocation2 + $0x32] sm:$0xff] }
 0x16f   : > { %2046 = vmatpush1.bf16.msra.mxu1 %v6808_v2  ;;  %v7917_v2 = vpack.i.bf16 %v2383_v28, %v2422_v23  ;;  %v1055_v23 = vpack.c.bf16 %v7755_v12, %v7721_v62  ;;  %v6826_v55 = vld [vmem:[%s9754_s3 + $0x230] ss:$8 sps:$4 sm:$0xff]   ;;  %v6831_v12 = vld [vmem:[%s9754_s3 + $0x244] ss:$8 sps:$4 sm:$0xff]  }
 0x170   : > { %6350 = vrot.lane.b32.xlu1 %v6349_v25, %s9810_s24  ;;  %2047 = vmatprep.subr.bf16.mxu1 %v6813_v47  ;;  %v7922_v47 = vld [vmem:[#allocation2 + $0x22] sm:$0xff]  ;;  %v7943_v62 = vld [vmem:[#allocation2 + $0x52] sm:$0xff] }
 0x171   : > { %6365 = vrot.lane.b32.xlu0 %v6364_v9, %s9810_s24  ;;  %v2407_v9 = vld [vmem:[#allocation3 + $0x50] sm:$0xff]  ;;  %v7924_v25 = vld [vmem:[#allocation3 + $0x60] sm:$0xff] }
 0x173   : > { %2048 = vmatpush1.bf16.msra.mxu1 %v6811_v10  ;;  %v1045_v10 = vpack.c.bf16 %v7912_v26, %v7922_v47  ;;  %v8155_v6 = vld [vmem:[#allocation3 + $0x94] sm:$0xff] }
 0x174   : > { %6355 = vrot.lane.b32.xlu1 %v6324_v7, %s7074_s25  ;;  %2049 = vmatprep.subr.bf16.mxu1 %v6816_v58  ;;  %v1036_v7 = vpack.c.bf16 %v7876_v54, %v977_v13  ;;  %v6828_v58 = vld [vmem:[%s9754_s3 + $0x234] ss:$8 sps:$4 sm:$0xff]   ;;  %v2416_v13 = vld [vmem:[#allocation3 + $0x61] sm:$0xff] }
 0x175   : > { %6370 = vrot.lane.b32.xlu0 %v7868_v11, %s7074_s25  ;;  %v2458_v5 = vld [vmem:[#allocation3 + $0x91] sm:$0xff] }
 0x177   : > { %2050 = vmatpush1.bf16.msra.mxu1 %v6814_v8  ;;  %v6419_v8 = vpack.i.bf16 %v7924_v25, %v2407_v9 }
 0x178   : > { %6380 = vrot.lane.b32.xlu1 %v7881_v27, %s9809_s16  ;;  %2092 = vmatprep.subr.bf16.mxu1 %v6819_v22  ;;  %v6938_v22 = vld [vmem:[%s9756_s5 + $0xc0] sm:$0xff]  }
 0x179   : > { %6375 = vrot.lane.b32.xlu0 %v6359_v1, %s7074_s25  ;;  %v6825_v1 = vld [vmem:[%s9754_s3 + $0x224] ss:$8 sps:$4 sm:$0xff]   ;;  %5916 = vmatprep.subr.bf16.mxu0 %v6938_v22  ;;  %v2377_v22 = vld [vmem:[#allocation3 + $0x71] sm:$0xff] }
 0x17a   : > { %2052 = vmatmul.mubr.bf16.vlgmr.msra.gmra.mrb[0].mxu1 %v1036_v7  ;;  %v6409_v7 = vpack.i.bf16 %v2407_v9, %v7840_v40  ;;  %v6832_v9 = vld [vmem:[%s9754_s3 + $0x250] ss:$8 sps:$4 sm:$0xff]  }
 0x17b   : > { %2061 = vmatprep.mubr.bf16.mxu1 %v1046_v20  ;;  %2093 = vmatpush1.bf16.msra.mxu1 %v6817_v51  ;;  %v6424_v51 = vpack.i.bf16 %v2416_v13, %v2375_v0  ;;  %v992_v20 = vld [vmem:[#allocation2 + $0x80] sm:$0xff]  ;;  %v6834_v0 = vld [vmem:[%s9754_s3 + $0x254] ss:$8 sps:$4 sm:$0xff]  }
 0x17c   : > { %6385 = vrot.lane.b32.xlu1 %v7903_v44, %s9809_s16  ;;  %2094 = vmatprep.subr.bf16.mxu1 %v6822_v49  ;;  %v7952_v49 = vld [vmem:[#allocation2 + $0x42] sm:$0xff]  ;;  %v1064_v40 = vpack.c.bf16 %v992_v20, %v7757_v16  ;;  %v7974_v16 = vld [vmem:[#allocation2 + $0x72] sm:$0xff] }
 0x17d   : > { %6400 = vrot.lane.b32.xlu0 %v7901_v39, %s9809_s16  ;;  %v6840_v20 = vld [vmem:[%s9754_s3 + $0x274] ss:$8 sps:$4 sm:$0xff]  }
 0x17f   : > { %2095 = vmatpush1.bf16.msra.mxu1 %v6820_v24  ;;  %v6829_v24 = vld [vmem:[%s9754_s3 + $0x240] ss:$8 sps:$4 sm:$0xff]  }
 0x180   : > { %6390 = vrot.lane.b32.xlu1 %v7917_v2, %s9810_s24  ;;  %2096 = vmatprep.subr.bf16.mxu1 %v6825_v1  ;;  %v2424_v1 = vld [vmem:[#allocation3 + $0x62] sm:$0xff] }
 0x181   : > { %6405 = vrot.lane.b32.xlu0 %v6404_v42, %s9810_s24  ;;  %v1054_v42 = vpack.c.bf16 %v7943_v62, %v7952_v49 }
 0x182   : > { %2062 = vmatmul.mubr.bf16.gmra.mrb[4].mxu1 %v1045_v10  ;;  %v2440_v10 = vld [vmem:[#allocation3 + $0x64] sm:$0xff] }
 0x183   : > { %2071 = vmatprep.mubr.bf16.mxu1 %v1055_v23  ;;  %2097 = vmatpush1.bf16.msra.mxu1 %v6823_v43  ;;  %v7965_v43 = vpack.i.bf16 %v2424_v1, %v2383_v28  ;;  %v6837_v28 = vld [vmem:[%s9754_s3 + $0x264] ss:$8 sps:$4 sm:$0xff]   ;;  %v7979_v23 = vpack.i.bf16 %v2440_v10, %v2478_v41  ;;  %v1039_v41 = vpack.c.bf16 %v7922_v47, %v7876_v54  ;;  %v8009_v54 = vld [vmem:[#allocation3 + $0x74] sm:$0xff] }
 0x184   : > { %6395 = vrot.lane.b32.xlu1 %v7901_v39, %s7074_s25  ;;  %2098 = vmatprep.subr.bf16.mxu1 %v6828_v58  ;;  %v6835_v58 = vld [vmem:[%s9754_s3 + $0x260] ss:$8 sps:$4 sm:$0xff]   ;;  %v2385_v47 = vld [vmem:[#allocation3 + $0x72] sm:$0xff] }
 0x185   : > { %6420 = vrot.lane.b32.xlu0 %v6419_v8, %s9809_s16 }
 0x187   : > { %2099 = vmatpush1.bf16.msra.mxu1 %v6826_v55  ;;  %v7984_v55 = vld [vmem:[#allocation2 + $0x62] sm:$0xff] }
 0x188   : > { %6410 = vrot.lane.b32.xlu1 %v6409_v7, %s9810_s24  ;;  %2100 = vmatprep.subr.bf16.mxu1 %v6831_v12  ;;  %v7986_v12 = vld [vmem:[#allocation3 + $0x73] sm:$0xff]  ;;  %v7995_v7 = vld [vmem:[#allocation3 + $0x63] sm:$0xff] }
 0x189   : > { %6425 = vrot.lane.b32.xlu0 %v6424_v51, %s9810_s24  ;;  %v1063_v51 = vpack.c.bf16 %v7974_v16, %v7984_v55 }
 0x18a   : > { %2072 = vmatmul.mubr.bf16.gmra.mrb[8].mxu1 %v1054_v42  ;;  %v6838_v42 = vld [vmem:[%s9754_s3 + $0x270] ss:$8 sps:$4 sm:$0xff]  }
 0x18b   : > { %2081 = vmatprep.mubr.bf16.mxu1 %v1064_v40  ;;  %2101 = vmatpush1.bf16.msra.mxu1 %v6829_v24  ;;  %v8004_v24 = vpack.i.bf16 %v2377_v22, %v2416_v13  ;;  %v6843_v13 = vld [vmem:[%s9754_s3 + $0x284] ss:$8 sps:$4 sm:$0xff]   ;;  %v6464_v40 = vpack.i.bf16 %v8009_v54, %v2440_v10  ;;  %v6846_v10 = vld [vmem:[%s9754_s3 + $0x294] ss:$8 sps:$4 sm:$0xff]  }
 0x18c   : > { %6415 = vrot.lane.b32.xlu1 %v7903_v44, %s7074_s25  ;;  %2102 = vmatprep.subr.bf16.mxu1 %v6834_v0  ;;  %v8019_v0 = vpack.i.bf16 %v2385_v47, %v2424_v1 }
 0x18d   : > { %6430 = vrot.lane.b32.xlu0 %v7965_v43, %s7074_s25 }
 0x18f   : > { %2103 = vmatpush1.bf16.msra.mxu1 %v6832_v9  ;;  %v6841_v9 = vld [vmem:[%s9754_s3 + $0x280] ss:$8 sps:$4 sm:$0xff]  }
 0x190   : > { %6440 = vrot.lane.b32.xlu1 %v7979_v23, %s9809_s16  ;;  %2104 = vmatprep.subr.bf16.mxu1 %v6837_v28  ;;  %v2409_v28 = vld [vmem:[#allocation3 + $0x70] sm:$0xff] }
 0x191   : > { %6435 = vrot.lane.b32.xlu0 %v6419_v8, %s7074_s25  ;;  %v8002_v8 = vpack.i.bf16 %v7986_v12, %v7995_v7 }
 0x192   : > { %2082 = vmatmul.mubr.bf16.gmra.mrb[12].mxu1 %v1063_v51  ;;  %v6844_v51 = vld [vmem:[%s9754_s3 + $0x290] ss:$8 sps:$4 sm:$0xff]  }
 0x193   : > { %2105 = vmatpush1.bf16.msra.mxu1 %v6835_v58  ;;  %2124 = vmatprep.mubr.bf16.mxu1 %v1039_v41  ;;  %v8024_v58 = vld [vmem:[#allocation3 + $0x80] sm:$0xff] }
 0x194   : > { %6445 = vrot.lane.b32.xlu1 %v8004_v24, %s9809_s16  ;;  %2106 = vmatprep.subr.bf16.mxu1 %v6840_v20  ;;  %v6479_v1 = vpack.i.bf16 %v8024_v58, %v2409_v28  ;;  %v8036_v41 = vld [vmem:[#allocation3 + $0x81] sm:$0xff] }
 0x195   : > { %6460 = vrot.lane.b32.xlu0 %v8002_v8, %s9809_s16  ;;  %v6849_v20 = vld [vmem:[%s9754_s3 + $0x2a4] ss:$8 sps:$4 sm:$0xff]   ;;  %v8175_v34 = vpack.i.bf16 %v2458_v5, %v8036_v41 }
 0x197   : > { %2107 = vmatpush1.bf16.msra.mxu1 %v6838_v42  ;;  %v6484_v42 = vpack.i.bf16 %v8036_v41, %v2377_v22 }
 0x198   : > { %6450 = vrot.lane.b32.xlu1 %v8019_v0, %s9810_s24  ;;  %2108 = vmatprep.subr.bf16.mxu1 %v6843_v13  ;;  %v6469_v13 = vpack.i.bf16 %v2409_v28, %v7924_v25  ;;  %v6850_v25 = vld [vmem:[%s9754_s3 + $0x2b0] ss:$8 sps:$4 sm:$0xff]   ;;  %v6855_v28 = vld [vmem:[%s9754_s3 + $0x2c4] ss:$8 sps:$4 sm:$0xff]  }
 0x199   : > { %6465 = vrot.lane.b32.xlu0 %v6464_v40, %s9810_s24  ;;  %v6847_v40 = vld [vmem:[%s9754_s3 + $0x2a0] ss:$8 sps:$4 sm:$0xff]  }
 0x19b   : > { %2109 = vmatpush1.bf16.msra.mxu1 %v6841_v9  ;;  %v8049_v9 = vld [vmem:[#allocation3 + $0x82] sm:$0xff] }
 0x19c   : > { %6455 = vrot.lane.b32.xlu1 %v8002_v8, %s7074_s25  ;;  %2110 = vmatprep.subr.bf16.mxu1 %v6846_v10  ;;  %v6852_v10 = vld [vmem:[%s9754_s3 + $0x2b4] ss:$8 sps:$4 sm:$0xff]   ;;  %v8057_v22 = vpack.i.bf16 %v8049_v9, %v2385_v47  ;;  %v6853_v47 = vld [vmem:[%s9754_s3 + $0x2c0] ss:$8 sps:$4 sm:$0xff]  }
 0x19d   : > { %6480 = vrot.lane.b32.xlu0 %v6479_v1, %s9809_s16 }
 0x19f   : > { %2111 = vmatpush1.bf16.msra.mxu1 %v6844_v51  ;;  %v6858_v51 = vld [vmem:[%s9754_s3 + $0x2d4] ss:$8 sps:$4 sm:$0xff]  }
 0x1a0   : > { %6470 = vrot.lane.b32.xlu1 %v6469_v13, %s9810_s24  ;;  %2112 = vmatprep.subr.bf16.mxu1 %v6849_v20  ;;  %v6509_v20 = vpack.i.bf16 %v7894_v38, %v7817_v46  ;;  %v6859_v46 = vld [vmem:[%s9754_s3 + $0x2e0] ss:$8 sps:$4 sm:$0xff]   ;;  %v6864_v38 = vld [vmem:[%s9754_s3 + $0x2f4] ss:$8 sps:$4 sm:$0xff]  }
 0x1a1   : > { %6485 = vrot.lane.b32.xlu0 %v6484_v42, %s9810_s24  ;;  %v6856_v42 = vld [vmem:[%s9754_s3 + $0x2d0] ss:$8 sps:$4 sm:$0xff]   ;;  %v4171_v13 = vld [vmem:[#allocation4] sm:$0xfe] }
 0x1a3   : > { %2113 = vmatpush1.bf16.msra.mxu1 %v6847_v40  ;;  %v6868_v40 = vld [vmem:[%s9754_s3 + $0x304] ss:$8 sps:$4 sm:$0xff]  }
 0x1a4   : > { %6475 = vrot.lane.b32.xlu1 %v8004_v24, %s7074_s25  ;;  %2114 = vmatprep.subr.bf16.mxu1 %v6852_v10 }
 0x1a5   : > { %6490 = vrot.lane.b32.xlu0 %v8057_v22, %s7074_s25 }
 0x1a7   : > { %2115 = vmatpush1.bf16.msra.mxu1 %v6850_v25  ;;  %v993_v25 = vld [vmem:[#allocation2 + $0x11] sm:$0xff] }
 0x1a8   : > { %6500 = vrot.lane.b32.xlu1 %v7868_v11, %s9809_s16  ;;  %2116 = vmatprep.subr.bf16.mxu1 %v6855_v28  ;;  %v6861_v11 = vld [vmem:[%s9754_s3 + $0x2e4] ss:$8 sps:$4 sm:$0xff]   ;;  %v8121_v28 = vld [vmem:[#allocation3 + $0x93] sm:$0xff] }
 0x1a9   : > { %6495 = vrot.lane.b32.xlu0 %v7903_v44, %s9809_s16  ;;  %v6862_v44 = vld [vmem:[%s9754_s3 + $0x2f0] ss:$8 sps:$4 sm:$0xff]  }
 0x1ab   : > { %2117 = vmatpush1.bf16.msra.mxu1 %v6853_v47  ;;  %v4172_v47 = vld [vmem:[#allocation4 + $0x8] sm:$0xfe] }
 0x1ac   : > { %6510 = vrot.lane.b32.xlu1 %v6509_v20, %s9810_s24  ;;  %2118 = vmatprep.subr.bf16.mxu1 %v6858_v51  ;;  %v4174_v51 = vld [vmem:[#allocation4 + $0x18] sm:$0x1]  ;;  %v4236_v20 = vrot.slane %v4171_v13, 1  ;;  %v4175_v13 = vld [vmem:[#allocation4 + $0x20] sm:$0xfe] }
 0x1ad   : > { %6505 = vrot.lane.b32.xlu0 %v7917_v2, %s9810_s24  ;;  %v8103_v2 = vld [vmem:[#allocation3 + $0x84] sm:$0xff] }
 0x1ae   : > { %v8116_v10 = vpack.i.bf16 %v8103_v2, %v8009_v54 }
 0x1af   : > { %2119 = vmatpush1.bf16.msra.mxu1 %v6856_v42 }
 0x1b0   : > { %6520 = vrot.lane.b32.xlu1 %v7881_v27, %s7074_s25  ;;  %2120 = vmatprep.subr.bf16.mxu1 %v6861_v11  ;;  %v4173_v27 = vld [vmem:[#allocation4 + $0x10] sm:$0x1]  ;;  %v8129_v11 = vld [vmem:[#allocation4] sm:$0xfc] }
 0x1b1   : > { %6515 = vrot.lane.b32.xlu0 %v7901_v39, %s7074_s25  ;;  %v8109_v39 = vld [vmem:[#allocation2 + $0x21] sm:$0xff]  ;;  %v4237_v42 = vrot.slane %v4173_v27, 1  ;;  %v8138_v27 = vld [vmem:[#allocation4 + $0x10] sm:$0x3] }
 0x1b2   : > { %v1038_v54 = vpack.c.bf16 %v8109_v39, %v993_v25  ;;  %v4382_v36 = vrot.slane %v8138_v27, 2  ;;  %v6876_v27 = vld [vmem:[%s9754_s3 + $0x320] ss:$8 sps:$4 sm:$0xff]  }
 0x1b3   : > { %2121 = vmatpush1.bf16.msra.mxu1 %v6859_v46  ;;  %v1048_v46 = vpack.c.bf16 %v7952_v49, %v7912_v26  ;;  %v8148_v26 = vmax.f32 %v4002_v17, %v7003_v61  ;;  %v4239_v49 = vrot.slane %v4172_v47, 1  ;;  %v8158_v60 = vsel %vm4235_vm2, %v4236_v20, %v4237_v42  ;;  %v6878_v20 = vld [vmem:[%s9754_s3 + $0x324] ss:$8 sps:$4 sm:$0xff]  }
 0x1b4   : > { %6530 = vrot.lane.b32.xlu1 %v7965_v43, %s9809_s16  ;;  %2122 = vmatprep.subr.bf16.mxu1 %v6864_v38  ;;  %v8123_v43 = vld [vmem:[#allocation3 + $0x90] sm:$0xff]  ;;  %v8133_v38 = vld [vmem:[#allocation3 + $0x83] sm:$0xff]  ;;  %v4240_v17 = vrot.slane %v4174_v51, 1  ;;  %v4381_v47 = vrot.slane %v8129_v11, 2 }
 0x1b5   : > { %6525 = vrot.lane.b32.xlu0 %v8004_v24, %s9809_s16  ;;  %v6866_v24 = vld [vmem:[%s9754_s3 + $0x300] ss:$8 sps:$4 sm:$0xff]   ;;  %v8142_v25 = vpack.i.bf16 %v8121_v28, %v8133_v38  ;;  %v4322_v11 = vld [vmem:[#allocation4 + $0x30] sm:$0x3]  ;;  %v4300_v33 = vmax.f32 %v8148_v26, %v8158_v60  ;;  %v1047_v60 = vpack.c.bf16 %v8166_v48, %v8183_v32 }
 0x1b6   : > { %v4142_v51 = vld [vmem:[#allocation4 + $0x28] sm:$0xff]  ;;  %v4320_v42 = vld [vmem:[#allocation4 + $0x20] sm:$0xfc]  ;;  %v8192_v14 = vsel %vm4235_vm2, %v4239_v49, %v4240_v17 }
 0x1b7   : > { %2123 = vmatpush1.bf16.msra.mxu1 %v6862_v44  ;;  %v6873_v44 = vld [vmem:[%s9754_s3 + $0x314] ss:$8 sps:$4 sm:$0xff]   ;;  %v4387_v26 = vrot.slane %v4320_v42, 2  ;;  %v4158_v49 = vmax.f32 %v4005_v21, %v4142_v51 }
 0x1b8   : > { %6540 = vrot.lane.b32.xlu1 %v8116_v10, %s9809_s16  ;;  %2165 = vmatprep.subr.bf16.mxu1 %v6868_v40  ;;  %v6554_v40 = vpack.i.bf16 %v8123_v43, %v8024_v58  ;;  %v4178_v58 = vld [vmem:[#allocation4 + $0x38] sm:$0x1] }
 0x1b9   : > { %6535 = vrot.lane.b32.xlu0 %v6479_v1, %s7074_s25  ;;  %v4177_v1 = vld [vmem:[#allocation4 + $0x30] sm:$0x1] }
 0x1ba   : > { %2125 = vmatmul.mubr.bf16.vlgmr.msra.gmra.mrb[0].mxu1 %v1038_v54  ;;  %v6871_v54 = vld [vmem:[%s9754_s3 + $0x310] ss:$8 sps:$4 sm:$0xff]   ;;  %v4243_v53 = vrot.slane %v4177_v1, 1  ;;  %v4246_v1 = vrot.slane %v4178_v58, 1  ;;  %v4385_v58 = vrot.slane %v4319_v52, 2 }
 0x1bb   : > { %2134 = vmatprep.mubr.bf16.mxu1 %v1048_v46  ;;  %2166 = vmatpush1.bf16.msra.mxu1 %v6866_v24  ;;  %v8164_v24 = vld [vmem:[#allocation4 + $0x20] sm:$0xff]  ;;  %v4242_v46 = vrot.slane %v4175_v13, 1  ;;  %v4245_v13 = vrot.slane %v4176_v63, 1  ;;  %v4323_v63 = vld [vmem:[#allocation4 + $0x38] sm:$0x3] }
 0x1bc   : > { %6555 = vrot.lane.b32.xlu1 %v6554_v40, %s9810_s24  ;;  %2167 = vmatprep.subr.bf16.mxu1 %v6873_v44  ;;  %v6549_v40 = vpack.i.bf16 %v8155_v6, %v8103_v2  ;;  %v8179_v44 = vmax.f32 %v4003_v18, %v7003_v61  ;;  %v2491_v2 = vld [vmem:[#allocation3 + $0xa0] sm:$0xff]  ;;  %v4157_v5 = vmax.f32 %v4004_v19, %v8164_v24  ;;  %v4321_v18 = vld [vmem:[#allocation4 + $0x28] sm:$0xfc]  ;;  %v4384_v61 = vrot.slane %v8150_v57, 2  ;;  %v6883_v57 = vld [vmem:[%s9754_s3 + $0x334] ss:$8 sps:$4 sm:$0xff]  }
 0x1bd   : > { %6545 = vrot.lane.b32.xlu0 %v8142_v25, %s9809_s16  ;;  %v4244_v41 = vsel %vm4235_vm2, %v4242_v46, %v4243_v53  ;;  %v1057_v19 = vpack.c.bf16 %v7984_v55, %v7943_v62  ;;  %v6559_v17 = vpack.i.bf16 %v2491_v2, %v8123_v43  ;;  %v6574_v53 = vpack.i.bf16 %v7995_v7, %v7886_v37  ;;  %v8211_v46 = vpop.permute.xlu1 %6295  ;;  %v4493_v52 = vld [vmem:[#allocation4 + $0x20] sm:$0xfc]  ;;  %v4495_v43 = vld [vmem:[#allocation4 + $0x30] sm:$0x3] }
 0x1be   : > { %v4383_v62 = vsel %vm4380_vm3, %v4381_v47, %v4382_v36  ;;  %v4390_v55 = vrot.slane %v4321_v18, 2  ;;  %v4391_v42 = vrot.slane %v4323_v63, 2  ;;  %v4302_v21 = vmax.f32 %v4157_v5, %v4244_v41  ;;  %v8221_v7 = vld [vmem:[#allocation2 + $0x61] sm:$0xff] }
 0x1bf   : > { %2168 = vmatpush1.bf16.msra.mxu1 %v6871_v54  ;;  %v4388_v54 = vrot.slane %v4322_v11, 2  ;;  %v6888_v36 = vld [vmem:[%s9754_s3 + $0x344] ss:$8 sps:$4 sm:$0xff]   ;;  %v4301_v47 = vmax.f32 %v8179_v44, %v8192_v14  ;;  %v8228_v11 = vmax.f32 %v4300_v33, %v4383_v62  ;;  %v4557_v18 = vrot.slane %v4493_v52, 2  ;;  %v6886_v44 = vld [vmem:[%s9754_s3 + $0x340] ss:$8 sps:$4 sm:$0xff]  }
 0x1c0   : > { %6570 = vrot.lane.b32.xlu1 %v8175_v34, %s7074_s25  ;;  %2169 = vmatprep.subr.bf16.mxu1 %v6878_v20  ;;  %v4247_v20 = vsel %vm4235_vm2, %v4245_v13, %v4246_v1  ;;  %v4499_v13 = vld [vmem:[#allocation4 + $0x50] sm:$0x3]  ;;  %v1008_v1 = vld [vmem:[#allocation2 + $0x82] sm:$0xff]  ;;  %v4392_v2 = vsel %vm4380_vm3, %v4390_v55, %v4391_v42  ;;  %v4558_v63 = vrot.slane %v4495_v43, 2  ;;  %v9817_v52 = vunpack.c.h.bf16 %v7269_v29 }
 0x1c1   : > { %6550 = vrot.lane.b32.xlu0 %v6549_v40, %s9810_s24  ;;  %v4389_v37 = vsel %vm4380_vm3, %v4387_v26, %v4388_v54  ;;  %v4303_v51 = vmax.f32 %v4158_v49, %v4247_v20  ;;  %v4497_v40 = vld [vmem:[#allocation4 + $0x40] sm:$0xfc]  ;;  %v4144_v14 = vld [vmem:[#allocation4 + $0x48] sm:$0xff]  ;;  %v6291_v54 = vpop.permute.xlu0 %6290  ;;  %v4564_v49 = vrot.slane %v4499_v13, 2  ;;  %v4477_v62 = vmax.f32 %v8228_v11, %v8164_v24 }
 0x1c2   : > { %2135 = vmatmul.mubr.bf16.gmra.mrb[4].mxu1 %v1047_v60  ;;  %v8232_v5 = vld [vmem:[#allocation4 + $0x40] sm:$0xff]  ;;  %v8234_v60 = vld [vmem:[#allocation2 + $0x51] sm:$0xff]  ;;  %v8239_v33 = vmax.f32 %v4302_v21, %v4389_v37  ;;  %v8266_v42 = vld [vmem:[#allocation4 + $0x48] sm:$0xfe]  ;;  %v4559_v21 = vsel %vm4380_vm3, %v4557_v18, %v4558_v63  ;;  %v8275_v43 = vmax.f32 %v9817_v52, %v4144_v14  ;;  %v6293_v37 = vunpack.i.h.bf16 %v6291_v54 }
 0x1c3   : > { %2144 = vmatprep.mubr.bf16.mxu1 %v1057_v19  ;;  %2170 = vmatpush1.bf16.msra.mxu1 %v6876_v27  ;;  %v4386_v27 = vsel %vm4380_vm3, %v4384_v61, %v4385_v58  ;;  %v4145_v41 = vld [vmem:[#allocation4 + $0x60] sm:$0xff]  ;;  %v8247_v61 = vpop.permute.xlu1 %6300  ;;  %v1056_v19 = vpack.c.bf16 %v8221_v7, %v8234_v60  ;;  %v1066_v58 = vpack.c.bf16 %v1008_v1, %v7974_v16  ;;  %v8268_v16 = vld [vmem:[#allocation4 + $0x50] sm:$0x1]  ;;  %v6298_v14 = vunpack.i.h.bf16 %v8211_v46 }
 0x1c4   : > { %6575 = vrot.lane.b32.xlu1 %v6574_v53, %s9810_s24  ;;  %2171 = vmatprep.subr.bf16.mxu1 %v6883_v57  ;;  %v8241_v26 = vld [vmem:[#allocation4 + $0x40] sm:$0xfe]  ;;  %v4563_v57 = vrot.slane %v4497_v40, 2  ;;  %v8255_v20 = vmax.f32 %v4301_v47, %v4386_v27  ;;  %v8264_v55 = vmax.f32 %v4006_v31, %v8232_v5  ;;  %v6892_v31 = vld [vmem:[%s9754_s3 + $0x350] ss:$8 sps:$4 sm:$0xff]  }
 0x1c5   : > { %6560 = vrot.lane.b32.xlu0 %v6559_v17, %s7074_s25  ;;  %v6894_v17 = vld [vmem:[%s9754_s3 + $0x354] ss:$8 sps:$4 sm:$0xff]   ;;  %v2539_v53 = vld [vmem:[#allocation3 + $0xa1] sm:$0xff]  ;;  %v8316_v47 = vld [vmem:[#allocation4 + $0x70] sm:$0x1] }
 0x1c6   : > { %9816 = vst [vmem:[#allocation11_spill] sm:$0xff] %v8264_v55  ;;  %v2362_v29 = vld [vmem:[#allocation3] sm:$0xff]  ;;  %v8292_v27 = vsel %vm4380_vm3, %v4563_v57, %v4564_v49  ;;  %v6594_v49 = vpack.i.bf16 %v8133_v38, %v7986_v12  ;;  %v1041_v38 = vpack.c.bf16 %v8183_v32, %v8109_v39 }
 0x1c7   : > { %2172 = vmatpush1.bf16.msra.mxu1 %v6881_v15  ;;  %v8270_v15 = vld [vmem:[#allocation4 + $0x58] sm:$0x1] }
 0x1c8   : > { %6585 = vrot.lane.b32.xlu1 %v7979_v23, %s7074_s25  ;;  %2173 = vmatprep.subr.bf16.mxu1 %v6888_v36  ;;  %v8257_v23 = vmax.f32 %v4303_v51, %v4392_v2  ;;  %v6292_v36 = vunpack.i.l.bf16 %v6291_v54  ;;  %v9818_v51 = vunpack.c.l.bf16 %v7272_v30  ;;  %v4249_v2 = vrot.slane %v8268_v16, 1  ;;  %v2394_v54 = vld [vmem:[#allocation3 + $0x4] sm:$0xff] }
 0x1c9   : > { %6565 = vrot.lane.b32.xlu0 %v8019_v0, %s9810_s24  ;;  %v2540_v0 = vld [vmem:[#allocation3 + $0xb1] sm:$0xff]  ;;  %v6939_v16 = vld [vmem:[%s9756_s5 + $0x80] sm:$0xff]  }
 0x1ca   : > { %2145 = vmatmul.mubr.bf16.gmra.mrb[8].mxu1 %v1056_v19  ;;  %v8284_v40 = vmax.f32 %v9818_v51, %v4145_v41  ;;  %v6604_v1 = vpack.i.bf16 %v2540_v0, %v2539_v53  ;;  %v2395_v19 = vld [vmem:[#allocation3 + $0x14] sm:$0xff]  ;;  %v2949_v53 = vsel %vm2327_vm0, %v2362_v29, %v6292_v36  ;;  %v6302_v29 = vunpack.i.l.bf16 %v8247_v61 }
 0x1cb   : > { %2154 = vmatprep.mubr.bf16.mxu1 %v1066_v58  ;;  %2174 = vmatpush1.bf16.msra.mxu1 %v6886_v44  ;;  %v8297_v44 = vld [vmem:[#allocation2 + $0x81] sm:$0xff]  ;;  %v8311_v51 = vld [vmem:[#allocation2 + $0x71] sm:$0xff] }
 0x1cc   : > { %9819 = vst [vmem:[#allocation12_spill] sm:$0xff] %v8284_v40  ;;  %6590 = vrot.lane.b32.xlu1 %v8057_v22, %s9809_s16  ;;  %2175 = vmatprep.subr.bf16.mxu1 %v6894_v17  ;;  %v6297_v22 = vunpack.i.l.bf16 %v8211_v46  ;;  %v8306_v58 = vld [vmem:[#allocation4 + $0x60] sm:$0xfe]  ;;  %v2950_v17 = vsel %vm2327_vm0, %v7791_v4, %v6293_v37  ;;  %v1065_v4 = vpack.c.bf16 %v8297_v44, %v8311_v51  ;;  %v4184_v37 = vld [vmem:[#allocation4 + $0x68] sm:$0xfe] }
 0x1cd   : > { %6580 = vrot.lane.b32.xlu0 %v8002_v8, %s7074_s25  ;;  %v6899_v8 = vld [vmem:[%s9754_s3 + $0x364] ss:$8 sps:$4 sm:$0xff]   ;;  %v6897_v46 = vld [vmem:[%s9754_s3 + $0x360] ss:$8 sps:$4 sm:$0xff]   ;;  %v4186_v36 = vld [vmem:[#allocation4 + $0x78] sm:$0x1]  ;;  %v2959_v32 = vsel %vm2957_vm4, %v2950_v17, %v6298_v14 }
 0x1ce   : > { %v6311_v41 = vpop.permute.xlu1 %6310  ;;  %v4254_v63 = vrot.slane %v8306_v58, 1  ;;  %v2958_v39 = vsel %vm2957_vm4, %v2949_v53, %v6297_v22  ;;  %v6902_v14 = vld [vmem:[%s9754_s3 + $0x370] ss:$8 sps:$4 sm:$0xff]   ;;  %v4257_v17 = vrot.slane %v4184_v37, 1  ;;  %v4258_v53 = vrot.slane %v4186_v36, 1  ;;  %v4147_v37 = vld [vmem:[#allocation4 + $0x80] sm:$0xff] }
 0x1cf   : > { %v6306_v57 = vpop.permute.xlu0 %6305  ;;  %2176 = vmatpush1.bf16.msra.mxu1 %v6892_v31  ;;  %v6313_v18 = vunpack.i.h.bf16 %v6311_v41  ;;  %v6312_v12 = vunpack.i.l.bf16 %v6311_v41  ;;  %v6303_v31 = vunpack.i.h.bf16 %v8247_v61  ;;  %v2546_v22 = vld [vmem:[#allocation3 + $0x92] sm:$0xff]  ;;  %v8369_v36 = vld [vmem:[#allocation4 + $0xb0] sm:$0x1] }
 0x1d0   : > { %v6308_v0 = vunpack.i.h.bf16 %v6306_v57  ;;  %v6307_v52 = vunpack.i.l.bf16 %v6306_v57  ;;  %6595 = vrot.lane.b32.xlu1 %v6594_v49, %s9810_s24  ;;  %2177 = vmatprep.subr.bf16.mxu1 %v6899_v8  ;;  %v4146_v49 = vld [vmem:[#allocation4 + $0x68] sm:$0xff]  ;;  %v8339_v8 = vmax.f32 %v4477_v62, %v4559_v21 }
 0x1d1   : > { %6605 = vrot.lane.b32.xlu0 %v6604_v1, %s9809_s16  ;;  %v6904_v1 = vld [vmem:[%s9754_s3 + $0x374] ss:$8 sps:$4 sm:$0xff]   ;;  %v8353_v62 = vld [vmem:[#allocation3 + $0xa2] sm:$0xff] }
 0x1d2   : > { %v2976_v57 = vsel %vm2327_vm0, %v2395_v19, %v6308_v0  ;;  %v2975_v41 = vsel %vm2327_vm0, %v2394_v54, %v6307_v52  ;;  %v8334_v13 = vpop.permute.xlu1 %6320  ;;  %2155 = vmatmul.mubr.bf16.gmra.mrb[12].mxu1 %v1065_v4  ;;  %v4255_v54 = vrot.slane %v8316_v47, 1  ;;  %v8342_v19 = vld [vmem:[#allocation4 + $0x80] sm:$0xfe]  ;;  %v4189_v52 = vld [vmem:[#allocation4 + $0x90] sm:$0x1]  ;;  %v2968_v4 = vsel %vm2966_vm5, %v2959_v32, %v6303_v31 }
 0x1d3   : > { %v6316_v61 = vpop.permute.xlu0 %6315  ;;  %2178 = vmatpush1.bf16.msra.mxu1 %v6897_v46  ;;  %2197 = vmatprep.mubr.bf16.mxu1 %v1041_v38  ;;  %v2983_v24 = vsel %vm2957_vm4, %v2975_v41, %v6312_v12  ;;  %v2984_v11 = vsel %vm2957_vm4, %v2976_v57, %v6313_v18  ;;  %v8355_v21 = vld [vmem:[#allocation4 + $0x88] sm:$0xfe]  ;;  %v8357_v47 = vld [vmem:[#allocation4 + $0x98] sm:$0x1]  ;;  %v8359_v46 = vld [vmem:[#allocation4 + $0xa0] sm:$0xfe]  ;;  %v2967_v38 = vsel %vm2966_vm5, %v2958_v39, %v6302_v29  ;;  %v9820_v12 = vunpack.c.h.bf16 %v7272_v30 }
 0x1d4   : > { %v6318_v0 = vunpack.i.h.bf16 %v6316_v61  ;;  %v6317_v58 = vunpack.i.l.bf16 %v6316_v61  ;;  %6600 = vrot.lane.b32.xlu1 %v8116_v10, %s7074_s25  ;;  %2179 = vmatprep.subr.bf16.mxu1 %v6904_v1  ;;  %v4260_v57 = vrot.slane %v8342_v19, 1  ;;  %v6614_v31 = vpack.i.bf16 %v2546_v22, %v8049_v9  ;;  %v6907_v1 = vld [vmem:[%s9754_s3 + $0x384] ss:$8 sps:$4 sm:$0xff]  }
 0x1d5   : > { %6610 = vrot.lane.b32.xlu0 %v8175_v34, %s9809_s16  ;;  %v8367_v18 = vmax.f32 %v9820_v12, %v4146_v49  ;;  %v9821_v30 = vrot.slane %v8241_v26, 1  ;;  %v9823_v32 = vrot.slane %v8270_v15, 1  ;;  %v9824_v39 = vrot.slane %v8266_v42, 1  ;;  %v8394_v9 = vld [vmem:[#allocation4 + $0xa8] sm:$0xfe] }
 0x1d6   : > { %v2991_v34 = vsel %vm2966_vm5, %v2983_v24, %v6317_v58  ;;  %v2992_v10 = vsel %vm2966_vm5, %v2984_v11, %v6318_v0  ;;  %v8374_v61 = vpop.permute.xlu1 %6325  ;;  %v4261_v0 = vrot.slane %v4189_v52, 1  ;;  %v6634_v58 = vpack.i.bf16 %v8353_v62, %v2546_v22  ;;  %v6905_v26 = vld [vmem:[%s9754_s3 + $0x380] ss:$8 sps:$4 sm:$0xff]   ;;  %v8409_v24 = vld [vmem:[#allocation4 + $0xb8] sm:$0x1] }
 0x1d7   : > { %v8372_v41 = vpop.permute.xlu0 %6340  ;;  %v3288_v29 = vpack.c.bf16 %v2992_v10, %v2991_v34  ;;  %v8385_v49 = vsel %vm4235_vm2, %v9821_v30, %v4249_v2  ;;  %v8392_v19 = vsel %vm4235_vm2, %v9824_v39, %v9823_v32  ;;  %2180 = vmatpush1.bf16.msra.mxu1 %v6902_v14  ;;  %v8404_v15 = vsel %vm4235_vm2, %v4254_v63, %v4255_v54  ;;  %v4148_v2 = vld [vmem:[#allocation4 + $0x88] sm:$0xff]  ;;  %v6910_v52 = vld [vmem:[%s9754_s3 + $0x394] ss:$8 sps:$4 sm:$0xff]   ;;  %v4149_v11 = vld [vmem:[#allocation4 + $0xa0] sm:$0xff] }
 0x1d8   : > { %9822 = vst [vmem:[#allocation13_spill] sm:$0xff] %v8385_v49  ;;  %9825 = vst [vmem:[#allocation14_spill] sm:$0xff] %v8404_v15  ;;  %v8407_v42 = vsel %vm4235_vm2, %v4257_v17, %v4258_v53  ;;  %v3287_v14 = vpack.c.bf16 %v2968_v4, %v2967_v38  ;;  %v8412_v22 = vld [vmem:[#allocation3 + $0xa3] sm:$0xff]  ;;  %v4263_v63 = vrot.slane %v8355_v21, 1  ;;  %v4264_v54 = vrot.slane %v8357_v47, 1  ;;  %6635 = vrot.lane.b32.xlu1 %v6634_v58, %s9809_s16  ;;  %v2548_v4 = vld [vmem:[#allocation3 + $0xb2] sm:$0xff] }
 0x1d9   : > { %6615 = vrot.lane.b32.xlu0 %v6614_v31, %s9810_s24  ;;  %3766 = vmatprep.mubr.bf16.mxu0 %v3288_v29  ;;  %v4266_v17 = vrot.slane %v8359_v46, 1  ;;  %v4267_v53 = vrot.slane %v8369_v36, 1  ;;  %v9826_v38 = vmax.f32 %v8239_v33, %v8232_v5  ;;  %v4150_v12 = vld [vmem:[#allocation4 + $0xa8] sm:$0xff]  ;;  %v9827_v21 = vunpack.c.l.bf16 %v7279_v35  ;;  %v8435_v36 = vld [vmem:[#allocation4 + $0xc0] sm:$0xfe]  ;;  %s9924_s16 = smov 64  }
 0x1da   : > { %v4269_v46 = vrot.slane %v8394_v9, 1  ;;  %v8437_v31 = vld [vmem:[#allocation4 + $0xd0] sm:$0x1]  ;;  %3767 = vmatmul.mubr.bf16.vlgmr.msra.gmra.mrb[32].mxu0 %v3287_v14  ;;  %v8441_v5 = vpop.permute.xlu1 %6330  ;;  %2181 = vmatprep.subr.bf16.mxu1 %v6907_v1  ;;  %v6943_v33 = vld [vmem:[%s9756_s5 + $0xc8] sm:$0xff]   ;;  %v4270_v30 = vrot.slane %v8409_v24, 1  ;;  %v4151_v32 = vld [vmem:[#allocation4 + $0xc0] sm:$0xff]  ;;  %v6639_v9 = vpack.i.bf16 %v8412_v22, %v8121_v28  ;;  %v6624_v28 = vpack.i.bf16 %v2548_v4, %v8353_v62 }
 0x1db   : > { %v8426_v34 = vmax.f32 %v9826_v38, %v8292_v27  ;;  %v8432_v47 = vmax.f32 %v9827_v21, %v4147_v37  ;;  %v8439_v29 = vpop.permute.xlu0 %6345  ;;  %v8449_v37 = vsel %vm4235_vm2, %v4260_v57, %v4261_v0  ;;  %v8452_v39 = vld [vmem:[#allocation4 + $0xc8] sm:$0xfe]  ;;  %2182 = vmatpush1.bf16.msra.mxu1 %v6905_v26  ;;  %v6908_v1 = vld [vmem:[%s9754_s3 + $0x390] ss:$8 sps:$4 sm:$0xff]   ;;  %5917 = vmatpush3.bf16.msra.mxu0 %v6939_v16  ;;  %v9830_v14 = vunpack.c.h.bf16 %v7279_v35  ;;  %v8480_v0 = vld [vmem:[#allocation4 + $0xe0] sm:$0xfe] }
 0x1dc   : > { %9829 = vst [vmem:[#allocation16_spill] sm:$0xff] %v8449_v37  ;;  %v6944_v58 = vld [vmem:[%s9756_s5 + $0x88] sm:$0xff]   ;;  %v4198_v24 = vld [vmem:[#allocation4 + $0xd8] sm:$0x1]  ;;  %2183 = vmatprep.subr.bf16.mxu1 %v6910_v52  ;;  %v9832_v21 = vunpack.c.l.bf16 %v7315_v50  ;;  %v4273_v62 = vrot.slane %v8437_v31, 1  ;;  %6640 = vrot.lane.b32.xlu1 %v6639_v9, %s9810_s24  ;;  %v8486_v4 = vsel %vm4235_vm2, %v4263_v63, %v4264_v54  ;;  %v8489_v35 = vsel %vm4235_vm2, %v4266_v17, %v4267_v53  ;;  %v6948_v63 = vld [vmem:[%s9756_s5 + $0xd0] sm:$0xff]  }
 0x1dd   : > { %9828 = vst [vmem:[#allocation15_spill] sm:$0xff] %v8432_v47  ;;  %6620 = vrot.lane.b32.xlu0 %v8142_v25, %s7074_s25  ;;  %v2523_v26 = vld [vmem:[#allocation3 + $0xa4] sm:$0xff]  ;;  %v8474_v38 = vmax.f32 %v9830_v14, %v4148_v2  ;;  %v4272_v25 = vrot.slane %v8435_v36, 1  ;;  %v2556_v52 = vld [vmem:[#allocation3 + $0xb3] sm:$0xff]  ;;  %9834 = vst [vmem:[#allocation19_spill] sm:$0xff] %v8486_v4  ;;  %5918 = vmatprep.subr.bf16.mxu0 %v6943_v33  ;;  %v9836_v54 = vunpack.c.h.bf16 %v7315_v50  ;;  %v4276_v2 = vrot.slane %v4198_v24, 1 }
 0x1de   : > { %v6913_v16 = vld [vmem:[%s9754_s3 + $0x3a4] ss:$8 sps:$4 sm:$0xff]   ;;  %v8478_v57 = vmax.f32 %v9832_v21, %v4149_v11  ;;  %9835 = vst [vmem:[#allocation20_spill] sm:$0xff] %v8489_v35  ;;  %v4201_v14 = vld [vmem:[#allocation4 + $0xf0] sm:$0x1]  ;;  %v4275_v21 = vrot.slane %v8452_v39, 1  ;;  %v8498_v31 = vpop.permute.xlu1 %6335  ;;  %v8508_v53 = vsel %vm4235_vm2, %v4269_v46, %v4270_v30  ;;  %v6644_v39 = vpack.i.bf16 %v2523_v26, %v8155_v6 }
 0x1df   : > { %9831 = vst [vmem:[#allocation17_spill] sm:$0xff] %v8474_v38  ;;  %v4152_v10 = vld [vmem:[#allocation4 + $0xc8] sm:$0xff]  ;;  %v8496_v36 = vpop.permute.xlu0 %6360  ;;  %v8505_v17 = vmax.f32 %v9836_v54, %v4150_v12  ;;  %9838 = vst [vmem:[#allocation22_spill] sm:$0xff] %v8508_v53  ;;  %v4202_v9 = vld [vmem:[#allocation4 + $0xf8] sm:$0x1]  ;;  %2184 = vmatpush1.bf16.msra.mxu1 %v6908_v1  ;;  %5919 = vmatpush3.bf16.msra.mxu0 %v6944_v58  ;;  %v9839_v50 = vunpack.c.l.bf16 %v7335_v59  ;;  %v9841_v46 = vunpack.c.h.bf16 %v7335_v59  ;;  %v4278_v1 = vrot.slane %v8480_v0, 1 }
 0x1e0   : > { %9833 = vst [vmem:[#allocation18_spill] sm:$0xff] %v8478_v57  ;;  %v8493_v11 = vld [vmem:[#allocation4 + $0xe8] sm:$0xfe]  ;;  %v6949_v27 = vld [vmem:[%s9756_s5 + $0x90] sm:$0xff]   ;;  %2185 = vmatprep.subr.bf16.mxu1 %v6913_v16  ;;  %v6629_v6 = vpack.i.bf16 %v2556_v52, %v8412_v22  ;;  %v4153_v24 = vld [vmem:[#allocation4 + $0xe0] sm:$0xff]  ;;  %v4279_v26 = vrot.slane %v4201_v14, 1  ;;  %v6328_v54 = vunpack.i.h.bf16 %v8374_v61  ;;  %v6327_v59 = vunpack.i.l.bf16 %v8374_v61  ;;  %6645 = vrot.lane.b32.xlu1 %v6644_v39, %s7074_s25 }
 0x1e1   : > { %9837 = vst [vmem:[#allocation21_spill] sm:$0xff] %v8505_v17  ;;  %v6911_v33 = vld [vmem:[%s9754_s3 + $0x3a0] ss:$8 sps:$4 sm:$0xff]   ;;  %v8519_v12 = vmax.f32 %v9839_v50, %v4151_v32  ;;  %v8523_v30 = vmax.f32 %v9841_v46, %v4152_v10  ;;  %6625 = vrot.lane.b32.xlu0 %v6624_v28, %s9810_s24  ;;  %v6916_v58 = vld [vmem:[%s9754_s3 + $0x3b4] ss:$8 sps:$4 sm:$0xff]   ;;  %v4281_v32 = vrot.slane %v8493_v11, 1  ;;  %v6333_v28 = vunpack.i.h.bf16 %v8441_v5  ;;  %5920 = vmatprep.subr.bf16.mxu0 %v6948_v63 }
 0x1e2   : > { %v6953_v10 = vld [vmem:[%s9756_s5 + $0xd8] sm:$0xff]   ;;  %v4154_v0 = vld [vmem:[#allocation4 + $0xe8] sm:$0xff]  ;;  %v4282_v22 = vrot.slane %v4202_v9, 1  ;;  %v6332_v16 = vunpack.i.l.bf16 %v8441_v5  ;;  %v6363_v52 = vunpack.i.h.bf16 %v8496_v36  ;;  %v8541_v11 = vpop.permute.xlu1 %6350  ;;  %v8544_v61 = vsel %vm4235_vm2, %v4272_v25, %v4273_v62  ;;  %v2365_v50 = vld [vmem:[#allocation3 + $0x30] sm:$0xff] }
 0x1e3   : > { %9840 = vst [vmem:[#allocation23_spill] sm:$0xff] %v8519_v12  ;;  %9842 = vst [vmem:[#allocation24_spill] sm:$0xff] %v8523_v30  ;;  %v6366_v14 = vpop.permute.xlu0 %6365  ;;  %v8547_v39 = vsel %vm4235_vm2, %v4275_v21, %v4276_v2  ;;  %v6362_v46 = vunpack.i.l.bf16 %v8496_v36  ;;  %v6337_v9 = vunpack.i.l.bf16 %v8498_v31  ;;  %2186 = vmatpush1.bf16.msra.mxu1 %v6911_v33  ;;  %v6914_v5 = vld [vmem:[%s9754_s3 + $0x3b0] ss:$8 sps:$4 sm:$0xff]   ;;  %5921 = vmatpush3.bf16.msra.mxu0 %v6949_v27  ;;  %v9845_v25 = vunpack.c.l.bf16 %v7354_v3  ;;  %v2364_v2 = vld [vmem:[#allocation3 + $0x20] sm:$0xff] }
 0x1e4   : > { %9843 = vst [vmem:[#allocation25_spill] sm:$0xff] %v8544_v61  ;;  %9844 = vst [vmem:[#allocation26_spill] sm:$0xff] %v8547_v39  ;;  %v6954_v63 = vld [vmem:[%s9756_s5 + $0x98] sm:$0xff]   ;;  %v6338_v21 = vunpack.i.h.bf16 %v8498_v31  ;;  %v6368_v36 = vunpack.i.h.bf16 %v6366_v14  ;;  %v6367_v45 = vunpack.i.l.bf16 %v6366_v14  ;;  %2187 = vmatprep.subr.bf16.mxu1 %v6916_v58  ;;  %v6919_v27 = vld [vmem:[%s9754_s3 + $0x3c4] ss:$8 sps:$4 sm:$0xff]   ;;  %v2952_v31 = vsel %vm2327_vm0, %v2365_v50, %v6328_v54  ;;  %5922 = vmatprep.subr.bf16.mxu0 %v6953_v10 }
 0x1e5   : > { %v8559_v62 = vmax.f32 %v9845_v25, %v4153_v24  ;;  %6630 = vrot.lane.b32.xlu0 %v6629_v6, %s7074_s25  ;;  %v6958_v33 = vld [vmem:[%s9756_s5 + $0xe0] sm:$0xff]   ;;  %v8571_v24 = vmax.f32 %v9847_v56, %v4154_v0  ;;  %v8574_v25 = vsel %vm4235_vm2, %v4278_v1, %v4279_v26  ;;  %v2951_v6 = vsel %vm2327_vm0, %v2364_v2, %v6327_v59  ;;  %v2397_v58 = vld [vmem:[#allocation3 + $0x34] sm:$0xff]  ;;  %s9925_s25 = smov 32  }
 0x1e6   : > { %9849 = vst [vmem:[#allocation29_spill] sm:$0xff] %v8574_v25  ;;  %v8579_v14 = vsel %vm4235_vm2, %v4281_v32, %v4282_v22  ;;  %v2960_v37 = vsel %vm2957_vm4, %v2951_v6, %v6332_v16  ;;  %v2961_v47 = vsel %vm2957_vm4, %v2952_v31, %v6333_v28  ;;  %v2978_v3 = vsel %vm2327_vm0, %v2397_v58, %v6363_v52  ;;  %v2396_v56 = vld [vmem:[#allocation3 + $0x24] sm:$0xff]  ;;  %v8584_v15 = vpop.permute.xlu1 %6355  ;;  %v6922_v52 = vld [vmem:[%s9754_s3 + $0x3d4] ss:$8 sps:$4 sm:$0xff]  }
 0x1e7   : > { %9846 = vst [vmem:[#allocation27_spill] sm:$0xff] %v8559_v62  ;;  %9848 = vst [vmem:[#allocation28_spill] sm:$0xff] %v8571_v24  ;;  %v6371_v0 = vpop.permute.xlu0 %6370  ;;  %v2977_v1 = vsel %vm2327_vm0, %v2396_v56, %v6362_v46  ;;  %2188 = vmatpush1.bf16.msra.mxu1 %v6914_v5  ;;  %v6917_v32 = vld [vmem:[%s9754_s3 + $0x3c0] ss:$8 sps:$4 sm:$0xff]   ;;  %v2969_v59 = vsel %vm2966_vm5, %v2960_v37, %v6337_v9  ;;  %5923 = vmatpush3.bf16.msra.mxu0 %v6954_v63  ;;  %v8608_v5 = vld [vmem:[#allocation2 + $0x30] sm:$0xff]  ;;  %v6353_v37 = vunpack.i.h.bf16 %v8541_v11 }
 0x1e8   : > { %9850 = vst [vmem:[#allocation30_spill] sm:$0xff] %v8579_v14  ;;  %v6373_v26 = vunpack.i.h.bf16 %v6371_v0  ;;  %v6372_v54 = vunpack.i.l.bf16 %v6371_v0  ;;  %v6959_v10 = vld [vmem:[%s9756_s5 + $0xa0] sm:$0xff]   ;;  %v2985_v22 = vsel %vm2957_vm4, %v2977_v1, %v6367_v45  ;;  %v2986_v28 = vsel %vm2957_vm4, %v2978_v3, %v6368_v36  ;;  %2189 = vmatprep.subr.bf16.mxu1 %v6919_v27  ;;  %5924 = vmatprep.subr.bf16.mxu0 %v6958_v33  ;;  %v8615_v2 = vld [vmem:[#allocation2 + $0x32] sm:$0xff] }
 0x1e9   : > { %v2970_v16 = vsel %vm2966_vm5, %v2961_v47, %v6338_v21  ;;  %v8606_v9 = vld [vmem:[#allocation2 + $0x20] sm:$0xff]  ;;  %v6963_v47 = vld [vmem:[%s9756_s5 + $0xe8] sm:$0xff]   ;;  %v8629_v3 = vld [vmem:[#allocation2 + $0x50] sm:$0xff]  ;;  %v6343_v21 = vunpack.i.h.bf16 %v8372_v41  ;;  %v6342_v27 = vunpack.i.l.bf16 %v8372_v41  ;;  %v6358_v25 = vunpack.i.h.bf16 %v8584_v15 }
 0x1ea   : > { %v2993_v46 = vsel %vm2966_vm5, %v2985_v22, %v6372_v54  ;;  %v2994_v45 = vsel %vm2966_vm5, %v2986_v28, %v6373_v26  ;;  %v8613_v63 = vld [vmem:[#allocation2 + $0x22] sm:$0xff]  ;;  %v8625_v31 = vpop.permute.xlu1 %6380  ;;  %v8631_v56 = vld [vmem:[#allocation2 + $0x52] sm:$0xff]  ;;  %v3294_v26 = vpack.c.bf16 %v2970_v16, %v2969_v59  ;;  %v6357_v62 = vunpack.i.l.bf16 %v8584_v15 }
 0x1eb   : > { %v8623_v33 = vpop.permute.xlu0 %6375  ;;  %v3295_v6 = vpack.c.bf16 %v2994_v45, %v2993_v46  ;;  %v8627_v58 = vld [vmem:[#allocation2 + $0x40] sm:$0xff]  ;;  %2190 = vmatpush1.bf16.msra.mxu1 %v6917_v32  ;;  %v6920_v54 = vld [vmem:[%s9754_s3 + $0x3d0] ss:$8 sps:$4 sm:$0xff]   ;;  %5925 = vmatpush3.bf16.msra.mxu0 %v6959_v10  ;;  %v6964_v22 = vld [vmem:[%s9756_s5 + $0xa8] sm:$0xff]   ;;  %v6352_v10 = vunpack.i.l.bf16 %v8541_v11  ;;  %v6348_v24 = vunpack.i.h.bf16 %v8439_v29  ;;  %v6347_v15 = vunpack.i.l.bf16 %v8439_v29 }
 0x1ec   : > { %v8643_v28 = vld [vmem:[#allocation2 + $0x42] sm:$0xff]  ;;  %2191 = vmatprep.subr.bf16.mxu1 %v6922_v52  ;;  %v8652_v16 = vld [vmem:[#allocation2 + $0x70] sm:$0xff]  ;;  %v6323_v52 = vunpack.i.h.bf16 %v8334_v13  ;;  %5926 = vmatprep.subr.bf16.mxu0 %v6963_v47  ;;  %v6967_v30 = vld [vmem:[%s9756_s5 + $0xf8] sm:$0xff]   ;;  %v6377_v53 = vunpack.i.l.bf16 %v8623_v33 }
 0x1ed   : > { %3774 = vmatprep.mubr.bf16.mxu0 %v3295_v6  ;;  %v6925_v46 = vld [vmem:[%s9754_s3 + $0x3e4] ss:$8 sps:$4 sm:$0xff]   ;;  %v6965_v45 = vld [vmem:[%s9756_s5 + $0xf0] sm:$0xff]   ;;  %v6322_v6 = vunpack.i.l.bf16 %v8334_v13  ;;  %v6923_v11 = vld [vmem:[%s9754_s3 + $0x3e0] ss:$8 sps:$4 sm:$0xff]  }
 0x1ee   : > { %3775 = vmatmul.mubr.bf16.gmra.mrb[36].mxu0 %v3294_v26  ;;  %v8663_v36 = vld [vmem:[#allocation2 + $0x91] sm:$0xff]  ;;  %v8665_v1 = vld [vmem:[#allocation2 + $0x80] sm:$0xff]  ;;  %v8674_v26 = vpop.permute.xlu1 %6385 }
 0x1ef   : > { %v2427_v50 = vld [vmem:[#allocation3 + $0x13] sm:$0xff]  ;;  %v8672_v13 = vpop.permute.xlu0 %6400  ;;  %v8678_v59 = vld [vmem:[#allocation2 + $0x60] sm:$0xff]  ;;  %2192 = vmatpush1.bf16.msra.mxu1 %v6920_v54  ;;  %5927 = vmatpush3.bf16.msra.mxu0 %v6964_v22  ;;  %v6378_v22 = vunpack.i.h.bf16 %v8623_v33  ;;  %v6387_v55 = vunpack.i.l.bf16 %v8674_v26 }
 0x1f0   : > { %v8680_v47 = vld [vmem:[#allocation2 + $0x72] sm:$0xff]  ;;  %v2428_v32 = vld [vmem:[#allocation3 + $0x23] sm:$0xff]  ;;  %2193 = vmatprep.subr.bf16.mxu1 %v6925_v46  ;;  %5928 = vmatprep.subr.bf16.mxu0 %v6965_v45  ;;  %v2999_v57 = vsel %vm2327_vm0, %v2427_v50, %v6322_v6 }
 0x1f1   : > { %9851 = vst [vmem:[#allocation31_spill] sm:$0xff] %v8680_v47  ;;  %v6966_v0 = vld [vmem:[%s9756_s5 + $0xb0] sm:$0xff]   ;;  %v8693_v12 = vld [vmem:[#allocation2 + $0x62] sm:$0xff]  ;;  %v3000_v46 = vsel %vm2327_vm0, %v2428_v32, %v6323_v52  ;;  %v3007_v40 = vsel %vm2957_vm4, %v2999_v57, %v6352_v10  ;;  %v6968_v10 = vld [vmem:[%s9756_s5 + $0xb8] sm:$0xff]  }
 0x1f2   : > { %9852 = vst [vmem:[#allocation32_spill] sm:$0xff] %v8693_v12  ;;  %v2459_v41 = vld [vmem:[#allocation3 + $0x22] sm:$0xff]  ;;  %v2460_v14 = vld [vmem:[#allocation3 + $0x32] sm:$0xff]  ;;  %v3008_v38 = vsel %vm2957_vm4, %v3000_v46, %v6353_v37  ;;  %v8728_v32 = vpop.permute.xlu1 %6390  ;;  %v8741_v37 = vsel %vm2966_vm5, %v3007_v40, %v6357_v62  ;;  %v6383_v62 = vunpack.i.h.bf16 %v8625_v31 }
 0x1f3   : > { %v6928_v54 = vld [vmem:[%s9754_s3 + $0x3f4] ss:$8 sps:$4 sm:$0xff]   ;;  %v8702_v61 = vld [vmem:[#allocation2] sm:$0xff]  ;;  %v3024_v4 = vsel %vm2327_vm0, %v2460_v14, %v6343_v21  ;;  %v8726_v49 = vpop.permute.xlu0 %6405  ;;  %v6926_v50 = vld [vmem:[%s9754_s3 + $0x3f0] ss:$8 sps:$4 sm:$0xff]   ;;  %v3023_v14 = vsel %vm2327_vm0, %v2459_v41, %v6342_v27  ;;  %v8744_v57 = vsel %vm2966_vm5, %v3008_v38, %v6358_v25  ;;  %2194 = vmatpush1.bf16.msra.mxu1 %v6923_v11  ;;  %5929 = vmatpush3.bf16.msra.mxu0 %v6966_v0  ;;  %v6382_v38 = vunpack.i.l.bf16 %v8625_v31 }
 0x1f4   : > { %v8709_v35 = vld [vmem:[#allocation2 + $0x82] sm:$0xff]  ;;  %v8711_v29 = vld [vmem:[#allocation2 + $0x92] sm:$0xff]  ;;  %v3031_v27 = vsel %vm2957_vm4, %v3023_v14, %v6347_v15  ;;  %v3032_v40 = vsel %vm2957_vm4, %v3024_v4, %v6348_v24  ;;  %2195 = vmatprep.subr.bf16.mxu1 %v6928_v54  ;;  %5930 = vmatprep.subr.bf16.mxu0 %v6967_v30  ;;  %v6403_v41 = vunpack.i.h.bf16 %v8672_v13  ;;  %v6388_v24 = vunpack.i.h.bf16 %v8674_v26 }
 0x1f5   : > { %9853 = vst [vmem:[#allocation33_spill] sm:$0xff] %v8709_v35  ;;  %9854 = vst [vmem:[#allocation34_spill] sm:$0xff] %v8711_v29  ;;  %v8717_v17 = vld [vmem:[#allocation3 + $0x64] sm:$0xff]  ;;  %v8719_v39 = vld [vmem:[#allocation3 + $0x74] sm:$0xff]  ;;  %v8767_v15 = vsel %vm2966_vm5, %v3031_v27, %v6377_v53  ;;  %v8770_v4 = vsel %vm2966_vm5, %v3032_v40, %v6378_v22  ;;  %v6402_v40 = vunpack.i.l.bf16 %v8672_v13  ;;  %v6393_v33 = vunpack.i.h.bf16 %v8728_v32 }
 0x1f6   : > { %v8721_v45 = vld [vmem:[#allocation3 + $0x44] sm:$0xff]  ;;  %v8735_v52 = vld [vmem:[#allocation3 + $0x54] sm:$0xff]  ;;  %v6396_v54 = vpop.permute.xlu1 %6395 }
 0x1f7   : > { %9855 = vst [vmem:[#allocation35_spill] sm:$0xff] %v8721_v45  ;;  %9856 = vst [vmem:[#allocation36_spill] sm:$0xff] %v8735_v52  ;;  %v8737_v6 = vld [vmem:[#allocation3 + $0x84] sm:$0xff]  ;;  %v8752_v46 = vld [vmem:[#allocation3 + $0x94] sm:$0xff]  ;;  %v6421_v31 = vpop.permute.xlu0 %6420  ;;  %2196 = vmatpush1.bf16.msra.mxu1 %v6926_v50  ;;  %5931 = vmatpush3.bf16.msra.mxu0 %v6968_v10  ;;  %v6407_v10 = vunpack.i.l.bf16 %v8726_v49  ;;  %v9862_v52 = vpack.c.bf16 %v8234_v60, %v8166_v48 }
 0x1f8   : > { %9857 = vst [vmem:[#allocation37_spill] sm:$0xff] %v8737_v6  ;;  %v6931_v21 = vld [vmem:[%s9754_s3 + $0x404] ss:$8 sps:$4 sm:$0xff]   ;;  %9858 = vst [vmem:[#allocation38_spill] sm:$0xff] %v8752_v46  ;;  %v8763_v11 = vld [vmem:[#allocation3 + $0xb4] sm:$0xff]  ;;  %v6397_v46 = vunpack.i.l.bf16 %v6396_v54 }
 0x1f9   : > { %v6969_v25 = vld [vmem:[%s9756_s5 + $0x140] sm:$0xff]   ;;  %9860 = vst [vmem:[#allocation40_spill] sm:$0xff] %v8763_v11  ;;  %v2429_v27 = vld [vmem:[#allocation3 + $0x33] sm:$0xff]  ;;  %2238 = vmatprep.subr.bf16.mxu1 %v6931_v21  ;;  %v6398_v11 = vunpack.i.h.bf16 %v6396_v54 }
 0x1fa   : > { %v8761_v0 = vld [vmem:[#allocation3 + $0xa4] sm:$0xff]  ;;  %v3001_v53 = vsel %vm2327_vm0, %v2429_v27, %v6382_v38  ;;  %v2462_v6 = vld [vmem:[#allocation3 + $0x52] sm:$0xff]  ;;  %5956 = vmatprep.subr.bf16.mxu0 %v6969_v25  ;;  %v6423_v27 = vunpack.i.h.bf16 %v6421_v31  ;;  %v6411_v26 = vpop.permute.xlu1 %6410 }
 0x1fb   : > { %9859 = vst [vmem:[#allocation39_spill] sm:$0xff] %v8761_v0  ;;  %v2430_v22 = vld [vmem:[#allocation3 + $0x43] sm:$0xff]  ;;  %v6934_v13 = vld [vmem:[%s9754_s3 + $0x414] ss:$8 sps:$4 sm:$0xff]   ;;  %v3026_v50 = vsel %vm2327_vm0, %v2462_v6, %v6403_v41  ;;  %v6422_v0 = vunpack.i.l.bf16 %v6421_v31  ;;  %v6426_v45 = vpop.permute.xlu0 %6425  ;;  %v9861_v6 = vpack.c.bf16 %v8608_v5, %v8606_v9  ;;  %v6932_v31 = vld [vmem:[%s9754_s3 + $0x410] ss:$8 sps:$4 sm:$0xff]   ;;  %v6413_v5 = vunpack.i.h.bf16 %v6411_v26 }
 0x1fc   : > { %v6929_v30 = vld [vmem:[%s9754_s3 + $0x400] ss:$8 sps:$4 sm:$0xff]   ;;  %v3002_v14 = vsel %vm2327_vm0, %v2430_v22, %v6383_v62  ;;  %v6392_v62 = vunpack.i.l.bf16 %v8728_v32  ;;  %v8803_v21 = vld [vmem:[#allocation3 + $0x50] sm:$0xff]  ;;  %v6428_v54 = vunpack.i.h.bf16 %v6426_v45  ;;  %v6427_v9 = vunpack.i.l.bf16 %v6426_v45 }
 0x1fd   : > { %v2461_v22 = vld [vmem:[#allocation3 + $0x42] sm:$0xff]  ;;  %2198 = vmatmul.mubr.bf16.vlgmr.msra.gmra.mrb[0].mxu1 %v9861_v6  ;;  %v2954_v32 = vsel %vm2327_vm0, %v8803_v21, %v6388_v24  ;;  %v6412_v6 = vunpack.i.l.bf16 %v6411_v26 }
 0x1fe   : > { %v8801_v38 = vld [vmem:[#allocation3 + $0x40] sm:$0xff]  ;;  %v3025_v25 = vsel %vm2327_vm0, %v2461_v22, %v6402_v40  ;;  %2207 = vmatprep.mubr.bf16.mxu1 %v9862_v52  ;;  %2239 = vmatpush1.bf16.msra.mxu1 %v6929_v30  ;;  %v2963_v60 = vsel %vm2957_vm4, %v2954_v32, %v6393_v33  ;;  %v2399_v30 = vld [vmem:[#allocation3 + $0x54] sm:$0xff] }
 0x1ff   : > { %v2953_v41 = vsel %vm2327_vm0, %v8801_v38, %v6387_v55  ;;  %2240 = vmatprep.subr.bf16.mxu1 %v6934_v13  ;;  %v6937_v24 = vld [vmem:[%s9754_s3 + $0x424] ss:$8 sps:$4 sm:$0xff]   ;;  %v6408_v55 = vunpack.i.h.bf16 %v8726_v49  ;;  %v3033_v40 = vsel %vm2957_vm4, %v3025_v25, %v6407_v10  ;;  %v2980_v22 = vsel %vm2327_vm0, %v2399_v30, %v6423_v27  ;;  %v6431_v26 = vpop.permute.xlu0 %6430  ;;  %v6416_v13 = vpop.permute.xlu1 %6415  ;;  %v6935_v33 = vld [vmem:[%s9754_s3 + $0x420] ss:$8 sps:$4 sm:$0xff]  }
 0x200   : > { %v2962_v48 = vsel %vm2957_vm4, %v2953_v41, %v6392_v62  ;;  %v2398_v52 = vld [vmem:[#allocation3 + $0x44] sm:$0xff]  ;;  %v2972_v29 = vsel %vm2966_vm5, %v2963_v60, %v6398_v11  ;;  %v6433_v12 = vunpack.i.h.bf16 %v6431_v26  ;;  %v6432_v49 = vunpack.i.l.bf16 %v6431_v26  ;;  %v6940_v41 = vld [vmem:[%s9754_s3 + $0x430] ss:$8 sps:$4 sm:$0xff]  }
 0x201   : > { %v2979_v45 = vsel %vm2327_vm0, %v2398_v52, %v6422_v0  ;;  %v2971_v35 = vsel %vm2966_vm5, %v2962_v48, %v6397_v46  ;;  %v6418_v47 = vunpack.i.h.bf16 %v6416_v13  ;;  %v6417_v10 = vunpack.i.l.bf16 %v6416_v13  ;;  %v6942_v46 = vld [vmem:[%s9754_s3 + $0x434] ss:$8 sps:$4 sm:$0xff]   ;;  %v4462_v48 = vld [vmem:[#allocation4 + $0x28] sm:$0xff] }
 0x202   : > { %2241 = vmatpush1.bf16.msra.mxu1 %v6932_v31  ;;  %v2987_v62 = vsel %vm2957_vm4, %v2979_v45, %v6427_v9  ;;  %v2988_v27 = vsel %vm2957_vm4, %v2980_v22, %v6428_v54  ;;  %v3009_v0 = vsel %vm2957_vm4, %v3001_v53, %v6412_v6  ;;  %v3010_v25 = vsel %vm2957_vm4, %v3002_v14, %v6413_v5  ;;  %v8857_v60 = vld [vmem:[#allocation4 + $0x48] sm:$0xff] }
 0x203   : > { %2242 = vmatprep.subr.bf16.mxu1 %v6937_v24  ;;  %v2995_v11 = vsel %vm2966_vm5, %v2987_v62, %v6432_v49  ;;  %v2996_v32 = vsel %vm2966_vm5, %v2988_v27, %v6433_v12  ;;  %v8846_v31 = vsel %vm2966_vm5, %v3009_v0, %v6417_v10  ;;  %v8849_v53 = vsel %vm2966_vm5, %v3010_v25, %v6418_v47  ;;  %v6436_v54 = vpop.permute.xlu0 %6435  ;;  %v6441_v9 = vpop.permute.xlu1 %6440  ;;  %v4494_v52 = vld [vmem:[#allocation4 + $0x28] sm:$0xfc]  ;;  %v2463_v25 = vld [vmem:[#allocation3 + $0x62] sm:$0xff] }
 0x204   : > { %v3034_v14 = vsel %vm2957_vm4, %v3026_v50, %v6408_v55  ;;  %v9863_v5 = vpack.c.bf16 %v8629_v3, %v8627_v58  ;;  %v3302_v6 = vpack.c.bf16 %v2996_v32, %v2995_v11  ;;  %v3301_v12 = vpack.c.bf16 %v2972_v29, %v2971_v35  ;;  %v4496_v58 = vld [vmem:[#allocation4 + $0x38] sm:$0x3]  ;;  %v4498_v3 = vld [vmem:[#allocation4 + $0x48] sm:$0xfc] }
 0x205   : > { %v3296_v24 = vpack.c.bf16 %v8849_v53, %v8846_v31  ;;  %v6438_v30 = vunpack.i.h.bf16 %v6436_v54  ;;  %v6437_v47 = vunpack.i.l.bf16 %v6436_v54  ;;  %v6443_v22 = vunpack.i.h.bf16 %v6441_v9  ;;  %v4500_v55 = vld [vmem:[#allocation4 + $0x58] sm:$0x3]  ;;  %v2432_v29 = vld [vmem:[#allocation3 + $0x63] sm:$0xff] }
 0x206   : > { %2208 = vmatmul.mubr.bf16.gmra.mrb[4].mxu1 %v9863_v5  ;;  %v6442_v45 = vunpack.i.l.bf16 %v6441_v9  ;;  %v9864_v50 = vpack.c.bf16 %v8311_v51, %v8221_v7  ;;  %v2431_v35 = vld [vmem:[#allocation3 + $0x53] sm:$0xff]  ;;  %3782 = vmatprep.mubr.bf16.mxu0 %v3302_v6  ;;  %v6947_v26 = vld [vmem:[%s9754_s3 + $0x444] ss:$8 sps:$4 sm:$0xff]   ;;  %v4478_v13 = vmax.f32 %v8255_v20, %v4462_v48  ;;  %v4480_v49 = vmax.f32 %v8257_v23, %v8857_v60 }
 0x207   : > { %2243 = vmatpush1.bf16.msra.mxu1 %v6935_v33  ;;  %v4560_v10 = vrot.slane %v4494_v52, 2  ;;  %v4561_v7 = vrot.slane %v4496_v58, 2  ;;  %v8869_v51 = vsel %vm2327_vm0, %v2432_v29, %v6443_v22  ;;  %3783 = vmatmul.mubr.bf16.gmra.mrb[40].mxu0 %v3301_v12  ;;  %v8875_v62 = vsel %vm2966_vm5, %v3033_v40, %v6437_v47  ;;  %v4671_v0 = vld [vmem:[#allocation4 + $0x48] sm:$0xfe]  ;;  %v4673_v20 = vld [vmem:[#allocation4 + $0x58] sm:$0x1]  ;;  %v6446_v23 = vpop.permute.xlu1 %6445 }
 0x208   : > { %2217 = vmatprep.mubr.bf16.mxu1 %v9864_v50  ;;  %2244 = vmatprep.subr.bf16.mxu1 %v6942_v46  ;;  %v8872_v33 = vsel %vm2327_vm0, %v2431_v35, %v6442_v45  ;;  %v8878_v27 = vsel %vm2966_vm5, %v3034_v14, %v6438_v30  ;;  %v6461_v46 = vpop.permute.xlu0 %6460  ;;  %v4566_v54 = vrot.slane %v4498_v3, 2  ;;  %v4567_v9 = vrot.slane %v4500_v55, 2  ;;  %v2464_v5 = vld [vmem:[#allocation3 + $0x72] sm:$0xff]  ;;  %v6945_v14 = vld [vmem:[%s9754_s3 + $0x440] ss:$8 sps:$4 sm:$0xff]  }
 0x209   : > { %v3297_v11 = vpack.c.bf16 %v8878_v27, %v8875_v62  ;;  %v4562_v32 = vsel %vm4380_vm3, %v4560_v10, %v4561_v7  ;;  %v6463_v6 = vunpack.i.h.bf16 %v6461_v46  ;;  %v6462_v12 = vunpack.i.l.bf16 %v6461_v46  ;;  %v4675_v52 = vld [vmem:[#allocation4 + $0x68] sm:$0xfe]  ;;  %v8886_v30 = vld [vmem:[#allocation3 + $0x60] sm:$0xff]  ;;  %v8888_v47 = vld [vmem:[#allocation3 + $0x70] sm:$0xff] }
 0x20a   : > { %v6448_v40 = vunpack.i.h.bf16 %v6446_v23  ;;  %v6447_v48 = vunpack.i.l.bf16 %v6446_v23  ;;  %v6952_v22 = vld [vmem:[%s9754_s3 + $0x454] ss:$8 sps:$4 sm:$0xff]   ;;  %v4568_v45 = vsel %vm4380_vm3, %v4566_v54, %v4567_v9  ;;  %v4622_v50 = vmax.f32 %v4478_v13, %v4562_v32  ;;  %v4677_v10 = vld [vmem:[#allocation4 + $0x78] sm:$0x1]  ;;  %v4815_v7 = vld [vmem:[#allocation4 + $0x48] sm:$0xfc] }
 0x20b   : > { %2245 = vmatpush1.bf16.msra.mxu1 %v6940_v41  ;;  %v4737_v58 = vrot.slane %v4671_v0, 1  ;;  %v4738_v3 = vrot.slane %v4673_v20, 1  ;;  %v3028_v41 = vsel %vm2327_vm0, %v2464_v5, %v6463_v6  ;;  %v3027_v55 = vsel %vm2327_vm0, %v2463_v25, %v6462_v12  ;;  %v6451_v23 = vpop.permute.xlu1 %6450  ;;  %v6950_v0 = vld [vmem:[%s9754_s3 + $0x450] ss:$8 sps:$4 sm:$0xff]   ;;  %v9057_v27 = vld [vmem:[#allocation4 + $0xa8] sm:$0xff] }
 0x20c   : > { %2246 = vmatprep.subr.bf16.mxu1 %v6947_v26  ;;  %v2956_v35 = vsel %vm2327_vm0, %v8888_v47, %v6448_v40  ;;  %v2955_v29 = vsel %vm2327_vm0, %v8886_v30, %v6447_v48  ;;  %v8900_v26 = vld [vmem:[#allocation4 + $0x68] sm:$0xff]  ;;  %v6466_v46 = vpop.permute.xlu0 %6465  ;;  %v9865_v13 = vpack.c.bf16 %v8652_v16, %v8678_v59  ;;  %v4624_v20 = vmax.f32 %v4480_v49, %v4568_v45  ;;  %v4817_v59 = vld [vmem:[#allocation4 + $0x58] sm:$0x3] }
 0x20d   : > { %v4655_v25 = vmax.f32 %v4622_v50, %v8857_v60  ;;  %v4739_v32 = vsel %vm4235_vm2, %v4737_v58, %v4738_v3  ;;  %v4743_v54 = vrot.slane %v4675_v52, 1  ;;  %v6468_v9 = vunpack.i.h.bf16 %v6466_v46  ;;  %v4819_v16 = vld [vmem:[#allocation4 + $0x68] sm:$0xfc]  ;;  %v4821_v48 = vld [vmem:[#allocation4 + $0x78] sm:$0x3] }
 0x20e   : > { %2218 = vmatmul.mubr.bf16.gmra.mrb[8].mxu1 %v9865_v13  ;;  %v6467_v5 = vunpack.i.l.bf16 %v6466_v46  ;;  %v6453_v6 = vunpack.i.h.bf16 %v6451_v23  ;;  %v6452_v12 = vunpack.i.l.bf16 %v6451_v23  ;;  %v9866_v40 = vpack.c.bf16 %v8663_v36, %v8297_v44  ;;  %v6957_v60 = vld [vmem:[%s9754_s3 + $0x464] ss:$8 sps:$4 sm:$0xff]  }
 0x20f   : > { %2247 = vmatpush1.bf16.msra.mxu1 %v6945_v14  ;;  %v4657_v49 = vmax.f32 %v4624_v20, %v8900_v26  ;;  %v4744_v52 = vrot.slane %v4677_v10, 1  ;;  %v4799_v45 = vmax.f32 %v4655_v25, %v4739_v32  ;;  %v4881_v50 = vrot.slane %v4815_v7, 2  ;;  %v6456_v46 = vpop.permute.xlu1 %6455 }
 0x210   : > { %2227 = vmatprep.mubr.bf16.mxu1 %v9866_v40  ;;  %2248 = vmatprep.subr.bf16.mxu1 %v6952_v22  ;;  %v8918_v58 = vsel %vm2957_vm4, %v3027_v55, %v6467_v5  ;;  %v8921_v44 = vsel %vm2957_vm4, %v3028_v41, %v6468_v9  ;;  %v2964_v36 = vsel %vm2957_vm4, %v2955_v29, %v6452_v12  ;;  %v8925_v22 = vld [vmem:[#allocation4 + $0x40] sm:$0xff]  ;;  %v6481_v3 = vpop.permute.xlu0 %6480  ;;  %v4882_v13 = vrot.slane %v4817_v59, 2 }
 0x211   : > { %v2965_v14 = vsel %vm2957_vm4, %v2956_v35, %v6453_v6  ;;  %v4745_v23 = vsel %vm4235_vm2, %v4743_v54, %v4744_v52  ;;  %v4887_v10 = vrot.slane %v4819_v16, 2  ;;  %v4888_v20 = vrot.slane %v4821_v48, 2  ;;  %v6955_v41 = vld [vmem:[%s9754_s3 + $0x460] ss:$8 sps:$4 sm:$0xff]   ;;  %v6962_v35 = vld [vmem:[%s9754_s3 + $0x474] ss:$8 sps:$4 sm:$0xff]  }
 0x212   : > { %v6483_v7 = vunpack.i.h.bf16 %v6481_v3  ;;  %v6482_v25 = vunpack.i.l.bf16 %v6481_v3  ;;  %v6458_v55 = vunpack.i.h.bf16 %v6456_v46  ;;  %v6457_v32 = vunpack.i.l.bf16 %v6456_v46  ;;  %v8931_v29 = vld [vmem:[#allocation4 + $0x60] sm:$0xff]  ;;  %v4672_v48 = vld [vmem:[#allocation4 + $0x50] sm:$0x1] }
 0x213   : > { %2249 = vmatpush1.bf16.msra.mxu1 %v6950_v0  ;;  %v4801_v54 = vmax.f32 %v4657_v49, %v4745_v23  ;;  %v4883_v9 = vsel %vm4380_vm3, %v4881_v50, %v4882_v13  ;;  %v4889_v5 = vsel %vm4380_vm3, %v4887_v10, %v4888_v20  ;;  %v4654_v6 = vmax.f32 %v8339_v8, %v8925_v22  ;;  %v4670_v16 = vld [vmem:[#allocation4 + $0x40] sm:$0xfe]  ;;  %v6471_v52 = vpop.permute.xlu1 %6470  ;;  %v6960_v50 = vld [vmem:[%s9754_s3 + $0x470] ss:$8 sps:$4 sm:$0xff]  }
 0x214   : > { %2250 = vmatprep.subr.bf16.mxu1 %v6957_v60  ;;  %v2982_v0 = vsel %vm2327_vm0, %v8719_v39, %v6483_v7  ;;  %v2981_v12 = vsel %vm2327_vm0, %v8717_v17, %v6482_v25  ;;  %v8945_v40 = vsel %vm2966_vm5, %v2964_v36, %v6457_v32  ;;  %v8948_v59 = vsel %vm2966_vm5, %v2965_v14, %v6458_v55  ;;  %v4674_v60 = vld [vmem:[#allocation4 + $0x60] sm:$0xfe]  ;;  %v6486_v49 = vpop.permute.xlu0 %6485  ;;  %v4816_v7 = vld [vmem:[#allocation4 + $0x50] sm:$0x3] }
 0x215   : > { %v9867_v8 = vpack.c.bf16 %v8702_v61, %v8665_v1  ;;  %v3308_v36 = vpack.c.bf16 %v8948_v59, %v8945_v40  ;;  %v4943_v22 = vmax.f32 %v4799_v45, %v4883_v9  ;;  %v4945_v3 = vmax.f32 %v4801_v54, %v4889_v5  ;;  %v4676_v61 = vld [vmem:[#allocation4 + $0x70] sm:$0x1]  ;;  %v4814_v1 = vld [vmem:[#allocation4 + $0x40] sm:$0xfc] }
 0x216   : > { %v4656_v14 = vmax.f32 %v8426_v34, %v8931_v29  ;;  %v6488_v46 = vunpack.i.h.bf16 %v6486_v49  ;;  %v6487_v23 = vunpack.i.l.bf16 %v6486_v49  ;;  %v6473_v13 = vunpack.i.h.bf16 %v6471_v52  ;;  %v4818_v5 = vld [vmem:[#allocation4 + $0x60] sm:$0xfc] }
 0x217   : > { %2228 = vmatmul.mubr.bf16.gmra.mrb[12].mxu1 %v9867_v8  ;;  %v6472_v10 = vunpack.i.l.bf16 %v6471_v52  ;;  %v7076_v20 = vmov 0   ;;  %v8961_v25 = vpack.c.bf16 %v4945_v3, %v4943_v22  ;;  %v4734_v55 = vrot.slane %v4670_v16, 1  ;;  %v6476_v52 = vpop.permute.xlu1 %6475 }
 0x218   : > { %2251 = vmatpush1.bf16.msra.mxu1 %v6955_v41  ;;  %2270 = vmatprep.mubr.bf16.mxu1 %v7076_v20  ;;  %v4735_v45 = vrot.slane %v4672_v48, 1  ;;  %v4740_v32 = vrot.slane %v4674_v60, 1  ;;  %v2989_v54 = vsel %vm2957_vm4, %v2981_v12, %v6487_v23  ;;  %v2990_v34 = vsel %vm2957_vm4, %v2982_v0, %v6488_v46  ;;  %v6491_v49 = vpop.permute.xlu0 %6490  ;;  %v4820_v0 = vld [vmem:[#allocation4 + $0x70] sm:$0x3] }
 0x219   : > { %2252 = vmatprep.subr.bf16.mxu1 %v6962_v35  ;;  %v3011_v9 = vsel %vm2957_vm4, %v8872_v33, %v6472_v10  ;;  %v3012_v41 = vsel %vm2957_vm4, %v8869_v51, %v6473_v13  ;;  %v4741_v8 = vrot.slane %v4676_v61, 1  ;;  %v4878_v22 = vrot.slane %v4814_v1, 2 }
 0x21a   : > { %v4736_v35 = vsel %vm4235_vm2, %v4734_v55, %v4735_v45  ;;  %v4879_v16 = vrot.slane %v4816_v7, 2  ;;  %v6493_v48 = vunpack.i.h.bf16 %v6491_v49  ;;  %v6492_v60 = vunpack.i.l.bf16 %v6491_v49  ;;  %v4325_v7 = vld [vmem:[#allocation4 + $0x48] sm:$0xfc]  ;;  %v4327_v55 = vld [vmem:[#allocation4 + $0x58] sm:$0x3] }
 0x21b   : > { %v6478_v3 = vunpack.i.h.bf16 %v6476_v52  ;;  %v6477_v12 = vunpack.i.l.bf16 %v6476_v52  ;;  %v4742_v46 = vsel %vm4235_vm2, %v4740_v32, %v4741_v8  ;;  %v4798_v33 = vmax.f32 %v4654_v6, %v4736_v35  ;;  %v6501_v45 = vpop.permute.xlu1 %6500  ;;  %v4331_v8 = vld [vmem:[#allocation4 + $0x78] sm:$0x3] }
 0x21c   : > { %2253 = vmatpush1.bf16.msra.mxu1 %v6960_v50  ;;  %v4880_v23 = vsel %vm4380_vm3, %v4878_v22, %v4879_v16  ;;  %v4884_v51 = vrot.slane %v4818_v5, 2  ;;  %v2997_v13 = vsel %vm2966_vm5, %v2989_v54, %v6492_v60  ;;  %v2998_v10 = vsel %vm2966_vm5, %v2990_v34, %v6493_v48  ;;  %v6496_v50 = vpop.permute.xlu0 %6495  ;;  %v2492_v22 = vld [vmem:[#allocation3 + $0x31] sm:$0xff]  ;;  %v2493_v16 = vld [vmem:[#allocation3 + $0x41] sm:$0xff] }
 0x21d   : > { %v8975_v61 = vsel %vm2966_vm5, %v3011_v9, %v6477_v12  ;;  %v8978_v1 = vsel %vm2966_vm5, %v3012_v41, %v6478_v3  ;;  %v9868_v6 = vpack.c.bf16 %v8615_v2, %v8613_v63  ;;  %v3309_v32 = vpack.c.bf16 %v2998_v10, %v2997_v13  ;;  %v4329_v41 = vld [vmem:[#allocation4 + $0x68] sm:$0xfc] }
 0x21e   : > { %v3303_v54 = vpack.c.bf16 %v8978_v1, %v8975_v61  ;;  %v4800_v5 = vmax.f32 %v4656_v14, %v4742_v46  ;;  %v4885_v34 = vrot.slane %v4820_v0, 2  ;;  %v6498_v49 = vunpack.i.h.bf16 %v6496_v50  ;;  %v4502_v46 = vld [vmem:[#allocation4 + $0x68] sm:$0xfc] }
 0x21f   : > { %2271 = vmatmul.mubr.bf16.vlgmr.msra.gmra.mrb[0].mxu1 %v9868_v6  ;;  %v6497_v9 = vunpack.i.l.bf16 %v6496_v50  ;;  %v6503_v52 = vunpack.i.h.bf16 %v6501_v45  ;;  %v6502_v35 = vunpack.i.l.bf16 %v6501_v45  ;;  %3790 = vmatprep.mubr.bf16.mxu0 %v3309_v32  ;;  %v4942_v2 = vmax.f32 %v4798_v33, %v4880_v23  ;;  %v4504_v6 = vld [vmem:[#allocation4 + $0x78] sm:$0x3]  ;;  %v4506_v32 = vld [vmem:[#allocation4 + $0x88] sm:$0xfc] }
 0x220   : > { %2280 = vmatprep.mubr.bf16.mxu1 %v7076_v20  ;;  %v4886_v63 = vsel %vm4380_vm3, %v4884_v51, %v4885_v34  ;;  %v4396_v48 = vrot.slane %v4325_v7, 2  ;;  %v4397_v60 = vrot.slane %v4327_v55, 2  ;;  %v3264_v14 = vsel %vm2327_vm0, %v8803_v21, %v6498_v49  ;;  %3791 = vmatmul.mubr.bf16.gmra.mrb[44].mxu0 %v3308_v36  ;;  %v6506_v13 = vpop.permute.xlu0 %6505  ;;  %v6511_v51 = vpop.permute.xlu1 %6510 }
 0x221   : > { %v3263_v3 = vsel %vm2327_vm0, %v8801_v38, %v6497_v9  ;;  %v3240_v12 = vsel %vm2327_vm0, %v2493_v16, %v6503_v52  ;;  %v3239_v0 = vsel %vm2327_vm0, %v2492_v22, %v6502_v35  ;;  %v9869_v33 = vpack.c.bf16 %v8770_v4, %v8767_v15  ;;  %v9010_v52 = vld [vmem:[#allocation4 + $0x88] sm:$0xff]  ;;  %v4508_v35 = vld [vmem:[#allocation4 + $0x98] sm:$0x3] }
 0x222   : > { %v4944_v23 = vmax.f32 %v4800_v5, %v4886_v63  ;;  %v4398_v21 = vsel %vm4380_vm3, %v4396_v48, %v4397_v60  ;;  %v4402_v10 = vrot.slane %v4329_v41, 2  ;;  %v4403_v38 = vrot.slane %v4331_v8, 2  ;;  %v4679_v41 = vld [vmem:[#allocation4 + $0x88] sm:$0xfe] }
 0x223   : > { %3831 = vmatprep.mubr.bf16.mxu0 %v9869_v33  ;;  %v6508_v7 = vunpack.i.h.bf16 %v6506_v13  ;;  %v6507_v55 = vunpack.i.l.bf16 %v6506_v13  ;;  %v6513_v50 = vunpack.i.h.bf16 %v6511_v51  ;;  %v6512_v45 = vunpack.i.l.bf16 %v6511_v51 }
 0x224   : > { %v9000_v40 = vpack.c.bf16 %v4944_v23, %v4942_v2  ;;  %v4404_v59 = vsel %vm4380_vm3, %v4402_v10, %v4403_v38  ;;  %v9870_v36 = vmax.f32 %v8275_v43, %v8392_v19  ;;  %v4572_v4 = vrot.slane %v4502_v46, 2  ;;  %v6516_v8 = vpop.permute.xlu0 %6515  ;;  %v6521_v22 = vpop.permute.xlu1 %6520  ;;  %v6970_v43 = vld [vmem:[%s9756_s5 + $0x100] sm:$0xff]   ;;  %v4683_v10 = vld [vmem:[#allocation4 + $0xa8] sm:$0xfe] }
 0x225   : > { %v3271_v5 = vsel %vm2957_vm4, %v3263_v3, %v6507_v55  ;;  %v3272_v34 = vsel %vm2957_vm4, %v3264_v14, %v6508_v7  ;;  %v3247_v49 = vsel %vm2957_vm4, %v3239_v0, %v6512_v45  ;;  %v3248_v9 = vsel %vm2957_vm4, %v3240_v12, %v6513_v50 }
 0x226   : > { %v4450_v15 = vmax.f32 %v9870_v36, %v4398_v21  ;;  %v9871_v16 = vpack.c.bf16 %v8631_v56, %v8643_v28  ;;  %v9872_v19 = vmax.f32 %v8367_v18, %v8407_v42  ;;  %v4573_v48 = vrot.slane %v4504_v6, 2  ;;  %v6971_v56 = vld [vmem:[%s9756_s5 + $0x148] sm:$0xff]   ;;  %v4681_v28 = vld [vmem:[#allocation4 + $0x98] sm:$0x1] }
 0x227   : > { %v4578_v60 = vrot.slane %v4506_v32, 2  ;;  %v6518_v14 = vunpack.i.h.bf16 %v6516_v8  ;;  %v6517_v3 = vunpack.i.l.bf16 %v6516_v8  ;;  %v6523_v12 = vunpack.i.h.bf16 %v6521_v22 }
 0x228   : > { %2281 = vmatmul.mubr.bf16.gmra.mrb[4].mxu1 %v9871_v16  ;;  %v4452_v63 = vmax.f32 %v9872_v19, %v4404_v59  ;;  %v4482_v2 = vmax.f32 %v4450_v15, %v8900_v26  ;;  %v6522_v0 = vunpack.i.l.bf16 %v6521_v22  ;;  %v4574_v18 = vsel %vm4380_vm3, %v4572_v4, %v4573_v48  ;;  %v6526_v7 = vpop.permute.xlu0 %6525  ;;  %v6531_v55 = vpop.permute.xlu1 %6530  ;;  %v4823_v15 = vld [vmem:[#allocation4 + $0x88] sm:$0xfc]  ;;  %v2494_v4 = vld [vmem:[#allocation3 + $0x51] sm:$0xff] }
 0x229   : > { %2290 = vmatprep.mubr.bf16.mxu1 %v7076_v20  ;;  %v4579_v42 = vrot.slane %v4508_v35, 2  ;;  %v4749_v13 = vrot.slane %v4679_v41, 1  ;;  %v9032_v51 = vsel %vm2966_vm5, %v3248_v9, %v6523_v12  ;;  %v9873_v33 = vpack.c.bf16 %v8744_v57, %v8741_v37  ;;  %v6972_v37 = vld [vmem:[%s9756_s5 + $0x108] sm:$0xff]   ;;  %v6973_v57 = vld [vmem:[%s9756_s5 + $0x150] sm:$0xff]  }
 0x22a   : > { %v4484_v46 = vmax.f32 %v4452_v63, %v9010_v52  ;;  %v9029_v26 = vsel %vm2966_vm5, %v3247_v49, %v6522_v0  ;;  %v9038_v23 = vsel %vm2966_vm5, %v3271_v5, %v6517_v3  ;;  %v9041_v21 = vsel %vm2966_vm5, %v3272_v34, %v6518_v14  ;;  %v2495_v5 = vld [vmem:[#allocation3 + $0x61] sm:$0xff]  ;;  %v4827_v19 = vld [vmem:[#allocation4 + $0xa8] sm:$0xfc]  ;;  %v9874_v48 = vld [vmem:[#allocation31_spill] sm:$0xff] }
 0x22b   : > { %3832 = vmatmul.mubr.bf16.vlgmr.msra.gmra.mrb[48].mxu0 %v9873_v33  ;;  %v3291_v38 = vpack.c.bf16 %v9032_v51, %v9029_v26  ;;  %v3292_v50 = vpack.c.bf16 %v9041_v21, %v9038_v23  ;;  %v4580_v45 = vsel %vm4380_vm3, %v4578_v60, %v4579_v42  ;;  %v4750_v6 = vrot.slane %v4681_v28, 1  ;;  %v9875_v60 = vld [vmem:[#allocation32_spill] sm:$0xff]  ;;  %v4826_v21 = vld [vmem:[#allocation4 + $0xa0] sm:$0xfc]  ;;  %v2530_v51 = vld [vmem:[#allocation3 + $0x90] sm:$0xff] }
 0x22c   : > { %3839 = vmatprep.mubr.bf16.mxu0 %v3297_v11  ;;  %5957 = vmatpush3.bf16.msra.mxu0 %v6970_v43  ;;  %v6528_v32 = vunpack.i.h.bf16 %v6526_v7  ;;  %v6527_v59 = vunpack.i.l.bf16 %v6526_v7  ;;  %v6533_v36 = vunpack.i.h.bf16 %v6531_v55  ;;  %v6532_v62 = vunpack.i.l.bf16 %v6531_v55  ;;  %v4685_v11 = vld [vmem:[#allocation4 + $0xb8] sm:$0x1]  ;;  %v6536_v63 = vpop.permute.xlu0 %6535  ;;  %v6985_v23 = vld [vmem:[%s9756_s5 + $0x180] sm:$0xff]  }
 0x22d   : > { %5958 = vmatprep.subr.bf16.mxu0 %v6971_v56  ;;  %v4626_v34 = vmax.f32 %v4482_v2, %v4574_v18  ;;  %v4628_v49 = vmax.f32 %v4484_v46, %v4580_v45  ;;  %v4751_v9 = vsel %vm4235_vm2, %v4749_v13, %v4750_v6  ;;  %v4755_v35 = vrot.slane %v4683_v10, 1  ;;  %v4825_v43 = vld [vmem:[#allocation4 + $0x98] sm:$0x3]  ;;  %v6541_v2 = vpop.permute.xlu1 %6540  ;;  %v2434_v10 = vld [vmem:[#allocation3 + $0x83] sm:$0xff] }
 0x22e   : > { %v9062_v41 = vsel %vm2327_vm0, %v8888_v47, %v6528_v32  ;;  %v9066_v8 = vsel %vm2327_vm0, %v8886_v30, %v6527_v59  ;;  %v9069_v22 = vsel %vm2327_vm0, %v2495_v5, %v6533_v36  ;;  %v9072_v16 = vsel %vm2327_vm0, %v2494_v4, %v6532_v62  ;;  %v6974_v30 = vld [vmem:[%s9756_s5 + $0x110] sm:$0xff]   ;;  %v6975_v42 = vld [vmem:[%s9756_s5 + $0x158] sm:$0xff]   ;;  %v4324_v32 = vld [vmem:[#allocation4 + $0x40] sm:$0xfc] }
 0x22f   : > { %v9876_v14 = vpack.c.bf16 %v9874_v48, %v9875_v60  ;;  %v4659_v47 = vmax.f32 %v4626_v34, %v9010_v52  ;;  %v4661_v3 = vmax.f32 %v4628_v49, %v9057_v27  ;;  %v4756_v12 = vrot.slane %v4685_v11, 1  ;;  %v4829_v13 = vld [vmem:[#allocation4 + $0xb8] sm:$0x3]  ;;  %v4326_v59 = vld [vmem:[#allocation4 + $0x50] sm:$0x3]  ;;  %v6987_v26 = vld [vmem:[%s9758_s7 + $0x40] sm:$0xff]  }
 0x230   : > { %5959 = vmatpush3.bf16.msra.mxu0 %v6972_v37  ;;  %v4893_v0 = vrot.slane %v4823_v15, 2  ;;  %v6538_v56 = vunpack.i.h.bf16 %v6536_v63  ;;  %v6537_v28 = vunpack.i.l.bf16 %v6536_v63  ;;  %v6543_v46 = vunpack.i.h.bf16 %v6541_v2  ;;  %v2433_v33 = vld [vmem:[#allocation3 + $0x73] sm:$0xff]  ;;  %v6546_v36 = vpop.permute.xlu0 %6545  ;;  %v4328_v49 = vld [vmem:[#allocation4 + $0x60] sm:$0xfc] }
 0x231   : > { %2291 = vmatmul.mubr.bf16.gmra.mrb[8].mxu1 %v9876_v14  ;;  %v6542_v18 = vunpack.i.l.bf16 %v6541_v2  ;;  %5960 = vmatprep.subr.bf16.mxu0 %v6973_v57  ;;  %v4757_v52 = vsel %vm4235_vm2, %v4755_v35, %v4756_v12  ;;  %v4803_v7 = vmax.f32 %v4659_v47, %v4751_v9  ;;  %v4894_v55 = vrot.slane %v4825_v43, 2  ;;  %v6556_v62 = vpop.permute.xlu1 %6555  ;;  %v6976_v15 = vld [vmem:[%s9756_s5 + $0x118] sm:$0xff]   ;;  %v4330_v9 = vld [vmem:[#allocation4 + $0x70] sm:$0x3]  ;;  %v2465_v35 = vld [vmem:[#allocation3 + $0x82] sm:$0xff] }
 0x232   : > { %2300 = vmatprep.mubr.bf16.mxu1 %v7076_v20  ;;  %v4899_v37 = vrot.slane %v4827_v19, 2  ;;  %v3006_v45 = vsel %vm2327_vm0, %v2434_v10, %v6543_v46  ;;  %v3043_v20 = vsel %vm2966_vm5, %v8918_v58, %v6537_v28  ;;  %v3044_v57 = vsel %vm2966_vm5, %v8921_v44, %v6538_v56  ;;  %v6977_v44 = vld [vmem:[%s9756_s5 + $0x160] sm:$0xff]   ;;  %v7005_v48 = vld [vmem:[#allocation3 + $0x92] sm:$0xff]  ;;  %v9877_v56 = vld [vmem:[#allocation34_spill] sm:$0xff] }
 0x233   : > { %v3005_v6 = vsel %vm2327_vm0, %v2433_v33, %v6542_v18  ;;  %3840 = vmatmul.mubr.bf16.gmra.mrb[52].mxu0 %v3296_v24  ;;  %v3304_v11 = vpack.c.bf16 %v3044_v57, %v3043_v20  ;;  %v4805_v4 = vmax.f32 %v4661_v3, %v4757_v52  ;;  %v4895_v31 = vsel %vm4380_vm3, %v4893_v0, %v4894_v55  ;;  %v4501_v3 = vld [vmem:[#allocation4 + $0x60] sm:$0xfc] }
 0x234   : > { %5961 = vmatpush3.bf16.msra.mxu0 %v6974_v30  ;;  %v4900_v53 = vrot.slane %v4829_v13, 2  ;;  %v6548_v24 = vunpack.i.h.bf16 %v6546_v36  ;;  %v6547_v5 = vunpack.i.l.bf16 %v6546_v36  ;;  %v6558_v58 = vunpack.i.h.bf16 %v6556_v62  ;;  %v6551_v12 = vpop.permute.xlu0 %6550  ;;  %v9878_v28 = vld [vmem:[#allocation33_spill] sm:$0xff] }
 0x235   : > { %v6557_v34 = vunpack.i.l.bf16 %v6556_v62  ;;  %5962 = vmatprep.subr.bf16.mxu0 %v6975_v42  ;;  %3847 = vmatprep.mubr.bf16.mxu0 %v3304_v11  ;;  %v4947_v19 = vmax.f32 %v4803_v7, %v4895_v31  ;;  %v4393_v63 = vrot.slane %v4324_v32, 2  ;;  %v4394_v2 = vrot.slane %v4326_v59, 2  ;;  %v6571_v0 = vpop.permute.xlu1 %6570  ;;  %v6978_v18 = vld [vmem:[%s9756_s5 + $0x120] sm:$0xff]   ;;  %v9880_v32 = vld [vmem:[#allocation11_spill] sm:$0xff] }
 0x236   : > { %v4901_v43 = vsel %vm4380_vm3, %v4899_v37, %v4900_v53  ;;  %v3030_v60 = vsel %vm2327_vm0, %v7005_v48, %v6548_v24  ;;  %v3029_v14 = vsel %vm2327_vm0, %v2465_v35, %v6547_v5  ;;  %v3014_v47 = vsel %vm2957_vm4, %v3006_v45, %v6558_v58  ;;  %v6979_v45 = vld [vmem:[%s9756_s5 + $0x168] sm:$0xff]   ;;  %v9131_v24 = vld [vmem:[#allocation4 + $0x80] sm:$0xff]  ;;  %v4507_v58 = vld [vmem:[#allocation4 + $0x90] sm:$0x3] }
 0x237   : > { %v3013_v30 = vsel %vm2957_vm4, %v3005_v6, %v6557_v34  ;;  %v9879_v46 = vpack.c.bf16 %v9877_v56, %v9878_v28  ;;  %v4949_v42 = vmax.f32 %v4805_v4, %v4901_v43  ;;  %v4395_v13 = vsel %vm4380_vm3, %v4393_v63, %v4394_v2  ;;  %v4503_v6 = vld [vmem:[#allocation4 + $0x70] sm:$0x3]  ;;  %v9881_v59 = vld [vmem:[#allocation13_spill] sm:$0xff]  ;;  %v9883_v35 = vld [vmem:[#allocation12_spill] sm:$0xff] }
 0x238   : > { %5963 = vmatpush3.bf16.msra.mxu0 %v6976_v15  ;;  %v4399_v33 = vrot.slane %v4328_v49, 2  ;;  %v4400_v10 = vrot.slane %v4330_v9, 2  ;;  %v6553_v52 = vunpack.i.h.bf16 %v6551_v12  ;;  %v6552_v7 = vunpack.i.l.bf16 %v6551_v12  ;;  %v4505_v5 = vld [vmem:[#allocation4 + $0x80] sm:$0xfc]  ;;  %v6561_v34 = vpop.permute.xlu0 %6560  ;;  %v6980_v49 = vld [vmem:[%s9756_s5 + $0x128] sm:$0xff]  }
 0x239   : > { %2301 = vmatmul.mubr.bf16.gmra.mrb[12].mxu1 %v9879_v46  ;;  %v6573_v55 = vunpack.i.h.bf16 %v6571_v0  ;;  %v6572_v37 = vunpack.i.l.bf16 %v6571_v0  ;;  %5964 = vmatprep.subr.bf16.mxu0 %v6977_v44  ;;  %v9118_v20 = vpack.c.bf16 %v4949_v42, %v4947_v19  ;;  %v9882_v36 = vmax.f32 %v9880_v32, %v9881_v59  ;;  %v6576_v44 = vpop.permute.xlu1 %6575  ;;  %v9884_v43 = vld [vmem:[#allocation14_spill] sm:$0xff]  ;;  %v4682_v42 = vld [vmem:[#allocation4 + $0xa0] sm:$0xfe] }
 0x23a   : > { %v4401_v57 = vsel %vm4380_vm3, %v4399_v33, %v4400_v10  ;;  %v4569_v11 = vrot.slane %v4501_v3, 2  ;;  %v3037_v15 = vsel %vm2957_vm4, %v3029_v14, %v6552_v7  ;;  %v3038_v4 = vsel %vm2957_vm4, %v3030_v60, %v6553_v52  ;;  %v6981_v14 = vld [vmem:[%s9756_s5 + $0x170] sm:$0xff]   ;;  %v9158_v32 = vld [vmem:[#allocation4 + $0xa0] sm:$0xff] }
 0x23b   : > { %v4449_v62 = vmax.f32 %v9882_v36, %v4395_v13  ;;  %3848 = vmatmul.mubr.bf16.gmra.mrb[56].mxu0 %v3303_v54  ;;  %v3021_v31 = vsel %vm2966_vm5, %v3013_v30, %v6572_v37  ;;  %v3022_v53 = vsel %vm2966_vm5, %v3014_v47, %v6573_v55  ;;  %v9885_v61 = vmax.f32 %v9883_v35, %v9884_v43  ;;  %v4678_v30 = vld [vmem:[#allocation4 + $0x80] sm:$0xfe]  ;;  %v6982_v52 = vld [vmem:[%s9756_s5 + $0x130] sm:$0xff]  }
 0x23c   : > { %5965 = vmatpush3.bf16.msra.mxu0 %v6978_v18  ;;  %v3310_v9 = vpack.c.bf16 %v3022_v53, %v3021_v31  ;;  %v4570_v19 = vrot.slane %v4503_v6, 2  ;;  %v6563_v63 = vunpack.i.h.bf16 %v6561_v34  ;;  %v6562_v2 = vunpack.i.l.bf16 %v6561_v34  ;;  %v4680_v18 = vld [vmem:[#allocation4 + $0x90] sm:$0x1]  ;;  %v6566_v13 = vpop.permute.xlu0 %6565 }
 0x23d   : > { %v4451_v1 = vmax.f32 %v9885_v61, %v4401_v57  ;;  %v4481_v54 = vmax.f32 %v4449_v62, %v8931_v29  ;;  %v6578_v48 = vunpack.i.h.bf16 %v6576_v44  ;;  %v6577_v60 = vunpack.i.l.bf16 %v6576_v44  ;;  %5966 = vmatprep.subr.bf16.mxu0 %v6979_v45  ;;  %v6586_v33 = vpop.permute.xlu1 %6585  ;;  %v6983_v57 = vld [vmem:[%s9756_s5 + $0x178] sm:$0xff]   ;;  %v4684_v59 = vld [vmem:[#allocation4 + $0xb0] sm:$0x1] }
 0x23e   : > { %v4571_v3 = vsel %vm4380_vm3, %v4569_v11, %v4570_v19  ;;  %v4575_v12 = vrot.slane %v4505_v5, 2  ;;  %v4576_v0 = vrot.slane %v4507_v58, 2  ;;  %v3045_v28 = vsel %vm2966_vm5, %v3037_v15, %v6562_v2  ;;  %v4822_v58 = vld [vmem:[#allocation4 + $0x80] sm:$0xfc]  ;;  %v4824_v34 = vld [vmem:[#allocation4 + $0x90] sm:$0x3] }
 0x23f   : > { %v4483_v47 = vmax.f32 %v4451_v1, %v9131_v24  ;;  %v3249_v29 = vsel %vm2957_vm4, %v9072_v16, %v6577_v60  ;;  %v3250_v56 = vsel %vm2957_vm4, %v9069_v22, %v6578_v48  ;;  %v3046_v46 = vsel %vm2966_vm5, %v3038_v4, %v6563_v63  ;;  %v2497_v19 = vld [vmem:[#allocation3 + $0x81] sm:$0xff] }
 0x240   : > { %5967 = vmatpush3.bf16.msra.mxu0 %v6980_v49  ;;  %v3311_v10 = vpack.c.bf16 %v3046_v46, %v3045_v28  ;;  %v4577_v7 = vsel %vm4380_vm3, %v4575_v12, %v4576_v0  ;;  %v4625_v16 = vmax.f32 %v4481_v54, %v4571_v3  ;;  %v4746_v55 = vrot.slane %v4678_v30, 1  ;;  %v6581_v44 = vpop.permute.xlu0 %6580  ;;  %v4828_v12 = vld [vmem:[#allocation4 + $0xb0] sm:$0x3]  ;;  %v4333_v0 = vld [vmem:[#allocation4 + $0x88] sm:$0xfc] }
 0x241   : > { %v6568_v37 = vunpack.i.h.bf16 %v6566_v13  ;;  %v6567_v22 = vunpack.i.l.bf16 %v6566_v13  ;;  %v6588_v45 = vunpack.i.h.bf16 %v6586_v33  ;;  %v6587_v6 = vunpack.i.l.bf16 %v6586_v33  ;;  %5968 = vmatprep.subr.bf16.mxu0 %v6981_v14  ;;  %v6591_v49 = vpop.permute.xlu1 %6590  ;;  %v2532_v28 = vld [vmem:[#allocation3 + $0xb0] sm:$0xff] }
 0x242   : > { %3855 = vmatprep.mubr.bf16.mxu0 %v3311_v10  ;;  %v4627_v36 = vmax.f32 %v4483_v47, %v4577_v7  ;;  %v4658_v62 = vmax.f32 %v4625_v16, %v9131_v24  ;;  %v4747_v11 = vrot.slane %v4680_v18, 1  ;;  %v4752_v15 = vrot.slane %v4682_v42, 1 }
 0x243   : > { %v3273_v4 = vsel %vm2957_vm4, %v9066_v8, %v6567_v22  ;;  %v3274_v31 = vsel %vm2957_vm4, %v9062_v41, %v6568_v37  ;;  %3856 = vmatmul.mubr.bf16.gmra.mrb[60].mxu0 %v3310_v9  ;;  %v9166_v53 = vsel %vm2966_vm5, %v3249_v29, %v6587_v6  ;;  %v9169_v5 = vsel %vm2966_vm5, %v3250_v56, %v6588_v45  ;;  %v6984_v41 = vld [vmem:[%s9756_s5 + $0x138] sm:$0xff]   ;;  %v2531_v56 = vld [vmem:[#allocation3 + $0xa0] sm:$0xff]  ;;  %v6986_v37 = vld [vmem:[%s9756_s5 + $0x188] sm:$0xff]  }
 0x244   : > { %5969 = vmatpush3.bf16.msra.mxu0 %v6982_v52  ;;  %3896 = vmatprep.mubr.bf16.mxu0 %v3292_v50  ;;  %v3298_v8 = vpack.c.bf16 %v9169_v5, %v9166_v53  ;;  %v4660_v24 = vmax.f32 %v4627_v36, %v9158_v32  ;;  %v4748_v9 = vsel %vm4235_vm2, %v4746_v55, %v4747_v11  ;;  %v4753_v35 = vrot.slane %v4684_v59, 1  ;;  %v2496_v50 = vld [vmem:[#allocation3 + $0x71] sm:$0xff]  ;;  %v6606_v46 = vpop.permute.xlu0 %6605  ;;  %v4337_v22 = vld [vmem:[#allocation4 + $0xa8] sm:$0xfc] }
 0x245   : > { %v6583_v43 = vunpack.i.h.bf16 %v6581_v44  ;;  %v6582_v61 = vunpack.i.l.bf16 %v6581_v44  ;;  %v6593_v1 = vunpack.i.h.bf16 %v6591_v49  ;;  %v6592_v54 = vunpack.i.l.bf16 %v6591_v49  ;;  %5970 = vmatprep.subr.bf16.mxu0 %v6983_v57  ;;  %v4335_v29 = vld [vmem:[#allocation4 + $0x98] sm:$0x3]  ;;  %v6596_v18 = vpop.permute.xlu1 %6595 }
 0x246   : > { %v4754_v63 = vsel %vm4235_vm2, %v4752_v15, %v4753_v35  ;;  %v9185_v2 = vmax.f32 %v4658_v62, %v4748_v9  ;;  %v4890_v48 = vrot.slane %v4822_v58, 2  ;;  %v4891_v60 = vrot.slane %v4824_v34, 2  ;;  %v4339_v45 = vld [vmem:[#allocation4 + $0xb8] sm:$0x3]  ;;  %v2529_v9 = vld [vmem:[#allocation3 + $0x80] sm:$0xff] }
 0x247   : > { %v3244_v14 = vsel %vm2327_vm0, %v2497_v19, %v6593_v1  ;;  %v3243_v30 = vsel %vm2327_vm0, %v2496_v50, %v6592_v54  ;;  %v3281_v47 = vsel %vm2966_vm5, %v3273_v4, %v6582_v61  ;;  %v3282_v3 = vsel %vm2966_vm5, %v3274_v31, %v6583_v43  ;;  %v4510_v31 = vld [vmem:[#allocation4 + $0xa8] sm:$0xfc]  ;;  %v4693_v53 = vld [vmem:[#allocation4 + $0xf8] sm:$0x1] }
 0x248   : > { %5971 = vmatpush3.bf16.msra.mxu0 %v6984_v41  ;;  %v3299_v42 = vpack.c.bf16 %v3282_v3, %v3281_v47  ;;  %v4804_v13 = vmax.f32 %v4660_v24, %v4754_v63  ;;  %v4892_v33 = vsel %vm4380_vm3, %v4890_v48, %v4891_v60  ;;  %v4896_v10 = vrot.slane %v4826_v21, 2  ;;  %v6611_v58 = vpop.permute.xlu0 %6610  ;;  %v9887_v21 = vld [vmem:[#allocation19_spill] sm:$0xff]  ;;  %v4472_v3 = vld [vmem:[#allocation4 + $0xc8] sm:$0xff] }
 0x249   : > { %v6608_v52 = vunpack.i.h.bf16 %v6606_v46  ;;  %v6607_v7 = vunpack.i.l.bf16 %v6606_v46  ;;  %v6598_v16 = vunpack.i.h.bf16 %v6596_v18  ;;  %v6597_v55 = vunpack.i.l.bf16 %v6596_v18  ;;  %6077 = vmatprep.subr.bf16.mxu0 %v6985_v23  ;;  %v6601_v34 = vpop.permute.xlu1 %6600  ;;  %v4512_v63 = vld [vmem:[#allocation4 + $0xb8] sm:$0x3]  ;;  %v9890_v46 = vld [vmem:[#allocation22_spill] sm:$0xff] }
 0x24a   : > { %v4897_v6 = vrot.slane %v4828_v12, 2  ;;  %v4946_v57 = vmax.f32 %v9185_v2, %v4892_v33  ;;  %v4408_v59 = vrot.slane %v4333_v0, 2  ;;  %v4409_v36 = vrot.slane %v4335_v29, 2  ;;  %v4514_v2 = vld [vmem:[#allocation4 + $0xc8] sm:$0xfc] }
 0x24b   : > { %v9197_v62 = vsel %vm2327_vm0, %v2532_v28, %v6608_v52  ;;  %v9200_v11 = vsel %vm2327_vm0, %v2531_v56, %v6607_v7  ;;  %v3251_v15 = vsel %vm2957_vm4, %v3243_v30, %v6597_v55  ;;  %v3252_v4 = vsel %vm2957_vm4, %v3244_v14, %v6598_v16  ;;  %3897 = vmatmul.mubr.bf16.vlgmr.msra.gmra.mrb[64].mxu0 %v3291_v38  ;;  %v4516_v12 = vld [vmem:[#allocation4 + $0xd8] sm:$0x3]  ;;  %v9889_v28 = vld [vmem:[#allocation21_spill] sm:$0xff] }
 0x24c   : > { %3904 = vmatprep.mubr.bf16.mxu0 %v3299_v42  ;;  %6078 = vmatpush3.bf16.msra.mxu0 %v6985_v23  ;;  %v4898_v44 = vsel %vm4380_vm3, %v4896_v10, %v4897_v6  ;;  %v4410_v49 = vsel %vm4380_vm3, %v4408_v59, %v4409_v36  ;;  %v4414_v41 = vrot.slane %v4337_v22, 2  ;;  %v4415_v24 = vrot.slane %v4339_v45, 2  ;;  %v9886_v23 = vld [vmem:[#allocation17_spill] sm:$0xff]  ;;  %v6616_v0 = vpop.permute.xlu0 %6615 }
 0x24d   : > { %v6613_v35 = vunpack.i.h.bf16 %v6611_v58  ;;  %v6612_v43 = vunpack.i.l.bf16 %v6611_v58  ;;  %v6603_v61 = vunpack.i.h.bf16 %v6601_v34  ;;  %v6602_v1 = vunpack.i.l.bf16 %v6601_v34  ;;  %6079 = vmatprep.subr.bf16.mxu0 %v6986_v37  ;;  %v4687_v33 = vld [vmem:[#allocation4 + $0xc8] sm:$0xfe]  ;;  %v2499_v7 = vld [vmem:[#allocation3 + $0xa1] sm:$0xff]  ;;  %v6636_v16 = vpop.permute.xlu1 %6635 }
 0x24e   : > { %v4948_v38 = vmax.f32 %v4804_v13, %v4898_v44  ;;  %v4416_v54 = vsel %vm4380_vm3, %v4414_v41, %v4415_v24  ;;  %v9888_v50 = vmax.f32 %v9886_v23, %v9887_v21  ;;  %v4584_v48 = vrot.slane %v4510_v31, 2  ;;  %v4691_v31 = vld [vmem:[#allocation4 + $0xe8] sm:$0xfe] }
 0x24f   : > { %v3268_v60 = vsel %vm2327_vm0, %v2530_v51, %v6613_v35  ;;  %v3267_v14 = vsel %vm2327_vm0, %v2529_v9, %v6612_v43  ;;  %v9219_v30 = vsel %vm2966_vm5, %v3251_v15, %v6602_v1  ;;  %v9222_v47 = vsel %vm2966_vm5, %v3252_v4, %v6603_v61  ;;  %v2498_v4 = vld [vmem:[#allocation3 + $0x91] sm:$0xff]  ;;  %v9241_v9 = vld [vmem:[#allocation4 + $0xe8] sm:$0xff] }
 0x250   : > { %v4454_v19 = vmax.f32 %v9888_v50, %v4410_v49  ;;  %v3305_v29 = vpack.c.bf16 %v9222_v47, %v9219_v30  ;;  %6080 = vmatpush3.bf16.msra.mxu0 %v6986_v37  ;;  %v9226_v56 = vpack.c.bf16 %v4948_v38, %v4946_v57  ;;  %v9891_v18 = vmax.f32 %v9889_v28, %v9890_v46  ;;  %v4689_v57 = vld [vmem:[#allocation4 + $0xd8] sm:$0x1]  ;;  %v6621_v49 = vpop.permute.xlu0 %6620  ;;  %v4511_v30 = vld [vmem:[#allocation4 + $0xb0] sm:$0x3]  ;;  %v4513_v47 = vld [vmem:[#allocation4 + $0xc0] sm:$0xfc] }
 0x251   : > { %v6618_v10 = vunpack.i.h.bf16 %v6616_v0  ;;  %v6617_v52 = vunpack.i.l.bf16 %v6616_v0  ;;  %6002 = vmatprep.subr.bf16.mxu0 %v6987_v26  ;;  %v4585_v55 = vrot.slane %v4512_v63, 2  ;;  %v4590_v22 = vrot.slane %v4514_v2, 2  ;;  %v6641_v61 = vpop.permute.xlu1 %6640  ;;  %v4833_v63 = vld [vmem:[#allocation4 + $0xd8] sm:$0x3]  ;;  %v4835_v0 = vld [vmem:[#allocation4 + $0xe8] sm:$0xfc] }
 0x252   : > { %v4456_v42 = vmax.f32 %v9891_v18, %v4416_v54  ;;  %v4486_v13 = vmax.f32 %v4454_v19, %v9057_v27  ;;  %v6638_v45 = vunpack.i.h.bf16 %v6636_v16  ;;  %v6637_v6 = vunpack.i.l.bf16 %v6636_v16  ;;  %v4831_v54 = vld [vmem:[#allocation4 + $0xc8] sm:$0xfc]  ;;  %v4332_v16 = vld [vmem:[#allocation4 + $0x80] sm:$0xfc] }
 0x253   : > { %v4591_v37 = vrot.slane %v4516_v12, 2  ;;  %v3275_v36 = vsel %vm2957_vm4, %v3267_v14, %v6617_v52  ;;  %v3276_v15 = vsel %vm2957_vm4, %v3268_v60, %v6618_v10  ;;  %3905 = vmatmul.mubr.bf16.gmra.mrb[68].mxu0 %v3298_v8  ;;  %v4586_v27 = vsel %vm4380_vm3, %v4584_v48, %v4585_v55 }
 0x254   : > { %v4488_v59 = vmax.f32 %v4456_v42, %v4472_v3  ;;  %v4761_v58 = vrot.slane %v4687_v33, 1  ;;  %v3246_v34 = vsel %vm2327_vm0, %v2499_v7, %v6638_v45  ;;  %v3245_v44 = vsel %vm2327_vm0, %v2498_v4, %v6637_v6  ;;  %v6626_v60 = vpop.permute.xlu0 %6625  ;;  %v4837_v42 = vld [vmem:[#allocation4 + $0xf8] sm:$0x3] }
 0x255   : > { %v4592_v41 = vsel %vm4380_vm3, %v4590_v22, %v4591_v37  ;;  %v4630_v24 = vmax.f32 %v4486_v13, %v4586_v27  ;;  %v6623_v35 = vunpack.i.h.bf16 %v6621_v49  ;;  %v6622_v43 = vunpack.i.l.bf16 %v6621_v49  ;;  %v6646_v46 = vpop.permute.xlu1 %6645  ;;  %v4336_v37 = vld [vmem:[#allocation4 + $0xa0] sm:$0xfc] }
 0x256   : > { %v4632_v1 = vmax.f32 %v4488_v59, %v4592_v41  ;;  %v4762_v5 = vrot.slane %v4689_v57, 1  ;;  %v6643_v8 = vunpack.i.h.bf16 %v6641_v61  ;;  %v6642_v26 = vunpack.i.l.bf16 %v6641_v61  ;;  %v4334_v59 = vld [vmem:[#allocation4 + $0x90] sm:$0x3] }
 0x257   : > { %v4663_v51 = vmax.f32 %v4630_v24, %v4472_v3  ;;  %v4767_v38 = vrot.slane %v4691_v31, 1  ;;  %v3283_v23 = vsel %vm2966_vm5, %v3275_v36, %v6622_v43  ;;  %v3284_v21 = vsel %vm2966_vm5, %v3276_v15, %v6623_v35  ;;  %v4509_v31 = vld [vmem:[#allocation4 + $0xa0] sm:$0xfc] }
 0x258   : > { %v4665_v50 = vmax.f32 %v4632_v1, %v9241_v9  ;;  %v4763_v19 = vsel %vm4235_vm2, %v4761_v58, %v4762_v5  ;;  %v3253_v2 = vsel %vm2957_vm4, %v3245_v44, %v6642_v26  ;;  %v3254_v48 = vsel %vm2957_vm4, %v3246_v34, %v6643_v8  ;;  %v6631_v57 = vpop.permute.xlu0 %6630  ;;  %v4686_v43 = vld [vmem:[#allocation4 + $0xc0] sm:$0xfe]  ;;  %v4688_v8 = vld [vmem:[#allocation4 + $0xd0] sm:$0x1] }
 0x259   : > { %v3306_v14 = vpack.c.bf16 %v3284_v21, %v3283_v23  ;;  %v4768_v12 = vrot.slane %v4693_v53, 1  ;;  %v6628_v3 = vunpack.i.h.bf16 %v6626_v60  ;;  %v6627_v28 = vunpack.i.l.bf16 %v6626_v60  ;;  %v4690_v26 = vld [vmem:[#allocation4 + $0xe0] sm:$0xfe]  ;;  %v4692_v21 = vld [vmem:[#allocation4 + $0xf0] sm:$0x1] }
 0x25a   : > { %v4807_v18 = vmax.f32 %v4663_v51, %v4763_v19  ;;  %v4905_v13 = vrot.slane %v4831_v54, 2  ;;  %v6648_v33 = vunpack.i.h.bf16 %v6646_v46  ;;  %v6647_v10 = vunpack.i.l.bf16 %v6646_v46  ;;  %v9895_v46 = vld [vmem:[#allocation18_spill] sm:$0xff] }
 0x25b   : > { %3912 = vmatprep.mubr.bf16.mxu0 %v3306_v14  ;;  %v4769_v52 = vsel %vm4235_vm2, %v4767_v38, %v4768_v12  ;;  %v4906_v7 = vrot.slane %v4833_v63, 2  ;;  %v3277_v55 = vsel %vm2957_vm4, %v9200_v11, %v6627_v28  ;;  %v3278_v22 = vsel %vm2957_vm4, %v9197_v62, %v6628_v3  ;;  %v4338_v11 = vld [vmem:[#allocation4 + $0xb0] sm:$0x3]  ;;  %v4471_v12 = vld [vmem:[#allocation4 + $0xc0] sm:$0xff] }
 0x25c   : > { %3913 = vmatmul.mubr.bf16.gmra.mrb[72].mxu0 %v3305_v29  ;;  %v4809_v45 = vmax.f32 %v4665_v50, %v4769_v52  ;;  %v4911_v6 = vrot.slane %v4835_v0, 2  ;;  %v3261_v36 = vsel %vm2966_vm5, %v3253_v2, %v6647_v10  ;;  %v3262_v15 = vsel %vm2966_vm5, %v3254_v48, %v6648_v33  ;;  %v4515_v29 = vld [vmem:[#allocation4 + $0xd0] sm:$0x3]  ;;  %v4830_v50 = vld [vmem:[#allocation4 + $0xc0] sm:$0xfc]  ;;  %v9892_v2 = vld [vmem:[#allocation15_spill] sm:$0xff] }
 0x25d   : > { %v4907_v4 = vsel %vm4380_vm3, %v4905_v13, %v4906_v7  ;;  %v4912_v27 = vrot.slane %v4837_v42, 2  ;;  %v6633_v58 = vunpack.i.h.bf16 %v6631_v57  ;;  %v6632_v62 = vunpack.i.l.bf16 %v6631_v57  ;;  %v9893_v48 = vld [vmem:[#allocation16_spill] sm:$0xff]  ;;  %v4832_v3 = vld [vmem:[#allocation4 + $0xd0] sm:$0x3]  ;;  %v4834_v28 = vld [vmem:[#allocation4 + $0xe0] sm:$0xfc] }
 0x25e   : > { %v3312_v34 = vpack.c.bf16 %v3262_v15, %v3261_v36  ;;  %v4951_v44 = vmax.f32 %v4807_v18, %v4907_v4  ;;  %v4405_v41 = vrot.slane %v4332_v16, 2  ;;  %v4406_v24 = vrot.slane %v4334_v59, 2  ;;  %v9896_v18 = vld [vmem:[#allocation20_spill] sm:$0xff]  ;;  %v4836_v7 = vld [vmem:[#allocation4 + $0xf0] sm:$0x3]  ;;  %v9899_v57 = vld [vmem:[#allocation35_spill] sm:$0xff] }
 0x25f   : > { %v4913_v49 = vsel %vm4380_vm3, %v4911_v6, %v4912_v27  ;;  %v4411_v35 = vrot.slane %v4336_v37, 2  ;;  %v3285_v61 = vsel %vm2966_vm5, %v3277_v55, %v6632_v62  ;;  %v3286_v1 = vsel %vm2966_vm5, %v3278_v22, %v6633_v58  ;;  %v4341_v16 = vld [vmem:[#allocation4 + $0xc8] sm:$0xfc]  ;;  %v4343_v59 = vld [vmem:[#allocation4 + $0xd8] sm:$0x3]  ;;  %v9898_v37 = vld [vmem:[#allocation36_spill] sm:$0xff] }
 0x260   : > { %v4953_v53 = vmax.f32 %v4809_v45, %v4913_v49  ;;  %v4412_v5 = vrot.slane %v4338_v11, 2  ;;  %v3313_v51 = vpack.c.bf16 %v3286_v1, %v3285_v61  ;;  %v4407_v38 = vsel %vm4380_vm3, %v4405_v41, %v4406_v24  ;;  %v4347_v58 = vld [vmem:[#allocation4 + $0xf8] sm:$0x3]  ;;  %v6988_v61 = vld [vmem:[%s9758_s7] sm:$0xff]  }
 0x261   : > { %v4581_v54 = vrot.slane %v4509_v31, 2  ;;  %v4582_v23 = vrot.slane %v4511_v30, 2  ;;  %v9894_v60 = vmax.f32 %v9892_v2, %v9893_v48  ;;  %v4587_v0 = vrot.slane %v4513_v47, 2  ;;  %v4345_v31 = vld [vmem:[#allocation4 + $0xe8] sm:$0xfc] }
 0x262   : > { %v9264_v19 = vpack.c.bf16 %v4953_v53, %v4951_v44  ;;  %v4413_v63 = vsel %vm4380_vm3, %v4411_v35, %v4412_v5  ;;  %3920 = vmatprep.mubr.bf16.mxu0 %v3313_v51  ;;  %v9897_v42 = vmax.f32 %v9895_v46, %v9896_v18  ;;  %v4588_v10 = vrot.slane %v4515_v29, 2  ;;  %v4518_v47 = vld [vmem:[#allocation4 + $0xe8] sm:$0xfc]  ;;  %v4520_v29 = vld [vmem:[#allocation4 + $0xf8] sm:$0x3] }
 0x263   : > { %v4453_v14 = vmax.f32 %v9894_v60, %v4407_v38  ;;  %v4583_v33 = vsel %vm4380_vm3, %v4581_v54, %v4582_v23  ;;  %v4758_v52 = vrot.slane %v4686_v43, 1  ;;  %v4759_v22 = vrot.slane %v4688_v8, 1  ;;  %v4522_v43 = vld [vmem:[#allocation4 + $0x108] sm:$0xfc] }
 0x264   : > { %v4455_v13 = vmax.f32 %v9897_v42, %v4413_v63  ;;  %3921 = vmatmul.mubr.bf16.gmra.mrb[76].mxu0 %v3312_v34  ;;  %v4764_v45 = vrot.slane %v4690_v26, 1  ;;  %v4765_v6 = vrot.slane %v4692_v21, 1  ;;  %v9900_v36 = vpack.c.bf16 %v9898_v37, %v9899_v57  ;;  %v9280_v34 = vld [vmem:[#allocation4 + $0xe0] sm:$0xff]  ;;  %v4524_v26 = vld [vmem:[#allocation4 + $0x118] sm:$0x3]  ;;  %v6989_v63 = vld [vmem:[%s9758_s7 + $0x48] sm:$0xff]  }
 0x265   : > { %v4485_v55 = vmax.f32 %v4453_v14, %v9158_v32  ;;  %v4589_v4 = vsel %vm4380_vm3, %v4587_v0, %v4588_v10  ;;  %v4902_v27 = vrot.slane %v4830_v50, 2  ;;  %v4903_v11 = vrot.slane %v4832_v3, 2  ;;  %v4695_v21 = vld [vmem:[#allocation4 + $0x108] sm:$0xfe]  ;;  %v4697_v50 = vld [vmem:[#allocation4 + $0x118] sm:$0x1] }
 0x266   : > { %6081 = vmatprep.mubr.msk.bf16.mxu0 %vm2327_vm0, %v9900_v36  ;;  %v4487_v15 = vmax.f32 %v4455_v13, %v4471_v12  ;;  %v4760_v32 = vsel %vm4235_vm2, %v4758_v52, %v4759_v22  ;;  %v4766_v44 = vsel %vm4235_vm2, %v4764_v45, %v4765_v6  ;;  %v4908_v30 = vrot.slane %v4834_v28, 2  ;;  %v4476_v14 = vld [vmem:[#allocation4 + $0x108] sm:$0xff]  ;;  %v9901_v28 = vld [vmem:[#allocation24_spill] sm:$0xff]  ;;  %v4841_v22 = vld [vmem:[#allocation4 + $0x118] sm:$0x3] }
 0x267   : > { %v4629_v62 = vmax.f32 %v4485_v55, %v4583_v33  ;;  %v4904_v41 = vsel %vm4380_vm3, %v4902_v27, %v4903_v11  ;;  %v4909_v24 = vrot.slane %v4836_v7, 2  ;;  %v4420_v35 = vrot.slane %v4341_v16, 2  ;;  %v4699_v0 = vld [vmem:[#allocation4 + $0x128] sm:$0xfe]  ;;  %v9904_v13 = vld [vmem:[#allocation28_spill] sm:$0xff] }
 0x268   : > { %v4631_v49 = vmax.f32 %v4487_v15, %v4589_v4  ;;  %v4421_v53 = vrot.slane %v4343_v59, 2  ;;  %v4426_v5 = vrot.slane %v4345_v31, 2  ;;  %v4427_v8 = vrot.slane %v4347_v58, 2  ;;  %v9902_v46 = vld [vmem:[#allocation26_spill] sm:$0xff]  ;;  %v4701_v16 = vld [vmem:[#allocation4 + $0x138] sm:$0x1] }
 0x269   : > { %v4662_v1 = vmax.f32 %v4629_v62, %v4471_v12  ;;  %v4910_v38 = vsel %vm4380_vm3, %v4908_v30, %v4909_v24  ;;  %v4596_v54 = vrot.slane %v4518_v47, 2  ;;  %v4597_v23 = vrot.slane %v4520_v29, 2  ;;  %v9905_v33 = vld [vmem:[#allocation30_spill] sm:$0xff]  ;;  %v9909_v27 = vld [vmem:[#allocation37_spill] sm:$0xff] }
 0x26a   : > { %v4664_v51 = vmax.f32 %v4631_v49, %v9280_v34  ;;  %v4422_v48 = vsel %vm4380_vm3, %v4420_v35, %v4421_v53  ;;  %v4428_v60 = vsel %vm4380_vm3, %v4426_v5, %v4427_v8  ;;  %v4602_v12 = vrot.slane %v4522_v43, 2  ;;  %v4839_v55 = vld [vmem:[#allocation4 + $0x108] sm:$0xfc]  ;;  %v4344_v24 = vld [vmem:[#allocation4 + $0xe0] sm:$0xfc] }
 0x26b   : > { %v4806_v2 = vmax.f32 %v4662_v1, %v4760_v32  ;;  %v9903_v18 = vmax.f32 %v9901_v28, %v9902_v46  ;;  %v9906_v10 = vmax.f32 %v9904_v13, %v9905_v33  ;;  %v4598_v7 = vsel %vm4380_vm3, %v4596_v54, %v4597_v23  ;;  %v6990_v6 = vld [vmem:[%s9758_s7 + $0x8] sm:$0xff]   ;;  %v4845_v32 = vld [vmem:[#allocation4 + $0x138] sm:$0x3]  ;;  %v4346_v53 = vld [vmem:[#allocation4 + $0xf0] sm:$0x3] }
 0x26c   : > { %v4808_v3 = vmax.f32 %v4664_v51, %v4766_v44  ;;  %v9907_v45 = vpack.c.bf16 %v8719_v39, %v8717_v17  ;;  %v4603_v37 = vrot.slane %v4524_v26, 2  ;;  %v4773_v57 = vrot.slane %v4695_v21, 1  ;;  %v4843_v15 = vld [vmem:[#allocation4 + $0x128] sm:$0xfc]  ;;  %v6991_v17 = vld [vmem:[%s9758_s7 + $0x50] sm:$0xff]   ;;  %v9325_v21 = vld [vmem:[#allocation4] sm:$0xff] }
 0x26d   : > { %v4458_v42 = vmax.f32 %v9903_v18, %v4422_v48  ;;  %v4460_v52 = vmax.f32 %v9906_v10, %v4428_v60  ;;  %v4950_v59 = vmax.f32 %v4806_v2, %v4904_v41  ;;  %v4774_v36 = vrot.slane %v4697_v50, 1  ;;  %v9908_v4 = vld [vmem:[#allocation38_spill] sm:$0xff]  ;;  %v4340_v44 = vld [vmem:[#allocation4 + $0xc0] sm:$0xfc] }
 0x26e   : > { %6082 = vmatmul.mubr.msk.bf16.vlgmr.msra.gmra.mrb[80].mxu0 %vm2327_vm0, %v9907_v45  ;;  %v9910_v11 = vpack.c.bf16 %v9908_v4, %v9909_v27  ;;  %v4952_v39 = vmax.f32 %v4808_v3, %v4910_v38  ;;  %v4779_v62 = vrot.slane %v4699_v0, 1  ;;  %v4604_v30 = vsel %vm4380_vm3, %v4602_v12, %v4603_v37  ;;  %v4342_v41 = vld [vmem:[#allocation4 + $0xd0] sm:$0x3]  ;;  %v4521_v48 = vld [vmem:[#allocation4 + $0x100] sm:$0xfc]  ;;  %v6993_v12 = vld [vmem:[%s9758_s7 + $0x58] sm:$0xff]  }
 0x26f   : > { %6003 = vmatpush3.bf16.msra.mxu0 %v6988_v61  ;;  %v4490_v31 = vmax.f32 %v4458_v42, %v9241_v9  ;;  %v4492_v58 = vmax.f32 %v4460_v52, %v4476_v14  ;;  %v4775_v47 = vsel %vm4235_vm2, %v4773_v57, %v4774_v36  ;;  %v4780_v29 = vrot.slane %v4701_v16, 1  ;;  %v4517_v9 = vld [vmem:[#allocation4 + $0xe0] sm:$0xfc]  ;;  %v4519_v38 = vld [vmem:[#allocation4 + $0xf0] sm:$0x3]  ;;  %v9912_v16 = vld [vmem:[#allocation39_spill] sm:$0xff] }
 0x270   : > { %6085 = vmatprep.mubr.msk.bf16.mxu0 %vm2327_vm0, %v9910_v11  ;;  %6004 = vmatprep.subr.bf16.mxu0 %v6989_v63  ;;  %v4917_v49 = vrot.slane %v4839_v55, 2  ;;  %v9319_v35 = vpack.c.bf16 %v4952_v39, %v4950_v59  ;;  %v4918_v1 = vrot.slane %v4841_v22, 2  ;;  %v4923_v8 = vrot.slane %v4843_v15, 2  ;;  %v6992_v54 = vld [vmem:[%s9758_s7 + $0x10] sm:$0xff]   ;;  %v4475_v33 = vld [vmem:[#allocation4 + $0x100] sm:$0xff]  ;;  %v6994_v27 = vld [vmem:[%s9758_s7 + $0x18] sm:$0xff]  }
 0x271   : > { %v4634_v43 = vmax.f32 %v4490_v31, %v4598_v7  ;;  %v4636_v61 = vmax.f32 %v4492_v58, %v4604_v30  ;;  %v4781_v5 = vsel %vm4235_vm2, %v4779_v62, %v4780_v29  ;;  %v4924_v26 = vrot.slane %v4845_v32, 2  ;;  %v4523_v60 = vld [vmem:[#allocation4 + $0x110] sm:$0x3]  ;;  %v9911_v7 = vld [vmem:[#allocation40_spill] sm:$0xff]  ;;  %v9914_v45 = vld [vmem:[#allocation23_spill] sm:$0xff] }
 0x272   : > { %v4417_v51 = vrot.slane %v4340_v44, 2  ;;  %v4919_v63 = vsel %vm4380_vm3, %v4917_v49, %v4918_v1  ;;  %v4418_v2 = vrot.slane %v4342_v41, 2  ;;  %v4423_v3 = vrot.slane %v4344_v24, 2  ;;  %v4696_v52 = vld [vmem:[#allocation4 + $0x110] sm:$0x1]  ;;  %v9917_v39 = vld [vmem:[#allocation27_spill] sm:$0xff] }
 0x273   : > { %6005 = vmatpush3.bf16.msra.mxu0 %v6990_v6  ;;  %v4667_v23 = vmax.f32 %v4634_v43, %v4476_v14  ;;  %v4669_v50 = vmax.f32 %v4636_v61, %v9325_v21  ;;  %v4925_v0 = vsel %vm4380_vm3, %v4923_v8, %v4924_v26  ;;  %v4424_v28 = vrot.slane %v4346_v53, 2  ;;  %v4694_v14 = vld [vmem:[#allocation4 + $0x100] sm:$0xfe]  ;;  %v4700_v4 = vld [vmem:[#allocation4 + $0x130] sm:$0x1] }
 0x274   : > { %6006 = vmatprep.subr.bf16.mxu0 %v6991_v17  ;;  %v4593_v46 = vrot.slane %v4517_v9, 2  ;;  %v4419_v13 = vsel %vm4380_vm3, %v4417_v51, %v4418_v2  ;;  %v4594_v10 = vrot.slane %v4519_v38, 2  ;;  %v9913_v55 = vpack.c.bf16 %v9911_v7, %v9912_v16  ;;  %v9915_v6 = vld [vmem:[#allocation25_spill] sm:$0xff]  ;;  %v4840_v30 = vld [vmem:[#allocation4 + $0x110] sm:$0x3] }
 0x275   : > { %v4811_v18 = vmax.f32 %v4667_v23, %v4775_v47  ;;  %v4813_v42 = vmax.f32 %v4669_v50, %v4781_v5  ;;  %v4425_v22 = vsel %vm4380_vm3, %v4423_v3, %v4424_v28  ;;  %v9916_v59 = vmax.f32 %v9914_v45, %v9915_v6  ;;  %v4698_v15 = vld [vmem:[#allocation4 + $0x120] sm:$0xfe]  ;;  %v4844_v43 = vld [vmem:[#allocation4 + $0x130] sm:$0x3]  ;;  %v6997_v50 = vld [vmem:[%s9758_s7 + $0x68] sm:$0xff]  }
 0x276   : > { %6086 = vmatmul.mubr.msk.bf16.gmra.mrb[84].mxu0 %vm2327_vm0, %v9913_v55  ;;  %v4599_v57 = vrot.slane %v4521_v48, 2  ;;  %v4600_v36 = vrot.slane %v4523_v60, 2  ;;  %v9918_v31 = vld [vmem:[#allocation29_spill] sm:$0xff]  ;;  %v4770_v32 = vrot.slane %v4694_v14, 1  ;;  %v4595_v49 = vsel %vm4380_vm3, %v4593_v46, %v4594_v10  ;;  %v6999_v46 = vld [vmem:[%s9758_s7 + $0x70] sm:$0xff]   ;;  %v5298_v6 = vld [vmem:[%s9760_s9 + $0x98] sm:$0xff] }
 0x277   : > { %v4457_v37 = vmax.f32 %v9916_v59, %v4419_v13  ;;  %6007 = vmatpush3.bf16.msra.mxu0 %v6992_v54  ;;  %5133 = vmatprep.mubr.bf16.mxu0 %v8961_v25  ;;  %v4955_v11 = vmax.f32 %v4811_v18, %v4919_v63  ;;  %v4957_v17 = vmax.f32 %v4813_v42, %v4925_v0  ;;  %v4838_v44 = vld [vmem:[#allocation4 + $0x100] sm:$0xfc]  ;;  %v4771_v41 = vrot.slane %v4696_v52, 1  ;;  %v6998_v3 = vld [vmem:[%s9758_s7 + $0x28] sm:$0xff]   ;;  %v7001_v13 = vld [vmem:[%s9758_s7 + $0x78] sm:$0xff]  }
 0x278   : > { %v9919_v58 = vmax.f32 %v9917_v39, %v9918_v31  ;;  %6008 = vmatprep.subr.bf16.mxu0 %v6993_v12  ;;  %v6995_v47 = vld [vmem:[%s9758_s7 + $0x60] sm:$0xff]   ;;  %v4601_v25 = vsel %vm4380_vm3, %v4599_v57, %v4600_v36  ;;  %v4776_v53 = vrot.slane %v4698_v15, 1  ;;  %v4777_v9 = vrot.slane %v4700_v4, 1  ;;  %v5296_v52 = vld [vmem:[%s9760_s9 + $0x88] sm:$0xff]  ;;  %v5297_v45 = vld [vmem:[%s9760_s9 + $0x90] sm:$0xff] }
 0x279   : > { %v4489_v29 = vmax.f32 %v4457_v37, %v9280_v34  ;;  %v4842_v24 = vld [vmem:[#allocation4 + $0x120] sm:$0xfc]  ;;  %v9355_v61 = vpack.c.bf16 %v4957_v17, %v4955_v11  ;;  %v4914_v8 = vrot.slane %v4838_v44, 2  ;;  %v4915_v26 = vrot.slane %v4840_v30, 2  ;;  %v5280_v55 = vld [vmem:[%s9760_s9 + $0x8] sm:$0xff]  ;;  %v5281_v59 = vld [vmem:[%s9760_s9 + $0x10] sm:$0xff] }
 0x27a   : > { %v4459_v62 = vmax.f32 %v9919_v58, %v4425_v22  ;;  %v6996_v34 = vld [vmem:[%s9758_s7 + $0x20] sm:$0xff]   ;;  %v4772_v38 = vsel %vm4235_vm2, %v4770_v32, %v4771_v41  ;;  %v4920_v54 = vrot.slane %v4842_v24, 2  ;;  %v4921_v23 = vrot.slane %v4844_v43, 2  ;;  %v5300_v36 = vld [vmem:[%s9760_s9 + $0xa8] sm:$0xff]  ;;  %v5301_v17 = vld [vmem:[%s9760_s9 + $0xb0] sm:$0xff] }
 0x27b   : > { %v4633_v5 = vmax.f32 %v4489_v29, %v4595_v49  ;;  %6009 = vmatpush3.bf16.msra.mxu0 %v6994_v27  ;;  %v4778_v2 = vsel %vm4235_vm2, %v4776_v53, %v4777_v9  ;;  %v4916_v60 = vsel %vm4380_vm3, %v4914_v8, %v4915_v26  ;;  %v5295_v10 = vld [vmem:[%s9760_s9 + $0x80] sm:$0xff]  ;;  %v6093_v37 = vpack.c.bf16 %v5298_v6, %v5297_v45  ;;  %v5284_v27 = vld [vmem:[%s9760_s9 + $0x28] sm:$0xff]  ;;  %v5302_v39 = vld [vmem:[%s9760_s9 + $0xb8] sm:$0xff] }
 0x27c   : > { %v4491_v1 = vmax.f32 %v4459_v62, %v4475_v33  ;;  %6010 = vmatprep.subr.bf16.mxu0 %v6995_v47  ;;  %v4922_v0 = vsel %vm4380_vm3, %v4920_v54, %v4921_v23  ;;  %v6089_v7 = vpack.c.bf16 %v5296_v52, %v5295_v10  ;;  %v5279_v16 = vld [vmem:[%s9760_s9] sm:$0xff]  ;;  %v6101_v31 = vpack.c.bf16 %v5302_v39, %v5301_v17  ;;  %v5304_v62 = vld [vmem:[%s9760_s9 + $0xc8] sm:$0xff]  ;;  %v5305_v47 = vld [vmem:[%s9760_s9 + $0xd0] sm:$0xff] }
 0x27d   : > { %v4666_v63 = vmax.f32 %v4633_v5, %v4475_v33  ;;  %v7002_v33 = vld [vmem:[%s9758_s7 + $0x38] sm:$0xff]   ;;  %v6091_v22 = vpack.c.bf16 %v5280_v55, %v5279_v16  ;;  %v5283_v4 = vld [vmem:[%s9760_s9 + $0x20] sm:$0xff]  ;;  %v5288_v44 = vld [vmem:[%s9760_s9 + $0x48] sm:$0xff] }
 0x27e   : > { %v4635_v51 = vmax.f32 %v4491_v1, %v4601_v25  ;;  %6090 = vmatprep.subr.bf16.mxu1 %v6089_v7  ;;  %v6099_v11 = vpack.c.bf16 %v5284_v27, %v5283_v4  ;;  %v5287_v32 = vld [vmem:[%s9760_s9 + $0x40] sm:$0xff]  ;;  %v5306_v29 = vld [vmem:[%s9760_s9 + $0xd8] sm:$0xff]  ;;  %v5289_v41 = vld [vmem:[%s9760_s9 + $0x50] sm:$0xff] }
 0x27f   : > { %v4810_v12 = vmax.f32 %v4666_v63, %v4772_v38  ;;  %6011 = vmatpush3.bf16.msra.mxu0 %v6996_v34  ;;  %6092 = vmatpush3.bf16.msra.mxu1 %v6091_v22  ;;  %v6107_v49 = vpack.c.bf16 %v5288_v44, %v5287_v32  ;;  %v6109_v25 = vpack.c.bf16 %v5306_v29, %v5305_v47  ;;  %v5290_v24 = vld [vmem:[%s9760_s9 + $0x58] sm:$0xff]  ;;  %v5307_v43 = vld [vmem:[%s9760_s9 + $0xe0] sm:$0xff]  ;;  %v5292_v5 = vld [vmem:[%s9760_s9 + $0x68] sm:$0xff] }
 0x280   : > { %v4668_v48 = vmax.f32 %v4635_v51, %v9325_v21  ;;  %6012 = vmatprep.subr.bf16.mxu0 %v6997_v50  ;;  %v7000_v21 = vld [vmem:[%s9758_s7 + $0x30] sm:$0xff]   ;;  %6094 = vmatprep.subr.bf16.mxu1 %v6093_v37  ;;  %v6111_v1 = vpack.c.bf16 %v5290_v24, %v5289_v41  ;;  %v5291_v9 = vld [vmem:[%s9760_s9 + $0x60] sm:$0xff]  ;;  %v5310_v26 = vld [vmem:[%s9760_s9 + $0xf8] sm:$0xff] }
 0x281   : > { %v4954_v14 = vmax.f32 %v4810_v12, %v4916_v60  ;;  %v5309_v8 = vld [vmem:[%s9760_s9 + $0xf0] sm:$0xff]  ;;  %v6115_v34 = vpack.c.bf16 %v5292_v5, %v5291_v9  ;;  %v5294_v54 = vld [vmem:[%s9760_s9 + $0x78] sm:$0xff]  ;;  %v1214_v7 = vld [vmem:[%s9755_s4] sm:$0x3] }
 0x282   : > { %v4812_v28 = vmax.f32 %v4668_v48, %v4778_v2  ;;  %v6117_v51 = vpack.c.bf16 %v5310_v26, %v5309_v8  ;;  %v5293_v38 = vld [vmem:[%s9760_s9 + $0x70] sm:$0xff]  ;;  %v9920_v16 = vld [vmem:[#allocation9_spill] sm:$0xff]  ;;  %v9518_v41 = vld [vmem:[%s9757_s6] ss:$0 sm:$0xff] }
 0x283   : > { %6013 = vmatpush3.bf16.msra.mxu0 %v6998_v3  ;;  %v6119_v23 = vpack.c.bf16 %v5294_v54, %v5293_v38  ;;  %v9921_v55 = vsub.s32 0, %v9920_v16  ;;  %v9922_v45 = vsub.s32 1, %v9920_v16 }
 0x284   : > { %v4956_v18 = vmax.f32 %v4812_v28, %v4922_v0  ;;  %6014 = vmatprep.subr.bf16.mxu0 %v6999_v46 }
 0x285   : > { %v9498_v22 = vrot.slane %v1214_v7, %v9921_v55  ;;  %v9502_v6 = vrot.slane %v1214_v7, %v9922_v45 }
 0x286   : > { %v4964_v42 = vpack.c.bf16 %v4956_v18, %v4954_v14 }
 0x287   : > { %6015 = vmatpush3.bf16.msra.mxu0 %v7000_v21 }
 0x288   : > { %6016 = vmatprep.subr.bf16.mxu0 %v7001_v13 }
 0x28b   : > { %6017 = vmatpush3.bf16.msra.mxu0 %v7002_v33 }
 0x28e   : > { %5134 = vmatmul.mubr.bf16.vlgmr.msra.gmra.mrb[88].mxu0 %v9000_v40  ;;  %v5282_v40 = vld [vmem:[%s9760_s9 + $0x18] sm:$0xff] }
 0x28f   : > { %5141 = vmatprep.mubr.bf16.mxu0 %v9118_v20  ;;  %v6095_v57 = vpack.c.bf16 %v5282_v40, %v5281_v59  ;;  %v5299_v20 = vld [vmem:[%s9760_s9 + $0xa0] sm:$0xff] }
 0x290   : > { %v6097_v15 = vpack.c.bf16 %v5300_v36, %v5299_v20 }
 0x291   : > { %6096 = vmatpush3.bf16.msra.mxu1 %v6095_v57 }
 0x292   : > { %6098 = vmatprep.subr.bf16.mxu1 %v6097_v15 }
 0x295   : > { %6100 = vmatpush3.bf16.msra.mxu1 %v6099_v11 }
 0x296   : > { %5142 = vmatmul.mubr.bf16.gmra.mrb[92].mxu0 %v9226_v56  ;;  %v5285_v56 = vld [vmem:[%s9760_s9 + $0x30] sm:$0xff]  ;;  %6102 = vmatprep.subr.bf16.mxu1 %v6101_v31 }
 0x297   : > { %5149 = vmatprep.mubr.bf16.mxu0 %v9264_v19  ;;  %v5286_v19 = vld [vmem:[%s9760_s9 + $0x38] sm:$0xff] }
 0x298   : > { %v6103_v58 = vpack.c.bf16 %v5286_v19, %v5285_v56 }
 0x29a   : > { %6104 = vmatpush3.bf16.msra.mxu1 %v6103_v58 }
 0x29e   : > { %5150 = vmatmul.mubr.bf16.gmra.mrb[96].mxu0 %v9319_v35  ;;  %v5303_v35 = vld [vmem:[%s9760_s9 + $0xc0] sm:$0xff] }
 0x29f   : > { %5157 = vmatprep.mubr.bf16.mxu0 %v9355_v61  ;;  %v6105_v30 = vpack.c.bf16 %v5304_v62, %v5303_v35  ;;  %v5308_v61 = vld [vmem:[%s9760_s9 + $0xe8] sm:$0xff] }
 0x2a0   : > { %v6113_v53 = vpack.c.bf16 %v5308_v61, %v5307_v43 }
 0x2a1   : > { %6106 = vmatprep.subr.bf16.mxu1 %v6105_v30 }
 0x2a2   : > { %6108 = vmatpush3.bf16.msra.mxu1 %v6107_v49 }
 0x2a3   : > { %6110 = vmatprep.subr.bf16.mxu1 %v6109_v25 }
 0x2a6   : > { %5158 = vmatmul.mubr.bf16.gmra.mrb[100].mxu0 %v4964_v42  ;;  %6112 = vmatpush3.bf16.msra.mxu1 %v6111_v1 }
 0x2a7   : > { %6114 = vmatprep.subr.bf16.mxu1 %v6113_v53 }
 0x2aa   : > { %6116 = vmatpush3.bf16.msra.mxu1 %v6115_v34 }
 0x2ab   : > { %6118 = vmatprep.subr.bf16.mxu1 %v6117_v51 }
 0x2ad   : > { %v5892_v50 = vpop.f32.mrb[32].mxu0 }
 0x2ae   : > { %6120 = vmatpush3.bf16.msra.mxu1 %v6119_v23  ;;  %v5893_v63 = vpop.f32.mrb[33].mxu0 }
 0x2af   : > { %v5894_v2 = vadd.f32 %v5893_v63, %v5892_v50  ;;  %v5895_v48 = vpop.f32.mrb[34].mxu0 }
 0x2b0   : > { %v5896_v60 = vpop.f32.mrb[35].mxu0 }
 0x2b1   : > { %v5897_v12 = vadd.f32 %v5896_v60, %v5895_v48  ;;  %v3769_v34 = vadd.f32 %v5894_v2, %v9518_v41 }
 0x2b3   : > { %v3772_v50 = vadd.f32 %v5897_v12, %v9518_v41 }
 0x2c1   : > { %v5898_v0 = vpop.f32.mrb[36].mxu0 }
 0x2c2   : > { %v5899_v3 = vpop.f32.mrb[37].mxu0 }
 0x2c3   : > { %v9485_v28 = vadd.f32 %v5899_v3, %v5898_v0  ;;  %v5901_v46 = vpop.f32.mrb[38].mxu0 }
 0x2c4   : > { %v5902_v14 = vpop.f32.mrb[39].mxu0 }
 0x2c5   : > { %v9487_v18 = vadd.f32 %v5902_v14, %v5901_v46 }
 0x2da   : > { %v5904_v21 = vpop.f32.mrb[40].mxu0 }
 0x2db   : > { %v5905_v42 = vpop.f32.mrb[41].mxu0 }
 0x2dc   : > { %v9489_v13 = vadd.f32 %v5905_v42, %v5904_v21  ;;  %v5907_v33 = vpop.f32.mrb[42].mxu0 }
 0x2dd   : > { %v5908_v10 = vpop.f32.mrb[43].mxu0 }
 0x2de   : > { %v9491_v52 = vadd.f32 %v5908_v10, %v5907_v33 }
 0x2f2   : > { %v2272_v59 = vpop.f32.mrb[0].mxu1 }
 0x2f3   : > { %v6163_v37 = vadd.f32 %v2272_v59, %v9498_v22  ;;  %v2274_v40 = vpop.f32.mrb[1].mxu1  ;;  %v5910_v4 = vpop.f32.mrb[44].mxu0 }
 0x2f4   : > { %v6164_v57 = vadd.f32 %v2274_v40, %v9502_v6  ;;  %v2276_v20 = vpop.f32.mrb[2].mxu1  ;;  %v5911_v17 = vpop.f32.mrb[45].mxu0  ;;  %v9923_v40 = vld [vmem:[#allocation10_spill] sm:$0xff] }
 0x2f5   : > { %v6165_v36 = vadd.f32 %v2276_v20, %v9498_v22  ;;  %v2278_v15 = vpop.f32.mrb[3].mxu1  ;;  %v2311_v39 = vmax.f32 %v6163_v37, 0.0  ;;  %v9508_v56 = vadd.f32 %v5911_v17, %v5910_v4  ;;  %v5913_v19 = vpop.f32.mrb[46].mxu0  ;;  %v3777_v4 = vadd.f32 %v9485_v28, %v9518_v41 }
 0x2f6   : > { %v2312_v27 = vmax.f32 %v6164_v57, 0.0  ;;  %v6166_v11 = vadd.f32 %v2278_v15, %v9502_v6  ;;  %v5914_v58 = vpop.f32.mrb[47].mxu0  ;;  %v5181_v57 = vrot.slane %v9923_v40, 4 }
 0x2f7   : > { %v2313_v31 = vmax.f32 %v6165_v36, 0.0  ;;  %v9510_v32 = vadd.f32 %v5914_v58, %v5913_v19 }
 0x2f8   : > { %v2314_v35 = vmax.f32 %v6166_v11, 0.0  ;;  %v5202_v44 = vsel %vm2957_vm4, %v2312_v27, 0.0 }
 0x2f9   : > { %v5189_v62 = vadd.f32 %v2313_v31, %v2311_v39  ;;  %v3780_v31 = vadd.f32 %v9487_v18, %v9518_v41 }
 0x2fa   : > { %v5203_v30 = vsel %vm2957_vm4, %v2314_v35, 0.0 }
 0x2fb   : > { %v2282_v47 = vpop.f32.mrb[4].mxu1  ;;  %v5204_v29 = vadd.f32 %v5203_v30, %v5202_v44 }
 0x2fc   : > { %v6167_v49 = vadd.f32 %v2282_v47, %v9498_v22  ;;  %v2284_v25 = vpop.f32.mrb[5].mxu1 }
 0x2fd   : > { %v6168_v24 = vadd.f32 %v2284_v25, %v9502_v6  ;;  %v2286_v43 = vpop.f32.mrb[6].mxu1 }
 0x2fe   : > { %v2315_v61 = vmax.f32 %v6167_v49, 0.0  ;;  %v6169_v1 = vadd.f32 %v2286_v43, %v9498_v22  ;;  %v2288_v53 = vpop.f32.mrb[7].mxu1  ;;  %v5932_v9 = vpop.f32.mrb[48].mxu0 }
 0x2ff   : > { %v2316_v5 = vmax.f32 %v6168_v24, 0.0  ;;  %v6170_v8 = vadd.f32 %v2288_v53, %v9502_v6  ;;  %v5933_v26 = vpop.f32.mrb[49].mxu0 }
 0x300   : > { %v5190_v51 = vadd.f32 %v5189_v62, %v2315_v61  ;;  %v2317_v38 = vmax.f32 %v6169_v1, 0.0  ;;  %v5934_v54 = vadd.f32 %v5933_v26, %v5932_v9  ;;  %v5935_v23 = vpop.f32.mrb[50].mxu0 }
 0x301   : > { %v5205_v63 = vsel %vm2957_vm4, %v2316_v5, 0.0  ;;  %v2318_v48 = vmax.f32 %v6170_v8, 0.0  ;;  %v5936_v60 = vpop.f32.mrb[51].mxu0 }
 0x302   : > { %v5206_v0 = vadd.f32 %v5205_v63, %v5204_v29  ;;  %v5191_v3 = vadd.f32 %v5190_v51, %v2317_v38  ;;  %v9526_v46 = vadd.f32 %v5934_v54, %v3769_v34  ;;  %v5937_v14 = vadd.f32 %v5936_v60, %v5935_v23 }
 0x303   : > { %v5207_v21 = vsel %vm2957_vm4, %v2318_v48, 0.0  ;;  %v5182_v29 = vadd.f32 %v5181_v57, %v9923_v40  ;;  %v3785_v54 = vadd.f32 %v9489_v13, %v9518_v41  ;;  %v3788_v60 = vadd.f32 %v9491_v52, %v9518_v41  ;;  %v5313_v52 = vld [vmem:[%s9760_s9 + $0x110] sm:$0xff] }
 0x304   : > { %v2292_v42 = vpop.f32.mrb[8].mxu1  ;;  %v5208_v33 = vadd.f32 %v5207_v21, %v5206_v0  ;;  %v9529_v2 = vadd.f32 %v5937_v14, %v3772_v50  ;;  %v5311_v14 = vld [vmem:[%s9760_s9 + $0x100] sm:$0xff] }
 0x305   : > { %v6171_v10 = vadd.f32 %v2292_v42, %v9498_v22  ;;  %v2294_v7 = vpop.f32.mrb[9].mxu1  ;;  %v5183_v26 = vrot.slane %v5182_v29, 2 }
 0x306   : > { %v6172_v12 = vadd.f32 %v2294_v7, %v9502_v6  ;;  %v2296_v16 = vpop.f32.mrb[10].mxu1  ;;  %v5938_v37 = vpop.f32.mrb[52].mxu0  ;;  %v5314_v7 = vld [vmem:[%s9760_s9 + $0x118] sm:$0xff] }
 0x307   : > { %v2319_v55 = vmax.f32 %v6171_v10, 0.0  ;;  %v6173_v45 = vadd.f32 %v2296_v16, %v9498_v22  ;;  %v2298_v59 = vpop.f32.mrb[11].mxu1  ;;  %v5939_v15 = vpop.f32.mrb[53].mxu0  ;;  %v7077_v10 = vmov 0.0|0.0   ;;  %v6125_v40 = vpack.c.bf16 %v5314_v7, %v5313_v52 }
 0x308   : > { %v2320_v20 = vmax.f32 %v6172_v12, 0.0  ;;  %v6174_v36 = vadd.f32 %v2298_v59, %v9502_v6  ;;  %v5940_v17 = vadd.f32 %v5939_v15, %v5938_v37  ;;  %v5941_v39 = vpop.f32.mrb[54].mxu0  ;;  %6121 = vmatprep.subr.bf16.mxu0 %v7077_v10  ;;  %v5184_v37 = vadd.f32 %v5183_v26, %v5182_v29 }
 0x309   : > { %v5192_v27 = vadd.f32 %v5191_v3, %v2319_v55  ;;  %v2321_v11 = vmax.f32 %v6173_v45, 0.0  ;;  %v5942_v58 = vpop.f32.mrb[55].mxu0  ;;  %v3793_v15 = vadd.f32 %v9508_v56, %v9518_v41 }
 0x30a   : > { %v5209_v19 = vsel %vm2957_vm4, %v2320_v20, 0.0  ;;  %v2322_v35 = vmax.f32 %v6174_v36, 0.0  ;;  %v9541_v30 = vadd.f32 %v5940_v17, %v3777_v4  ;;  %v5943_v47 = vadd.f32 %v5942_v58, %v5941_v39 }
 0x30b   : > { %v5210_v62 = vadd.f32 %v5209_v19, %v5208_v33  ;;  %v5193_v44 = vadd.f32 %v5192_v27, %v2321_v11  ;;  %v5185_v17 = vrot.slane %v5184_v37, 1 }
 0x30c   : > { %v5211_v28 = vsel %vm2957_vm4, %v2322_v35, 0.0  ;;  %v2302_v49 = vpop.f32.mrb[12].mxu1  ;;  %v9545_v24 = vadd.f32 %v5943_v47, %v3780_v31  ;;  %v3796_v31 = vadd.f32 %v9510_v32, %v9518_v41 }
 0x30d   : > { %v5212_v25 = vadd.f32 %v5211_v28, %v5210_v62  ;;  %v6175_v43 = vadd.f32 %v2302_v49, %v9498_v22  ;;  %v2304_v18 = vpop.f32.mrb[13].mxu1  ;;  %v5186_v47 = vadd.f32 %v5185_v17, %v5184_v37 }
 0x30e   : > { %v6176_v61 = vadd.f32 %v2304_v18, %v9502_v6  ;;  %v2306_v1 = vpop.f32.mrb[14].mxu1  ;;  %v5944_v8 = vpop.f32.mrb[56].mxu0 }
 0x30f   : > { %v2323_v53 = vmax.f32 %v6175_v43, 0.0  ;;  %v6177_v9 = vadd.f32 %v2306_v1, %v9498_v22  ;;  %v2308_v5 = vpop.f32.mrb[15].mxu1  ;;  %v5945_v38 = vpop.f32.mrb[57].mxu0  ;;  %v5188_v18 = vmul.f32 0.015625, %v5186_v47 }
 0x310   : > { %v2324_v34 = vmax.f32 %v6176_v61, 0.0  ;;  %v6178_v51 = vadd.f32 %v2308_v5, %v9502_v6  ;;  %v5946_v63 = vadd.f32 %v5945_v38, %v5944_v8  ;;  %v5947_v48 = vpop.f32.mrb[58].mxu0  ;;  %v5312_v6 = vld [vmem:[%s9760_s9 + $0x108] sm:$0xff] }
 0x311   : > { %v5194_v23 = vadd.f32 %v5193_v44, %v2323_v53  ;;  %v2325_v50 = vmax.f32 %v6177_v9, 0.0  ;;  %v5948_v3 = vpop.f32.mrb[59].mxu0  ;;  %v6122_v16 = vpack.c.bf16 %v5312_v6, %v5311_v14 }
 0x312   : > { %v5213_v0 = vsel %vm2957_vm4, %v2324_v34, 0.0  ;;  %v2326_v22 = vmax.f32 %v6178_v51, 0.0  ;;  %v3850_v42 = vadd.f32 %v5946_v63, %v3785_v54  ;;  %v5949_v33 = vadd.f32 %v5948_v3, %v5947_v48 }
 0x313   : > { %v5214_v13 = vadd.f32 %v5213_v0, %v5212_v25  ;;  %v5195_v21 = vadd.f32 %v5194_v23, %v2325_v50  ;;  %6123 = vmatpush1.bf16.msra.mxu0 %v6122_v16 }
 0x314   : > { %v5215_v12 = vsel %vm2957_vm4, %v2326_v22, 0.0  ;;  %v3853_v59 = vadd.f32 %v5949_v33, %v3788_v60  ;;  %6124 = vmatprep.subr.bf16.mxu0 %v7077_v10 }
 0x315   : > { %v5196_v55 = vrot.slane %v5195_v21, 4  ;;  %v9570_v45 = vadd.f32 %v5215_v12, %v5214_v13 }
 0x316   : > { %v5950_v20 = vpop.f32.mrb[60].mxu0 }
 0x317   : > { %v5197_v57 = vadd.f32 %v5196_v55, %v5195_v21  ;;  %v5951_v36 = vpop.f32.mrb[61].mxu0  ;;  %6126 = vmatpush1.bf16.msra.mxu0 %v6125_v40 }
 0x318   : > { %v5952_v27 = vadd.f32 %v5951_v36, %v5950_v20  ;;  %v5953_v11 = vpop.f32.mrb[62].mxu0  ;;  %6127 = vmatprep.subr.bf16.mxu0 %v7077_v10 }
 0x319   : > { %v5198_v4 = vrot.slane %v5197_v57, 2  ;;  %v5954_v39 = vpop.f32.mrb[63].mxu0 }
 0x31a   : > { %v3858_v19 = vadd.f32 %v5952_v27, %v3793_v15  ;;  %v5955_v35 = vadd.f32 %v5954_v39, %v5953_v11 }
 0x31b   : > { %v5199_v58 = vadd.f32 %v5198_v4, %v5197_v57 }
 0x31c   : > { %v3861_v62 = vadd.f32 %v5955_v35, %v3796_v31 }
 0x31d   : > { %v5200_v44 = vrot.slane %v5199_v58, 1 }
 0x31e   : > { %v5972_v29 = vpop.f32.mrb[64].mxu0 }
 0x31f   : > { %v5201_v28 = vadd.f32 %v5200_v44, %v5199_v58  ;;  %v5973_v56 = vpop.f32.mrb[65].mxu0 }
 0x320   : > { %v5974_v49 = vadd.f32 %v5973_v56, %v5972_v29  ;;  %v5975_v25 = vpop.f32.mrb[66].mxu0 }
 0x321   : > { %v5223_v43 = vmul.f32 0.015625, %v5201_v28  ;;  %v5976_v61 = vpop.f32.mrb[67].mxu0 }
 0x322   : > { %v5977_v1 = vadd.f32 %v5976_v61, %v5975_v25  ;;  %v3899_v32 = vadd.f32 %v5974_v49, %v9526_v46 }
 0x323   : > { %5407 = vmatprep.mubr.f32.mxu1 %v5223_v43 }
 0x324   : > { %5408 = vmatmul.mubr.f32.vlgmr.msra.gmra.mrb[16].mxu1 %v5188_v18  ;;  %v3902_v41 = vadd.f32 %v5977_v1, %v9529_v2 }
 0x326   : > { %v5978_v53 = vpop.f32.mrb[68].mxu0 }
 0x327   : > { %v5979_v9 = vpop.f32.mrb[69].mxu0 }
 0x328   : > { %v5980_v5 = vadd.f32 %v5979_v9, %v5978_v53  ;;  %v5981_v8 = vpop.f32.mrb[70].mxu0 }
 0x329   : > { %v5982_v26 = vpop.f32.mrb[71].mxu0 }
 0x32a   : > { %v5983_v34 = vadd.f32 %v5982_v26, %v5981_v8  ;;  %v3907_v51 = vadd.f32 %v5980_v5, %v9541_v30  ;;  %v5315_v5 = vld [vmem:[%s9760_s9 + $0x120] sm:$0xff]  ;;  %v5316_v8 = vld [vmem:[%s9760_s9 + $0x128] sm:$0xff]  ;;  %v5317_v26 = vld [vmem:[%s9760_s9 + $0x130] sm:$0xff] }
 0x32c   : > { %v3910_v38 = vadd.f32 %v5983_v34, %v9545_v24 }
 0x32f   : > { %v5984_v54 = vpop.f32.mrb[72].mxu0 }
 0x330   : > { %v5985_v23 = vpop.f32.mrb[73].mxu0 }
 0x331   : > { %v5986_v50 = vadd.f32 %v5985_v23, %v5984_v54  ;;  %v5987_v63 = vpop.f32.mrb[74].mxu0 }
 0x332   : > { %v5988_v48 = vpop.f32.mrb[75].mxu0 }
 0x333   : > { %v5989_v60 = vadd.f32 %v5988_v48, %v5987_v63  ;;  %v3915_v46 = vadd.f32 %v5986_v50, %v3850_v42  ;;  %v5319_v50 = vld [vmem:[%s9760_s9 + $0x140] sm:$0xff]  ;;  %v5320_v63 = vld [vmem:[%s9760_s9 + $0x148] sm:$0xff] }
 0x335   : > { %v3918_v0 = vadd.f32 %v5989_v60, %v3853_v59 }
 0x337   : > { %v5990_v22 = vpop.f32.mrb[76].mxu0 }
 0x338   : > { %v5991_v2 = vpop.f32.mrb[77].mxu0 }
 0x339   : > { %v5992_v3 = vadd.f32 %v5991_v2, %v5990_v22  ;;  %v5993_v14 = vpop.f32.mrb[78].mxu0  ;;  %v5321_v22 = vld [vmem:[%s9760_s9 + $0x150] sm:$0xff]  ;;  %v5322_v2 = vld [vmem:[%s9760_s9 + $0x158] sm:$0xff] }
 0x33a   : > { %v5994_v6 = vpop.f32.mrb[79].mxu0 }
 0x33b   : > { %v5995_v13 = vadd.f32 %v5994_v6, %v5993_v14  ;;  %v3923_v21 = vadd.f32 %v5992_v3, %v3858_v19  ;;  %v9619_v3 = vld [vmem:[%s9759_s8] ss:$0 sm:$0xff] }
 0x33d   : > { %v3926_v33 = vadd.f32 %v5995_v13, %v3861_v62 }
 0x341   : > { %v6083_v52 = vpop.f32.mrb[80].mxu0 }
 0x342   : > { %v3972_v30 = vadd.f32 %v6083_v52, %v3907_v51  ;;  %v3963_v7 = vpop.f32.mrb[81].mxu0  ;;  %v6128_v51 = vpack.c.bf16 %v5316_v8, %v5315_v5 }
 0x343   : > { %v3964_v24 = vadd.f32 %v3963_v7, %v3899_v32  ;;  %v6084_v12 = vpop.f32.mrb[82].mxu0 }
 0x344   : > { %v3975_v16 = vadd.f32 %v6084_v12, %v3910_v38  ;;  %v3966_v55 = vpop.f32.mrb[83].mxu0  ;;  %v3996_v57 = vmax.f32 %v3972_v30, 0.0  ;;  %v5318_v38 = vld [vmem:[%s9760_s9 + $0x138] sm:$0xff]  ;;  %6129 = vmatpush1.bf16.msra.mxu0 %v6128_v51  ;;  %v6137_v30 = vpack.c.bf16 %v5322_v2, %v5321_v22  ;;  %v5323_v12 = vld [vmem:[%s9760_s9 + $0x160] sm:$0xff] }
 0x345   : > { %v3994_v37 = vmax.f32 %v3964_v24, 0.0  ;;  %v3967_v40 = vadd.f32 %v3966_v55, %v3902_v41  ;;  %v6131_v23 = vpack.c.bf16 %v5318_v38, %v5317_v26  ;;  %6130 = vmatprep.subr.bf16.mxu0 %v7077_v10 }
 0x346   : > { %v3997_v20 = vmax.f32 %v3975_v16, 0.0  ;;  %v5228_v17 = vsel %vm2966_vm5, %v3996_v57, 0.0  ;;  %v5324_v16 = vld [vmem:[%s9760_s9 + $0x168] sm:$0xff] }
 0x347   : > { %v3995_v42 = vmax.f32 %v3967_v40, 0.0  ;;  %v5225_v59 = vsel %vm2966_vm5, %v3994_v37, 0.0  ;;  %v6140_v40 = vpack.c.bf16 %v5324_v16, %v5323_v12 }
 0x348   : > { %v5230_v62 = vsel %vm2966_vm5, %v3997_v20, 0.0  ;;  %6132 = vmatpush1.bf16.msra.mxu0 %v6131_v23  ;;  %v5326_v20 = vld [vmem:[%s9760_s9 + $0x178] sm:$0xff] }
 0x349   : > { %v5226_v36 = vsel %vm2966_vm5, %v3995_v42, 0.0  ;;  %v6087_v15 = vpop.f32.mrb[84].mxu0  ;;  %6133 = vmatprep.subr.bf16.mxu0 %v7077_v10 }
 0x34a   : > { %v5227_v4 = vadd.f32 %v5226_v36, %v5225_v59  ;;  %v3988_v27 = vadd.f32 %v6087_v15, %v3923_v21  ;;  %v3979_v11 = vpop.f32.mrb[85].mxu0  ;;  %v5325_v59 = vld [vmem:[%s9760_s9 + $0x170] sm:$0xff] }
 0x34b   : > { %v3980_v39 = vadd.f32 %v3979_v11, %v3915_v46  ;;  %v6088_v31 = vpop.f32.mrb[86].mxu0  ;;  %v6134_v46 = vpack.c.bf16 %v5320_v63, %v5319_v50  ;;  %v5331_v50 = vld [vmem:[%s9760_s9 + $0x1a0] sm:$0xff]  ;;  %v5332_v63 = vld [vmem:[%s9760_s9 + $0x1a8] sm:$0xff] }
 0x34c   : > { %v5229_v19 = vadd.f32 %v5228_v17, %v5227_v4  ;;  %v3991_v35 = vadd.f32 %v6088_v31, %v3926_v33  ;;  %v3982_v58 = vpop.f32.mrb[87].mxu0  ;;  %v4000_v28 = vmax.f32 %v3988_v27, 0.0  ;;  %v6143_v31 = vpack.c.bf16 %v5326_v20, %v5325_v59 }
 0x34d   : > { %v3998_v44 = vmax.f32 %v3980_v39, 0.0  ;;  %v3983_v47 = vadd.f32 %v3982_v58, %v3918_v0  ;;  %6135 = vmatpush1.bf16.msra.mxu0 %v6134_v46  ;;  %v5327_v58 = vld [vmem:[%s9760_s9 + $0x180] sm:$0xff]  ;;  %v6152_v46 = vpack.c.bf16 %v5332_v63, %v5331_v50 }
 0x34e   : > { %v5231_v29 = vadd.f32 %v5230_v62, %v5229_v19  ;;  %v4001_v43 = vmax.f32 %v3991_v35, 0.0  ;;  %v5236_v1 = vsel %vm2966_vm5, %v4000_v28, 0.0  ;;  %6136 = vmatprep.subr.bf16.mxu0 %v7077_v10  ;;  %v5328_v62 = vld [vmem:[%s9760_s9 + $0x188] sm:$0xff] }
 0x34f   : > { %v5232_v56 = vsel %vm2966_vm5, %v3998_v44, 0.0  ;;  %v3999_v49 = vmax.f32 %v3983_v47, 0.0 }
 0x350   : > { %v5233_v25 = vadd.f32 %v5232_v56, %v5231_v29  ;;  %v5238_v41 = vsel %vm2966_vm5, %v4001_v43, 0.0  ;;  %v6146_v29 = vpack.c.bf16 %v5328_v62, %v5327_v58  ;;  %v5330_v43 = vld [vmem:[%s9760_s9 + $0x198] sm:$0xff] }
 0x351   : > { %v5234_v18 = vsel %vm2966_vm5, %v3999_v49, 0.0  ;;  %6138 = vmatpush1.bf16.msra.mxu0 %v6137_v30 }
 0x352   : > { %v5235_v61 = vadd.f32 %v5234_v18, %v5233_v25  ;;  %6139 = vmatprep.subr.bf16.mxu0 %v7077_v10  ;;  %v5329_v25 = vld [vmem:[%s9760_s9 + $0x190] sm:$0xff] }
 0x353   : > { %v6149_v5 = vpack.c.bf16 %v5330_v43, %v5329_v25 }
 0x354   : > { %v5237_v32 = vadd.f32 %v5236_v1, %v5235_v61 }
 0x355   : > { %6141 = vmatpush1.bf16.msra.mxu0 %v6140_v40 }
 0x356   : > { %v5239_v53 = vadd.f32 %v5238_v41, %v5237_v32  ;;  %6142 = vmatprep.subr.bf16.mxu0 %v7077_v10 }
 0x358   : > { %v5240_v9 = vrot.slane %v5239_v53, 4 }
 0x359   : > { %6144 = vmatpush1.bf16.msra.mxu0 %v6143_v31 }
 0x35a   : > { %v5241_v34 = vadd.f32 %v5240_v9, %v5239_v53  ;;  %6145 = vmatprep.subr.bf16.mxu0 %v7077_v10 }
 0x35c   : > { %v5242_v54 = vrot.slane %v5241_v34, 2 }
 0x35d   : > { %6147 = vmatpush1.bf16.msra.mxu0 %v6146_v29 }
 0x35e   : > { %v5243_v48 = vadd.f32 %v5242_v54, %v5241_v34  ;;  %6148 = vmatprep.subr.bf16.mxu0 %v7077_v10 }
 0x360   : > { %v5244_v60 = vrot.slane %v5243_v48, 1 }
 0x361   : > { %v6018_v0 = vpop.f32.mrb[88].mxu0  ;;  %6150 = vmatpush1.bf16.msra.mxu0 %v6149_v5 }
 0x362   : > { %v6019_v14 = vpop.f32.mrb[89].mxu0  ;;  %v5245_v6 = vadd.f32 %v5244_v60, %v5243_v48  ;;  %6151 = vmatprep.subr.bf16.mxu0 %v7077_v10 }
 0x363   : > { %v6020_v13 = vadd.f32 %v6019_v14, %v6018_v0  ;;  %v6021_v21 = vpop.f32.mrb[90].mxu0  ;;  %v5333_v14 = vld [vmem:[%s9760_s9 + $0x1b0] sm:$0xff] }
 0x364   : > { %v6022_v33 = vpop.f32.mrb[91].mxu0  ;;  %v5246_v52 = vmul.f32 0.015625, %v5245_v6  ;;  %v5334_v6 = vld [vmem:[%s9760_s9 + $0x1b8] sm:$0xff] }
 0x365   : > { %v5136_v7 = vadd.f32 %v6020_v13, %v9619_v3  ;;  %v6023_v24 = vadd.f32 %v6022_v33, %v6021_v21  ;;  %6153 = vmatpush1.bf16.msra.mxu0 %v6152_v46  ;;  %v6155_v33 = vpack.c.bf16 %v5334_v6, %v5333_v14 }
 0x366   : > { %5270 = vrot.lane.b32.xlu0 %v5246_v52, %s9924_s16  ;;  %6154 = vmatprep.subr.bf16.mxu0 %v7077_v10  ;;  %s5832_s16 = sshll.u32 %s7160_s21, 4  ;;  %s7007_s21 = scalar_lea.vmem %s9711_s15, 16 }
 0x367   : > { %v5166_v55 = vmax.f32 %v5136_v7, 0.0  ;;  %v5139_v37 = vadd.f32 %v6023_v24, %v9619_v3  ;;  %v5335_v7 = vld [vmem:[%s9760_s9 + $0x1c0] sm:$0xff]  ;;  %v5336_v24 = vld [vmem:[%s9760_s9 + $0x1c8] sm:$0xff]  ;;  %s9709_s29 = scalar_lea.hbm %s9762_s11, %s5832_s16  ;;  %p7008_p11 = scmp.ne.s32.totalorder %s9711_s15, %s7007_s21 }
 0x369   : > { %v5167_v57 = vmax.f32 %v5139_v37, 0.0  ;;  %v6024_v42 = vpop.f32.mrb[92].mxu0  ;;  %v5247_v15 = vsel %vm2957_vm4, %v5166_v55, 0.0  ;;  %6156 = vmatpush1.bf16.msra.mxu0 %v6155_v33  ;;  %v6158_v55 = vpack.c.bf16 %v5336_v24, %v5335_v7  ;;  %p7009_p12 = pnand %p7008_p11, %p7177_p5 }
 0x36a   : > { %v6025_v36 = vpop.f32.mrb[93].mxu0  ;;  %6157 = vmatprep.subr.bf16.mxu0 %v7077_v10 }
 0x36b   : > { %v5248_v4 = vsel %vm2957_vm4, %v5167_v57, 0.0  ;;  %v6026_v27 = vadd.f32 %v6025_v36, %v6024_v42  ;;  %v6027_v11 = vpop.f32.mrb[94].mxu0  ;;  %v5337_v57 = vld [vmem:[%s9760_s9 + $0x1d0] sm:$0xff]  ;;  %v5338_v42 = vld [vmem:[%s9760_s9 + $0x1d8] sm:$0xff]  ;;  %p7010_p13 = pneg %p7009_p12 }
 0x36c   : > { %v5249_v17 = vadd.f32 %v5248_v4, %v5247_v15  ;;  %v6028_v39 = vpop.f32.mrb[95].mxu0 }
 0x36d   : > { %v5144_v19 = vadd.f32 %v6026_v27, %v9619_v3  ;;  %v6029_v35 = vadd.f32 %v6028_v39, %v6027_v11  ;;  %6159 = vmatpush1.bf16.msra.mxu0 %v6158_v55 }
 0x36e   : > { %6160 = vmatprep.subr.bf16.mxu0 %v7077_v10 }
 0x36f   : > { %v5168_v44 = vmax.f32 %v5144_v19, 0.0  ;;  %v5147_v47 = vadd.f32 %v6029_v35, %v9619_v3  ;;  %v5217_v19 = vrot.slane %v9570_v45, 4 }
 0x371   : > { %v5250_v28 = vsel %vm2957_vm4, %v5168_v44, 0.0  ;;  %v5169_v56 = vmax.f32 %v5147_v47, 0.0  ;;  %v6030_v49 = vpop.f32.mrb[96].mxu0  ;;  %v5218_v35 = vadd.f32 %v5217_v19, %v9570_v45  ;;  %v5339_v45 = vld [vmem:[%s9761_s10] sm:$0x1] }
 0x372   : > { %v5251_v18 = vadd.f32 %v5250_v28, %v5249_v17  ;;  %v6031_v61 = vpop.f32.mrb[97].mxu0 }
 0x373   : > { %v5252_v1 = vsel %vm2957_vm4, %v5169_v56, 0.0  ;;  %v6032_v32 = vadd.f32 %v6031_v61, %v6030_v49  ;;  %v6033_v41 = vpop.f32.mrb[98].mxu0  ;;  %v5219_v58 = vrot.slane %v5218_v35, 2 }
 0x374   : > { %v5253_v53 = vadd.f32 %v5252_v1, %v5251_v18  ;;  %v6034_v9 = vpop.f32.mrb[99].mxu0 }
 0x375   : > { %v5152_v8 = vadd.f32 %v6032_v32, %v9619_v3  ;;  %v6035_v26 = vadd.f32 %v6034_v9, %v6033_v41  ;;  %v5220_v44 = vadd.f32 %v5219_v58, %v5218_v35 }
 0x377   : > { %v5170_v34 = vmax.f32 %v5152_v8, 0.0  ;;  %v5155_v51 = vadd.f32 %v6035_v26, %v9619_v3  ;;  %v5221_v29 = vrot.slane %v5220_v44, 1 }
 0x379   : > { %v5254_v38 = vsel %vm2957_vm4, %v5170_v34, 0.0  ;;  %v5171_v54 = vmax.f32 %v5155_v51, 0.0  ;;  %v6036_v23 = vpop.f32.mrb[100].mxu0  ;;  %v5222_v28 = vadd.f32 %v5221_v29, %v5220_v44 }
 0x37a   : > { %v5255_v48 = vadd.f32 %v5254_v38, %v5253_v53  ;;  %v6037_v60 = vpop.f32.mrb[101].mxu0 }
 0x37b   : > { %v5256_v0 = vsel %vm2957_vm4, %v5171_v54, 0.0  ;;  %v6038_v22 = vadd.f32 %v6037_v60, %v6036_v23  ;;  %v6039_v2 = vpop.f32.mrb[102].mxu0  ;;  %v5224_v49 = vmul.f32 0.015625, %v5222_v28 }
 0x37c   : > { %v5257_v13 = vadd.f32 %v5256_v0, %v5255_v48  ;;  %v6040_v21 = vpop.f32.mrb[103].mxu0 }
 0x37d   : > { %v5160_v52 = vadd.f32 %v6038_v22, %v9619_v3  ;;  %v6041_v30 = vadd.f32 %v6040_v21, %v6039_v2 }
 0x37f   : > { %v5172_v12 = vmax.f32 %v5160_v52, 0.0  ;;  %v5163_v16 = vadd.f32 %v6041_v30, %v9619_v3  ;;  %v6161_v3 = vpack.c.bf16 %v5338_v42, %v5337_v57 }
 0x381   : > { %v5258_v37 = vsel %vm2957_vm4, %v5172_v12, 0.0  ;;  %v5173_v40 = vmax.f32 %v5163_v16, 0.0  ;;  %6162 = vmatpush1.bf16.msra.mxu0 %v6161_v3 }
 0x382   : > { %v5259_v59 = vadd.f32 %v5258_v37, %v5257_v13 }
 0x383   : > { %v5260_v20 = vsel %vm2957_vm4, %v5173_v40, 0.0 }
 0x384   : > { %v5261_v36 = vadd.f32 %v5260_v20, %v5259_v59 }
 0x386   : > { %v5262_v15 = vrot.slane %v5261_v36, 4 }
 0x388   : > { %v5263_v4 = vadd.f32 %v5262_v15, %v5261_v36 }
 0x38a   : > { %v5264_v27 = vrot.slane %v5263_v4, 2 }
 0x38c   : > { %v5265_v11 = vadd.f32 %v5264_v27, %v5263_v4 }
 0x38e   : > { %v5266_v17 = vrot.slane %v5265_v11, 1 }
 0x390   : > { %v5267_v39 = vadd.f32 %v5266_v17, %v5265_v11 }
 0x392   : > { %v5268_v31 = vmul.f32 0.015625, %v5267_v39 }
 0x394   : > { %5274 = vrot.lane.b32.xlu1 %v5268_v31, %s9925_s25  ;;  %s7078_s25 = smov [#allocation5]  }
 0x395   : > { %s7011_s13 = sshll.u32 %s7078_s25, 4  ;;  %s7012_s13 = int_to_ptr.vmem [resolvable:$false] %s7011_s13 }
 0x396   : > { %s7013_s14 = scalar_lea.vmem %s7012_s13, 32  ;;  %p7014_p0 = scmp.lt.s32.totalorder %s9711_s15, %s7012_s13 }
 0x397   : > { %p7015_p1 = scmp.lt.s32.totalorder %s7013_s14, %s7007_s21 }
 0x399   : > { %p7016_p2 = por %p7015_p1, %p7014_p0 }
 0x39b   : > { %p7017_p3 = pnand %p7016_p2, %p7010_p13 }
 0x3d8   : > { %v5271_v56 = vpop.permute.xlu0 %5270 }
 0x3d9   : > { %v5277_v18 = vsel %vm2957_vm4, %v5224_v49, %v5271_v56 }
 0x3f7   : > { %v6074_v62 = vpop.f32.mrb[16].mxu1 }
 0x3f8   : > { %v6075_v10 = vpop.f32.mrb[17].mxu1 }
 0x3f9   : > { %v6076_v47 = vadd.f32 %v6075_v10, %v6074_v62 }
 0x3fb   : > { %v5410_v61 = vadd.f32 %v6076_v47, %v5339_v45 }
 0x406   : > { %v5275_v25 = vpop.permute.xlu1 %5274 }
 0x407   : > { %v5278_v43 = vsel %vm2327_vm0, %v5271_v56, %v5275_v25 }
 0x408   : > { %5831 = vmatprep.mubr.msk.f32.mxu0 %vm2966_vm5, %v5278_v43 }
 0x409   : > { %5478 = vmatmul.mubr.f32.vlgmr.msra.gmra.mrb[104].mxu0 %v5277_v18 }
 0x4dc   : > { %v5479_v1 = vpop.f32.mrb[104].mxu0 }
 0x4dd   : > { %v5480_v32 = vadd.f32 %v5479_v1, %v5410_v61  ;;  %v5481_v41 = vpop.f32.mrb[105].mxu0 }
 0x4df   : > { %5484 = vst.msk [vmem:[%s378_s22] sm:$0x1] %vm5483_vm6, %v5480_v32 }
 0x4e0   : > { %7020 = shalt.err (!%p7017_p3)
}
 0x4e1   : > { %s7021_s12 = scalar_lea.hbm %s9709_s29, 16  ;;  %s7025_s24 = scalar_lea.hbm %s9762_s11, 32 }
 0x4e2   : > { %p7022_p4 = scmp.ne.s32.totalorder %s9709_s29, %s7021_s12  ;;  %p7026_p9 = scmp.lt.u32.totalorder %s9709_s29, %s9762_s11 }
 0x4e3   : > { %p7027_p10 = scmp.lt.u32.totalorder %s7025_s24, %s7021_s12  ;;  %p7029_p12 = scmp.lt.u32.totalorder %s7021_s12, %s9709_s29 }
 0x4e4   : > { %p7023_p7 = pnand %p7022_p4, %p7177_p5 }
 0x4e5   : > { %p7028_p11 = por %p7027_p10, %p7026_p9 }
 0x4e6   : > { %p7024_p8 = pneg %p7023_p7 }
 0x4e7   : > { %p7030_p13 = por %p7029_p12, %p7028_p11 }
 0x4e9   : > { %p7031_p0 = pnand %p7030_p13, %p7024_p8 }
 0x4eb   : > { %7034 = shalt.err (!%p7031_p0)
}
 0x4ec   : > { %6243 = dma.vmem_to_hbm [thread:$0]  (%p7177_p5), %s9711_s15, 16, %s9709_s29, %s5486_s30  }
 0x4ed PF: > { %p6249_p1 = scmp.ge.s32.totalorder %s7069_s20, 2  ;;  %s5510_s21 = sand.u32 1, %s7057_s17  }
 0x4ee   : > { %s5511_s13 = scalar_lea.sflag [#allocation6], %s5510_s21 }
 0x4ef   : > { %p6246_p2 = pnand %p6249_p1, %p7181_p6 }
 0x4f1   : > { %7052 = dma.done.wait (!%p6246_p2), %s5511_s13, 16  }
 0x4f2   : > { %7054 = vsyncadd (!%p6246_p2), %s5511_s13, 4294967280  ;;  %s9926_s14 = sld [smem:[#allocation8_spill]]  ;;  %p21_p3 = scmp.ge.s32.totalorder %s7164_s23, 4  }
 0x4f3   : > { %s9927_s17 = smov %s7061_s18  ;;  %s9928_s18 = smov %s7065_s19 }
 0x4f4   : > { %s9930_s20 = smov %s7164_s23  ;;  %23 = sbr.rel (!%p21_p3) target bundleno = 3 (0x3), region = 107 }
 0x4f8   : > { %s9929_s19 = smov %s9926_s14 }
 0x4fb   :  { %5515 = vsyncpa [#allocation6], 1 }
 0x4fc   :  { %5517 = vsyncpa [#allocation6 + $0x1], 1 }

</bundles_post_ra>
